<compile_context>
chip_gen: v5e
topology: v5e:2x2
jax: 0.10.0
libtpu: 0.0.40
codegen_flags: <defaults>
</compile_context>

<pallas_src>
import jax
import jax.numpy as jnp
import numpy as np
from jax.experimental import pallas as pl
from jax.experimental.pallas import tpu as pltpu

EPS = 1e-5
LANE = 128


# --------------------------------------------------------------------------
# kernel helpers
# --------------------------------------------------------------------------
def _im2col_conv(xpad, w_ref, patch_ref):
    """3x3/stride-1 conv of one spatially padded tile via one MXU matmul.

    xpad:      (H+2, W+2, Cp) bf16 value (zero border)
    w_ref:     (9*Cp, Cp)     bf16 packed weights, row order (kh, kw, cin)
    patch_ref: (H*W, 9*Cp)    bf16 VMEM scratch for the im2col patch
    returns    (H*W, Cp)      f32 accumulator
    """
    Hp, Wp, Cp = xpad.shape
    H, W = Hp - 2, Wp - 2
    for k in range(9):
        kh, kw = k // 3, k % 3
        patch_ref[:, k * Cp:(k + 1) * Cp] = (
            xpad[kh:kh + H, kw:kw + W, :].reshape(H * W, Cp))
    return jnp.dot(patch_ref[...], w_ref[...],
                   preferred_element_type=jnp.float32)


def _partial_stats(acc):
    """Per-tile [sum, sum-of-squares] over the H*W axis -> (2, Cp) f32."""
    return jnp.concatenate(
        [jnp.sum(acc, axis=0, keepdims=True),
         jnp.sum(acc * acc, axis=0, keepdims=True)], axis=0)


# --------------------------------------------------------------------------
# kernels
# --------------------------------------------------------------------------
def _conv1_kernel(xpad_ref, w_ref, y_ref, s_ref, patch_ref):
    # xpad_ref: (H+2, W+2, Cp) bf16 ; y_ref: (H, W, Cp) f32 ; s_ref: (2, Cp) f32
    Hp, Wp, Cp = xpad_ref.shape
    H, W = Hp - 2, Wp - 2
    acc = _im2col_conv(xpad_ref[...], w_ref, patch_ref)
    y_ref[...] = acc.reshape(H, W, Cp)
    s_ref[...] = _partial_stats(acc)


def _conv2_kernel(y1_ref, w_ref, scale_ref, shift_ref, y2_ref, s_ref,
                  zpad_ref, patch_ref):
    # y1_ref: (H, W, Cp) f32 raw conv1 output; scale/shift: folded bn1 affine
    H, W, Cp = y1_ref.shape

    # Zero border written once; scratch persists across grid iterations and the
    # interior is fully rewritten every step, so the zero border stays valid.
    @pl.when(pl.program_id(0) == 0)
    def _():
        zpad_ref[...] = jnp.zeros_like(zpad_ref)

    scale = scale_ref[...].reshape(1, 1, Cp)
    shift = shift_ref[...].reshape(1, 1, Cp)
    # bn1 + relu in f32, then cast to bf16 for the conv2 matmul.
    z = jnp.maximum(y1_ref[...] * scale + shift, 0.0)
    zpad_ref[1:H + 1, 1:W + 1, :] = z.astype(zpad_ref.dtype)
    acc = _im2col_conv(zpad_ref[...], w_ref, patch_ref)
    y2_ref[...] = acc.reshape(H, W, Cp)
    s_ref[...] = _partial_stats(acc)


def _bn2_residual_kernel(y2_ref, x_ref, scale_ref, shift_ref, o_ref):
    # y2/x/o: (H, W, Cp) f32 ; scale/shift: folded bn2 affine
    Cp = o_ref.shape[-1]
    scale = scale_ref[...].reshape(1, 1, Cp)
    shift = shift_ref[...].reshape(1, 1, Cp)
    o_ref[...] = jnp.maximum(y2_ref[...] * scale + shift + x_ref[...], 0.0)


# --------------------------------------------------------------------------
# wrapper
# --------------------------------------------------------------------------
def _round_up(x, m):
    return (x + m - 1) // m * m


@jax.jit
def basic_block(x_nchw, w1, w2, g1, b1, g2, b2):
    """x_nchw: (N, C, H, W) f32; w1/w2: (C, C, 3, 3) PyTorch OIHW weights."""
    N, C, H, W = x_nchw.shape
    assert w1.shape[0] == C, "downsample=None / stride=1 requires Cin == Cout"
    Cp = _round_up(C, LANE)
    cpad = Cp - C
    count = float(N * H * W)

    # ---- layout plumbing: NCHW -> lane-dense NHWC, channel pad to 128 ----
    x_nhwc = jnp.transpose(x_nchw, (0, 2, 3, 1)).astype(jnp.float32)
    x_id = jnp.pad(x_nhwc, ((0, 0), (0, 0), (0, 0), (0, cpad)))      # identity (f32)
    x_pad = jnp.pad(x_id, ((0, 0), (1, 1), (1, 1), (0, 0))).astype(jnp.bfloat16)

    def pack_w(w):   # OIHW -> (kh, kw, cin, cout), pad channels, flatten K
        wk = jnp.transpose(w, (2, 3, 1, 0))
        wk = jnp.pad(wk, ((0, 0), (0, 0), (0, cpad), (0, cpad)))
        return wk.reshape(9 * Cp, Cp).astype(jnp.bfloat16)

    w1p, w2p = pack_w(w1), pack_w(w2)
    g1p, b1p = jnp.pad(g1, (0, cpad)), jnp.pad(b1, (0, cpad))
    g2p, b2p = jnp.pad(g2, (0, cpad)), jnp.pad(b2, (0, cpad))

    cparams = pltpu.CompilerParams(dimension_semantics=("parallel",),
                                   vmem_limit_bytes=48 * 1024 * 1024)

    # ---- kernel A: conv1 + per-image BN1 partial sums ------------------
    y1, s1 = pl.pallas_call(
        _conv1_kernel,
        out_shape=(jax.ShapeDtypeStruct((N, H, W, Cp), jnp.float32),
                   jax.ShapeDtypeStruct((N, 2, Cp), jnp.float32)),
        grid_spec=pltpu.PrefetchScalarGridSpec(
            num_scalar_prefetch=0,
            grid=(N,),
            in_specs=[
                pl.BlockSpec((None, H + 2, W + 2, Cp), lambda i: (i, 0, 0, 0)),
                pl.BlockSpec((9 * Cp, Cp), lambda i: (0, 0)),
            ],
            out_specs=(
                pl.BlockSpec((None, H, W, Cp), lambda i: (i, 0, 0, 0)),
                pl.BlockSpec((None, 2, Cp), lambda i: (i, 0, 0)),
            ),
            scratch_shapes=[pltpu.VMEM((H * W, 9 * Cp), jnp.bfloat16)]),
        compiler_params=cparams,
    )(x_pad, w1p)

    # ---- finalize BN1 (global over N,H,W) -> folded scale/shift ---------
    mean1 = jnp.sum(s1[:, 0, :], axis=0) / count
    var1 = jnp.maximum(jnp.sum(s1[:, 1, :], axis=0) / count - mean1 * mean1, 0.0)
    inv1 = jax.lax.rsqrt(var1 + EPS)
    scale1 = (g1p * inv1).reshape(1, Cp)
    shift1 = (b1p - mean1 * g1p * inv1).reshape(1, Cp)

    # ---- kernel B: bn1 + relu + conv2 + per-image BN2 partial sums ------
    y2, s2 = pl.pallas_call(
        _conv2_kernel,
        out_shape=(jax.ShapeDtypeStruct((N, H, W, Cp), jnp.float32),
                   jax.ShapeDtypeStruct((N, 2, Cp), jnp.float32)),
        grid_spec=pltpu.PrefetchScalarGridSpec(
            num_scalar_prefetch=0,
            grid=(N,),
            in_specs=[
                pl.BlockSpec((None, H, W, Cp), lambda i: (i, 0, 0, 0)),
                pl.BlockSpec((9 * Cp, Cp), lambda i: (0, 0)),
                pl.BlockSpec((1, Cp), lambda i: (0, 0)),
                pl.BlockSpec((1, Cp), lambda i: (0, 0)),
            ],
            out_specs=(
                pl.BlockSpec((None, H, W, Cp), lambda i: (i, 0, 0, 0)),
                pl.BlockSpec((None, 2, Cp), lambda i: (i, 0, 0)),
            ),
            scratch_shapes=[pltpu.VMEM((H + 2, W + 2, Cp), jnp.bfloat16),
                            pltpu.VMEM((H * W, 9 * Cp), jnp.bfloat16)]),
        compiler_params=cparams,
    )(y1, w2p, scale1, shift1)

    # ---- finalize BN2 ----------------------------------------------------
    mean2 = jnp.sum(s2[:, 0, :], axis=0) / count
    var2 = jnp.maximum(jnp.sum(s2[:, 1, :], axis=0) / count - mean2 * mean2, 0.0)
    inv2 = jax.lax.rsqrt(var2 + EPS)
    scale2 = (g2p * inv2).reshape(1, Cp)
    shift2 = (b2p - mean2 * g2p * inv2).reshape(1, Cp)

    # ---- kernel C: bn2 + residual add + relu -----------------------------
    out_nhwc = pl.pallas_call(
        _bn2_residual_kernel,
        out_shape=jax.ShapeDtypeStruct((N, H, W, Cp), jnp.float32),
        grid_spec=pltpu.PrefetchScalarGridSpec(
            num_scalar_prefetch=0,
            grid=(N,),
            in_specs=[
                pl.BlockSpec((None, H, W, Cp), lambda i: (i, 0, 0, 0)),
                pl.BlockSpec((None, H, W, Cp), lambda i: (i, 0, 0, 0)),
                pl.BlockSpec((1, Cp), lambda i: (0, 0)),
                pl.BlockSpec((1, Cp), lambda i: (0, 0)),
            ],
            out_specs=pl.BlockSpec((None, H, W, Cp), lambda i: (i, 0, 0, 0))),
        compiler_params=cparams,
    )(y2, x_id, scale2, shift2)

    out = out_nhwc[..., :C]
    return jnp.transpose(out, (0, 3, 1, 2))


# --------------------------------------------------------------------------
# pure-JAX reference (f32, HIGHEST precision) of the PyTorch forward
# --------------------------------------------------------------------------
def reference(x, w1, w2, g1, b1, g2, b2):
    def conv(x, w):
        return jax.lax.conv_general_dilated(
            x, w, window_strides=(1, 1), padding=((1, 1), (1, 1)),
            dimension_numbers=("NCHW", "OIHW", "NCHW"),
            precision=jax.lax.Precision.HIGHEST)

    def bn(x, g, b):
        m = jnp.mean(x, axis=(0, 2, 3), keepdims=True)
        v = jnp.mean((x - m) ** 2, axis=(0, 2, 3), keepdims=True)
        return ((x - m) / jnp.sqrt(v + EPS) * g.reshape(1, -1, 1, 1)
                + b.reshape(1, -1, 1, 1))

    out = jnp.maximum(bn(conv(x, w1), g1, b1), 0.0)
    out = bn(conv(out, w2), g2, b2)
    return jnp.maximum(out + x, 0.0)


if __name__ == "__main__":
    N, C, H, W = 2, 4, 16, 16            # in_channel == out_channel, stride=1
    key = jax.random.PRNGKey(0)
    kx, kw1, kw2, kg1, kb1, kg2, kb2 = jax.random.split(key, 7)

    x = jax.random.normal(kx, (N, C, H, W), jnp.float32)
    w1 = jax.random.normal(kw1, (C, C, 3, 3), jnp.float32) * 0.1
    w2 = jax.random.normal(kw2, (C, C, 3, 3), jnp.float32) * 0.1
    g1 = 1.0 + 0.1 * jax.random.normal(kg1, (C,), jnp.float32)
    b1 = 0.1 * jax.random.normal(kb1, (C,), jnp.float32)
    g2 = 1.0 + 0.1 * jax.random.normal(kg2, (C,), jnp.float32)
    b2 = 0.1 * jax.random.normal(kb2, (C,), jnp.float32)

    out = jax.block_until_ready(basic_block(x, w1, w2, g1, b1, g2, b2))
    ref = jax.block_until_ready(reference(x, w1, w2, g1, b1, g2, b2))

    assert out.shape == (N, C, H, W)
    # bf16 conv inputs (f32 accumulation, f32 BN/residual) vs a pure-f32
    # HIGHEST-precision reference -> tolerance relaxed slightly beyond 1e-2.
    np.testing.assert_allclose(np.asarray(out), np.asarray(ref),
                               rtol=2e-2, atol=3e-2)
    print("KERNEL_OK")
</pallas_src>

<mosaic_0001>
module attributes {stable_mosaic.version = 11 : i64} {
  func.func @_conv1_kernel(%arg0: i32, %arg1: memref<1x18x18x128xbf16, #tpu.memory_space<vmem>>, %arg2: memref<1152x128xbf16, #tpu.memory_space<vmem>>, %arg3: memref<1x16x16x128xf32, #tpu.memory_space<vmem>>, %arg4: memref<1x2x128xf32, #tpu.memory_space<vmem>>, %arg5: memref<256x1152xbf16, #tpu.memory_space<vmem>>) attributes {dimension_semantics = [#tpu.dimension_semantics<parallel>], iteration_bounds = array<i64: 2>, scalar_prefetch = 0 : i64, scratch_operands = 1 : i64, tpu.core_type = #tpu.core_type<tc>, window_params = [{transform_indices = @transform_0, window_bounds = array<i64: 1, 18, 18, 128>}, {pipeline_mode = #tpu.pipeline_mode<synchronous>, transform_indices = @transform_1, window_bounds = array<i64: 1152, 128>}, {transform_indices = @transform_2, window_bounds = array<i64: 1, 16, 16, 128>}, {transform_indices = @transform_3, window_bounds = array<i64: 1, 2, 128>}]} {
    %c0 = arith.constant 0 : index
    %c0_0 = arith.constant 0 : index
    %c0_1 = arith.constant 0 : index
    %c0_2 = arith.constant 0 : index
    %0 = vector.load %arg1[%c0, %c0_0, %c0_1, %c0_2] : memref<1x18x18x128xbf16, #tpu.memory_space<vmem>>, vector<1x18x18x128xbf16>
    %1 = vector.shape_cast %0 : vector<1x18x18x128xbf16> to vector<18x18x128xbf16>
    %2 = vector.extract_strided_slice %1 {offsets = [0, 0, 0], sizes = [16, 16, 128], strides = [1, 1, 1]} : vector<18x18x128xbf16> to vector<16x16x128xbf16>
    %3 = vector.shape_cast %2 : vector<16x16x128xbf16> to vector<256x128xbf16>
    %c0_3 = arith.constant 0 : index
    %c0_4 = arith.constant 0 : index
    %4 = vector.load %arg5[%c0_3, %c0_4] : memref<256x1152xbf16, #tpu.memory_space<vmem>>, vector<256x128xbf16>
    tpu.vector_store %arg5[%c0_3, %c0_4], %3 {strides = array<i32>} : memref<256x1152xbf16, #tpu.memory_space<vmem>>, vector<256x128xbf16>,
    %5 = vector.extract_strided_slice %1 {offsets = [0, 1, 0], sizes = [16, 16, 128], strides = [1, 1, 1]} : vector<18x18x128xbf16> to vector<16x16x128xbf16>
    %6 = vector.shape_cast %5 : vector<16x16x128xbf16> to vector<256x128xbf16>
    %c0_5 = arith.constant 0 : index
    %c128 = arith.constant 128 : index
    %7 = vector.load %arg5[%c0_5, %c128] : memref<256x1152xbf16, #tpu.memory_space<vmem>>, vector<256x128xbf16>
    tpu.vector_store %arg5[%c0_5, %c128], %6 {strides = array<i32>} : memref<256x1152xbf16, #tpu.memory_space<vmem>>, vector<256x128xbf16>,
    %8 = vector.extract_strided_slice %1 {offsets = [0, 2, 0], sizes = [16, 16, 128], strides = [1, 1, 1]} : vector<18x18x128xbf16> to vector<16x16x128xbf16>
    %9 = vector.shape_cast %8 : vector<16x16x128xbf16> to vector<256x128xbf16>
    %c0_6 = arith.constant 0 : index
    %c256 = arith.constant 256 : index
    %10 = vector.load %arg5[%c0_6, %c256] : memref<256x1152xbf16, #tpu.memory_space<vmem>>, vector<256x128xbf16>
    tpu.vector_store %arg5[%c0_6, %c256], %9 {strides = array<i32>} : memref<256x1152xbf16, #tpu.memory_space<vmem>>, vector<256x128xbf16>,
    %11 = vector.extract_strided_slice %1 {offsets = [1, 0, 0], sizes = [16, 16, 128], strides = [1, 1, 1]} : vector<18x18x128xbf16> to vector<16x16x128xbf16>
    %12 = vector.shape_cast %11 : vector<16x16x128xbf16> to vector<256x128xbf16>
    %c0_7 = arith.constant 0 : index
    %c384 = arith.constant 384 : index
    %13 = vector.load %arg5[%c0_7, %c384] : memref<256x1152xbf16, #tpu.memory_space<vmem>>, vector<256x128xbf16>
    tpu.vector_store %arg5[%c0_7, %c384], %12 {strides = array<i32>} : memref<256x1152xbf16, #tpu.memory_space<vmem>>, vector<256x128xbf16>,
    %14 = vector.extract_strided_slice %1 {offsets = [1, 1, 0], sizes = [16, 16, 128], strides = [1, 1, 1]} : vector<18x18x128xbf16> to vector<16x16x128xbf16>
    %15 = vector.shape_cast %14 : vector<16x16x128xbf16> to vector<256x128xbf16>
    %c0_8 = arith.constant 0 : index
    %c512 = arith.constant 512 : index
    %16 = vector.load %arg5[%c0_8, %c512] : memref<256x1152xbf16, #tpu.memory_space<vmem>>, vector<256x128xbf16>
    tpu.vector_store %arg5[%c0_8, %c512], %15 {strides = array<i32>} : memref<256x1152xbf16, #tpu.memory_space<vmem>>, vector<256x128xbf16>,
    %17 = vector.extract_strided_slice %1 {offsets = [1, 2, 0], sizes = [16, 16, 128], strides = [1, 1, 1]} : vector<18x18x128xbf16> to vector<16x16x128xbf16>
    %18 = vector.shape_cast %17 : vector<16x16x128xbf16> to vector<256x128xbf16>
    %c0_9 = arith.constant 0 : index
    %c640 = arith.constant 640 : index
    %19 = vector.load %arg5[%c0_9, %c640] : memref<256x1152xbf16, #tpu.memory_space<vmem>>, vector<256x128xbf16>
    tpu.vector_store %arg5[%c0_9, %c640], %18 {strides = array<i32>} : memref<256x1152xbf16, #tpu.memory_space<vmem>>, vector<256x128xbf16>,
    %20 = vector.extract_strided_slice %1 {offsets = [2, 0, 0], sizes = [16, 16, 128], strides = [1, 1, 1]} : vector<18x18x128xbf16> to vector<16x16x128xbf16>
    %21 = vector.shape_cast %20 : vector<16x16x128xbf16> to vector<256x128xbf16>
    %c0_10 = arith.constant 0 : index
    %c768 = arith.constant 768 : index
    %22 = vector.load %arg5[%c0_10, %c768] : memref<256x1152xbf16, #tpu.memory_space<vmem>>, vector<256x128xbf16>
    tpu.vector_store %arg5[%c0_10, %c768], %21 {strides = array<i32>} : memref<256x1152xbf16, #tpu.memory_space<vmem>>, vector<256x128xbf16>,
    %23 = vector.extract_strided_slice %1 {offsets = [2, 1, 0], sizes = [16, 16, 128], strides = [1, 1, 1]} : vector<18x18x128xbf16> to vector<16x16x128xbf16>
    %24 = vector.shape_cast %23 : vector<16x16x128xbf16> to vector<256x128xbf16>
    %c0_11 = arith.constant 0 : index
    %c896 = arith.constant 896 : index
    %25 = vector.load %arg5[%c0_11, %c896] : memref<256x1152xbf16, #tpu.memory_space<vmem>>, vector<256x128xbf16>
    tpu.vector_store %arg5[%c0_11, %c896], %24 {strides = array<i32>} : memref<256x1152xbf16, #tpu.memory_space<vmem>>, vector<256x128xbf16>,
    %26 = vector.extract_strided_slice %1 {offsets = [2, 2, 0], sizes = [16, 16, 128], strides = [1, 1, 1]} : vector<18x18x128xbf16> to vector<16x16x128xbf16>
    %27 = vector.shape_cast %26 : vector<16x16x128xbf16> to vector<256x128xbf16>
    %c0_12 = arith.constant 0 : index
    %c1024 = arith.constant 1024 : index
    %28 = vector.load %arg5[%c0_12, %c1024] : memref<256x1152xbf16, #tpu.memory_space<vmem>>, vector<256x128xbf16>
    tpu.vector_store %arg5[%c0_12, %c1024], %27 {strides = array<i32>} : memref<256x1152xbf16, #tpu.memory_space<vmem>>, vector<256x128xbf16>,
    %c0_13 = arith.constant 0 : index
    %c0_14 = arith.constant 0 : index
    %29 = vector.load %arg5[%c0_13, %c0_14] : memref<256x1152xbf16, #tpu.memory_space<vmem>>, vector<256x1152xbf16>
    %c0_15 = arith.constant 0 : index
    %c0_16 = arith.constant 0 : index
    %30 = vector.load %arg2[%c0_15, %c0_16] : memref<1152x128xbf16, #tpu.memory_space<vmem>>, vector<1152x128xbf16>
    %cst = arith.constant dense<0.000000e+00> : vector<256x128xf32>
    %31 = tpu.matmul %29, %30, %cst {dimension_numbers = #tpu.dot_dimension_numbers<[1], [0], [0], [1], [0, 0, 1, 1], [], []>} : vector<256x1152xbf16>, vector<1152x128xbf16>, vector<256x128xf32> -> vector<256x128xf32>
    %32 = vector.shape_cast %31 : vector<256x128xf32> to vector<16x16x128xf32>
    %c0_17 = arith.constant 0 : index
    %c0_18 = arith.constant 0 : index
    %c0_19 = arith.constant 0 : index
    %c0_20 = arith.constant 0 : index
    %33 = vector.load %arg3[%c0_17, %c0_18, %c0_19, %c0_20] : memref<1x16x16x128xf32, #tpu.memory_space<vmem>>, vector<1x16x16x128xf32>
    %34 = vector.shape_cast %33 : vector<1x16x16x128xf32> to vector<16x16x128xf32>
    %35 = vector.shape_cast %32 : vector<16x16x128xf32> to vector<1x16x16x128xf32>
    tpu.vector_store %arg3[%c0_17, %c0_18, %c0_19, %c0_20], %35 {strides = array<i32>} : memref<1x16x16x128xf32, #tpu.memory_space<vmem>>, vector<1x16x16x128xf32>,
    %cst_21 = arith.constant dense<0.000000e+00> : vector<128xf32>
    %36 = vector.multi_reduction <add>, %31, %cst_21 [0] : vector<256x128xf32> to vector<128xf32>
    %37 = vector.shape_cast %36 : vector<128xf32> to vector<1x128xf32>
    %38 = arith.mulf %31, %31 : vector<256x128xf32>
    %cst_22 = arith.constant dense<0.000000e+00> : vector<128xf32>
    %39 = vector.multi_reduction <add>, %38, %cst_22 [0] : vector<256x128xf32> to vector<128xf32>
    %40 = vector.shape_cast %39 : vector<128xf32> to vector<1x128xf32>
    %41 = tpu.concatenate %37, %40 in 0 : vector<1x128xf32>, vector<1x128xf32> -> vector<2x128xf32>
    %c0_23 = arith.constant 0 : index
    %c0_24 = arith.constant 0 : index
    %c0_25 = arith.constant 0 : index
    %42 = vector.load %arg4[%c0_23, %c0_24, %c0_25] : memref<1x2x128xf32, #tpu.memory_space<vmem>>, vector<1x2x128xf32>
    %43 = vector.shape_cast %42 : vector<1x2x128xf32> to vector<2x128xf32>
    %44 = vector.shape_cast %41 : vector<2x128xf32> to vector<1x2x128xf32>
    tpu.vector_store %arg4[%c0_23, %c0_24, %c0_25], %44 {strides = array<i32>} : memref<1x2x128xf32, #tpu.memory_space<vmem>>, vector<1x2x128xf32>,
    return
  }
  func.func @transform_0(%arg0: i32) -> (i32, i32, i32, i32) {
    %c0_i32 = arith.constant 0 : i32
    %c0_i32_0 = arith.constant 0 : i32
    %c0_i32_1 = arith.constant 0 : i32
    %c0_i32_2 = arith.constant 0 : i32
    return %arg0, %c0_i32, %c0_i32_0, %c0_i32_1 : i32, i32, i32, i32
  }
  func.func @transform_1(%arg0: i32) -> (i32, i32) {
    %c0_i32 = arith.constant 0 : i32
    %c0_i32_0 = arith.constant 0 : i32
    %c0_i32_1 = arith.constant 0 : i32
    return %c0_i32, %c0_i32_0 : i32, i32
  }
  func.func @transform_2(%arg0: i32) -> (i32, i32, i32, i32) {
    %c0_i32 = arith.constant 0 : i32
    %c0_i32_0 = arith.constant 0 : i32
    %c0_i32_1 = arith.constant 0 : i32
    %c0_i32_2 = arith.constant 0 : i32
    return %arg0, %c0_i32, %c0_i32_0, %c0_i32_1 : i32, i32, i32, i32
  }
  func.func @transform_3(%arg0: i32) -> (i32, i32, i32) {
    %c0_i32 = arith.constant 0 : i32
    %c0_i32_0 = arith.constant 0 : i32
    %c0_i32_1 = arith.constant 0 : i32
    return %arg0, %c0_i32, %c0_i32_0 : i32, i32, i32
  }
}

module attributes {stable_mosaic.version = 11 : i64} {
  func.func @_bn2_residual_kernel(%arg0: i32, %arg1: memref<1x16x16x128xf32, #tpu.memory_space<vmem>>, %arg2: memref<1x16x16x128xf32, #tpu.memory_space<vmem>>, %arg3: memref<1x128xf32, #tpu.memory_space<vmem>>, %arg4: memref<1x128xf32, #tpu.memory_space<vmem>>, %arg5: memref<1x16x16x128xf32, #tpu.memory_space<vmem>>) attributes {dimension_semantics = [#tpu.dimension_semantics<parallel>], iteration_bounds = array<i64: 2>, scalar_prefetch = 0 : i64, scratch_operands = 0 : i64, tpu.core_type = #tpu.core_type<tc>, window_params = [{transform_indices = @transform_0, window_bounds = array<i64: 1, 16, 16, 128>}, {transform_indices = @transform_1, window_bounds = array<i64: 1, 16, 16, 128>}, {pipeline_mode = #tpu.pipeline_mode<synchronous>, transform_indices = @transform_2, window_bounds = array<i64: 1, 128>}, {pipeline_mode = #tpu.pipeline_mode<synchronous>, transform_indices = @transform_3, window_bounds = array<i64: 1, 128>}, {transform_indices = @transform_4, window_bounds = array<i64: 1, 16, 16, 128>}]} {
    %c0 = arith.constant 0 : index
    %c0_0 = arith.constant 0 : index
    %0 = vector.load %arg3[%c0, %c0_0] : memref<1x128xf32, #tpu.memory_space<vmem>>, vector<1x128xf32>
    %1 = vector.shape_cast %0 : vector<1x128xf32> to vector<1x1x128xf32>
    %c0_1 = arith.constant 0 : index
    %c0_2 = arith.constant 0 : index
    %2 = vector.load %arg4[%c0_1, %c0_2] : memref<1x128xf32, #tpu.memory_space<vmem>>, vector<1x128xf32>
    %3 = vector.shape_cast %2 : vector<1x128xf32> to vector<1x1x128xf32>
    %c0_3 = arith.constant 0 : index
    %c0_4 = arith.constant 0 : index
    %c0_5 = arith.constant 0 : index
    %c0_6 = arith.constant 0 : index
    %4 = vector.load %arg1[%c0_3, %c0_4, %c0_5, %c0_6] : memref<1x16x16x128xf32, #tpu.memory_space<vmem>>, vector<1x16x16x128xf32>
    %5 = vector.shape_cast %4 : vector<1x16x16x128xf32> to vector<16x16x128xf32>
    %6 = vector.broadcast %1 : vector<1x1x128xf32> to vector<16x16x128xf32>
    %7 = arith.mulf %5, %6 : vector<16x16x128xf32>
    %8 = vector.broadcast %3 : vector<1x1x128xf32> to vector<16x16x128xf32>
    %9 = arith.addf %7, %8 : vector<16x16x128xf32>
    %c0_7 = arith.constant 0 : index
    %c0_8 = arith.constant 0 : index
    %c0_9 = arith.constant 0 : index
    %c0_10 = arith.constant 0 : index
    %10 = vector.load %arg2[%c0_7, %c0_8, %c0_9, %c0_10] : memref<1x16x16x128xf32, #tpu.memory_space<vmem>>, vector<1x16x16x128xf32>
    %11 = vector.shape_cast %10 : vector<1x16x16x128xf32> to vector<16x16x128xf32>
    %12 = arith.addf %9, %11 : vector<16x16x128xf32>
    %cst = arith.constant 0.000000e+00 : f32
    %13 = vector.broadcast %cst : f32 to vector<16x16x128xf32>
    %14 = arith.maximumf %12, %13 : vector<16x16x128xf32>
    %c0_11 = arith.constant 0 : index
    %c0_12 = arith.constant 0 : index
    %c0_13 = arith.constant 0 : index
    %c0_14 = arith.constant 0 : index
    %15 = vector.load %arg5[%c0_11, %c0_12, %c0_13, %c0_14] : memref<1x16x16x128xf32, #tpu.memory_space<vmem>>, vector<1x16x16x128xf32>
    %16 = vector.shape_cast %15 : vector<1x16x16x128xf32> to vector<16x16x128xf32>
    %17 = vector.shape_cast %14 : vector<16x16x128xf32> to vector<1x16x16x128xf32>
    tpu.vector_store %arg5[%c0_11, %c0_12, %c0_13, %c0_14], %17 {strides = array<i32>} : memref<1x16x16x128xf32, #tpu.memory_space<vmem>>, vector<1x16x16x128xf32>,
    return
  }
  func.func @transform_0(%arg0: i32) -> (i32, i32, i32, i32) {
    %c0_i32 = arith.constant 0 : i32
    %c0_i32_0 = arith.constant 0 : i32
    %c0_i32_1 = arith.constant 0 : i32
    %c0_i32_2 = arith.constant 0 : i32
    return %arg0, %c0_i32, %c0_i32_0, %c0_i32_1 : i32, i32, i32, i32
  }
  func.func @transform_1(%arg0: i32) -> (i32, i32, i32, i32) {
    %c0_i32 = arith.constant 0 : i32
    %c0_i32_0 = arith.constant 0 : i32
    %c0_i32_1 = arith.constant 0 : i32
    %c0_i32_2 = arith.constant 0 : i32
    return %arg0, %c0_i32, %c0_i32_0, %c0_i32_1 : i32, i32, i32, i32
  }
  func.func @transform_2(%arg0: i32) -> (i32, i32) {
    %c0_i32 = arith.constant 0 : i32
    %c0_i32_0 = arith.constant 0 : i32
    %c0_i32_1 = arith.constant 0 : i32
    return %c0_i32, %c0_i32_0 : i32, i32
  }
  func.func @transform_3(%arg0: i32) -> (i32, i32) {
    %c0_i32 = arith.constant 0 : i32
    %c0_i32_0 = arith.constant 0 : i32
    %c0_i32_1 = arith.constant 0 : i32
    return %c0_i32, %c0_i32_0 : i32, i32
  }
  func.func @transform_4(%arg0: i32) -> (i32, i32, i32, i32) {
    %c0_i32 = arith.constant 0 : i32
    %c0_i32_0 = arith.constant 0 : i32
    %c0_i32_1 = arith.constant 0 : i32
    %c0_i32_2 = arith.constant 0 : i32
    return %arg0, %c0_i32, %c0_i32_0, %c0_i32_1 : i32, i32, i32, i32
  }
}

module attributes {stable_mosaic.version = 11 : i64} {
  func.func @_conv2_kernel(%arg0: i32, %arg1: memref<1x16x16x128xf32, #tpu.memory_space<vmem>>, %arg2: memref<1152x128xbf16, #tpu.memory_space<vmem>>, %arg3: memref<1x128xf32, #tpu.memory_space<vmem>>, %arg4: memref<1x128xf32, #tpu.memory_space<vmem>>, %arg5: memref<1x16x16x128xf32, #tpu.memory_space<vmem>>, %arg6: memref<1x2x128xf32, #tpu.memory_space<vmem>>, %arg7: memref<18x18x128xbf16, #tpu.memory_space<vmem>>, %arg8: memref<256x1152xbf16, #tpu.memory_space<vmem>>) attributes {dimension_semantics = [#tpu.dimension_semantics<parallel>], iteration_bounds = array<i64: 2>, scalar_prefetch = 0 : i64, scratch_operands = 2 : i64, tpu.core_type = #tpu.core_type<tc>, window_params = [{transform_indices = @transform_0, window_bounds = array<i64: 1, 16, 16, 128>}, {pipeline_mode = #tpu.pipeline_mode<synchronous>, transform_indices = @transform_1, window_bounds = array<i64: 1152, 128>}, {pipeline_mode = #tpu.pipeline_mode<synchronous>, transform_indices = @transform_2, window_bounds = array<i64: 1, 128>}, {pipeline_mode = #tpu.pipeline_mode<synchronous>, transform_indices = @transform_3, window_bounds = array<i64: 1, 128>}, {transform_indices = @transform_4, window_bounds = array<i64: 1, 16, 16, 128>}, {transform_indices = @transform_5, window_bounds = array<i64: 1, 2, 128>}]} {
    %c0_i32 = arith.constant 0 : i32
    %0 = arith.cmpi eq, %arg0, %c0_i32 : i32
    %1 = arith.extui %0 : i1 to i32
    %c0_i32_0 = arith.constant 0 : i32
    %2 = arith.cmpi ne, %1, %c0_i32_0 : i32
    scf.if %2 {
      %cst_37 = arith.constant 0.000000e+00 : bf16
      %61 = vector.broadcast %cst_37 : bf16 to vector<18x18x128xbf16>
      %c0_38 = arith.constant 0 : index
      %c0_39 = arith.constant 0 : index
      %c0_40 = arith.constant 0 : index
      %62 = vector.load %arg7[%c0_38, %c0_39, %c0_40] : memref<18x18x128xbf16, #tpu.memory_space<vmem>>, vector<18x18x128xbf16>
      tpu.vector_store %arg7[%c0_38, %c0_39, %c0_40], %61 {strides = array<i32>} : memref<18x18x128xbf16, #tpu.memory_space<vmem>>, vector<18x18x128xbf16>,
    } else {
    }
    %c0 = arith.constant 0 : index
    %c0_1 = arith.constant 0 : index
    %3 = vector.load %arg3[%c0, %c0_1] : memref<1x128xf32, #tpu.memory_space<vmem>>, vector<1x128xf32>
    %4 = vector.shape_cast %3 : vector<1x128xf32> to vector<1x1x128xf32>
    %c0_2 = arith.constant 0 : index
    %c0_3 = arith.constant 0 : index
    %5 = vector.load %arg4[%c0_2, %c0_3] : memref<1x128xf32, #tpu.memory_space<vmem>>, vector<1x128xf32>
    %6 = vector.shape_cast %5 : vector<1x128xf32> to vector<1x1x128xf32>
    %c0_4 = arith.constant 0 : index
    %c0_5 = arith.constant 0 : index
    %c0_6 = arith.constant 0 : index
    %c0_7 = arith.constant 0 : index
    %7 = vector.load %arg1[%c0_4, %c0_5, %c0_6, %c0_7] : memref<1x16x16x128xf32, #tpu.memory_space<vmem>>, vector<1x16x16x128xf32>
    %8 = vector.shape_cast %7 : vector<1x16x16x128xf32> to vector<16x16x128xf32>
    %9 = vector.broadcast %4 : vector<1x1x128xf32> to vector<16x16x128xf32>
    %10 = arith.mulf %8, %9 : vector<16x16x128xf32>
    %11 = vector.broadcast %6 : vector<1x1x128xf32> to vector<16x16x128xf32>
    %12 = arith.addf %10, %11 : vector<16x16x128xf32>
    %cst = arith.constant 0.000000e+00 : f32
    %13 = vector.broadcast %cst : f32 to vector<16x16x128xf32>
    %14 = arith.maximumf %12, %13 : vector<16x16x128xf32>
    %15 = arith.truncf %14 : vector<16x16x128xf32> to vector<16x16x128xbf16>
    %c1 = arith.constant 1 : index
    %c1_8 = arith.constant 1 : index
    %c0_9 = arith.constant 0 : index
    %16 = vector.load %arg7[%c1, %c1_8, %c0_9] : memref<18x18x128xbf16, #tpu.memory_space<vmem>>, vector<16x16x128xbf16>
    tpu.vector_store %arg7[%c1, %c1_8, %c0_9], %15 {strides = array<i32>} : memref<18x18x128xbf16, #tpu.memory_space<vmem>>, vector<16x16x128xbf16>,
    %c0_10 = arith.constant 0 : index
    %c0_11 = arith.constant 0 : index
    %c0_12 = arith.constant 0 : index
    %17 = vector.load %arg7[%c0_10, %c0_11, %c0_12] : memref<18x18x128xbf16, #tpu.memory_space<vmem>>, vector<18x18x128xbf16>
    %18 = vector.extract_strided_slice %17 {offsets = [0, 0, 0], sizes = [16, 16, 128], strides = [1, 1, 1]} : vector<18x18x128xbf16> to vector<16x16x128xbf16>
    %19 = vector.shape_cast %18 : vector<16x16x128xbf16> to vector<256x128xbf16>
    %c0_13 = arith.constant 0 : index
    %c0_14 = arith.constant 0 : index
    %20 = vector.load %arg8[%c0_13, %c0_14] : memref<256x1152xbf16, #tpu.memory_space<vmem>>, vector<256x128xbf16>
    tpu.vector_store %arg8[%c0_13, %c0_14], %19 {strides = array<i32>} : memref<256x1152xbf16, #tpu.memory_space<vmem>>, vector<256x128xbf16>,
    %21 = vector.extract_strided_slice %17 {offsets = [0, 1, 0], sizes = [16, 16, 128], strides = [1, 1, 1]} : vector<18x18x128xbf16> to vector<16x16x128xbf16>
    %22 = vector.shape_cast %21 : vector<16x16x128xbf16> to vector<256x128xbf16>
    %c0_15 = arith.constant 0 : index
    %c128 = arith.constant 128 : index
    %23 = vector.load %arg8[%c0_15, %c128] : memref<256x1152xbf16, #tpu.memory_space<vmem>>, vector<256x128xbf16>
    tpu.vector_store %arg8[%c0_15, %c128], %22 {strides = array<i32>} : memref<256x1152xbf16, #tpu.memory_space<vmem>>, vector<256x128xbf16>,
    %24 = vector.extract_strided_slice %17 {offsets = [0, 2, 0], sizes = [16, 16, 128], strides = [1, 1, 1]} : vector<18x18x128xbf16> to vector<16x16x128xbf16>
    %25 = vector.shape_cast %24 : vector<16x16x128xbf16> to vector<256x128xbf16>
    %c0_16 = arith.constant 0 : index
    %c256 = arith.constant 256 : index
    %26 = vector.load %arg8[%c0_16, %c256] : memref<256x1152xbf16, #tpu.memory_space<vmem>>, vector<256x128xbf16>
    tpu.vector_store %arg8[%c0_16, %c256], %25 {strides = array<i32>} : memref<256x1152xbf16, #tpu.memory_space<vmem>>, vector<256x128xbf16>,
    %27 = vector.extract_strided_slice %17 {offsets = [1, 0, 0], sizes = [16, 16, 128], strides = [1, 1, 1]} : vector<18x18x128xbf16> to vector<16x16x128xbf16>
    %28 = vector.shape_cast %27 : vector<16x16x128xbf16> to vector<256x128xbf16>
    %c0_17 = arith.constant 0 : index
    %c384 = arith.constant 384 : index
    %29 = vector.load %arg8[%c0_17, %c384] : memref<256x1152xbf16, #tpu.memory_space<vmem>>, vector<256x128xbf16>
    tpu.vector_store %arg8[%c0_17, %c384], %28 {strides = array<i32>} : memref<256x1152xbf16, #tpu.memory_space<vmem>>, vector<256x128xbf16>,
    %30 = vector.extract_strided_slice %17 {offsets = [1, 1, 0], sizes = [16, 16, 128], strides = [1, 1, 1]} : vector<18x18x128xbf16> to vector<16x16x128xbf16>
    %31 = vector.shape_cast %30 : vector<16x16x128xbf16> to vector<256x128xbf16>
    %c0_18 = arith.constant 0 : index
    %c512 = arith.constant 512 : index
    %32 = vector.load %arg8[%c0_18, %c512] : memref<256x1152xbf16, #tpu.memory_space<vmem>>, vector<256x128xbf16>
    tpu.vector_store %arg8[%c0_18, %c512], %31 {strides = array<i32>} : memref<256x1152xbf16, #tpu.memory_space<vmem>>, vector<256x128xbf16>,
    %33 = vector.extract_strided_slice %17 {offsets = [1, 2, 0], sizes = [16, 16, 128], strides = [1, 1, 1]} : vector<18x18x128xbf16> to vector<16x16x128xbf16>
    %34 = vector.shape_cast %33 : vector<16x16x128xbf16> to vector<256x128xbf16>
    %c0_19 = arith.constant 0 : index
    %c640 = arith.constant 640 : index
    %35 = vector.load %arg8[%c0_19, %c640] : memref<256x1152xbf16, #tpu.memory_space<vmem>>, vector<256x128xbf16>
    tpu.vector_store %arg8[%c0_19, %c640], %34 {strides = array<i32>} : memref<256x1152xbf16, #tpu.memory_space<vmem>>, vector<256x128xbf16>,
    %36 = vector.extract_strided_slice %17 {offsets = [2, 0, 0], sizes = [16, 16, 128], strides = [1, 1, 1]} : vector<18x18x128xbf16> to vector<16x16x128xbf16>
    %37 = vector.shape_cast %36 : vector<16x16x128xbf16> to vector<256x128xbf16>
    %c0_20 = arith.constant 0 : index
    %c768 = arith.constant 768 : index
    %38 = vector.load %arg8[%c0_20, %c768] : memref<256x1152xbf16, #tpu.memory_space<vmem>>, vector<256x128xbf16>
    tpu.vector_store %arg8[%c0_20, %c768], %37 {strides = array<i32>} : memref<256x1152xbf16, #tpu.memory_space<vmem>>, vector<256x128xbf16>,
    %39 = vector.extract_strided_slice %17 {offsets = [2, 1, 0], sizes = [16, 16, 128], strides = [1, 1, 1]} : vector<18x18x128xbf16> to vector<16x16x128xbf16>
    %40 = vector.shape_cast %39 : vector<16x16x128xbf16> to vector<256x128xbf16>
    %c0_21 = arith.constant 0 : index
    %c896 = arith.constant 896 : index
    %41 = vector.load %arg8[%c0_21, %c896] : memref<256x1152xbf16, #tpu.memory_space<vmem>>, vector<256x128xbf16>
    tpu.vector_store %arg8[%c0_21, %c896], %40 {strides = array<i32>} : memref<256x1152xbf16, #tpu.memory_space<vmem>>, vector<256x128xbf16>,
    %42 = vector.extract_strided_slice %17 {offsets = [2, 2, 0], sizes = [16, 16, 128], strides = [1, 1, 1]} : vector<18x18x128xbf16> to vector<16x16x128xbf16>
    %43 = vector.shape_cast %42 : vector<16x16x128xbf16> to vector<256x128xbf16>
    %c0_22 = arith.constant 0 : index
    %c1024 = arith.constant 1024 : index
    %44 = vector.load %arg8[%c0_22, %c1024] : memref<256x1152xbf16, #tpu.memory_space<vmem>>, vector<256x128xbf16>
    tpu.vector_store %arg8[%c0_22, %c1024], %43 {strides = array<i32>} : memref<256x1152xbf16, #tpu.memory_space<vmem>>, vector<256x128xbf16>,
    %c0_23 = arith.constant 0 : index
    %c0_24 = arith.constant 0 : index
    %45 = vector.load %arg8[%c0_23, %c0_24] : memref<256x1152xbf16, #tpu.memory_space<vmem>>, vector<256x1152xbf16>
    %c0_25 = arith.constant 0 : index
    %c0_26 = arith.constant 0 : index
    %46 = vector.load %arg2[%c0_25, %c0_26] : memref<1152x128xbf16, #tpu.memory_space<vmem>>, vector<1152x128xbf16>
    %cst_27 = arith.constant dense<0.000000e+00> : vector<256x128xf32>
    %47 = tpu.matmul %45, %46, %cst_27 {dimension_numbers = #tpu.dot_dimension_numbers<[1], [0], [0], [1], [0, 0, 1, 1], [], []>} : vector<256x1152xbf16>, vector<1152x128xbf16>, vector<256x128xf32> -> vector<256x128xf32>
    %48 = vector.shape_cast %47 : vector<256x128xf32> to vector<16x16x128xf32>
    %c0_28 = arith.constant 0 : index
    %c0_29 = arith.constant 0 : index
    %c0_30 = arith.constant 0 : index
    %c0_31 = arith.constant 0 : index
    %49 = vector.load %arg5[%c0_28, %c0_29, %c0_30, %c0_31] : memref<1x16x16x128xf32, #tpu.memory_space<vmem>>, vector<1x16x16x128xf32>
    %50 = vector.shape_cast %49 : vector<1x16x16x128xf32> to vector<16x16x128xf32>
    %51 = vector.shape_cast %48 : vector<16x16x128xf32> to vector<1x16x16x128xf32>
    tpu.vector_store %arg5[%c0_28, %c0_29, %c0_30, %c0_31], %51 {strides = array<i32>} : memref<1x16x16x128xf32, #tpu.memory_space<vmem>>, vector<1x16x16x128xf32>,
    %cst_32 = arith.constant dense<0.000000e+00> : vector<128xf32>
    %52 = vector.multi_reduction <add>, %47, %cst_32 [0] : vector<256x128xf32> to vector<128xf32>
    %53 = vector.shape_cast %52 : vector<128xf32> to vector<1x128xf32>
    %54 = arith.mulf %47, %47 : vector<256x128xf32>
    %cst_33 = arith.constant dense<0.000000e+00> : vector<128xf32>
    %55 = vector.multi_reduction <add>, %54, %cst_33 [0] : vector<256x128xf32> to vector<128xf32>
    %56 = vector.shape_cast %55 : vector<128xf32> to vector<1x128xf32>
    %57 = tpu.concatenate %53, %56 in 0 : vector<1x128xf32>, vector<1x128xf32> -> vector<2x128xf32>
    %c0_34 = arith.constant 0 : index
    %c0_35 = arith.constant 0 : index
    %c0_36 = arith.constant 0 : index
    %58 = vector.load %arg6[%c0_34, %c0_35, %c0_36] : memref<1x2x128xf32, #tpu.memory_space<vmem>>, vector<1x2x128xf32>
    %59 = vector.shape_cast %58 : vector<1x2x128xf32> to vector<2x128xf32>
    %60 = vector.shape_cast %57 : vector<2x128xf32> to vector<1x2x128xf32>
    tpu.vector_store %arg6[%c0_34, %c0_35, %c0_36], %60 {strides = array<i32>} : memref<1x2x128xf32, #tpu.memory_space<vmem>>, vector<1x2x128xf32>,
    return
  }
  func.func @transform_0(%arg0: i32) -> (i32, i32, i32, i32) {
    %c0_i32 = arith.constant 0 : i32
    %c0_i32_0 = arith.constant 0 : i32
    %c0_i32_1 = arith.constant 0 : i32
    %c0_i32_2 = arith.constant 0 : i32
    return %arg0, %c0_i32, %c0_i32_0, %c0_i32_1 : i32, i32, i32, i32
  }
  func.func @transform_1(%arg0: i32) -> (i32, i32) {
    %c0_i32 = arith.constant 0 : i32
    %c0_i32_0 = arith.constant 0 : i32
    %c0_i32_1 = arith.constant 0 : i32
    return %c0_i32, %c0_i32_0 : i32, i32
  }
  func.func @transform_2(%arg0: i32) -> (i32, i32) {
    %c0_i32 = arith.constant 0 : i32
    %c0_i32_0 = arith.constant 0 : i32
    %c0_i32_1 = arith.constant 0 : i32
    return %c0_i32, %c0_i32_0 : i32, i32
  }
  func.func @transform_3(%arg0: i32) -> (i32, i32) {
    %c0_i32 = arith.constant 0 : i32
    %c0_i32_0 = arith.constant 0 : i32
    %c0_i32_1 = arith.constant 0 : i32
    return %c0_i32, %c0_i32_0 : i32, i32
  }
  func.func @transform_4(%arg0: i32) -> (i32, i32, i32, i32) {
    %c0_i32 = arith.constant 0 : i32
    %c0_i32_0 = arith.constant 0 : i32
    %c0_i32_1 = arith.constant 0 : i32
    %c0_i32_2 = arith.constant 0 : i32
    return %arg0, %c0_i32, %c0_i32_0, %c0_i32_1 : i32, i32, i32, i32
  }
  func.func @transform_5(%arg0: i32) -> (i32, i32, i32) {
    %c0_i32 = arith.constant 0 : i32
    %c0_i32_0 = arith.constant 0 : i32
    %c0_i32_1 = arith.constant 0 : i32
    return %arg0, %c0_i32, %c0_i32_0 : i32, i32, i32
  }
}

</mosaic_0001>

<bundles_post_ra>
// kernel: basic_block.5
= control target key start
LH: loop header
LB: loop body
LE: loop exit
PB: predicated region body
PF: predicated region fallthrough
CT: control target
= control target key end

     0   :  { %s576_s15 = smov 0   ;;  %s777_s0 = inlined_call_operand.vmem [shape: f32[2,16,16,128], index: 0, kind: input, shape index: {}]   ;;  %s778_s1 = inlined_call_operand.vmem [shape: f32[2,16,16,128], index: 1, kind: input, shape index: {}]   ;;  %s779_s2 = inlined_call_operand.vmem [shape: f32[1,128], index: 2, kind: input, shape index: {}]   ;;  %s780_s3 = inlined_call_operand.vmem [shape: f32[1,128], index: 3, kind: input, shape index: {}]   ;;  %s781_s4 = inlined_call_operand.vmem [shape: f32[2,16,16,128], index: 4, kind: output, shape index: {}]  }
   0x1 LB: > { %s517_s16 = sadd.s32 4294967295, %s549_s15   ;;  %p521_p0 = scmp.ge.s32.totalorder %s549_s15, 1  ;;  %s549_s15 = sphi %s576_s15, %s14_s15  }
   0x2   : > { %p172_p1 = scmp.lt.s32.totalorder %s549_s15, 3 }
   0x4   : > { %p173_p2 = pnand %p521_p0, %p172_p1 }
   0x5   : > { %p203_p3 = scmp.lt.s32.totalorder (!%p173_p2), %s517_s16, 1 }
   0x6   : > { %176 = sbr.rel (%p173_p2) target bundleno = 55 (0x37), region = 36 }
   0xb   : > { %s783_s16 = smov (!%p203_p3, %s517_s16), 1  ;;  %v587_v0 = vld [vmem:[%s779_s2] ss:$0 sm:$0xff] }
   0xc   : > { %s589_s19 = sshll.u32 %s783_s16, 8  ;;  %v606_v1 = vld [vmem:[%s780_s3] ss:$0 sm:$0xff] }
   0xd   : > { %s595_s22 = scalar_lea.vmem %s777_s0, %s589_s19  ;;  %s601_s25 = scalar_lea.vmem %s778_s1, %s589_s19 }
   0xe   : > { %v220_v2 = vld [vmem:[%s595_s22] sm:$0xff]  ;;  %v221_v3 = vld [vmem:[%s595_s22 + $0x8] sm:$0xff]  ;;  %v222_v7 = vld [vmem:[%s595_s22 + $0x10] sm:$0xff]  ;;  %s637_s30 = scalar_lea.vmem %s781_s4, %s589_s19 }
   0xf   : > { %v255_v4 = vmul.f32 %v587_v0, %v220_v2  ;;  %v322_v5 = vld [vmem:[%s601_s25] sm:$0xff]  ;;  %v256_v6 = vmul.f32 %v587_v0, %v221_v3  ;;  %v323_v8 = vld [vmem:[%s601_s25 + $0x8] sm:$0xff]  ;;  %v257_v9 = vmul.f32 %v587_v0, %v222_v7  ;;  %v223_v10 = vld [vmem:[%s595_s22 + $0x18] sm:$0xff] }
  0x10   : > { %v224_v11 = vld [vmem:[%s595_s22 + $0x20] sm:$0xff]  ;;  %v324_v14 = vld [vmem:[%s601_s25 + $0x10] sm:$0xff]  ;;  %v258_v15 = vmul.f32 %v587_v0, %v223_v10  ;;  %v325_v16 = vld [vmem:[%s601_s25 + $0x18] sm:$0xff] }
  0x11   : > { %v290_v12 = vadd.f32 %v606_v1, %v255_v4  ;;  %v291_v13 = vadd.f32 %v606_v1, %v256_v6  ;;  %v259_v17 = vmul.f32 %v587_v0, %v224_v11  ;;  %v225_v18 = vld [vmem:[%s595_s22 + $0x28] sm:$0xff]  ;;  %v292_v19 = vadd.f32 %v606_v1, %v257_v9  ;;  %v326_v20 = vld [vmem:[%s601_s25 + $0x20] sm:$0xff]  ;;  %v226_v22 = vld [vmem:[%s595_s22 + $0x30] sm:$0xff] }
  0x12   : > { %v260_v21 = vmul.f32 %v587_v0, %v225_v18  ;;  %v227_v23 = vld [vmem:[%s595_s22 + $0x38] sm:$0xff]  ;;  %v293_v26 = vadd.f32 %v606_v1, %v258_v15  ;;  %v327_v28 = vld [vmem:[%s601_s25 + $0x28] sm:$0xff]  ;;  %v261_v31 = vmul.f32 %v587_v0, %v226_v22  ;;  %v228_v33 = vld [vmem:[%s595_s22 + $0x40] sm:$0xff] }
  0x13   : > { %v354_v24 = vadd.f32 %v322_v5, %v290_v12  ;;  %v355_v25 = vadd.f32 %v323_v8, %v291_v13  ;;  %v294_v27 = vadd.f32 %v606_v1, %v259_v17  ;;  %v356_v29 = vadd.f32 %v324_v14, %v292_v19  ;;  %v229_v34 = vld [vmem:[%s595_s22 + $0x48] sm:$0xff]  ;;  %v328_v39 = vld [vmem:[%s601_s25 + $0x30] sm:$0xff]  ;;  %v329_v40 = vld [vmem:[%s601_s25 + $0x38] sm:$0xff] }
  0x14   : > { %v295_v30 = vadd.f32 %v606_v1, %v260_v21  ;;  %v262_v32 = vmul.f32 %v587_v0, %v227_v23  ;;  %v357_v37 = vadd.f32 %v325_v16, %v293_v26  ;;  %v230_v41 = vld [vmem:[%s595_s22 + $0x50] sm:$0xff]  ;;  %v296_v44 = vadd.f32 %v606_v1, %v261_v31  ;;  %v231_v46 = vld [vmem:[%s595_s22 + $0x58] sm:$0xff]  ;;  %v232_v47 = vld [vmem:[%s595_s22 + $0x60] sm:$0xff] }
  0x15   : > { %v386_v35 = vmax.f32 %v354_v24, 0.0  ;;  %v387_v36 = vmax.f32 %v355_v25, 0.0  ;;  %v358_v38 = vadd.f32 %v326_v20, %v294_v27  ;;  %v388_v42 = vmax.f32 %v356_v29, 0.0  ;;  %v233_v52 = vld [vmem:[%s595_s22 + $0x68] sm:$0xff]  ;;  %v330_v56 = vld [vmem:[%s601_s25 + $0x40] sm:$0xff]  ;;  %v332_v61 = vld [vmem:[%s601_s25 + $0x50] sm:$0xff] }
  0x16   : > { %v359_v43 = vadd.f32 %v327_v28, %v295_v30  ;;  %v297_v45 = vadd.f32 %v606_v1, %v262_v32  ;;  %v389_v48 = vmax.f32 %v357_v37, 0.0  ;;  %v263_v50 = vmul.f32 %v587_v0, %v228_v33  ;;  %v331_v57 = vld [vmem:[%s601_s25 + $0x48] sm:$0xff]  ;;  %v234_v2 = vld [vmem:[%s595_s22 + $0x70] sm:$0xff]  ;;  %v235_v3 = vld [vmem:[%s595_s22 + $0x78] sm:$0xff] }
  0x17   : > { %418 = vst [vmem:[%s637_s30] sm:$0xff] %v386_v35  ;;  %v390_v49 = vmax.f32 %v358_v38, 0.0  ;;  %v264_v51 = vmul.f32 %v587_v0, %v229_v34  ;;  %v360_v54 = vadd.f32 %v328_v39, %v296_v44  ;;  %v265_v58 = vmul.f32 %v587_v0, %v230_v41  ;;  %v333_v7 = vld [vmem:[%s601_s25 + $0x58] sm:$0xff]  ;;  %v334_v8 = vld [vmem:[%s601_s25 + $0x60] sm:$0xff]  ;;  %v335_v14 = vld [vmem:[%s601_s25 + $0x68] sm:$0xff] }
  0x18   : > { %419 = vst [vmem:[%s637_s30 + $0x8] sm:$0xff] %v387_v36  ;;  %v391_v53 = vmax.f32 %v359_v43, 0.0  ;;  %v361_v55 = vadd.f32 %v329_v40, %v297_v45  ;;  %v298_v59 = vadd.f32 %v606_v1, %v263_v50  ;;  %v266_v62 = vmul.f32 %v587_v0, %v231_v46  ;;  %v236_v19 = vld [vmem:[%s595_s22 + $0x80] sm:$0xff]  ;;  %v237_v20 = vld [vmem:[%s595_s22 + $0x88] sm:$0xff]  ;;  %v336_v25 = vld [vmem:[%s601_s25 + $0x70] sm:$0xff] }
  0x19   : > { %420 = vst [vmem:[%s637_s30 + $0x10] sm:$0xff] %v388_v42  ;;  %v299_v60 = vadd.f32 %v606_v1, %v264_v51  ;;  %v267_v63 = vmul.f32 %v587_v0, %v232_v47  ;;  %v392_v4 = vmax.f32 %v360_v54, 0.0  ;;  %v300_v6 = vadd.f32 %v606_v1, %v265_v58  ;;  %v337_v26 = vld [vmem:[%s601_s25 + $0x78] sm:$0xff]  ;;  %v238_v27 = vld [vmem:[%s595_s22 + $0x90] sm:$0xff]  ;;  %v240_v33 = vld [vmem:[%s595_s22 + $0xa0] sm:$0xff] }
  0x1a   : > { %421 = vst [vmem:[%s637_s30 + $0x18] sm:$0xff] %v389_v48  ;;  %v393_v5 = vmax.f32 %v361_v55, 0.0  ;;  %v268_v9 = vmul.f32 %v587_v0, %v233_v52  ;;  %v362_v10 = vadd.f32 %v330_v56, %v298_v59  ;;  %v301_v12 = vadd.f32 %v606_v1, %v266_v62  ;;  %v239_v32 = vld [vmem:[%s595_s22 + $0x98] sm:$0xff]  ;;  %v241_v38 = vld [vmem:[%s595_s22 + $0xa8] sm:$0xff]  ;;  %v338_v42 = vld [vmem:[%s601_s25 + $0x80] sm:$0xff] }
  0x1b   : > { %422 = vst [vmem:[%s637_s30 + $0x20] sm:$0xff] %v390_v49  ;;  %v363_v11 = vadd.f32 %v331_v57, %v299_v60  ;;  %v302_v13 = vadd.f32 %v606_v1, %v267_v63  ;;  %v364_v15 = vadd.f32 %v332_v61, %v300_v6  ;;  %v269_v17 = vmul.f32 %v587_v0, %v234_v2  ;;  %v339_v43 = vld [vmem:[%s601_s25 + $0x88] sm:$0xff]  ;;  %v340_v47 = vld [vmem:[%s601_s25 + $0x90] sm:$0xff]  ;;  %v243_v51 = vld [vmem:[%s595_s22 + $0xb8] sm:$0xff] }
  0x1c   : > { %423 = vst [vmem:[%s637_s30 + $0x28] sm:$0xff] %v391_v53  ;;  %v303_v16 = vadd.f32 %v606_v1, %v268_v9  ;;  %v270_v18 = vmul.f32 %v587_v0, %v235_v3  ;;  %v394_v21 = vmax.f32 %v362_v10, 0.0  ;;  %v365_v23 = vadd.f32 %v333_v7, %v301_v12  ;;  %v242_v50 = vld [vmem:[%s595_s22 + $0xb0] sm:$0xff]  ;;  %v341_v55 = vld [vmem:[%s601_s25 + $0x98] sm:$0xff]  ;;  %v342_v56 = vld [vmem:[%s601_s25 + $0xa0] sm:$0xff] }
  0x1d   : > { %424 = vst [vmem:[%s637_s30 + $0x30] sm:$0xff] %v392_v4  ;;  %v395_v22 = vmax.f32 %v363_v11, 0.0  ;;  %v366_v24 = vadd.f32 %v334_v8, %v302_v13  ;;  %v396_v28 = vmax.f32 %v364_v15, 0.0  ;;  %v304_v30 = vadd.f32 %v606_v1, %v269_v17  ;;  %v343_v62 = vld [vmem:[%s601_s25 + $0xa8] sm:$0xff]  ;;  %v344_v11 = vld [vmem:[%s601_s25 + $0xb0] sm:$0xff]  ;;  %v345_v12 = vld [vmem:[%s601_s25 + $0xb8] sm:$0xff] }
  0x1e   : > { %425 = vst [vmem:[%s637_s30 + $0x38] sm:$0xff] %v393_v5  ;;  %v367_v29 = vadd.f32 %v335_v14, %v303_v16  ;;  %v305_v31 = vadd.f32 %v606_v1, %v270_v18  ;;  %v397_v34 = vmax.f32 %v365_v23, 0.0  ;;  %v271_v36 = vmul.f32 %v587_v0, %v236_v19  ;;  %v244_v5 = vld [vmem:[%s595_s22 + $0xc0] sm:$0xff]  ;;  %v245_v6 = vld [vmem:[%s595_s22 + $0xc8] sm:$0xff]  ;;  %v246_v13 = vld [vmem:[%s595_s22 + $0xd0] sm:$0xff] }
  0x1f   : > { %426 = vst [vmem:[%s637_s30 + $0x40] sm:$0xff] %v394_v21  ;;  %v398_v35 = vmax.f32 %v366_v24, 0.0  ;;  %v272_v37 = vmul.f32 %v587_v0, %v237_v20  ;;  %v368_v40 = vadd.f32 %v336_v25, %v304_v30  ;;  %v273_v44 = vmul.f32 %v587_v0, %v238_v27  ;;  %v247_v18 = vld [vmem:[%s595_s22 + $0xd8] sm:$0xff]  ;;  %v248_v19 = vld [vmem:[%s595_s22 + $0xe0] sm:$0xff]  ;;  %v249_v24 = vld [vmem:[%s595_s22 + $0xe8] sm:$0xff] }
  0x20   : > { %427 = vst [vmem:[%s637_s30 + $0x48] sm:$0xff] %v395_v22  ;;  %v399_v39 = vmax.f32 %v367_v29, 0.0  ;;  %v369_v41 = vadd.f32 %v337_v26, %v305_v31  ;;  %v306_v45 = vadd.f32 %v606_v1, %v271_v36  ;;  %v274_v48 = vmul.f32 %v587_v0, %v239_v32  ;;  %v347_v29 = vld [vmem:[%s601_s25 + $0xc8] sm:$0xff]  ;;  %v250_v36 = vld [vmem:[%s595_s22 + $0xf0] sm:$0xff] }
  0x21   : > { %428 = vst [vmem:[%s637_s30 + $0x50] sm:$0xff] %v396_v28  ;;  %v307_v46 = vadd.f32 %v606_v1, %v272_v37  ;;  %v275_v49 = vmul.f32 %v587_v0, %v240_v33  ;;  %v400_v52 = vmax.f32 %v368_v40, 0.0  ;;  %v308_v54 = vadd.f32 %v606_v1, %v273_v44  ;;  %v346_v28 = vld [vmem:[%s601_s25 + $0xc0] sm:$0xff]  ;;  %v348_v33 = vld [vmem:[%s601_s25 + $0xd0] sm:$0xff]  ;;  %v251_v37 = vld [vmem:[%s595_s22 + $0xf8] sm:$0xff] }
  0x22   : > { %429 = vst [vmem:[%s637_s30 + $0x58] sm:$0xff] %v397_v34  ;;  %v401_v53 = vmax.f32 %v369_v41, 0.0  ;;  %v276_v57 = vmul.f32 %v587_v0, %v241_v38  ;;  %v370_v58 = vadd.f32 %v338_v42, %v306_v45  ;;  %v309_v60 = vadd.f32 %v606_v1, %v274_v48  ;;  %v349_v41 = vld [vmem:[%s601_s25 + $0xd8] sm:$0xff]  ;;  %v350_v42 = vld [vmem:[%s601_s25 + $0xe0] sm:$0xff]  ;;  %v351_v48 = vld [vmem:[%s601_s25 + $0xe8] sm:$0xff] }
  0x23   : > { %430 = vst [vmem:[%s637_s30 + $0x60] sm:$0xff] %v398_v35  ;;  %v371_v59 = vadd.f32 %v339_v43, %v307_v46  ;;  %v310_v61 = vadd.f32 %v606_v1, %v275_v49  ;;  %v372_v63 = vadd.f32 %v340_v47, %v308_v54  ;;  %v277_v3 = vmul.f32 %v587_v0, %v242_v50 }
  0x24   : > { %431 = vst [vmem:[%s637_s30 + $0x68] sm:$0xff] %v399_v39  ;;  %v311_v2 = vadd.f32 %v606_v1, %v276_v57  ;;  %v278_v4 = vmul.f32 %v587_v0, %v243_v51  ;;  %v402_v7 = vmax.f32 %v370_v58, 0.0  ;;  %v373_v9 = vadd.f32 %v341_v55, %v309_v60  ;;  %v352_v57 = vld [vmem:[%s601_s25 + $0xf0] sm:$0xff]  ;;  %v353_v58 = vld [vmem:[%s601_s25 + $0xf8] sm:$0xff] }
  0x25   : > { %432 = vst [vmem:[%s637_s30 + $0x70] sm:$0xff] %v400_v52  ;;  %v403_v8 = vmax.f32 %v371_v59, 0.0  ;;  %v374_v10 = vadd.f32 %v342_v56, %v310_v61  ;;  %v404_v14 = vmax.f32 %v372_v63, 0.0  ;;  %v312_v16 = vadd.f32 %v606_v1, %v277_v3 }
  0x26   : > { %433 = vst [vmem:[%s637_s30 + $0x78] sm:$0xff] %v401_v53  ;;  %v375_v15 = vadd.f32 %v343_v62, %v311_v2  ;;  %v313_v17 = vadd.f32 %v606_v1, %v278_v4  ;;  %v405_v20 = vmax.f32 %v373_v9, 0.0  ;;  %v279_v22 = vmul.f32 %v587_v0, %v244_v5 }
  0x27   : > { %434 = vst [vmem:[%s637_s30 + $0x80] sm:$0xff] %v402_v7  ;;  %v406_v21 = vmax.f32 %v374_v10, 0.0  ;;  %v280_v23 = vmul.f32 %v587_v0, %v245_v6  ;;  %v376_v26 = vadd.f32 %v344_v11, %v312_v16  ;;  %v281_v30 = vmul.f32 %v587_v0, %v246_v13 }
  0x28   : > { %435 = vst [vmem:[%s637_s30 + $0x88] sm:$0xff] %v403_v8  ;;  %v407_v25 = vmax.f32 %v375_v15, 0.0  ;;  %v377_v27 = vadd.f32 %v345_v12, %v313_v17  ;;  %v314_v31 = vadd.f32 %v606_v1, %v279_v22  ;;  %v282_v34 = vmul.f32 %v587_v0, %v247_v18 }
  0x29   : > { %436 = vst [vmem:[%s637_s30 + $0x90] sm:$0xff] %v404_v14  ;;  %v315_v32 = vadd.f32 %v606_v1, %v280_v23  ;;  %v283_v35 = vmul.f32 %v587_v0, %v248_v19  ;;  %v408_v38 = vmax.f32 %v376_v26, 0.0  ;;  %v316_v40 = vadd.f32 %v606_v1, %v281_v30 }
  0x2a   : > { %437 = vst [vmem:[%s637_s30 + $0x98] sm:$0xff] %v405_v20  ;;  %v409_v39 = vmax.f32 %v377_v27, 0.0  ;;  %v284_v43 = vmul.f32 %v587_v0, %v249_v24  ;;  %v378_v44 = vadd.f32 %v346_v28, %v314_v31  ;;  %v317_v46 = vadd.f32 %v606_v1, %v282_v34 }
  0x2b   : > { %438 = vst [vmem:[%s637_s30 + $0xa0] sm:$0xff] %v406_v21  ;;  %v379_v45 = vadd.f32 %v347_v29, %v315_v32  ;;  %v318_v47 = vadd.f32 %v606_v1, %v283_v35  ;;  %v380_v49 = vadd.f32 %v348_v33, %v316_v40  ;;  %v285_v51 = vmul.f32 %v587_v0, %v250_v36 }
  0x2c   : > { %439 = vst [vmem:[%s637_s30 + $0xa8] sm:$0xff] %v407_v25  ;;  %v319_v50 = vadd.f32 %v606_v1, %v284_v43  ;;  %v286_v52 = vmul.f32 %v587_v0, %v251_v37  ;;  %v410_v53 = vmax.f32 %v378_v44, 0.0  ;;  %v381_v55 = vadd.f32 %v349_v41, %v317_v46 }
  0x2d   : > { %440 = vst [vmem:[%s637_s30 + $0xb0] sm:$0xff] %v408_v38  ;;  %v411_v54 = vmax.f32 %v379_v45, 0.0  ;;  %v382_v56 = vadd.f32 %v350_v42, %v318_v47  ;;  %v412_v59 = vmax.f32 %v380_v49, 0.0  ;;  %v320_v61 = vadd.f32 %v606_v1, %v285_v51 }
  0x2e   : > { %441 = vst [vmem:[%s637_s30 + $0xb8] sm:$0xff] %v409_v39  ;;  %v383_v60 = vadd.f32 %v351_v48, %v319_v50  ;;  %v321_v0 = vadd.f32 %v606_v1, %v286_v52  ;;  %v413_v62 = vmax.f32 %v381_v55, 0.0 }
  0x2f   : > { %442 = vst [vmem:[%s637_s30 + $0xc0] sm:$0xff] %v410_v53  ;;  %v414_v63 = vmax.f32 %v382_v56, 0.0  ;;  %v384_v3 = vadd.f32 %v352_v57, %v320_v61 }
  0x30   : > { %443 = vst [vmem:[%s637_s30 + $0xc8] sm:$0xff] %v411_v54  ;;  %v415_v2 = vmax.f32 %v383_v60, 0.0  ;;  %v385_v4 = vadd.f32 %v353_v58, %v321_v0 }
  0x31   : > { %444 = vst [vmem:[%s637_s30 + $0xd0] sm:$0xff] %v412_v59  ;;  %v416_v5 = vmax.f32 %v384_v3, 0.0 }
  0x32   : > { %445 = vst [vmem:[%s637_s30 + $0xd8] sm:$0xff] %v413_v62  ;;  %v417_v6 = vmax.f32 %v385_v4, 0.0 }
  0x33   : > { %446 = vst [vmem:[%s637_s30 + $0xe0] sm:$0xff] %v414_v63 }
  0x34   : > { %447 = vst [vmem:[%s637_s30 + $0xe8] sm:$0xff] %v415_v2 }
  0x35   : > { %448 = vst [vmem:[%s637_s30 + $0xf0] sm:$0xff] %v416_v5 }
  0x36   : > { %449 = vst [vmem:[%s637_s30 + $0xf8] sm:$0xff] %v417_v6 }
  0x37 PF: > { %s14_s15 = sadd.s32 1, %s549_s15  }
  0x38   : > { %p11_p4 = scmp.ge.s32.totalorder %s14_s15, 4  }
  0x3a   :  { %13 = sbr.rel (!%p11_p4) target bundleno = 1 (0x1), region = 69 }

// kernel: basic_block.3
= control target key start
LH: loop header
LB: loop body
LE: loop exit
PB: predicated region body
PF: predicated region fallthrough
CT: control target
= control target key end

     0   :  { %s4886_s12 = smov 0   ;;  %s5902_s0 = inlined_call_operand.vmem [shape: bf16[2,18,18,128], index: 0, kind: input, shape index: {}]   ;;  %s5903_s1 = inlined_call_operand.vmem [shape: bf16[1152,128], index: 1, kind: input, shape index: {}]   ;;  %s5904_s2 = inlined_call_operand.vmem [shape: f32[2,16,16,128], index: 2, kind: output, shape index: {0}]   ;;  %s5905_s3 = inlined_call_operand.vmem [shape: f32[2,2,128], index: 3, kind: output, shape index: {1}]  }
   0x1 LB: > { %s3714_s13 = sadd.s32 4294967295, %s4864_s12   ;;  %p3718_p0 = scmp.ge.s32.totalorder %s4864_s12, 1  ;;  %s4864_s12 = sphi %s4886_s12, %s14_s12  }
   0x2   : > { %p140_p1 = scmp.lt.s32.totalorder %s4864_s12, 3 }
   0x4   : > { %p141_p2 = pnand %p3718_p0, %p140_p1 }
   0x6   : > { %144 = sbr.rel (%p141_p2) target bundleno = 781 (0x30d), region = 28 }
   0xb   : > { %v4759_v0 = vld [vmem:[%s5903_s1 + $0x38] sm:$0xff]  ;;  %p168_p3 = scmp.lt.s32.totalorder %s3714_s13, 1  ;;  %v4758_v1 = vld [vmem:[%s5903_s1 + $0x30] sm:$0xff]  ;;  %v4757_v2 = vld [vmem:[%s5903_s1 + $0x28] sm:$0xff]  ;;  %vm268_vm0 = vsmask.f32 3328 }
   0xc   : > { %4824 = vmatpush.bf16.msra.mxu1 %v4759_v0  ;;  %4825 = vmatpush.bf16.msra.mxu2 %v4759_v0  ;;  %v4756_v5 = vld [vmem:[%s5903_s1 + $0x20] sm:$0xff]  ;;  %v4755_v8 = vld [vmem:[%s5903_s1 + $0x18] sm:$0xff]  ;;  %v4754_v10 = vld [vmem:[%s5903_s1 + $0x10] sm:$0xff]  ;;  %vm269_vm1 = vsmask.f32 7440  ;;  %vm767_vm3 = vcmask 1042432  }
   0xd   : > { %s5923_s13 = smov (!%p168_p3, %s3714_s13), 1  ;;  %4826 = vmatpush.bf16.msra.mxu3 %v4759_v0  ;;  %2686 = vmatpush.bf16.msra.mxu0 %v4759_v0  ;;  %v4753_v12 = vld [vmem:[%s5903_s1 + $0x8] sm:$0xff]  ;;  %v4752_v15 = vld [vmem:[%s5903_s1] sm:$0xff]  ;;  %v4775_v24 = vld [vmem:[%s5903_s1 + $0xb8] sm:$0xff]  ;;  %vm768_vm4 = vcmask 1046532   ;;  %vm3625_vm6 = vcmask 1040384  }
   0xe   : > { %s4848_s18 = smul.u32 216, %s5923_s13  ;;  %v4783_v25 = vld [vmem:[%s5903_s1 + $0xf8] sm:$0xff]  ;;  %v4774_v32 = vld [vmem:[%s5903_s1 + $0xb0] sm:$0xff]  ;;  %v4773_v40 = vld [vmem:[%s5903_s1 + $0xa8] sm:$0xff]  ;;  %s4607_s17 = sshll.u32 %s5923_s13, 8 }
   0xf   : > { %v4767_v29 = vld [vmem:[%s5903_s1 + $0x78] sm:$0xff]  ;;  %v4782_v33 = vld [vmem:[%s5903_s1 + $0xf0] sm:$0xff]  ;;  %v4781_v41 = vld [vmem:[%s5903_s1 + $0xe8] sm:$0xff]  ;;  %s5812_s20 = scalar_lea.vmem %s5904_s2, %s4607_s17 }
  0x10   : > { %4827 = vmatpush.bf16.msra.mxu1 %v4758_v1  ;;  %4828 = vmatpush.bf16.msra.mxu2 %v4758_v1  ;;  %s4909_s23 = scalar_lea.vmem %s5902_s0, %s4848_s18  ;;  %v4791_v30 = vld [vmem:[%s5903_s1 + $0x138] sm:$0xff]  ;;  %v4766_v37 = vld [vmem:[%s5903_s1 + $0x70] sm:$0xff]  ;;  %v4765_v44 = vld [vmem:[%s5903_s1 + $0x68] sm:$0xff] }
  0x11   : > { %4829 = vmatpush.bf16.msra.mxu3 %v4758_v1  ;;  %2687 = vmatpush.bf16.msra.mxu0 %v4758_v1  ;;  %v4912_v3 = vld [vmem:[%s4909_s23 + $0x30] sm:$0xf]  ;;  %v4915_v4 = vld [vmem:[%s4909_s23 + $0x34] sm:$0xf]  ;;  %v4925_v6 = vld [vmem:[%s4909_s23 + $0x60] sm:$0xf] }
  0x12   : > { %244 = vst [vmem:[#allocation2 + $0x120] sm:$0xf] %v4912_v3  ;;  %v4929_v7 = vld [vmem:[%s4909_s23 + $0x64] sm:$0xf]  ;;  %v4940_v9 = vld [vmem:[%s4909_s23 + $0x90] sm:$0xf]  ;;  %vm5237_vm2 = vmor %vm268_vm0, %vm269_vm1 }
  0x13   : > { %245 = vst [vmem:[#allocation2 + $0x144] sm:$0xf] %v4915_v4  ;;  %v4947_v11 = vld [vmem:[%s4909_s23 + $0x94] sm:$0xf]  ;;  %v4958_v13 = vld [vmem:[%s4909_s23] sm:$0xf]  ;;  %vm5258_vm5 = vmor %vm767_vm3, %vm768_vm4 }
  0x14   : > { %4830 = vmatpush.bf16.msra.mxu1 %v4757_v2  ;;  %4831 = vmatpush.bf16.msra.mxu2 %v4757_v2  ;;  %952 = vst [vmem:[#allocation2 + $0xe4] sm:$0xf] %v4912_v3  ;;  %v4961_v14 = vld [vmem:[%s4909_s23 + $0x4] sm:$0xf]  ;;  %v4968_v16 = vld [vmem:[%s4909_s23 + $0x3c] sm:$0xf] }
  0x15   : > { %4832 = vmatpush.bf16.msra.mxu3 %v4757_v2  ;;  %2688 = vmatpush.bf16.msra.mxu0 %v4757_v2  ;;  %953 = vst [vmem:[#allocation2 + $0x108] sm:$0xf] %v4915_v4  ;;  %v4971_v17 = vld [vmem:[%s4909_s23 + $0x40] sm:$0xf]  ;;  %v4993_v31 = vld [vmem:[%s4909_s23 + $0x6c] sm:$0xf] }
  0x16   : > { %1084 = vst [vmem:[#allocation2 + $0xa8] sm:$0xf] %v4912_v3  ;;  %v5003_v34 = vld [vmem:[%s4909_s23 + $0x70] sm:$0xf]  ;;  %v5023_v42 = vld [vmem:[%s4909_s23 + $0x9c] sm:$0xf] }
  0x17   : > { %1085 = vst [vmem:[#allocation2 + $0xcc] sm:$0xf] %v4915_v4  ;;  %v4790_v39 = vld [vmem:[%s5903_s1 + $0x130] sm:$0xff]  ;;  %v5027_v43 = vld [vmem:[%s4909_s23 + $0xa0] sm:$0xf]  ;;  %v4789_v45 = vld [vmem:[%s5903_s1 + $0x128] sm:$0xff] }
  0x18   : > { %4833 = vmatpush.bf16.msra.mxu1 %v4756_v5  ;;  %4834 = vmatpush.bf16.msra.mxu2 %v4756_v5  ;;  %252 = vst [vmem:[#allocation2 + $0x240] sm:$0xf] %v4925_v6  ;;  %v4772_v46 = vld [vmem:[%s5903_s1 + $0xa0] sm:$0xff]  ;;  %v5050_v53 = vld [vmem:[%s4909_s23 + $0xc] sm:$0xf]  ;;  %v4771_v55 = vld [vmem:[%s5903_s1 + $0x98] sm:$0xff] }
  0x19   : > { %4835 = vmatpush.bf16.msra.mxu3 %v4756_v5  ;;  %2689 = vmatpush.bf16.msra.mxu0 %v4756_v5  ;;  %253 = vst [vmem:[#allocation2 + $0x264] sm:$0xf] %v4929_v7  ;;  %v3887_v18 = vld [vmem:[#allocation2 + $0x120] sm:$0xf]  ;;  %v5054_v54 = vld [vmem:[%s4909_s23 + $0x10] sm:$0xf] }
  0x1a   : > { %960 = vst [vmem:[#allocation2 + $0x204] sm:$0xf] %v4925_v6  ;;  %v4648_v19 = vld [vmem:[#allocation2 + $0x140] sm:$0xf0]  ;;  %v5062_v58 = vld [vmem:[%s4909_s23 + $0x48] sm:$0xf] }
  0x1b   : > { %961 = vst [vmem:[#allocation2 + $0x228] sm:$0xf] %v4929_v7  ;;  %v3888_v26 = vor.u32 %v4648_v19, %v3887_v18  ;;  %v4780_v47 = vld [vmem:[%s5903_s1 + $0xe0] sm:$0xff]  ;;  %v5065_v59 = vld [vmem:[%s4909_s23 + $0x4c] sm:$0xf]  ;;  %v4779_v61 = vld [vmem:[%s5903_s1 + $0xd8] sm:$0xff] }
  0x1c   : > { %4836 = vmatpush.bf16.msra.mxu1 %v4755_v8  ;;  %4837 = vmatpush.bf16.msra.mxu2 %v4755_v8  ;;  %1092 = vst [vmem:[#allocation2 + $0x1c8] sm:$0xf] %v4925_v6  ;;  %v4764_v48 = vld [vmem:[%s5903_s1 + $0x60] sm:$0xff]  ;;  %v4763_v0 = vld [vmem:[%s5903_s1 + $0x58] sm:$0xff]  ;;  %v4770_v1 = vld [vmem:[%s5903_s1 + $0x90] sm:$0xff] }
  0x1d   : > { %4838 = vmatpush.bf16.msra.mxu3 %v4755_v8  ;;  %2690 = vmatpush.bf16.msra.mxu0 %v4755_v8  ;;  %1093 = vst [vmem:[#allocation2 + $0x1ec] sm:$0xf] %v4929_v7  ;;  %v4788_v62 = vld [vmem:[%s5903_s1 + $0x120] sm:$0xff]  ;;  %v4778_v5 = vld [vmem:[%s5903_s1 + $0xd0] sm:$0xff]  ;;  %v4787_v8 = vld [vmem:[%s5903_s1 + $0x118] sm:$0xff] }
  0x1e   : > { %260 = vst [vmem:[#allocation2 + $0x360] sm:$0xf] %v4940_v9  ;;  %v5100_v19 = vld [vmem:[%s4909_s23 + $0x7c] sm:$0xf] }
  0x1f   : > { %261 = vst [vmem:[#allocation2 + $0x384] sm:$0xf] %v4947_v11  ;;  %v4031_v20 = vld [vmem:[#allocation2 + $0x240] sm:$0xf] }
  0x20   : > { %4839 = vmatpush.bf16.msra.mxu1 %v4754_v10  ;;  %4840 = vmatpush.bf16.msra.mxu2 %v4754_v10  ;;  %968 = vst [vmem:[#allocation2 + $0x324] sm:$0xf] %v4940_v9  ;;  %v4684_v21 = vld [vmem:[#allocation2 + $0x260] sm:$0xf0] }
  0x21   : > { %4841 = vmatpush.bf16.msra.mxu3 %v4754_v10  ;;  %2691 = vmatpush.bf16.msra.mxu0 %v4754_v10  ;;  %969 = vst [vmem:[#allocation2 + $0x348] sm:$0xf] %v4947_v11  ;;  %v4032_v27 = vor.u32 %v4684_v21, %v4031_v20  ;;  %v4762_v10 = vld [vmem:[%s5903_s1 + $0x50] sm:$0xff] }
  0x22   : > { %1100 = vst [vmem:[#allocation2 + $0x2e8] sm:$0xf] %v4940_v9 }
  0x23   : > { %1101 = vst [vmem:[#allocation2 + $0x30c] sm:$0xf] %v4947_v11 }
  0x24   : > { %4842 = vmatpush.bf16.msra.mxu1 %v4753_v12  ;;  %4843 = vmatpush.bf16.msra.mxu2 %v4753_v12  ;;  %236 = vst [vmem:[#allocation2] sm:$0xf] %v4958_v13 }
  0x25   : > { %4844 = vmatpush.bf16.msra.mxu3 %v4753_v12  ;;  %2692 = vmatpush.bf16.msra.mxu0 %v4753_v12  ;;  %v4175_v22 = vld [vmem:[#allocation2 + $0x360] sm:$0xf]  ;;  %237 = vst [vmem:[#allocation2 + $0x24] sm:$0xf] %v4961_v14 }
  0x26   : > { %v4720_v23 = vld [vmem:[#allocation2 + $0x380] sm:$0xf0]  ;;  %246 = vst [vmem:[#allocation2 + $0x168] sm:$0xf] %v4968_v16 }
  0x27   : > { %247 = vst [vmem:[#allocation2 + $0x18c] sm:$0xf] %v4971_v17  ;;  %v4176_v28 = vor.u32 %v4720_v23, %v4175_v22  ;;  %v5108_v23 = vld [vmem:[%s4909_s23 + $0xa8] sm:$0xf] }
  0x28   : > { %4845 = vmatpush.bf16.msra.mxu1 %v4752_v15  ;;  %4846 = vmatpush.bf16.msra.mxu2 %v4752_v15  ;;  %954 = vst [vmem:[#allocation2 + $0x12c] sm:$0xf] %v4968_v16 }
  0x29   : > { %4847 = vmatpush.bf16.msra.mxu3 %v4752_v15  ;;  %2693 = vmatpush.bf16.msra.mxu0 %v4752_v15  ;;  %955 = vst [vmem:[#allocation2 + $0x150] sm:$0xf] %v4971_v17  ;;  %v5096_v15 = vld [vmem:[%s4909_s23 + $0x78] sm:$0xf] }
  0x2a   : > { %1086 = vst [vmem:[#allocation2 + $0xf0] sm:$0xf] %v4968_v16 }
  0x2b   : > { %2714 = vmatmul.bf16.vlgmr.msra.gmra.mxu1 %v3888_v26  ;;  %2734 = vmatmul.bf16.vlgmr.msra.gmra.mxu2 %v4032_v27  ;;  %v3743_v35 = vld [vmem:[#allocation2] sm:$0xf]  ;;  %1087 = vst [vmem:[#allocation2 + $0x114] sm:$0xf] %v4971_v17 }
  0x2c   : > { %2864 = vmatpush.bf16.msrb.mxu2 %v4775_v24  ;;  %2754 = vmatmul.bf16.vlgmr.msra.gmra.mxu3 %v4176_v28  ;;  %v4612_v36 = vld [vmem:[#allocation2 + $0x20] sm:$0xf0]  ;;  %254 = vst [vmem:[#allocation2 + $0x288] sm:$0xf] %v4993_v31  ;;  %v5112_v24 = vld [vmem:[%s4909_s23 + $0xac] sm:$0xf] }
  0x2d   : > { %2953 = vmatpush.bf16.msrb.mxu3 %v4783_v25  ;;  %2775 = vmatpush.bf16.msrb.mxu1 %v4767_v29  ;;  %v3744_v38 = vor.u32 %v4612_v36, %v3743_v35  ;;  %255 = vst [vmem:[#allocation2 + $0x2ac] sm:$0xf] %v5003_v34  ;;  %v3923_v49 = vld [vmem:[#allocation2 + $0x168] sm:$0xf]  ;;  %v5120_v29 = vld [vmem:[%s4909_s23 + $0x18] sm:$0xf] }
  0x2e   : > { %3042 = vmatpush.bf16.msrb.mxu0 %v4791_v30  ;;  %962 = vst [vmem:[#allocation2 + $0x24c] sm:$0xf] %v4993_v31  ;;  %v4657_v50 = vld [vmem:[#allocation2 + $0x188] sm:$0xf0]  ;;  %v5134_v36 = vld [vmem:[%s4909_s23 + $0x54] sm:$0xf] }
  0x2f   : > { %2694 = vmatmul.bf16.vlgmr.msra.gmra.mxu0 %v3744_v38  ;;  %963 = vst [vmem:[#allocation2 + $0x270] sm:$0xf] %v5003_v34  ;;  %v3924_v56 = vor.u32 %v4657_v50, %v3923_v49  ;;  %v4769_v30 = vld [vmem:[%s5903_s1 + $0x88] sm:$0xff]  ;;  %v275_v49 = vshll.u32 %v4958_v13, 16 }
  0x30   : > { %2865 = vmatpush.bf16.msrb.mxu2 %v4774_v32  ;;  %1094 = vst [vmem:[#allocation2 + $0x210] sm:$0xf] %v4993_v31  ;;  %v5127_v32 = vld [vmem:[%s4909_s23 + $0x1c] sm:$0xf]  ;;  %v4777_v38 = vld [vmem:[%s5903_s1 + $0xc8] sm:$0xff] }
  0x31   : > { %2954 = vmatpush.bf16.msrb.mxu3 %v4782_v33  ;;  %2776 = vmatpush.bf16.msrb.mxu1 %v4766_v37  ;;  %1095 = vst [vmem:[#allocation2 + $0x234] sm:$0xf] %v5003_v34 }
  0x32   : > { %3043 = vmatpush.bf16.msrb.mxu0 %v4790_v39  ;;  %262 = vst [vmem:[#allocation2 + $0x3a8] sm:$0xf] %v5023_v42  ;;  %v4786_v39 = vld [vmem:[%s5903_s1 + $0x110] sm:$0xff] }
  0x33   : > { %263 = vst [vmem:[#allocation2 + $0x3cc] sm:$0xf] %v5027_v43  ;;  %v4067_v51 = vld [vmem:[#allocation2 + $0x288] sm:$0xf] }
  0x34   : > { %2866 = vmatpush.bf16.msrb.mxu2 %v4773_v40  ;;  %v4693_v52 = vld [vmem:[#allocation2 + $0x2a8] sm:$0xf0]  ;;  %970 = vst [vmem:[#allocation2 + $0x36c] sm:$0xf] %v5023_v42 }
  0x35   : > { %2955 = vmatpush.bf16.msrb.mxu3 %v4781_v41  ;;  %2777 = vmatpush.bf16.msrb.mxu1 %v4765_v44  ;;  %971 = vst [vmem:[#allocation2 + $0x390] sm:$0xf] %v5027_v43  ;;  %v4068_v57 = vor.u32 %v4693_v52, %v4067_v51  ;;  %v4761_v40 = vld [vmem:[%s5903_s1 + $0x48] sm:$0xff]  ;;  %v5148_v41 = vld [vmem:[%s4909_s23 + $0x58] sm:$0xf]  ;;  %v4768_v44 = vld [vmem:[%s5903_s1 + $0x80] sm:$0xff] }
  0x36   : > { %3044 = vmatpush.bf16.msrb.mxu0 %v4789_v45  ;;  %1102 = vst [vmem:[#allocation2 + $0x330] sm:$0xf] %v5023_v42  ;;  %v4785_v45 = vld [vmem:[%s5903_s1 + $0x108] sm:$0xff]  ;;  %v285_v51 = vshrl.u32 %v4961_v14, 16 }
  0x37   : > { %1103 = vst [vmem:[#allocation2 + $0x354] sm:$0xf] %v5027_v43 }
  0x38   : > { %2867 = vmatpush.bf16.msrb.mxu2 %v4772_v46  ;;  %238 = vst [vmem:[#allocation2 + $0x48] sm:$0xf] %v5050_v53  ;;  %v4776_v46 = vld [vmem:[%s5903_s1 + $0xc0] sm:$0xff] }
  0x39   : > { %2956 = vmatpush.bf16.msrb.mxu3 %v4780_v47  ;;  %2778 = vmatpush.bf16.msrb.mxu1 %v4764_v48  ;;  %v4211_v60 = vld [vmem:[#allocation2 + $0x3a8] sm:$0xf]  ;;  %239 = vst [vmem:[#allocation2 + $0x6c] sm:$0xf] %v5054_v54  ;;  %v4760_v47 = vld [vmem:[%s5903_s1 + $0x40] sm:$0xff]  ;;  %v272_v48 = vshrl.u32 %v4958_v13, 16 }
  0x3a   : > { %v4729_v63 = vld [vmem:[#allocation2 + $0x3c8] sm:$0xf0]  ;;  %946 = vst [vmem:[#allocation2 + $0xc] sm:$0xf] %v5050_v53  ;;  %3045 = vmatpush.bf16.msrb.mxu0 %v4788_v62 }
  0x3b   : > { %2719 = vmatmul.bf16.gmra.mxu1 %v3924_v56  ;;  %2739 = vmatmul.bf16.gmra.mxu2 %v4068_v57  ;;  %v4212_v2 = vor.u32 %v4729_v63, %v4211_v60  ;;  %947 = vst [vmem:[#allocation2 + $0x30] sm:$0xf] %v5054_v54  ;;  %v5172_v57 = vld [vmem:[%s4909_s23 + $0x84] sm:$0xf]  ;;  %v274_v62 = vrot.slane %v272_v48, 4  ;;  %v277_v63 = vrot.slane %v275_v49, 5 }
  0x3c   : > { %2868 = vmatpush.bf16.msrb.mxu2 %v4771_v55  ;;  %248 = vst [vmem:[#allocation2 + $0x1b0] sm:$0xf] %v5062_v58  ;;  %v281_v55 = vshll.u32 %v4961_v14, 16  ;;  %v4784_v60 = vld [vmem:[%s5903_s1 + $0x100] sm:$0xff]  ;;  %v4823_v48 = vld [vmem:[%s5903_s1 + $0x238] sm:$0xff] }
  0x3d   : > { %2957 = vmatpush.bf16.msrb.mxu3 %v4779_v61  ;;  %249 = vst [vmem:[#allocation2 + $0x1d4] sm:$0xf] %v5065_v59  ;;  %2779 = vmatpush.bf16.msrb.mxu1 %v4763_v0  ;;  %v5179_v61 = vld [vmem:[%s4909_s23 + $0x88] sm:$0xf]  ;;  %v287_v0 = vrot.slane %v285_v51, 4 }
  0x3e   : > { %2759 = vmatmul.bf16.gmra.mxu3 %v4212_v2  ;;  %956 = vst [vmem:[#allocation2 + $0x174] sm:$0xf] %v5062_v58  ;;  %3046 = vmatpush.bf16.msrb.mxu0 %v4787_v8  ;;  %v296_v2 = vshrl.u32 %v5050_v53, 16  ;;  %v5231_v51 = vld [vmem:[%s4909_s23 + $0x14] sm:$0x1] }
  0x3f   : > { %v3779_v12 = vld [vmem:[#allocation2 + $0x48] sm:$0xf]  ;;  %957 = vst [vmem:[#allocation2 + $0x198] sm:$0xf] %v5065_v59 }
  0x40   : > { %2869 = vmatpush.bf16.msrb.mxu2 %v4770_v1  ;;  %v4621_v18 = vld [vmem:[#allocation2 + $0x68] sm:$0xf0]  ;;  %1088 = vst [vmem:[#allocation2 + $0x138] sm:$0xf] %v5062_v58  ;;  %v5183_v1 = vrot.slane %v281_v55, 5 }
  0x41   : > { %2958 = vmatpush.bf16.msrb.mxu3 %v4778_v5  ;;  %v3780_v20 = vor.u32 %v4621_v18, %v3779_v12  ;;  %1089 = vst [vmem:[#allocation2 + $0x15c] sm:$0xf] %v5065_v59  ;;  %2780 = vmatpush.bf16.msrb.mxu1 %v4762_v10  ;;  %v299_v5 = vshll.u32 %v5050_v53, 16  ;;  %v4807_v10 = vld [vmem:[%s5903_s1 + $0x1b8] sm:$0xff]  ;;  %v305_v12 = vshll.u32 %v5054_v54, 16 }
  0x42   : > { %256 = vst [vmem:[#allocation2 + $0x2d0] sm:$0xf] %v5096_v15  ;;  %3047 = vmatpush.bf16.msrb.mxu0 %v4786_v39  ;;  %v5213_v39 = vld [vmem:[%s4909_s23 + $0x24] sm:$0xf] }
  0x43   : > { %2699 = vmatmul.bf16.gmra.mxu0 %v3780_v20  ;;  %257 = vst [vmem:[#allocation2 + $0x2f4] sm:$0xf] %v5100_v19  ;;  %v3959_v21 = vld [vmem:[#allocation2 + $0x1b0] sm:$0xf]  ;;  %v5194_v20 = vld [vmem:[%s4909_s23 + $0x8] sm:$0x1] }
  0x44   : > { %v4666_v22 = vld [vmem:[#allocation2 + $0x1d0] sm:$0xf0]  ;;  %964 = vst [vmem:[#allocation2 + $0x294] sm:$0xf] %v5096_v15  ;;  %2870 = vmatpush.bf16.msrb.mxu2 %v4769_v30  ;;  %v298_v30 = vrot.slane %v296_v2, 4  ;;  %v315_v2 = vshll.u32 %v5231_v51, 16 }
  0x45   : > { %965 = vst [vmem:[#allocation2 + $0x2b8] sm:$0xf] %v5100_v19  ;;  %v3960_v25 = vor.u32 %v4666_v22, %v3959_v21  ;;  %2959 = vmatpush.bf16.msrb.mxu3 %v4777_v38  ;;  %2781 = vmatpush.bf16.msrb.mxu1 %v4761_v40  ;;  %v5198_v22 = vld [vmem:[%s4909_s23 + $0xb4] sm:$0xf]  ;;  %v4815_v40 = vld [vmem:[%s5903_s1 + $0x1f8] sm:$0xff] }
  0x46   : > { %1096 = vst [vmem:[#allocation2 + $0x258] sm:$0xf] %v5096_v15  ;;  %3048 = vmatpush.bf16.msrb.mxu0 %v4785_v45 }
  0x47   : > { %1097 = vst [vmem:[#allocation2 + $0x27c] sm:$0xf] %v5100_v19 }
  0x48   : > { %264 = vst [vmem:[#allocation2 + $0x3f0] sm:$0xf] %v5108_v23  ;;  %2871 = vmatpush.bf16.msrb.mxu2 %v4768_v44  ;;  %v4799_v44 = vld [vmem:[%s5903_s1 + $0x178] sm:$0xff] }
  0x49   : > { %v4103_v26 = vld [vmem:[#allocation2 + $0x2d0] sm:$0xf]  ;;  %265 = vst [vmem:[#allocation2 + $0x414] sm:$0xf] %v5112_v24  ;;  %2960 = vmatpush.bf16.msrb.mxu3 %v4776_v46  ;;  %2782 = vmatpush.bf16.msrb.mxu1 %v4760_v47  ;;  %v5223_v46 = vld [vmem:[%s4909_s23 + $0x28] sm:$0xf] }
  0x4a   : > { %v4702_v27 = vld [vmem:[#allocation2 + $0x2f0] sm:$0xf0]  ;;  %972 = vst [vmem:[#allocation2 + $0x3b4] sm:$0xf] %v5108_v23  ;;  %3049 = vmatpush.bf16.msrb.mxu0 %v4784_v60 }
  0x4b   : > { %2724 = vmatmul.bf16.gmra.mxu1 %v3960_v25  ;;  %v4104_v28 = vor.u32 %v4702_v27, %v4103_v26  ;;  %973 = vst [vmem:[#allocation2 + $0x3d8] sm:$0xf] %v5112_v24  ;;  %v5202_v25 = vld [vmem:[%s4909_s23 + $0xb8] sm:$0xf]  ;;  %v309_v26 = vshrl.u32 %v5054_v54, 16  ;;  %v278_v27 = vor.u32 %v277_v63, %v274_v62  ;;  %v323_v63 = vshll.u32 %v5120_v29, 16 }
  0x4c   : > { %1104 = vst [vmem:[#allocation2 + $0x378] sm:$0xf] %v5108_v23  ;;  %3220 = vmatpush.bf16.msra.mxu2 %v4807_v10 }
  0x4d   : > { %2744 = vmatmul.bf16.gmra.mxu2 %v4104_v28  ;;  %1105 = vst [vmem:[#allocation2 + $0x39c] sm:$0xf] %v5112_v24  ;;  %v291_v28 = vshll.u32 %v5194_v20, 16  ;;  %v311_v47 = vrot.slane %v309_v26, 4  ;;  %3309 = vmatpush.bf16.msra.mxu3 %v4815_v40 }
  0x4e   : > { %240 = vst [vmem:[#allocation2 + $0x90] sm:$0xf] %v5120_v29  ;;  %3131 = vmatpush.bf16.msra.mxu1 %v4799_v44  ;;  %3398 = vmatpush.bf16.msra.mxu0 %v4823_v48  ;;  %v317_v44 = vrot.slane %v315_v2, 5  ;;  %v5270_v48 = vld [vmem:[%s4909_s23 + $0x20] sm:$0x1] }
  0x4f   : > { %v4247_v33 = vld [vmem:[#allocation2 + $0x3f0] sm:$0xf]  ;;  %241 = vst [vmem:[#allocation2 + $0xb4] sm:$0xf] %v5127_v32  ;;  %v339_v2 = vshll.u32 %v5270_v48, 16 }
  0x50   : > { %v4738_v35 = vld [vmem:[#allocation2 + $0x410] sm:$0xf0]  ;;  %948 = vst [vmem:[#allocation2 + $0x54] sm:$0xf] %v5120_v29 }
  0x51   : > { %v4248_v37 = vor.u32 %v4738_v35, %v4247_v33  ;;  %949 = vst [vmem:[#allocation2 + $0x78] sm:$0xf] %v5127_v32  ;;  %v288_v33 = vor.u32 %v287_v0, %v5183_v1  ;;  %v301_v35 = vrot.slane %v299_v5, 5  ;;  %v329_v5 = vshll.u32 %v5127_v32, 16 }
  0x52   : > { %1080 = vst [vmem:[#allocation2 + $0x18] sm:$0xf] %v5120_v29 }
  0x53   : > { %2764 = vmatmul.bf16.gmra.mxu3 %v4248_v37  ;;  %1081 = vst [vmem:[#allocation2 + $0x3c] sm:$0xf] %v5127_v32  ;;  %v5209_v37 = vrot.slane %v305_v12, 5  ;;  %v289_v55 = vrot.slane %v288_v33, 4  ;;  %v302_v60 = vor.u32 %v301_v35, %v298_v30  ;;  %v3723_v12 = vrot.slane %v4958_v13, 9 }
  0x54   : > { %250 = vst [vmem:[#allocation2 + $0x1f8] sm:$0xf] %v5134_v36  ;;  %v775_v13 = vrot.slane %v5194_v20, 5  ;;  %v779_v35 = vrot.slane %v5054_v54, 5 }
  0x55   : > { %v3815_v50 = vld [vmem:[#allocation2 + $0x90] sm:$0xf]  ;;  %251 = vst [vmem:[#allocation2 + $0x21c] sm:$0xf] %v5148_v41  ;;  %v312_v0 = vor.u32 %v311_v47, %v5209_v37  ;;  %v303_v30 = vrot.slane %v302_v60, 4 }
  0x56   : > { %v4630_v52 = vld [vmem:[#allocation2 + $0xb0] sm:$0xf0]  ;;  %958 = vst [vmem:[#allocation2 + $0x1bc] sm:$0xf] %v5134_v36 }
  0x57   : > { %v3816_v56 = vor.u32 %v4630_v52, %v3815_v50  ;;  %959 = vst [vmem:[#allocation2 + $0x1e0] sm:$0xf] %v5148_v41  ;;  %v772_v50 = vrot.slane %v4961_v14, 5  ;;  %v279_v52 = vrot.slane %v278_v27, 4  ;;  %v320_v14 = vshrl.u32 %v5120_v29, 16 }
  0x58   : > { %1090 = vst [vmem:[#allocation2 + $0x180] sm:$0xf] %v5134_v36  ;;  %v313_v40 = vrot.slane %v312_v0, 4 }
  0x59   : > { %2704 = vmatmul.bf16.gmra.mxu0 %v3816_v56  ;;  %1091 = vst [vmem:[#allocation2 + $0x1a4] sm:$0xf] %v5148_v41  ;;  %v293_v56 = vrot.slane %v291_v28, 5  ;;  %v284_v26 = vsel %vm5237_vm2, %v279_v52, %v5183_v1  ;;  %v325_v1 = vrot.slane %v323_v63, 5  ;;  %v773_v20 = vsel %vm5258_vm5, %v3723_v12, %v772_v50 }
  0x5a   : > { %258 = vst [vmem:[#allocation2 + $0x318] sm:$0xf] %v5172_v57  ;;  %v308_v52 = vsel %vm5237_vm2, %v303_v30, %v5209_v37  ;;  %v782_v63 = vrot.slane %v5231_v51, 5  ;;  %v347_v37 = vshll.u32 %v5213_v39, 16  ;;  %v353_v12 = vshll.u32 %v5223_v46, 16 }
  0x5b   : > { %v3995_v8 = vld [vmem:[#allocation2 + $0x1f8] sm:$0xf]  ;;  %259 = vst [vmem:[#allocation2 + $0x33c] sm:$0xf] %v5179_v61  ;;  %v294_v27 = vsel %vm5237_vm2, %v289_v55, %v293_v56  ;;  %v3724_v55 = vrot.slane %v5050_v53, 9  ;;  %v781_v56 = vrot.slane %v779_v35, 4 }
  0x5c   : > { %v4675_v18 = vld [vmem:[#allocation2 + $0x218] sm:$0xf0]  ;;  %966 = vst [vmem:[#allocation2 + $0x2dc] sm:$0xf] %v5172_v57  ;;  %v357_v51 = vshrl.u32 %v5223_v46, 16 }
  0x5d   : > { %v3996_v21 = vor.u32 %v4675_v18, %v3995_v8  ;;  %967 = vst [vmem:[#allocation2 + $0x300] sm:$0xf] %v5179_v61  ;;  %v333_v8 = vshrl.u32 %v5127_v32, 16  ;;  %v774_v18 = vrot.slane %v772_v50, 4  ;;  %v318_v50 = vsel %vm5237_vm2, %v313_v40, %v317_v44 }
  0x5e   : > { %1098 = vst [vmem:[#allocation2 + $0x2a0] sm:$0xf] %v5172_v57  ;;  %v780_v53 = vsel %vm5258_vm5, %v3724_v55, %v779_v35  ;;  %v5296_v55 = vld [vmem:[%s4909_s23 + $0x2c] sm:$0x1] }
  0x5f   : > { %2729 = vmatmul.bf16.gmra.mxu1 %v3996_v21  ;;  %1099 = vst [vmem:[#allocation2 + $0x2c4] sm:$0xf] %v5179_v61  ;;  %v335_v47 = vrot.slane %v333_v8, 4  ;;  %v776_v54 = vsel %vm5258_vm5, %v774_v18, %v775_v13  ;;  %v344_v8 = vshrl.u32 %v5213_v39, 16  ;;  %v4609_v18 = vld [vmem:[#allocation2 + $0xc] sm:$0xf] }
  0x60   : > { %266 = vst [vmem:[#allocation2 + $0x438] sm:$0xf] %v5198_v22  ;;  %v341_v13 = vrot.slane %v339_v2, 5 }
  0x61   : > { %v4139_v38 = vld [vmem:[#allocation2 + $0x318] sm:$0xf]  ;;  %267 = vst [vmem:[#allocation2 + $0x45c] sm:$0xf] %v5202_v25  ;;  %v346_v35 = vrot.slane %v344_v8, 4 }
  0x62   : > { %v4711_v45 = vld [vmem:[#allocation2 + $0x338] sm:$0xf0]  ;;  %974 = vst [vmem:[#allocation2 + $0x3fc] sm:$0xf] %v5198_v22 }
  0x63   : > { %v4140_v49 = vor.u32 %v4711_v45, %v4139_v38  ;;  %975 = vst [vmem:[#allocation2 + $0x420] sm:$0xf] %v5202_v25  ;;  %v322_v38 = vrot.slane %v320_v14, 4  ;;  %v331_v45 = vrot.slane %v329_v5, 5 }
  0x64   : > { %1106 = vst [vmem:[#allocation2 + $0x3c0] sm:$0xf] %v5198_v22 }
  0x65   : > { %2749 = vmatmul.bf16.gmra.mxu2 %v4140_v49  ;;  %1107 = vst [vmem:[#allocation2 + $0x3e4] sm:$0xf] %v5202_v25  ;;  %v326_v60 = vor.u32 %v325_v1, %v322_v38  ;;  %v336_v0 = vor.u32 %v335_v47, %v331_v45  ;;  %v349_v1 = vrot.slane %v347_v37, 5 }
  0x66   : > { %242 = vst [vmem:[#allocation2 + $0xd8] sm:$0xf] %v5213_v39 }
  0x67   : > { %v4283_v10 = vld [vmem:[#allocation2 + $0x438] sm:$0xf]  ;;  %243 = vst [vmem:[#allocation2 + $0xfc] sm:$0xf] %v5223_v46 }
  0x68   : > { %v4747_v21 = vld [vmem:[#allocation2 + $0x458] sm:$0xf0]  ;;  %950 = vst [vmem:[#allocation2 + $0x9c] sm:$0xf] %v5213_v39 }
  0x69   : > { %v4284_v33 = vor.u32 %v4747_v21, %v4283_v10  ;;  %951 = vst [vmem:[#allocation2 + $0xc0] sm:$0xf] %v5223_v46  ;;  %v327_v10 = vrot.slane %v326_v60, 4  ;;  %v3753_v21 = vld [vmem:[#allocation2 + $0x2c] sm:$0xf0]  ;;  %v3725_v60 = vrot.slane %v5120_v29, 9 }
  0x6a   : > { %1082 = vst [vmem:[#allocation2 + $0x60] sm:$0xf] %v5213_v39  ;;  %v4806_v29 = vld [vmem:[%s5903_s1 + $0x1b0] sm:$0xff] }
  0x6b   : > { %2769 = vmatmul.bf16.gmra.mxu3 %v4284_v33  ;;  %1083 = vst [vmem:[#allocation2 + $0x84] sm:$0xf] %v5223_v46  ;;  %v786_v33 = vrot.slane %v5127_v32, 5  ;;  %v332_v47 = vsel %vm5237_vm2, %v327_v10, %v331_v45  ;;  %v350_v45 = vor.u32 %v349_v1, %v346_v35  ;;  %3221 = vmatpush.bf16.msra.mxu2 %v4806_v29  ;;  %v4814_v1 = vld [vmem:[%s5903_s1 + $0x1f0] sm:$0xff] }
  0x6c   : > { %687 = vst [vmem:[#allocation2 + $0x4] sm:$0xf] %v284_v26  ;;  %v783_v26 = vsel %vm5258_vm5, %v781_v56, %v782_v63  ;;  %v3756_v56 = vor.u32 %v4609_v18, %v3753_v21  ;;  %v371_v18 = vshll.u32 %v4912_v3, 16  ;;  %v377_v21 = vshll.u32 %v4915_v4, 16  ;;  %3310 = vmatpush.bf16.msra.mxu3 %v4814_v1 }
  0x6d   : > { %v3851_v49 = vld [vmem:[#allocation2 + $0xd8] sm:$0xf]  ;;  %688 = vst [vmem:[#allocation2 + $0x28] sm:$0xf] %v294_v27  ;;  %v337_v27 = vrot.slane %v336_v0, 4  ;;  %v363_v0 = vshll.u32 %v5296_v55, 16  ;;  %v787_v8 = vsel %vm5258_vm5, %v3725_v60, %v786_v33 }
  0x6e   : > { %v4639_v14 = vld [vmem:[#allocation2 + $0xf8] sm:$0xf0]  ;;  %914 = vst [vmem:[#allocation2 + $0x8] sm:$0xf] %v773_v20  ;;  %v355_v20 = vrot.slane %v353_v12, 5 }
  0x6f   : > { %v3852_v5 = vor.u32 %v4639_v14, %v3851_v49  ;;  %915 = vst [vmem:[#allocation2 + $0x2c] sm:$0xf] %v776_v54  ;;  %v359_v54 = vrot.slane %v357_v51, 4  ;;  %v788_v14 = vrot.slane %v786_v33, 4  ;;  %v365_v12 = vrot.slane %v363_v0, 5 }
  0x70   : > { %1004 = vst [vmem:[#allocation2 + $0x10] sm:$0xf] %v308_v52  ;;  %v368_v51 = vshrl.u32 %v4912_v3, 16  ;;  %v5328_v60 = vld [vmem:[%s4909_s23 + $0x38] sm:$0x1] }
  0x71   : > { %2709 = vmatmul.bf16.gmra.mxu0 %v3852_v5  ;;  %1005 = vst [vmem:[#allocation2 + $0x34] sm:$0xf] %v318_v50  ;;  %v360_v63 = vor.u32 %v359_v54, %v355_v20  ;;  %v4618_v54 = vld [vmem:[#allocation2 + $0x54] sm:$0xf] }
  0x72   : > { %689 = vst [vmem:[#allocation2 + $0x4c] sm:$0xf] %v308_v52  ;;  %v342_v52 = vsel %vm5237_vm2, %v337_v27, %v341_v13  ;;  %v370_v33 = vrot.slane %v368_v51, 4 }
  0x73   : > { %v4608_v30 = vld [vmem:[#allocation2 + $0x4] sm:$0xf]  ;;  %690 = vst [vmem:[#allocation2 + $0x70] sm:$0xf] %v318_v50  ;;  %v789_v50 = vrot.slane %v5270_v48, 5  ;;  %v361_v10 = vrot.slane %v360_v63, 4 }
  0x74   : > { %v3745_v38 = vld [vmem:[#allocation2 + $0x24] sm:$0xf0]  ;;  %916 = vst [vmem:[#allocation2 + $0x50] sm:$0xf] %v780_v53 }
  0x75   : > { %v3748_v40 = vor.u32 %v4608_v30, %v3745_v38  ;;  %v3751_v44 = vld [vmem:[#allocation2 + $0x8] sm:$0xf]  ;;  %917 = vst [vmem:[#allocation2 + $0x74] sm:$0xf] %v783_v26  ;;  %v790_v48 = vsel %vm5258_vm5, %v788_v14, %v789_v50  ;;  %v793_v30 = vrot.slane %v5223_v46, 5  ;;  %v381_v38 = vshrl.u32 %v4915_v4, 16 }
  0x76   : > { %v4613_v49 = vld [vmem:[#allocation2 + $0x28] sm:$0xf0]  ;;  %1048 = vst [vmem:[#allocation2 + $0x14] sm:$0xf] %v780_v53  ;;  %v351_v53 = vrot.slane %v350_v45, 4  ;;  %v4822_v46 = vld [vmem:[%s5903_s1 + $0x230] sm:$0xff] }
  0x77   : > { %2783 = vmatmul.bf16.vlgmr.msrb.gmra.mxu1 %v3748_v40  ;;  %v3752_v32 = vor.u32 %v4613_v49, %v3751_v44  ;;  %1049 = vst [vmem:[#allocation2 + $0x38] sm:$0xf] %v783_v26  ;;  %v3759_v2 = vld [vmem:[#allocation2 + $0x10] sm:$0xf]  ;;  %v373_v44 = vrot.slane %v371_v18, 5  ;;  %3399 = vmatpush.bf16.msra.mxu0 %v4822_v46  ;;  %v795_v14 = vrot.slane %v793_v30, 4 }
  0x78   : > { %1006 = vst [vmem:[#allocation2 + $0x58] sm:$0xf] %v332_v47  ;;  %v4614_v5 = vld [vmem:[#allocation2 + $0x30] sm:$0xf0]  ;;  %v356_v35 = vsel %vm5237_vm2, %v351_v53, %v355_v20  ;;  %v3789_v49 = vld [vmem:[#allocation2 + $0x74] sm:$0xf0]  ;;  %v366_v20 = vsel %vm5237_vm2, %v361_v10, %v365_v12 }
  0x79   : > { %2872 = vmatmul.bf16.vlgmr.msrb.gmra.mxu2 %v3752_v32  ;;  %1007 = vst [vmem:[#allocation2 + $0x7c] sm:$0xf] %v342_v52  ;;  %v3760_v37 = vor.u32 %v4614_v5, %v3759_v2  ;;  %v4617_v26 = vld [vmem:[#allocation2 + $0x4c] sm:$0xf]  ;;  %v4798_v40 = vld [vmem:[%s5903_s1 + $0x170] sm:$0xff]  ;;  %v796_v50 = vrot.slane %v5296_v55, 5  ;;  %v374_v0 = vor.u32 %v373_v44, %v370_v33 }
  0x7a   : > { %1138 = vst [vmem:[#allocation2 + $0x1c] sm:$0xf] %v332_v47  ;;  %v3781_v27 = vld [vmem:[#allocation2 + $0x6c] sm:$0xf0]  ;;  %3132 = vmatpush.bf16.msra.mxu1 %v4798_v40  ;;  %v383_v45 = vrot.slane %v381_v38, 4  ;;  %v387_v5 = vshll.u32 %v5328_v60, 16 }
  0x7b   : > { %2961 = vmatmul.bf16.vlgmr.msrb.gmra.mxu3 %v3756_v56  ;;  %1139 = vst [vmem:[#allocation2 + $0x40] sm:$0xf] %v342_v52  ;;  %v3787_v13 = vld [vmem:[#allocation2 + $0x50] sm:$0xf]  ;;  %v3784_v32 = vor.u32 %v4617_v26, %v3781_v27  ;;  %v3726_v56 = vrot.slane %v5213_v39, 9  ;;  %v797_v29 = vsel %vm5258_vm5, %v795_v14, %v796_v50  ;;  %v392_v26 = vshrl.u32 %v4968_v16, 16 }
  0x7c   : > { %691 = vst [vmem:[#allocation2 + $0x94] sm:$0xf] %v332_v47  ;;  %v4622_v47 = vld [vmem:[#allocation2 + $0x70] sm:$0xf0]  ;;  %v389_v10 = vrot.slane %v387_v5, 5  ;;  %v395_v27 = vshll.u32 %v4968_v16, 16 }
  0x7d   : > { %692 = vst [vmem:[#allocation2 + $0xb8] sm:$0xf] %v342_v52  ;;  %v379_v52 = vrot.slane %v377_v21, 5  ;;  %v3788_v63 = vor.u32 %v4622_v47, %v3787_v13  ;;  %v794_v39 = vsel %vm5258_vm5, %v3726_v56, %v793_v30  ;;  %v401_v30 = vshll.u32 %v4971_v17, 16  ;;  %v5346_v46 = vld [vmem:[%s4909_s23 + $0x44] sm:$0x1] }
  0x7e   : > { %918 = vst [vmem:[#allocation2 + $0x98] sm:$0xf] %v787_v8  ;;  %v405_v33 = vshrl.u32 %v4971_v17, 16  ;;  %v800_v38 = vrot.slane %v4915_v4, 5  ;;  %v397_v1 = vrot.slane %v395_v27, 5 }
  0x7f   : > { %919 = vst [vmem:[#allocation2 + $0xbc] sm:$0xf] %v790_v48  ;;  %v384_v2 = vor.u32 %v383_v45, %v379_v52  ;;  %v3795_v55 = vld [vmem:[#allocation2 + $0x58] sm:$0xf]  ;;  %v4627_v47 = vld [vmem:[#allocation2 + $0x9c] sm:$0xf] }
  0x80   : > { %1182 = vst [vmem:[#allocation2 + $0x20] sm:$0xf] %v787_v8  ;;  %v403_v56 = vrot.slane %v401_v30, 5  ;;  %v407_v4 = vrot.slane %v405_v33, 4  ;;  %v3825_v14 = vld [vmem:[#allocation2 + $0xbc] sm:$0xf0] }
  0x81   : > { %3050 = vmatmul.bf16.vlgmr.msrb.gmra.mxu0 %v3760_v37  ;;  %1183 = vst [vmem:[#allocation2 + $0x44] sm:$0xf] %v790_v48  ;;  %v4623_v37 = vld [vmem:[#allocation2 + $0x78] sm:$0xf0]  ;;  %v385_v53 = vrot.slane %v384_v2, 4  ;;  %v411_v45 = vshll.u32 %v5346_v46, 16 }
  0x82   : > { %1050 = vst [vmem:[#allocation2 + $0x5c] sm:$0xf] %v787_v8  ;;  %v3792_v8 = vor.u32 %v4618_v54, %v3789_v49  ;;  %v3796_v12 = vor.u32 %v4623_v37, %v3795_v55  ;;  %v3727_v54 = vrot.slane %v4912_v3, 9  ;;  %v802_v49 = vrot.slane %v800_v38, 4  ;;  %v4805_v37 = vld [vmem:[%s5903_s1 + $0x1a8] sm:$0xff] }
  0x83   : > { %1051 = vst [vmem:[#allocation2 + $0x80] sm:$0xf] %v790_v48  ;;  %v375_v48 = vrot.slane %v374_v0, 4  ;;  %v4626_v18 = vld [vmem:[#allocation2 + $0x94] sm:$0xf]  ;;  %v390_v21 = vsel %vm5237_vm2, %v385_v53, %v389_v10  ;;  %v408_v2 = vor.u32 %v407_v4, %v403_v56  ;;  %v413_v5 = vrot.slane %v411_v45, 5  ;;  %3222 = vmatpush.bf16.msra.mxu2 %v4805_v37 }
  0x84   : > { %1008 = vst [vmem:[#allocation2 + $0xa0] sm:$0xf] %v356_v35  ;;  %v3817_v13 = vld [vmem:[#allocation2 + $0xb4] sm:$0xf0]  ;;  %v801_v50 = vsel %vm5258_vm5, %v3727_v54, %v800_v38  ;;  %v807_v30 = vrot.slane %v4971_v17, 5  ;;  %v810_v54 = vrot.slane %v5346_v46, 5 }
  0x85   : > { %1009 = vst [vmem:[#allocation2 + $0xc4] sm:$0xf] %v366_v20  ;;  %v380_v51 = vsel %vm5237_vm2, %v375_v48, %v379_v52  ;;  %v3823_v40 = vld [vmem:[#allocation2 + $0x98] sm:$0xf]  ;;  %v3820_v52 = vor.u32 %v4626_v18, %v3817_v13  ;;  %v4636_v4 = vld [vmem:[#allocation2 + $0xe4] sm:$0xf] }
  0x86   : > { %693 = vst [vmem:[#allocation2 + $0xdc] sm:$0xf] %v356_v35  ;;  %v4631_v44 = vld [vmem:[#allocation2 + $0xb8] sm:$0xf0]  ;;  %v809_v17 = vrot.slane %v807_v30, 4 }
  0x87   : > { %2788 = vmatmul.bf16.gmra.mxu1 %v3784_v32  ;;  %694 = vst [vmem:[#allocation2 + $0x100] sm:$0xf] %v366_v20  ;;  %v803_v32 = vrot.slane %v5328_v60, 5  ;;  %v3828_v60 = vor.u32 %v4627_v47, %v3825_v14  ;;  %v3728_v47 = vrot.slane %v4968_v16, 9  ;;  %v3861_v14 = vld [vmem:[#allocation2 + $0x104] sm:$0xf0] }
  0x88   : > { %1140 = vst [vmem:[#allocation2 + $0x64] sm:$0xf] %v356_v35  ;;  %v394_v35 = vrot.slane %v392_v26, 4  ;;  %v429_v26 = vshrl.u32 %v5065_v59, 16  ;;  %v811_v16 = vsel %vm5258_vm5, %v809_v17, %v810_v54 }
  0x89   : > { %2877 = vmatmul.bf16.gmra.mxu2 %v3788_v63  ;;  %1141 = vst [vmem:[#allocation2 + $0x88] sm:$0xf] %v366_v20  ;;  %v3824_v63 = vor.u32 %v4631_v44, %v3823_v40  ;;  %v804_v3 = vsel %vm5258_vm5, %v802_v49, %v803_v32  ;;  %v4821_v40 = vld [vmem:[%s5903_s1 + $0x228] sm:$0xff]  ;;  %v5379_v49 = vld [vmem:[%s4909_s23 + $0x50] sm:$0x1] }
  0x8a   : > { %920 = vst [vmem:[#allocation2 + $0xe0] sm:$0xf] %v794_v39  ;;  %v398_v20 = vor.u32 %v397_v1, %v394_v35  ;;  %v4813_v35 = vld [vmem:[%s5903_s1 + $0x1e8] sm:$0xff]  ;;  %v431_v32 = vrot.slane %v429_v26, 4  ;;  %3400 = vmatpush.bf16.msra.mxu0 %v4821_v40  ;;  %v814_v26 = vrot.slane %v5065_v59, 5  ;;  %v817_v54 = vrot.slane %v5379_v49, 5 }
  0x8b   : > { %2966 = vmatmul.bf16.gmra.mxu3 %v3792_v8  ;;  %921 = vst [vmem:[#allocation2 + $0x104] sm:$0xf] %v797_v29  ;;  %v409_v8 = vrot.slane %v408_v2, 4  ;;  %v4797_v1 = vld [vmem:[%s5903_s1 + $0x168] sm:$0xff] }
  0x8c   : > { %1052 = vst [vmem:[#allocation2 + $0xa4] sm:$0xf] %v794_v39  ;;  %v399_v0 = vrot.slane %v398_v20, 4  ;;  %v4632_v55 = vld [vmem:[#allocation2 + $0xc0] sm:$0xf0]  ;;  %3311 = vmatpush.bf16.msra.mxu3 %v4813_v35  ;;  %3133 = vmatpush.bf16.msra.mxu1 %v4797_v1  ;;  %v816_v17 = vrot.slane %v814_v26, 4 }
  0x8d   : > { %1053 = vst [vmem:[#allocation2 + $0xc8] sm:$0xf] %v797_v29  ;;  %v414_v48 = vsel %vm5237_vm2, %v409_v8, %v413_v5  ;;  %v4635_v10 = vld [vmem:[#allocation2 + $0xdc] sm:$0xf] }
  0x8e   : > { %1184 = vst [vmem:[#allocation2 + $0x68] sm:$0xf] %v794_v39  ;;  %v404_v39 = vsel %vm5237_vm2, %v399_v0, %v403_v56  ;;  %v3853_v18 = vld [vmem:[#allocation2 + $0xfc] sm:$0xf0]  ;;  %v435_v56 = vshll.u32 %v5379_v49, 16  ;;  %v3864_v0 = vor.u32 %v4636_v4, %v3861_v14 }
  0x8f   : > { %1185 = vst [vmem:[#allocation2 + $0x8c] sm:$0xf] %v797_v29  ;;  %v3831_v29 = vld [vmem:[#allocation2 + $0xa0] sm:$0xf]  ;;  %v3897_v4 = vld [vmem:[#allocation2 + $0x14c] sm:$0xf0] }
  0x90   : > { %1010 = vst [vmem:[#allocation2 + $0xe8] sm:$0xf] %v380_v51  ;;  %v3832_v53 = vor.u32 %v4632_v55, %v3831_v29 }
  0x91   : > { %3055 = vmatmul.bf16.gmra.mxu0 %v3796_v12  ;;  %1011 = vst [vmem:[#allocation2 + $0x10c] sm:$0xf] %v390_v21  ;;  %v416_v12 = vshrl.u32 %v5062_v58, 16  ;;  %v3859_v27 = vld [vmem:[#allocation2 + $0xe0] sm:$0xf] }
  0x92   : > { %695 = vst [vmem:[#allocation2 + $0x124] sm:$0xf] %v380_v51  ;;  %v4640_v13 = vld [vmem:[#allocation2 + $0x100] sm:$0xf0] }
  0x93   : > { %696 = vst [vmem:[#allocation2 + $0x148] sm:$0xf] %v390_v21  ;;  %v418_v33 = vrot.slane %v416_v12, 4  ;;  %v3860_v46 = vor.u32 %v4640_v13, %v3859_v27  ;;  %v449_v12 = vshll.u32 %v5148_v41, 16 }
  0x94   : > { %1142 = vst [vmem:[#allocation2 + $0xac] sm:$0xf] %v380_v51  ;;  %v419_v51 = vshll.u32 %v5062_v58, 16 }
  0x95   : > { %1143 = vst [vmem:[#allocation2 + $0xd0] sm:$0xf] %v390_v21  ;;  %v425_v21 = vshll.u32 %v5065_v59, 16 }
  0x96   : > { %922 = vst [vmem:[#allocation2 + $0x128] sm:$0xf] %v801_v50  ;;  %v421_v38 = vrot.slane %v419_v51, 5 }
  0x97   : > { %2793 = vmatmul.bf16.gmra.mxu1 %v3820_v52  ;;  %923 = vst [vmem:[#allocation2 + $0x14c] sm:$0xf] %v804_v3  ;;  %v427_v44 = vrot.slane %v425_v21, 5  ;;  %v3856_v52 = vor.u32 %v4635_v10, %v3853_v18  ;;  %v443_v10 = vshll.u32 %v5134_v36, 16  ;;  %v453_v18 = vshrl.u32 %v5148_v41, 16 }
  0x98   : > { %1054 = vst [vmem:[#allocation2 + $0xec] sm:$0xf] %v801_v50  ;;  %v422_v20 = vor.u32 %v421_v38, %v418_v33  ;;  %v4641_v29 = vld [vmem:[#allocation2 + $0x108] sm:$0xf0]  ;;  %v5402_v38 = vld [vmem:[%s4909_s23 + $0x5c] sm:$0x1] }
  0x99   : > { %2882 = vmatmul.bf16.gmra.mxu2 %v3824_v63  ;;  %1055 = vst [vmem:[#allocation2 + $0x110] sm:$0xf] %v804_v3  ;;  %v432_v63 = vor.u32 %v431_v32, %v427_v44  ;;  %v445_v13 = vrot.slane %v443_v10, 5  ;;  %v455_v35 = vrot.slane %v453_v18, 4  ;;  %v459_v32 = vshll.u32 %v5402_v38, 16 }
  0x9a   : > { %1186 = vst [vmem:[#allocation2 + $0xb0] sm:$0xf] %v801_v50  ;;  %v808_v50 = vsel %vm5258_vm5, %v3728_v47, %v807_v30  ;;  %v423_v45 = vrot.slane %v422_v20, 4  ;;  %v3889_v51 = vld [vmem:[#allocation2 + $0x144] sm:$0xf0]  ;;  %v451_v30 = vrot.slane %v449_v12, 5 }
  0x9b   : > { %2971 = vmatmul.bf16.gmra.mxu3 %v3828_v60  ;;  %1187 = vst [vmem:[#allocation2 + $0xd4] sm:$0xf] %v804_v3  ;;  %v437_v3 = vrot.slane %v435_v56, 5  ;;  %v433_v2 = vrot.slane %v432_v63, 4  ;;  %v3729_v47 = vrot.slane %v5062_v58, 9  ;;  %v464_v10 = vshrl.u32 %v4925_v6, 16 }
  0x9c   : > { %1012 = vst [vmem:[#allocation2 + $0x130] sm:$0xf] %v404_v39  ;;  %v428_v60 = vsel %vm5237_vm2, %v423_v45, %v427_v44  ;;  %v4645_v56 = vld [vmem:[#allocation2 + $0x12c] sm:$0xf]  ;;  %v467_v12 = vshll.u32 %v4925_v6, 16 }
  0x9d   : > { %1013 = vst [vmem:[#allocation2 + $0x154] sm:$0xf] %v414_v48  ;;  %v438_v8 = vsel %vm5237_vm2, %v433_v2, %v437_v3  ;;  %v3895_v33 = vld [vmem:[#allocation2 + $0x128] sm:$0xf]  ;;  %v815_v14 = vsel %vm5258_vm5, %v3729_v47, %v814_v26  ;;  %v3900_v49 = vor.u32 %v4645_v56, %v3897_v4  ;;  %v477_v26 = vshrl.u32 %v4929_v7, 16  ;;  %v4812_v47 = vld [vmem:[%s5903_s1 + $0x1e0] sm:$0xff] }
  0x9e   : > { %697 = vst [vmem:[#allocation2 + $0x16c] sm:$0xf] %v404_v39  ;;  %v4649_v40 = vld [vmem:[#allocation2 + $0x148] sm:$0xf0]  ;;  %v824_v56 = vrot.slane %v5402_v38, 5  ;;  %3312 = vmatpush.bf16.msra.mxu3 %v4812_v47  ;;  %v497_v47 = vshll.u32 %v5003_v34, 16 }
  0x9f   : > { %698 = vst [vmem:[#allocation2 + $0x190] sm:$0xf] %v414_v48  ;;  %v3896_v45 = vor.u32 %v4649_v40, %v3895_v33  ;;  %v466_v33 = vrot.slane %v464_v10, 4 }
  0xa0   : > { %1144 = vst [vmem:[#allocation2 + $0xf4] sm:$0xf] %v404_v39  ;;  %v3867_v39 = vld [vmem:[#allocation2 + $0xe8] sm:$0xf] }
  0xa1   : > { %3060 = vmatmul.bf16.gmra.mxu0 %v3832_v53  ;;  %1145 = vst [vmem:[#allocation2 + $0x118] sm:$0xf] %v414_v48  ;;  %v3868_v55 = vor.u32 %v4641_v29, %v3867_v39  ;;  %v4644_v48 = vld [vmem:[#allocation2 + $0x124] sm:$0xf]  ;;  %v440_v53 = vshrl.u32 %v5134_v36, 16 }
  0xa2   : > { %924 = vst [vmem:[#allocation2 + $0x170] sm:$0xf] %v808_v50  ;;  %v3892_v59 = vor.u32 %v4644_v48, %v3889_v51  ;;  %v4804_v39 = vld [vmem:[%s5903_s1 + $0x1a0] sm:$0xff]  ;;  %v473_v51 = vshll.u32 %v4929_v7, 16 }
  0xa3   : > { %925 = vst [vmem:[#allocation2 + $0x194] sm:$0xf] %v811_v16  ;;  %v442_v27 = vrot.slane %v440_v53, 4  ;;  %3223 = vmatpush.bf16.msra.mxu2 %v4804_v39 }
  0xa4   : > { %1056 = vst [vmem:[#allocation2 + $0x134] sm:$0xf] %v808_v50  ;;  %v475_v40 = vrot.slane %v473_v51, 5 }
  0xa5   : > { %1057 = vst [vmem:[#allocation2 + $0x158] sm:$0xf] %v811_v16  ;;  %v446_v20 = vor.u32 %v445_v13, %v442_v27  ;;  %v4653_v53 = vld [vmem:[#allocation2 + $0x16c] sm:$0xf] }
  0xa6   : > { %1188 = vst [vmem:[#allocation2 + $0xf8] sm:$0xf] %v808_v50  ;;  %v818_v50 = vsel %vm5258_vm5, %v816_v17, %v817_v54  ;;  %v3925_v18 = vld [vmem:[#allocation2 + $0x18c] sm:$0xf0]  ;;  %v4796_v17 = vld [vmem:[%s5903_s1 + $0x160] sm:$0xff] }
  0xa7   : > { %2798 = vmatmul.bf16.gmra.mxu1 %v3856_v52  ;;  %1189 = vst [vmem:[#allocation2 + $0x11c] sm:$0xf] %v811_v16  ;;  %v456_v52 = vor.u32 %v455_v35, %v451_v30  ;;  %v447_v16 = vrot.slane %v446_v20, 4  ;;  %v469_v35 = vrot.slane %v467_v12, 5  ;;  %v4820_v54 = vld [vmem:[%s5903_s1 + $0x220] sm:$0xff]  ;;  %v479_v20 = vrot.slane %v477_v26, 4 }
  0xa8   : > { %v5386_v5 = vpop.f32.mrf.mxu1  ;;  %1014 = vst [vmem:[#allocation2 + $0x178] sm:$0xf] %v428_v60  ;;  %3134 = vmatpush.bf16.msra.mxu1 %v4796_v17  ;;  %3401 = vmatpush.bf16.msra.mxu0 %v4820_v54  ;;  %v501_v17 = vshrl.u32 %v5003_v34, 16 }
  0xa9   : > { %2887 = vmatmul.bf16.gmra.mxu2 %v3860_v46  ;;  %1015 = vst [vmem:[#allocation2 + $0x19c] sm:$0xf] %v438_v8  ;;  %v457_v58 = vrot.slane %v456_v52, 4  ;;  %v461_v46 = vrot.slane %v459_v32, 5  ;;  %v3931_v27 = vld [vmem:[#allocation2 + $0x170] sm:$0xf]  ;;  %v470_v4 = vor.u32 %v469_v35, %v466_v33 }
  0xaa   : > { %699 = vst [vmem:[#allocation2 + $0x1b4] sm:$0xf] %v428_v60  ;;  %v3730_v52 = vrot.slane %v5134_v36, 9  ;;  %v488_v33 = vshrl.u32 %v4993_v31, 16  ;;  %v491_v35 = vshll.u32 %v4993_v31, 16 }
  0xab   : > { %2976 = vmatmul.bf16.gmra.mxu3 %v3864_v0  ;;  %700 = vst [vmem:[#allocation2 + $0x1d8] sm:$0xf] %v438_v8  ;;  %v452_v0 = vsel %vm5237_vm2, %v447_v16, %v451_v30  ;;  %v462_v2 = vsel %vm5237_vm2, %v457_v58, %v461_v46  ;;  %v821_v30 = vrot.slane %v5148_v41, 5  ;;  %v480_v16 = vor.u32 %v479_v20, %v475_v40  ;;  %v3933_v58 = vld [vmem:[#allocation2 + $0x194] sm:$0xf0] }
  0xac   : > { %1146 = vst [vmem:[#allocation2 + $0x13c] sm:$0xf] %v428_v60  ;;  %v5404_v1 = vpop.f32.mrf.mxu0  ;;  %v3903_v60 = vld [vmem:[#allocation2 + $0x130] sm:$0xf]  ;;  %v471_v36 = vrot.slane %v470_v4, 4 }
  0xad   : > { %1147 = vst [vmem:[#allocation2 + $0x160] sm:$0xf] %v438_v8  ;;  %v4650_v8 = vld [vmem:[#allocation2 + $0x150] sm:$0xf0]  ;;  %v823_v32 = vrot.slane %v821_v30, 4  ;;  %v822_v46 = vsel %vm5258_vm5, %v3730_v52, %v821_v30  ;;  %v481_v39 = vrot.slane %v480_v16, 4 }
  0xae   : > { %v5392_v37 = vpop.f32.mrf.mxu2  ;;  %926 = vst [vmem:[#allocation2 + $0x1b8] sm:$0xf] %v815_v14  ;;  %v3904_v48 = vor.u32 %v4650_v8, %v3903_v60  ;;  %v828_v52 = vrot.slane %v4929_v7, 5  ;;  %v5480_v4 = vld [vmem:[%s4909_s23 + $0x74] sm:$0x1]  ;;  %v503_v16 = vrot.slane %v501_v17, 4 }
  0xaf   : > { %v5406_v44 = vpop.f32.mrf.mxu3  ;;  %927 = vst [vmem:[#allocation2 + $0x1dc] sm:$0xf] %v818_v50  ;;  %v3939_v10 = vld [vmem:[#allocation2 + $0x178] sm:$0xf]  ;;  %v507_v7 = vshll.u32 %v5480_v4, 16 }
  0xb0   : > { %v5398_v21 = vpop.f32.mrf.mxu1  ;;  %1058 = vst [vmem:[#allocation2 + $0x17c] sm:$0xf] %v815_v14  ;;  %v4659_v12 = vld [vmem:[#allocation2 + $0x198] sm:$0xf0] }
  0xb1   : > { %3065 = vmatmul.bf16.gmra.mxu0 %v3868_v55  ;;  %1059 = vst [vmem:[#allocation2 + $0x1a0] sm:$0xf] %v818_v50  ;;  %v4662_v30 = vld [vmem:[#allocation2 + $0x1b4] sm:$0xf] }
  0xb2   : > { %1190 = vst [vmem:[#allocation2 + $0x140] sm:$0xf] %v815_v14  ;;  %v3928_v14 = vor.u32 %v4653_v53, %v3925_v18  ;;  %v476_v53 = vsel %vm5237_vm2, %v471_v36, %v475_v40  ;;  %v3961_v40 = vld [vmem:[#allocation2 + $0x1d4] sm:$0xf0] }
  0xb3   : > { %1191 = vst [vmem:[#allocation2 + $0x164] sm:$0xf] %v818_v50  ;;  %v5451_v50 = vld [vmem:[%s4909_s23 + $0x68] sm:$0x1]  ;;  %v3964_v36 = vor.u32 %v4662_v30, %v3961_v40  ;;  %v509_v30 = vrot.slane %v507_v7, 5 }
  0xb4   : > { %1016 = vst [vmem:[#allocation2 + $0x1c0] sm:$0xf] %v452_v0  ;;  %v5426_v29 = vpop.f32.mrf.mxu0  ;;  %v483_v38 = vshll.u32 %v5451_v50, 16 }
  0xb5   : > { %1017 = vst [vmem:[#allocation2 + $0x1e4] sm:$0xf] %v462_v2 }
  0xb6   : > { %v5415_v63 = vpop.f32.mrf.mxu2  ;;  %701 = vst [vmem:[#allocation2 + $0x1fc] sm:$0xf] %v452_v0 }
  0xb7   : > { %2803 = vmatmul.bf16.gmra.mxu1 %v3892_v59  ;;  %v5428_v55 = vpop.f32.mrf.mxu3  ;;  %702 = vst [vmem:[#allocation2 + $0x220] sm:$0xf] %v462_v2  ;;  %v4658_v59 = vld [vmem:[#allocation2 + $0x190] sm:$0xf0] }
  0xb8   : > { %v5417_v3 = vpop.f32.mrf.mxu1  ;;  %1148 = vst [vmem:[#allocation2 + $0x184] sm:$0xf] %v452_v0  ;;  %v3932_v0 = vor.u32 %v4658_v59, %v3931_v27  ;;  %v3940_v27 = vor.u32 %v4659_v12, %v3939_v10  ;;  %v3967_v59 = vld [vmem:[#allocation2 + $0x1b8] sm:$0xf] }
  0xb9   : > { %2892 = vmatmul.bf16.gmra.mxu2 %v3896_v45  ;;  %1149 = vst [vmem:[#allocation2 + $0x1a8] sm:$0xf] %v462_v2  ;;  %v4654_v45 = vld [vmem:[#allocation2 + $0x174] sm:$0xf] }
  0xba   : > { %928 = vst [vmem:[#allocation2 + $0x200] sm:$0xf] %v822_v46  ;;  %v3936_v8 = vor.u32 %v4654_v45, %v3933_v58  ;;  %v4667_v45 = vld [vmem:[#allocation2 + $0x1d8] sm:$0xf0]  ;;  %v3731_v58 = vrot.slane %v4925_v6, 9 }
  0xbb   : > { %2981 = vmatmul.bf16.gmra.mxu3 %v3900_v49  ;;  %v825_v49 = vsel %vm5258_vm5, %v823_v32, %v824_v56  ;;  %1060 = vst [vmem:[#allocation2 + $0x1c4] sm:$0xf] %v822_v46  ;;  %v490_v32 = vrot.slane %v488_v33, 4  ;;  %v493_v56 = vrot.slane %v491_v35, 5  ;;  %v3968_v12 = vor.u32 %v4667_v45, %v3967_v59  ;;  %v3975_v40 = vld [vmem:[#allocation2 + $0x1c0] sm:$0xf] }
  0xbc   : > { %929 = vst [vmem:[#allocation2 + $0x224] sm:$0xf] %v825_v49  ;;  %v515_v45 = vshll.u32 %v5096_v15, 16 }
  0xbd   : > { %1061 = vst [vmem:[#allocation2 + $0x1e8] sm:$0xf] %v825_v49 }
  0xbe   : > { %v5434_v13 = vpop.f32.mrf.mxu2  ;;  %1192 = vst [vmem:[#allocation2 + $0x188] sm:$0xf] %v822_v46  ;;  %v830_v46 = vrot.slane %v828_v52, 4 }
  0xbf   : > { %1193 = vst [vmem:[#allocation2 + $0x1ac] sm:$0xf] %v825_v49  ;;  %v494_v49 = vor.u32 %v493_v56, %v490_v32  ;;  %v4671_v32 = vld [vmem:[#allocation2 + $0x1fc] sm:$0xf] }
  0xc0   : > { %v5446_v41 = vpop.f32.mrf.mxu1  ;;  %v5458_v2 = vpop.f32.mrf.mxu0  ;;  %1018 = vst [vmem:[#allocation2 + $0x208] sm:$0xf] %v476_v53 }
  0xc1   : > { %3070 = vmatmul.bf16.gmra.mxu0 %v3904_v48  ;;  %v5460_v60 = vpop.f32.mrf.mxu3  ;;  %v485_v48 = vrot.slane %v483_v38, 5  ;;  %703 = vst [vmem:[#allocation2 + $0x244] sm:$0xf] %v476_v53  ;;  %v495_v10 = vrot.slane %v494_v49, 4  ;;  %v525_v49 = vshrl.u32 %v5100_v19, 16 }
  0xc2   : > { %5910 = vst [vmem:[#allocation3_spill] sm:$0xff] %v5460_v60 }
  0xc3   : > { %v486_v18 = vsel %vm5237_vm2, %v481_v39, %v485_v48  ;;  %1150 = vst [vmem:[#allocation2 + $0x1cc] sm:$0xf] %v476_v53  ;;  %v3969_v39 = vld [vmem:[#allocation2 + $0x1dc] sm:$0xf0]  ;;  %v829_v53 = vsel %vm5258_vm5, %v3731_v58, %v828_v52 }
  0xc4   : > { %1019 = vst [vmem:[#allocation2 + $0x22c] sm:$0xf] %v486_v18  ;;  %v3997_v58 = vld [vmem:[#allocation2 + $0x21c] sm:$0xf0] }
  0xc5   : > { %704 = vst [vmem:[#allocation2 + $0x268] sm:$0xf] %v486_v18 }
  0xc6   : > { %v5464_v51 = vpop.f32.mrf.mxu2  ;;  %1151 = vst [vmem:[#allocation2 + $0x1f0] sm:$0xf] %v486_v18 }
  0xc7   : > { %2808 = vmatmul.bf16.gmra.mxu1 %v3928_v14  ;;  %v499_v14 = vrot.slane %v497_v47, 5  ;;  %930 = vst [vmem:[#allocation2 + $0x248] sm:$0xf] %v829_v53  ;;  %v4668_v47 = vld [vmem:[#allocation2 + $0x1e0] sm:$0xf0] }
  0xc8   : > { %v5468_v26 = vpop.f32.mrf.mxu1  ;;  %v5474_v54 = vpop.f32.mrf.mxu0  ;;  %1062 = vst [vmem:[#allocation2 + $0x20c] sm:$0xf] %v829_v53  ;;  %v3976_v52 = vor.u32 %v4668_v47, %v3975_v40  ;;  %v527_v40 = vrot.slane %v525_v49, 4 }
  0xc9   : > { %2897 = vmatmul.bf16.gmra.mxu2 %v3932_v0  ;;  %v5476_v20 = vpop.f32.mrf.mxu3  ;;  %v831_v0 = vrot.slane %v5451_v50, 5  ;;  %v504_v38 = vor.u32 %v503_v16, %v499_v14  ;;  %v500_v33 = vsel %vm5237_vm2, %v495_v10, %v499_v14  ;;  %1194 = vst [vmem:[#allocation2 + $0x1d0] sm:$0xf] %v829_v53  ;;  %v4803_v14 = vld [vmem:[%s5903_s1 + $0x198] sm:$0xff]  ;;  %v512_v16 = vshrl.u32 %v5096_v15, 16 }
  0xca   : > { %5911 = vst [vmem:[#allocation4_spill] sm:$0xff] %v5476_v20  ;;  %3224 = vmatpush.bf16.msra.mxu2 %v4803_v14  ;;  %v4795_v53 = vld [vmem:[%s5903_s1 + $0x158] sm:$0xff]  ;;  %v5520_v10 = vld [vmem:[%s4909_s23 + $0x80] sm:$0x1] }
  0xcb   : > { %2986 = vmatmul.bf16.gmra.mxu3 %v3936_v8  ;;  %v4663_v8 = vld [vmem:[#allocation2 + $0x1bc] sm:$0xf]  ;;  %v832_v6 = vsel %vm5258_vm5, %v830_v46, %v831_v0  ;;  %1020 = vst [vmem:[#allocation2 + $0x250] sm:$0xf] %v500_v33  ;;  %v521_v46 = vshll.u32 %v5100_v19, 16  ;;  %v514_v7 = vrot.slane %v512_v16, 4  ;;  %3135 = vmatpush.bf16.msra.mxu1 %v4795_v53 }
  0xcc   : > { %931 = vst [vmem:[#allocation2 + $0x26c] sm:$0xf] %v832_v6  ;;  %v3972_v50 = vor.u32 %v4663_v8, %v3969_v39  ;;  %v4003_v0 = vld [vmem:[#allocation2 + $0x200] sm:$0xf]  ;;  %v517_v8 = vrot.slane %v515_v45, 5  ;;  %v4811_v39 = vld [vmem:[%s5903_s1 + $0x1d8] sm:$0xff] }
  0xcd   : > { %1063 = vst [vmem:[#allocation2 + $0x230] sm:$0xf] %v832_v6  ;;  %3313 = vmatpush.bf16.msra.mxu3 %v4811_v39  ;;  %v531_v47 = vshll.u32 %v5520_v10, 16  ;;  %v4672_v16 = vld [vmem:[#allocation2 + $0x204] sm:$0xf] }
  0xce   : > { %1195 = vst [vmem:[#allocation2 + $0x1f4] sm:$0xf] %v832_v6  ;;  %v4676_v6 = vld [vmem:[#allocation2 + $0x220] sm:$0xf0]  ;;  %v4677_v53 = vld [vmem:[#allocation2 + $0x228] sm:$0xf0] }
  0xcf   : > { %705 = vst [vmem:[#allocation2 + $0x28c] sm:$0xf] %v500_v33  ;;  %v4004_v45 = vor.u32 %v4676_v6, %v4003_v0 }
  0xd0   : > { %v5485_v48 = vpop.f32.mrf.mxu2  ;;  %v5491_v18 = vpop.f32.mrf.mxu1  ;;  %1152 = vst [vmem:[#allocation2 + $0x214] sm:$0xf] %v500_v33  ;;  %v523_v33 = vrot.slane %v521_v46, 5  ;;  %v4819_v46 = vld [vmem:[%s5903_s1 + $0x218] sm:$0xff] }
  0xd1   : > { %3075 = vmatmul.bf16.gmra.mxu0 %v3940_v27  ;;  %v505_v27 = vrot.slane %v504_v38, 4  ;;  %v835_v38 = vrot.slane %v5003_v34, 5 }
  0xd2   : > { %3402 = vmatpush.bf16.msra.mxu0 %v4819_v46 }
  0xd3   : > { %v510_v59 = vsel %vm5237_vm2, %v505_v27, %v509_v30  ;;  %v837_v34 = vrot.slane %v835_v38, 4  ;;  %v518_v27 = vor.u32 %v517_v8, %v514_v7  ;;  %v838_v30 = vrot.slane %v5480_v4, 5 }
  0xd4   : > { %1021 = vst [vmem:[#allocation2 + $0x274] sm:$0xf] %v510_v59  ;;  %v528_v4 = vor.u32 %v527_v40, %v523_v33  ;;  %v533_v8 = vrot.slane %v531_v47, 5  ;;  %v539_v40 = vshll.u32 %v5172_v57, 16  ;;  %v4033_v47 = vld [vmem:[#allocation2 + $0x264] sm:$0xf0] }
  0xd5   : > { %706 = vst [vmem:[#allocation2 + $0x2b0] sm:$0xf] %v510_v59 }
  0xd6   : > { %v5495_v35 = vpop.f32.mrf.mxu0  ;;  %v5497_v17 = vpop.f32.mrf.mxu3  ;;  %1153 = vst [vmem:[#allocation2 + $0x238] sm:$0xf] %v510_v59  ;;  %v529_v7 = vrot.slane %v528_v4, 4  ;;  %v5554_v4 = vld [vmem:[%s4909_s23 + $0x8c] sm:$0x1] }
  0xd7   : > { %2813 = vmatmul.bf16.gmra.mxu1 %v3964_v36  ;;  %5912 = vst [vmem:[#allocation5_spill] sm:$0xff] %v5497_v17  ;;  %v845_v17 = vrot.slane %v5520_v10, 5 }
  0xd8   : > { %v5501_v56 = vpop.f32.mrf.mxu2 }
  0xd9   : > { %2902 = vmatmul.bf16.gmra.mxu2 %v3968_v12  ;;  %v4000_v12 = vor.u32 %v4671_v32, %v3997_v58  ;;  %v4005_v32 = vld [vmem:[#allocation2 + $0x224] sm:$0xf0]  ;;  %v839_v58 = vsel %vm5258_vm5, %v837_v34, %v838_v30  ;;  %v4680_v30 = vld [vmem:[#allocation2 + $0x244] sm:$0xf] }
  0xda   : > { %933 = vst [vmem:[#allocation2 + $0x2b4] sm:$0xf] %v839_v58  ;;  %v4008_v49 = vor.u32 %v4672_v16, %v4005_v32  ;;  %v545_v16 = vshll.u32 %v5179_v61, 16  ;;  %v549_v32 = vshrl.u32 %v5179_v61, 16 }
  0xdb   : > { %2991 = vmatmul.bf16.gmra.mxu3 %v3972_v50  ;;  %v3732_v50 = vrot.slane %v4993_v31, 9  ;;  %v519_v31 = vrot.slane %v518_v27, 4  ;;  %1065 = vst [vmem:[#allocation2 + $0x278] sm:$0xf] %v839_v58 }
  0xdc   : > { %v5510_v36 = vpop.f32.mrf.mxu1  ;;  %1197 = vst [vmem:[#allocation2 + $0x23c] sm:$0xf] %v839_v58  ;;  %v541_v58 = vrot.slane %v539_v40, 5  ;;  %v547_v46 = vrot.slane %v545_v16, 5  ;;  %v4041_v40 = vld [vmem:[#allocation2 + $0x26c] sm:$0xf0] }
  0xdd   : > { %v836_v59 = vsel %vm5258_vm5, %v3732_v50, %v835_v38  ;;  %v524_v0 = vsel %vm5237_vm2, %v519_v31, %v523_v33  ;;  %v4011_v38 = vld [vmem:[#allocation2 + $0x208] sm:$0xf]  ;;  %v536_v33 = vshrl.u32 %v5172_v57, 16  ;;  %v842_v31 = vrot.slane %v5100_v19, 5 }
  0xde   : > { %v5527_v14 = vpop.f32.mrf.mxu3  ;;  %932 = vst [vmem:[#allocation2 + $0x290] sm:$0xf] %v836_v59  ;;  %v4012_v50 = vor.u32 %v4677_v53, %v4011_v38  ;;  %v3733_v38 = vrot.slane %v5096_v15, 9 }
  0xdf   : > { %5913 = vst [vmem:[#allocation6_spill] sm:$0xff] %v5527_v14  ;;  %v844_v53 = vrot.slane %v842_v31, 4  ;;  %v4036_v14 = vor.u32 %v4680_v30, %v4033_v47 }
  0xe0   : > { %1064 = vst [vmem:[#allocation2 + $0x254] sm:$0xf] %v836_v59  ;;  %v843_v16 = vsel %vm5258_vm5, %v3733_v38, %v842_v31 }
  0xe1   : > { %3080 = vmatmul.bf16.gmra.mxu0 %v3976_v52  ;;  %v5525_v52 = vpop.f32.mrf.mxu0  ;;  %1196 = vst [vmem:[#allocation2 + $0x218] sm:$0xf] %v836_v59  ;;  %v4039_v59 = vld [vmem:[#allocation2 + $0x248] sm:$0xf] }
  0xe2   : > { %1022 = vst [vmem:[#allocation2 + $0x298] sm:$0xf] %v524_v0 }
  0xe3   : > { %707 = vst [vmem:[#allocation2 + $0x2d4] sm:$0xf] %v524_v0 }
  0xe4   : > { %v5540_v6 = vpop.f32.mrf.mxu1  ;;  %1154 = vst [vmem:[#allocation2 + $0x25c] sm:$0xf] %v524_v0  ;;  %v4681_v0 = vld [vmem:[#allocation2 + $0x24c] sm:$0xf] }
  0xe5   : > { %934 = vst [vmem:[#allocation2 + $0x2d8] sm:$0xf] %v843_v16  ;;  %v4044_v10 = vor.u32 %v4681_v0, %v4041_v40  ;;  %v4075_v40 = vld [vmem:[#allocation2 + $0x290] sm:$0xf] }
  0xe6   : > { %1066 = vst [vmem:[#allocation2 + $0x29c] sm:$0xf] %v843_v16 }
  0xe7   : > { %2818 = vmatmul.bf16.gmra.mxu1 %v4000_v12  ;;  %v534_v12 = vsel %vm5237_vm2, %v529_v7, %v533_v8  ;;  %v4685_v8 = vld [vmem:[#allocation2 + $0x268] sm:$0xf0]  ;;  %1198 = vst [vmem:[#allocation2 + $0x260] sm:$0xf] %v843_v16  ;;  %v4694_v16 = vld [vmem:[#allocation2 + $0x2b0] sm:$0xf0] }
  0xe8   : > { %v5536_v39 = vpop.f32.mrf.mxu2  ;;  %1023 = vst [vmem:[#allocation2 + $0x2bc] sm:$0xf] %v534_v12  ;;  %v4040_v20 = vor.u32 %v4685_v8, %v4039_v59  ;;  %v4686_v59 = vld [vmem:[#allocation2 + $0x270] sm:$0xf0]  ;;  %v4076_v60 = vor.u32 %v4694_v16, %v4075_v40 }
  0xe9   : > { %2907 = vmatmul.bf16.gmra.mxu2 %v4004_v45  ;;  %708 = vst [vmem:[#allocation2 + $0x2f8] sm:$0xf] %v534_v12  ;;  %v538_v45 = vrot.slane %v536_v33, 4  ;;  %v555_v33 = vshll.u32 %v5554_v4, 16  ;;  %v4818_v40 = vld [vmem:[%s5903_s1 + $0x210] sm:$0xff] }
  0xea   : > { %1155 = vst [vmem:[#allocation2 + $0x280] sm:$0xf] %v534_v12  ;;  %v846_v12 = vsel %vm5258_vm5, %v844_v53, %v845_v17  ;;  %v4689_v53 = vld [vmem:[#allocation2 + $0x28c] sm:$0xf]  ;;  %3403 = vmatpush.bf16.msra.mxu0 %v4818_v40 }
  0xeb   : > { %2996 = vmatmul.bf16.gmra.mxu3 %v4008_v49  ;;  %v551_v49 = vrot.slane %v549_v32, 4  ;;  %935 = vst [vmem:[#allocation2 + $0x2fc] sm:$0xf] %v846_v12 }
  0xec   : > { %1067 = vst [vmem:[#allocation2 + $0x2c0] sm:$0xf] %v846_v12 }
  0xed   : > { %v552_v19 = vor.u32 %v551_v49, %v547_v46  ;;  %1199 = vst [vmem:[#allocation2 + $0x284] sm:$0xf] %v846_v12  ;;  %v573_v12 = vshrl.u32 %v4947_v11, 16 }
  0xee   : > { %v5544_v34 = vpop.f32.mrf.mxu0  ;;  %v5546_v27 = vpop.f32.mrf.mxu3 }
  0xef   : > { %5914 = vst [vmem:[#allocation7_spill] sm:$0xff] %v5546_v27  ;;  %v542_v27 = vor.u32 %v541_v58, %v538_v45  ;;  %v553_v47 = vrot.slane %v552_v19, 4  ;;  %v557_v45 = vrot.slane %v555_v33, 5  ;;  %v4069_v19 = vld [vmem:[#allocation2 + $0x2ac] sm:$0xf0] }
  0xf0   : > { %v5556_v7 = vpop.f32.mrf.mxu2 }
  0xf1   : > { %3085 = vmatmul.bf16.gmra.mxu0 %v4012_v50  ;;  %v543_v32 = vrot.slane %v542_v27, 4  ;;  %v4047_v27 = vld [vmem:[#allocation2 + $0x250] sm:$0xf]  ;;  %v558_v58 = vsel %vm5237_vm2, %v553_v47, %v557_v45 }
  0xf2   : > { %v4048_v8 = vor.u32 %v4686_v59, %v4047_v27  ;;  %1025 = vst [vmem:[#allocation2 + $0x304] sm:$0xf] %v558_v58  ;;  %v4072_v27 = vor.u32 %v4689_v53, %v4069_v19  ;;  %v4810_v59 = vld [vmem:[%s5903_s1 + $0x1d0] sm:$0xff] }
  0xf3   : > { %v548_v31 = vsel %vm5237_vm2, %v543_v32, %v547_v46  ;;  %v569_v32 = vshll.u32 %v4947_v11, 16  ;;  %710 = vst [vmem:[#allocation2 + $0x340] sm:$0xf] %v558_v58  ;;  %3314 = vmatpush.bf16.msra.mxu3 %v4810_v59 }
  0xf4   : > { %v2784_v50 = vpop.f32.mrf.mxu1  ;;  %1024 = vst [vmem:[#allocation2 + $0x2e0] sm:$0xf] %v548_v31 }
  0xf5   : > { %v2785_v17 = vadd.f32 %v2784_v50, %v5404_v1  ;;  %v560_v1 = vshrl.u32 %v4940_v9, 16  ;;  %v563_v50 = vshll.u32 %v4940_v9, 16  ;;  %709 = vst [vmem:[#allocation2 + $0x31c] sm:$0xf] %v548_v31  ;;  %v571_v19 = vrot.slane %v569_v32, 5 }
  0xf6   : > { %v5565_v15 = vpop.f32.mrf.mxu0  ;;  %v5567_v30 = vpop.f32.mrf.mxu3  ;;  %1156 = vst [vmem:[#allocation2 + $0x2a4] sm:$0xf] %v548_v31  ;;  %v852_v31 = vrot.slane %v5554_v4, 5 }
  0xf7   : > { %5915 = vst [vmem:[#allocation8_spill] sm:$0xff] %v5567_v30  ;;  %2823 = vmatmul.bf16.gmra.mxu1 %v4036_v14  ;;  %v562_v47 = vrot.slane %v560_v1, 4  ;;  %v565_v45 = vrot.slane %v563_v50, 5 }
  0xf8   : > { %1157 = vst [vmem:[#allocation2 + $0x2c8] sm:$0xf] %v558_v58 }
  0xf9   : > { %2912 = vmatmul.bf16.gmra.mxu2 %v4040_v20  ;;  %v4802_v20 = vld [vmem:[%s5903_s1 + $0x190] sm:$0xff]  ;;  %v566_v53 = vor.u32 %v565_v45, %v562_v47 }
  0xfa   : > { %3225 = vmatpush.bf16.msra.mxu2 %v4802_v20  ;;  %v575_v20 = vrot.slane %v573_v12, 4 }
  0xfb   : > { %3001 = vmatmul.bf16.gmra.mxu3 %v4044_v10  ;;  %v849_v10 = vrot.slane %v5179_v61, 5  ;;  %v3734_v61 = vrot.slane %v5172_v57, 9  ;;  %v567_v58 = vrot.slane %v566_v53, 4 }
  0xfc   : > { %v2873_v14 = vpop.f32.mrf.mxu2  ;;  %v2786_v49 = vpop.f32.mrf.mxu1  ;;  %v576_v4 = vor.u32 %v575_v20, %v571_v19 }
  0xfd   : > { %v2874_v38 = vadd.f32 %v2873_v14, %v2785_v17  ;;  %v4794_v17 = vld [vmem:[%s5903_s1 + $0x150] sm:$0xff]  ;;  %v5589_v14 = vld [vmem:[%s4909_s23 + $0x98] sm:$0x1] }
  0xfe   : > { %v3051_v33 = vpop.f32.mrf.mxu0  ;;  %v2962_v46 = vpop.f32.mrf.mxu3  ;;  %3136 = vmatpush.bf16.msra.mxu1 %v4794_v17  ;;  %v579_v1 = vshll.u32 %v5589_v14, 16  ;;  %v4083_v17 = vld [vmem:[#allocation2 + $0x298] sm:$0xf] }
  0xff   : > { %v2963_v0 = vadd.f32 %v2962_v46, %v2874_v38  ;;  %v2787_v46 = vadd.f32 %v2786_v49, %v5426_v29  ;;  %v850_v29 = vsel %vm5258_vm5, %v3734_v61, %v849_v10 }
 0x100   : > { %936 = vst [vmem:[#allocation2 + $0x320] sm:$0xf] %v850_v29  ;;  %v581_v59 = vrot.slane %v579_v1, 5 }
 0x101   : > { %3090 = vmatmul.bf16.gmra.mxu0 %v4048_v8  ;;  %v5591_v38 = vadd.f32 %v3051_v33, %v2963_v0  ;;  %v851_v8 = vrot.slane %v849_v10, 4  ;;  %v4690_v33 = vld [vmem:[#allocation2 + $0x294] sm:$0xf]  ;;  %v4077_v0 = vld [vmem:[#allocation2 + $0x2b4] sm:$0xf0]  ;;  %v577_v10 = vrot.slane %v576_v4, 4 }
 0x102   : > { %v4080_v45 = vor.u32 %v4690_v33, %v4077_v0  ;;  %1068 = vst [vmem:[#allocation2 + $0x2e4] sm:$0xf] %v850_v29  ;;  %v587_v33 = vshll.u32 %v5023_v42, 16 }
 0x103   : > { %v853_v47 = vsel %vm5258_vm5, %v851_v8, %v852_v31  ;;  %1200 = vst [vmem:[#allocation2 + $0x2a8] sm:$0xf] %v850_v29  ;;  %v4105_v29 = vld [vmem:[#allocation2 + $0x2f4] sm:$0xf0] }
 0x104   : > { %v2875_v50 = vpop.f32.mrf.mxu2  ;;  %v2789_v30 = vpop.f32.mrf.mxu1  ;;  %937 = vst [vmem:[#allocation2 + $0x344] sm:$0xf] %v853_v47  ;;  %v589_v4 = vrot.slane %v587_v33, 5 }
 0x105   : > { %v2876_v57 = vadd.f32 %v2875_v50, %v2787_v46  ;;  %v2790_v49 = vadd.f32 %v2789_v30, %v5458_v2  ;;  %1069 = vst [vmem:[#allocation2 + $0x308] sm:$0xf] %v853_v47  ;;  %v572_v2 = vsel %vm5237_vm2, %v567_v58, %v571_v19  ;;  %v4695_v46 = vld [vmem:[#allocation2 + $0x2b8] sm:$0xf0]  ;;  %v584_v50 = vshrl.u32 %v5023_v42, 16 }
 0x106   : > { %v3053_v32 = vpop.f32.mrf.mxu0  ;;  %v2964_v12 = vpop.f32.mrf.mxu3  ;;  %1201 = vst [vmem:[#allocation2 + $0x2cc] sm:$0xf] %v853_v47  ;;  %v4084_v53 = vor.u32 %v4695_v46, %v4083_v17  ;;  %v593_v58 = vshll.u32 %v5027_v43, 16  ;;  %v4111_v47 = vld [vmem:[#allocation2 + $0x2d8] sm:$0xf] }
 0x107   : > { %v2965_v16 = vadd.f32 %v2964_v12, %v2876_v57  ;;  %2828 = vmatmul.bf16.gmra.mxu1 %v4072_v27  ;;  %v582_v27 = vsel %vm5237_vm2, %v577_v10, %v581_v59  ;;  %1026 = vst [vmem:[#allocation2 + $0x328] sm:$0xf] %v572_v2  ;;  %v597_v57 = vshrl.u32 %v5027_v43, 16  ;;  %v3735_v10 = vrot.slane %v4940_v9, 9 }
 0x108   : > { %1027 = vst [vmem:[#allocation2 + $0x34c] sm:$0xf] %v582_v27  ;;  %v595_v12 = vrot.slane %v593_v58, 5 }
 0x109   : > { %2917 = vmatmul.bf16.gmra.mxu2 %v4076_v60  ;;  %v5607_v30 = vadd.f32 %v3053_v32, %v2965_v16  ;;  %v4698_v60 = vld [vmem:[#allocation2 + $0x2d4] sm:$0xf]  ;;  %711 = vst [vmem:[#allocation2 + $0x364] sm:$0xf] %v572_v2  ;;  %v5618_v32 = vld [vmem:[%s4909_s23 + $0xa4] sm:$0x1] }
 0x10a   : > { %712 = vst [vmem:[#allocation2 + $0x388] sm:$0xf] %v582_v27  ;;  %v599_v40 = vrot.slane %v597_v57, 4  ;;  %v4108_v46 = vor.u32 %v4698_v60, %v4105_v29 }
 0x10b   : > { %3006 = vmatmul.bf16.gmra.mxu3 %v4080_v45  ;;  %1158 = vst [vmem:[#allocation2 + $0x2ec] sm:$0xf] %v572_v2  ;;  %v4703_v45 = vld [vmem:[#allocation2 + $0x2f8] sm:$0xf0] }
 0x10c   : > { %v2878_v61 = vpop.f32.mrf.mxu2  ;;  %v2791_v8 = vpop.f32.mrf.mxu1  ;;  %1159 = vst [vmem:[#allocation2 + $0x310] sm:$0xf] %v582_v27  ;;  %v4112_v9 = vor.u32 %v4703_v45, %v4111_v47  ;;  %v4119_v47 = vld [vmem:[#allocation2 + $0x2e0] sm:$0xf] }
 0x10d   : > { %v2879_v31 = vadd.f32 %v2878_v61, %v2790_v49  ;;  %v2792_v20 = vadd.f32 %v2791_v8, %v5474_v54  ;;  %v856_v54 = vrot.slane %v4947_v11, 5  ;;  %v586_v49 = vrot.slane %v584_v50, 4 }
 0x10e   : > { %v3056_v1 = vpop.f32.mrf.mxu0  ;;  %v2967_v19 = vpop.f32.mrf.mxu3  ;;  %v859_v61 = vrot.slane %v5589_v14, 5  ;;  %v600_v11 = vor.u32 %v599_v40, %v595_v12  ;;  %v603_v8 = vshll.u32 %v5618_v32, 16 }
 0x10f   : > { %v2968_v0 = vadd.f32 %v2967_v19, %v2879_v31  ;;  %v858_v59 = vrot.slane %v856_v54, 4  ;;  %v590_v17 = vor.u32 %v589_v4, %v586_v49  ;;  %v4699_v31 = vld [vmem:[#allocation2 + $0x2dc] sm:$0xf]  ;;  %v4113_v19 = vld [vmem:[#allocation2 + $0x2fc] sm:$0xf0] }
 0x110   : > { %v4116_v58 = vor.u32 %v4699_v31, %v4113_v19  ;;  %v601_v57 = vrot.slane %v600_v11, 4  ;;  %v605_v49 = vrot.slane %v603_v8, 5  ;;  %v4801_v8 = vld [vmem:[%s5903_s1 + $0x188] sm:$0xff]  ;;  %v4147_v19 = vld [vmem:[#allocation2 + $0x320] sm:$0xf] }
 0x111   : > { %3095 = vmatmul.bf16.gmra.mxu0 %v4084_v53  ;;  %v5620_v16 = vadd.f32 %v3056_v1, %v2968_v0  ;;  %v857_v1 = vsel %vm5258_vm5, %v3735_v10, %v856_v54  ;;  %v591_v50 = vrot.slane %v590_v17, 4  ;;  %v860_v60 = vsel %vm5258_vm5, %v858_v59, %v859_v61  ;;  %v4704_v54 = vld [vmem:[#allocation2 + $0x300] sm:$0xf0]  ;;  %3226 = vmatpush.bf16.msra.mxu2 %v4801_v8 }
 0x112   : > { %938 = vst [vmem:[#allocation2 + $0x368] sm:$0xf] %v857_v1  ;;  %v606_v4 = vsel %vm5237_vm2, %v601_v57, %v605_v49  ;;  %v4120_v10 = vor.u32 %v4704_v54, %v4119_v47 }
 0x113   : > { %939 = vst [vmem:[#allocation2 + $0x38c] sm:$0xf] %v860_v60 }
 0x114   : > { %v2880_v53 = vpop.f32.mrf.mxu2  ;;  %v2794_v2 = vpop.f32.mrf.mxu1  ;;  %1070 = vst [vmem:[#allocation2 + $0x32c] sm:$0xf] %v857_v1 }
 0x115   : > { %v2881_v33 = vadd.f32 %v2880_v53, %v2792_v20  ;;  %v2795_v27 = vadd.f32 %v2794_v2, %v5495_v35  ;;  %1071 = vst [vmem:[#allocation2 + $0x350] sm:$0xf] %v860_v60  ;;  %v596_v20 = vsel %vm5237_vm2, %v591_v50, %v595_v12  ;;  %v4141_v12 = vld [vmem:[#allocation2 + $0x33c] sm:$0xf0]  ;;  %v608_v53 = vshrl.u32 %v5108_v23, 16 }
 0x116   : > { %v3058_v14 = vpop.f32.mrf.mxu0  ;;  %v2969_v0 = vpop.f32.mrf.mxu3  ;;  %1202 = vst [vmem:[#allocation2 + $0x2f0] sm:$0xf] %v857_v1  ;;  %v611_v2 = vshll.u32 %v5108_v23, 16  ;;  %v4712_v1 = vld [vmem:[#allocation2 + $0x340] sm:$0xf0]  ;;  %v621_v50 = vshrl.u32 %v5112_v24, 16 }
 0x117   : > { %v2970_v29 = vadd.f32 %v2969_v0, %v2881_v33  ;;  %2833 = vmatmul.bf16.gmra.mxu1 %v4108_v46  ;;  %1203 = vst [vmem:[#allocation2 + $0x314] sm:$0xf] %v860_v60  ;;  %v4707_v46 = vld [vmem:[#allocation2 + $0x31c] sm:$0xf]  ;;  %v863_v33 = vrot.slane %v5027_v43, 5  ;;  %v4809_v60 = vld [vmem:[%s5903_s1 + $0x1c8] sm:$0xff] }
 0x118   : > { %1028 = vst [vmem:[#allocation2 + $0x370] sm:$0xf] %v596_v20  ;;  %v5652_v0 = vld [vmem:[%s4909_s23 + $0xb0] sm:$0x1]  ;;  %v3736_v43 = vrot.slane %v5023_v42, 9  ;;  %3315 = vmatpush.bf16.msra.mxu3 %v4809_v60  ;;  %v623_v54 = vrot.slane %v621_v50, 4 }
 0x119   : > { %2922 = vmatmul.bf16.gmra.mxu2 %v4112_v9  ;;  %v5632_v35 = vadd.f32 %v3058_v14, %v2970_v29  ;;  %1029 = vst [vmem:[#allocation2 + $0x394] sm:$0xf] %v606_v4  ;;  %v613_v9 = vrot.slane %v611_v2, 5  ;;  %v4793_v14 = vld [vmem:[%s5903_s1 + $0x148] sm:$0xff]  ;;  %v865_v57 = vrot.slane %v863_v33, 4 }
 0x11a   : > { %713 = vst [vmem:[#allocation2 + $0x3ac] sm:$0xf] %v596_v20  ;;  %3137 = vmatpush.bf16.msra.mxu1 %v4793_v14 }
 0x11b   : > { %3011 = vmatmul.bf16.gmra.mxu3 %v4116_v58  ;;  %714 = vst [vmem:[#allocation2 + $0x3d0] sm:$0xf] %v606_v4  ;;  %v4144_v58 = vor.u32 %v4707_v46, %v4141_v12 }
 0x11c   : > { %v2883_v40 = vpop.f32.mrf.mxu2  ;;  %v2796_v45 = vpop.f32.mrf.mxu1  ;;  %1160 = vst [vmem:[#allocation2 + $0x334] sm:$0xf] %v596_v20  ;;  %v866_v20 = vrot.slane %v5618_v32, 5 }
 0x11d   : > { %v2884_v59 = vadd.f32 %v2883_v40, %v2795_v27  ;;  %v2797_v17 = vadd.f32 %v2796_v45, %v5525_v52  ;;  %v617_v52 = vshll.u32 %v5112_v24, 16  ;;  %v610_v27 = vrot.slane %v608_v53, 4  ;;  %1161 = vst [vmem:[#allocation2 + $0x358] sm:$0xf] %v606_v4 }
 0x11e   : > { %v3061_v61 = vpop.f32.mrf.mxu0  ;;  %v2972_v11 = vpop.f32.mrf.mxu3  ;;  %v627_v40 = vshll.u32 %v5652_v0, 16  ;;  %v864_v4 = vsel %vm5258_vm5, %v3736_v43, %v863_v33  ;;  %v867_v8 = vsel %vm5258_vm5, %v865_v57, %v866_v20  ;;  %v4155_v33 = vld [vmem:[#allocation2 + $0x328] sm:$0xf] }
 0x11f   : > { %v2973_v31 = vadd.f32 %v2972_v11, %v2884_v59  ;;  %v614_v49 = vor.u32 %v613_v9, %v610_v27  ;;  %v619_v47 = vrot.slane %v617_v52, 5  ;;  %v4148_v59 = vor.u32 %v4712_v1, %v4147_v19  ;;  %v4708_v11 = vld [vmem:[#allocation2 + $0x324] sm:$0xf]  ;;  %940 = vst [vmem:[#allocation2 + $0x3b0] sm:$0xf] %v864_v4 }
 0x120   : > { %941 = vst [vmem:[#allocation2 + $0x3d4] sm:$0xf] %v867_v8  ;;  %v4713_v27 = vld [vmem:[#allocation2 + $0x348] sm:$0xf0] }
 0x121   : > { %3100 = vmatmul.bf16.gmra.mxu0 %v4120_v10  ;;  %v5654_v29 = vadd.f32 %v3061_v61, %v2973_v31  ;;  %v4149_v61 = vld [vmem:[#allocation2 + $0x344] sm:$0xf0]  ;;  %v615_v46 = vrot.slane %v614_v49, 4  ;;  %v624_v32 = vor.u32 %v623_v54, %v619_v47  ;;  %1072 = vst [vmem:[#allocation2 + $0x374] sm:$0xf] %v864_v4  ;;  %v632_v54 = vshrl.u32 %v5198_v22, 16 }
 0x122   : > { %v4817_v31 = vld [vmem:[%s5903_s1 + $0x208] sm:$0xff]  ;;  %v4152_v1 = vor.u32 %v4708_v11, %v4149_v61  ;;  %1073 = vst [vmem:[#allocation2 + $0x398] sm:$0xf] %v867_v8  ;;  %v645_v11 = vshrl.u32 %v5202_v25, 16 }
 0x123   : > { %v625_v52 = vrot.slane %v624_v32, 4  ;;  %3404 = vmatpush.bf16.msra.mxu0 %v4817_v31  ;;  %1204 = vst [vmem:[#allocation2 + $0x338] sm:$0xf] %v864_v4  ;;  %v4183_v61 = vld [vmem:[#allocation2 + $0x368] sm:$0xf]  ;;  %v634_v4 = vrot.slane %v632_v54, 4 }
 0x124   : > { %v2885_v45 = vpop.f32.mrf.mxu2  ;;  %v2799_v10 = vpop.f32.mrf.mxu1  ;;  %1205 = vst [vmem:[#allocation2 + $0x35c] sm:$0xf] %v867_v8  ;;  %v647_v8 = vrot.slane %v645_v11, 4 }
 0x125   : > { %v2886_v42 = vadd.f32 %v2885_v45, %v2797_v17  ;;  %v2800_v12 = vadd.f32 %v2799_v10, %v5544_v34  ;;  %v629_v17 = vrot.slane %v627_v40, 5  ;;  %v620_v34 = vsel %vm5237_vm2, %v615_v46, %v619_v47  ;;  %v4716_v47 = vld [vmem:[#allocation2 + $0x364] sm:$0xf]  ;;  %v4177_v10 = vld [vmem:[#allocation2 + $0x384] sm:$0xf0] }
 0x126   : > { %v3063_v53 = vpop.f32.mrf.mxu0  ;;  %v2974_v2 = vpop.f32.mrf.mxu3  ;;  %1030 = vst [vmem:[#allocation2 + $0x3b8] sm:$0xf] %v620_v34  ;;  %v635_v40 = vshll.u32 %v5198_v22, 16 }
 0x127   : > { %v2975_v19 = vadd.f32 %v2974_v2, %v2886_v42  ;;  %2838 = vmatmul.bf16.gmra.mxu1 %v4144_v58  ;;  %v630_v9 = vsel %vm5237_vm2, %v625_v52, %v629_v17  ;;  %v4156_v58 = vor.u32 %v4713_v27, %v4155_v33  ;;  %715 = vst [vmem:[#allocation2 + $0x3f4] sm:$0xf] %v620_v34  ;;  %v5680_v42 = vld [vmem:[%s4909_s23 + $0xbc] sm:$0x1]  ;;  %v3737_v2 = vrot.slane %v5108_v23, 9 }
 0x128   : > { %1031 = vst [vmem:[#allocation2 + $0x3dc] sm:$0xf] %v630_v9  ;;  %v637_v46 = vrot.slane %v635_v40, 5  ;;  %v873_v52 = vrot.slane %v5652_v0, 5  ;;  %v651_v17 = vshll.u32 %v5680_v42, 16 }
 0x129   : > { %2927 = vmatmul.bf16.gmra.mxu2 %v4148_v59  ;;  %v5669_v50 = vadd.f32 %v3063_v53, %v2975_v19  ;;  %v641_v59 = vshll.u32 %v5202_v25, 16  ;;  %716 = vst [vmem:[#allocation2 + $0x418] sm:$0xf] %v630_v9  ;;  %v4721_v53 = vld [vmem:[#allocation2 + $0x388] sm:$0xf0] }
 0x12a   : > { %1162 = vst [vmem:[#allocation2 + $0x37c] sm:$0xf] %v620_v34  ;;  %v638_v19 = vor.u32 %v637_v46, %v634_v4  ;;  %v4717_v27 = vld [vmem:[#allocation2 + $0x36c] sm:$0xf]  ;;  %v653_v40 = vrot.slane %v651_v17, 5 }
 0x12b   : > { %3016 = vmatmul.bf16.gmra.mxu3 %v4152_v1  ;;  %1163 = vst [vmem:[#allocation2 + $0x3a0] sm:$0xf] %v630_v9  ;;  %v4180_v1 = vor.u32 %v4716_v47, %v4177_v10  ;;  %v4184_v9 = vor.u32 %v4721_v53, %v4183_v61  ;;  %v4191_v10 = vld [vmem:[#allocation2 + $0x370] sm:$0xf] }
 0x12c   : > { %v2888_v60 = vpop.f32.mrf.mxu2  ;;  %v2801_v14 = vpop.f32.mrf.mxu1  ;;  %v4213_v53 = vld [vmem:[#allocation2 + $0x3cc] sm:$0xf0] }
 0x12d   : > { %v2889_v43 = vadd.f32 %v2888_v60, %v2800_v12  ;;  %v2802_v57 = vadd.f32 %v2801_v14, %v5565_v15  ;;  %v870_v15 = vrot.slane %v5112_v24, 5  ;;  %v643_v12 = vrot.slane %v641_v59, 5  ;;  %v4185_v60 = vld [vmem:[#allocation2 + $0x38c] sm:$0xf0]  ;;  %v4722_v59 = vld [vmem:[#allocation2 + $0x390] sm:$0xf0] }
 0x12e   : > { %v3066_v49 = vpop.f32.mrf.mxu0  ;;  %v2977_v20 = vpop.f32.mrf.mxu3  ;;  %v4188_v47 = vor.u32 %v4717_v27, %v4185_v60  ;;  %v4192_v46 = vor.u32 %v4722_v59, %v4191_v10 }
 0x12f   : > { %v2978_v45 = vadd.f32 %v2977_v20, %v2889_v43  ;;  %v872_v31 = vrot.slane %v870_v15, 4  ;;  %v648_v24 = vor.u32 %v647_v8, %v643_v12  ;;  %v871_v14 = vsel %vm5258_vm5, %v3737_v2, %v870_v15  ;;  %v4725_v8 = vld [vmem:[#allocation2 + $0x3ac] sm:$0xf] }
 0x130   : > { %942 = vst [vmem:[#allocation2 + $0x3f8] sm:$0xf] %v871_v14 }
 0x131   : > { %3105 = vmatmul.bf16.gmra.mxu0 %v4156_v58  ;;  %v5682_v32 = vadd.f32 %v3066_v49, %v2978_v45  ;;  %v639_v58 = vrot.slane %v638_v19, 4  ;;  %v874_v23 = vsel %vm5258_vm5, %v872_v31, %v873_v52  ;;  %1074 = vst [vmem:[#allocation2 + $0x3bc] sm:$0xf] %v871_v14  ;;  %v649_v54 = vrot.slane %v648_v24, 4  ;;  %v4800_v19 = vld [vmem:[%s5903_s1 + $0x180] sm:$0xff] }
 0x132   : > { %943 = vst [vmem:[#allocation2 + $0x41c] sm:$0xf] %v874_v23  ;;  %v4219_v52 = vld [vmem:[#allocation2 + $0x3b0] sm:$0xf]  ;;  %v5705_v24 = vld [vmem:[%s4909_s23 + $0xc4] sm:$0xf]  ;;  %3227 = vmatpush.bf16.msra.mxu2 %v4800_v19 }
 0x133   : > { %1075 = vst [vmem:[#allocation2 + $0x3e0] sm:$0xf] %v874_v23  ;;  %v644_v45 = vsel %vm5237_vm2, %v639_v58, %v643_v12  ;;  %v654_v61 = vsel %vm5237_vm2, %v649_v54, %v653_v40  ;;  %v988_v27 = vshll.u32 %v5705_v24, 16  ;;  %v992_v60 = vshrl.u32 %v5705_v24, 16  ;;  %v4808_v58 = vld [vmem:[%s5903_s1 + $0x1c0] sm:$0xff] }
 0x134   : > { %v2890_v33 = vpop.f32.mrf.mxu2  ;;  %v2804_v34 = vpop.f32.mrf.mxu1  ;;  %1206 = vst [vmem:[#allocation2 + $0x380] sm:$0xf] %v871_v14  ;;  %v4730_v14 = vld [vmem:[#allocation2 + $0x3d0] sm:$0xf0]  ;;  %3316 = vmatpush.bf16.msra.mxu3 %v4808_v58  ;;  %v880_v54 = vrot.slane %v5680_v42, 5 }
 0x135   : > { %v2891_v43 = vadd.f32 %v2890_v33, %v2802_v57  ;;  %1207 = vst [vmem:[#allocation2 + $0x3a4] sm:$0xf] %v874_v23  ;;  %v2805_v11 = vadd.f32 %v2804_v34, %v5386_v5  ;;  %v5702_v5 = vld [vmem:[%s4909_s23 + $0xc0] sm:$0xf]  ;;  %v877_v34 = vrot.slane %v5202_v25, 5  ;;  %v4216_v25 = vor.u32 %v4725_v8, %v4213_v53 }
 0x136   : > { %v3068_v49 = vpop.f32.mrf.mxu0  ;;  %v2979_v20 = vpop.f32.mrf.mxu3  ;;  %1032 = vst [vmem:[#allocation2 + $0x400] sm:$0xf] %v644_v45  ;;  %v979_v17 = vshrl.u32 %v5702_v5, 16  ;;  %v982_v33 = vshll.u32 %v5702_v5, 16  ;;  %v990_v10 = vrot.slane %v988_v27, 5 }
 0x137   : > { %v2980_v0 = vadd.f32 %v2979_v20, %v2891_v43  ;;  %2843 = vmatmul.bf16.gmra.mxu1 %v4180_v1  ;;  %1033 = vst [vmem:[#allocation2 + $0x424] sm:$0xf] %v654_v61  ;;  %v4792_v43 = vld [vmem:[%s5903_s1 + $0x140] sm:$0xff]  ;;  %v3738_v20 = vrot.slane %v5198_v22, 9  ;;  %v994_v22 = vrot.slane %v992_v60, 4 }
 0x138   : > { %717 = vst [vmem:[#allocation2 + $0x43c] sm:$0xf] %v644_v45  ;;  %3138 = vmatpush.bf16.msra.mxu1 %v4792_v43  ;;  %v981_v40 = vrot.slane %v979_v17, 4  ;;  %v4227_v27 = vld [vmem:[#allocation2 + $0x3b8] sm:$0xf] }
 0x139   : > { %2932 = vmatmul.bf16.gmra.mxu2 %v4184_v9  ;;  %v5693_v57 = vadd.f32 %v3068_v49, %v2980_v0  ;;  %718 = vst [vmem:[#allocation2 + $0x460] sm:$0xf] %v654_v61  ;;  %v4726_v49 = vld [vmem:[#allocation2 + $0x3b4] sm:$0xf]  ;;  %v879_v0 = vrot.slane %v877_v34, 4 }
 0x13a   : > { %1164 = vst [vmem:[#allocation2 + $0x3c4] sm:$0xf] %v644_v45  ;;  %v984_v45 = vrot.slane %v982_v33, 5  ;;  %v4731_v60 = vld [vmem:[#allocation2 + $0x3d8] sm:$0xf0] }
 0x13b   : > { %3021 = vmatmul.bf16.gmra.mxu3 %v4188_v47  ;;  %1165 = vst [vmem:[#allocation2 + $0x3e8] sm:$0xf] %v654_v61  ;;  %v232_v47 = vld [vmem:[%s4909_s23 + $0xc8] sm:$0x1]  ;;  %v878_v61 = vsel %vm5258_vm5, %v3738_v20, %v877_v34 }
 0x13c   : > { %v2893_v15 = vpop.f32.mrf.mxu2  ;;  %v2806_v4 = vpop.f32.mrf.mxu1  ;;  %976 = vst [vmem:[#allocation2 + $0x444] sm:$0xf] %v5702_v5  ;;  %v985_v42 = vor.u32 %v984_v45, %v981_v40  ;;  %v4249_v40 = vld [vmem:[#allocation2 + $0x414] sm:$0xf0] }
 0x13d   : > { %v2894_v12 = vadd.f32 %v2893_v15, %v2805_v11  ;;  %v2807_v23 = vadd.f32 %v2806_v4, %v5398_v21  ;;  %v4220_v15 = vor.u32 %v4730_v14, %v4219_v52  ;;  %v4221_v21 = vld [vmem:[#allocation2 + $0x3d4] sm:$0xf0]  ;;  %977 = vst [vmem:[#allocation2 + $0x468] sm:$0xf] %v5705_v24 }
 0x13e   : > { %v3071_v2 = vpop.f32.mrf.mxu0  ;;  %v2982_v31 = vpop.f32.mrf.mxu3  ;;  %944 = vst [vmem:[#allocation2 + $0x440] sm:$0xf] %v878_v61  ;;  %v986_v52 = vrot.slane %v985_v42, 4 }
 0x13f   : > { %v2983_v1 = vadd.f32 %v2982_v31, %v2894_v12  ;;  %v998_v12 = vshll.u32 %v232_v47, 16  ;;  %v995_v31 = vor.u32 %v994_v22, %v990_v10  ;;  %1076 = vst [vmem:[#allocation2 + $0x404] sm:$0xf] %v878_v61  ;;  %v4735_v22 = vld [vmem:[#allocation2 + $0x3fc] sm:$0xf] }
 0x140   : > { %1208 = vst [vmem:[#allocation2 + $0x3c8] sm:$0xf] %v878_v61 }
 0x141   : > { %3110 = vmatmul.bf16.gmra.mxu0 %v4192_v46  ;;  %v5718_v9 = vadd.f32 %v3071_v2, %v2983_v1  ;;  %v881_v46 = vsel %vm5258_vm5, %v879_v0, %v880_v54  ;;  %v4816_v2 = vld [vmem:[%s5903_s1 + $0x200] sm:$0xff]  ;;  %v4224_v1 = vor.u32 %v4726_v49, %v4221_v21  ;;  %v996_v17 = vrot.slane %v995_v31, 4  ;;  %1108 = vst [vmem:[#allocation2 + $0x408] sm:$0xf] %v5702_v5 }
 0x142   : > { %945 = vst [vmem:[#allocation2 + $0x464] sm:$0xf] %v881_v46  ;;  %3405 = vmatpush.bf16.msra.mxu0 %v4816_v2  ;;  %v1000_v33 = vrot.slane %v998_v12, 5 }
 0x143   : > { %1077 = vst [vmem:[#allocation2 + $0x428] sm:$0xf] %v881_v46 }
 0x144   : > { %v2895_v59 = vpop.f32.mrf.mxu2  ;;  %v2809_v11 = vpop.f32.mrf.mxu1  ;;  %1209 = vst [vmem:[#allocation2 + $0x3ec] sm:$0xf] %v881_v46  ;;  %v1001_v20 = vsel %vm5237_vm2, %v996_v17, %v1000_v33 }
 0x145   : > { %v2896_v4 = vadd.f32 %v2895_v59, %v2807_v23  ;;  %v2810_v14 = vadd.f32 %v2809_v11, %v5417_v3  ;;  %v991_v23 = vsel %vm5237_vm2, %v986_v52, %v990_v10  ;;  %1109 = vst [vmem:[#allocation2 + $0x42c] sm:$0xf] %v5705_v24  ;;  %v4734_v3 = vld [vmem:[#allocation2 + $0x3f4] sm:$0xf]  ;;  %v4255_v59 = vld [vmem:[#allocation2 + $0x3f8] sm:$0xf] }
 0x146   : > { %v3073_v8 = vpop.f32.mrf.mxu0  ;;  %v2984_v53 = vpop.f32.mrf.mxu3  ;;  %1034 = vst [vmem:[#allocation2 + $0x448] sm:$0xf] %v991_v23  ;;  %v4739_v10 = vld [vmem:[#allocation2 + $0x418] sm:$0xf0] }
 0x147   : > { %v2985_v19 = vadd.f32 %v2984_v53, %v2896_v4  ;;  %2848 = vmatmul.bf16.gmra.mxu1 %v4216_v25  ;;  %v4228_v25 = vor.u32 %v4731_v60, %v4227_v27  ;;  %1035 = vst [vmem:[#allocation2 + $0x46c] sm:$0xf] %v1001_v20  ;;  %v4257_v4 = vld [vmem:[#allocation2 + $0x41c] sm:$0xf0]  ;;  %v4256_v42 = vor.u32 %v4739_v10, %v4255_v59 }
 0x148   : > { %1166 = vst [vmem:[#allocation2 + $0x40c] sm:$0xf] %v991_v23  ;;  %v4260_v2 = vor.u32 %v4735_v22, %v4257_v4  ;;  %v4285_v23 = vld [vmem:[#allocation2 + $0x45c] sm:$0xf0] }
 0x149   : > { %2937 = vmatmul.bf16.gmra.mxu2 %v4220_v15  ;;  %v5733_v34 = vadd.f32 %v3073_v8, %v2985_v19  ;;  %1167 = vst [vmem:[#allocation2 + $0x430] sm:$0xf] %v1001_v20  ;;  %v4252_v15 = vor.u32 %v4734_v3, %v4249_v40  ;;  %v4263_v19 = vld [vmem:[#allocation2 + $0x400] sm:$0xf]  ;;  %v4748_v20 = vld [vmem:[#allocation2 + $0x460] sm:$0xf0] }
 0x14a   : > { %v4744_v3 = vld [vmem:[#allocation2 + $0x444] sm:$0xf]  ;;  %v4293_v40 = vld [vmem:[#allocation2 + $0x464] sm:$0xf0] }
 0x14b   : > { %3026 = vmatmul.bf16.gmra.mxu3 %v4224_v1  ;;  %v4740_v1 = vld [vmem:[#allocation2 + $0x420] sm:$0xf0] }
 0x14c   : > { %v2898_v58 = vpop.f32.mrf.mxu2  ;;  %v2811_v43 = vpop.f32.mrf.mxu1  ;;  %v4264_v33 = vor.u32 %v4740_v1, %v4263_v19 }
 0x14d   : > { %v2899_v49 = vadd.f32 %v2898_v58, %v2810_v14  ;;  %v2812_v11 = vadd.f32 %v2811_v43, %v5446_v41  ;;  %v4743_v43 = vld [vmem:[#allocation2 + $0x43c] sm:$0xf]  ;;  %v4299_v4 = vld [vmem:[#allocation2 + $0x448] sm:$0xf] }
 0x14e   : > { %v3076_v0 = vpop.f32.mrf.mxu0  ;;  %v2987_v47 = vpop.f32.mrf.mxu3 }
 0x14f   : > { %v2988_v54 = vadd.f32 %v2987_v47, %v2899_v49  ;;  %v4291_v49 = vld [vmem:[#allocation2 + $0x440] sm:$0xf]  ;;  %v4288_v47 = vor.u32 %v4743_v43, %v4285_v23  ;;  %v4611_v43 = vld [vmem:[#allocation2 + $0x1c] sm:$0xf] }
 0x150   : > { %v4292_v10 = vor.u32 %v4748_v20, %v4291_v49  ;;  %v3769_v23 = vld [vmem:[#allocation2 + $0x3c] sm:$0xf0] }
 0x151   : > { %3115 = vmatmul.bf16.gmra.mxu0 %v4228_v25  ;;  %v5742_v45 = vadd.f32 %v3076_v0, %v2988_v54 }
 0x154   : > { %v2900_v21 = vpop.f32.mrf.mxu2  ;;  %v2814_v61 = vpop.f32.mrf.mxu1 }
 0x155   : > { %v2901_v46 = vadd.f32 %v2900_v21, %v2812_v11  ;;  %v2815_v52 = vadd.f32 %v2814_v61, %v5468_v26  ;;  %v4296_v61 = vor.u32 %v4744_v3, %v4293_v40  ;;  %v3775_v40 = vld [vmem:[#allocation2 + $0x20] sm:$0xf] }
 0x156   : > { %v3078_v12 = vpop.f32.mrf.mxu0  ;;  %v2989_v8 = vpop.f32.mrf.mxu3 }
 0x157   : > { %v2990_v53 = vadd.f32 %v2989_v8, %v2901_v46  ;;  %2853 = vmatmul.bf16.gmra.mxu1 %v4252_v15  ;;  %v4749_v46 = vld [vmem:[#allocation2 + $0x468] sm:$0xf0] }
 0x158   : > { %v4300_v8 = vor.u32 %v4749_v46, %v4299_v4 }
 0x159   : > { %2942 = vmatmul.bf16.gmra.mxu2 %v4256_v42  ;;  %v5745_v31 = vadd.f32 %v3078_v12, %v2990_v53 }
 0x15b   : > { %3031 = vmatmul.bf16.gmra.mxu3 %v4260_v2 }
 0x15c   : > { %v2903_v41 = vpop.f32.mrf.mxu2  ;;  %v2816_v17 = vpop.f32.mrf.mxu1 }
 0x15d   : > { %v2904_v27 = vadd.f32 %v2903_v41, %v2815_v52  ;;  %v2817_v0 = vadd.f32 %v2816_v17, %v5491_v18  ;;  %v4610_v52 = vld [vmem:[#allocation2 + $0x14] sm:$0xf]  ;;  %v3761_v41 = vld [vmem:[#allocation2 + $0x34] sm:$0xf0] }
 0x15e   : > { %v3081_v60 = vpop.f32.mrf.mxu0  ;;  %v2992_v14 = vpop.f32.mrf.mxu3 }
 0x15f   : > { %v2993_v58 = vadd.f32 %v2992_v14, %v2904_v27  ;;  %v4615_v27 = vld [vmem:[#allocation2 + $0x38] sm:$0xf0]  ;;  %v3764_v14 = vor.u32 %v4610_v52, %v3761_v41  ;;  %v4620_v52 = vld [vmem:[#allocation2 + $0x64] sm:$0xf]  ;;  %v3805_v41 = vld [vmem:[#allocation2 + $0x84] sm:$0xf0] }
 0x161   : > { %3120 = vmatmul.bf16.gmra.mxu0 %v4264_v33  ;;  %v5748_v25 = vadd.f32 %v3081_v60, %v2993_v58  ;;  %v3767_v33 = vld [vmem:[#allocation2 + $0x18] sm:$0xf] }
 0x162   : > { %v3768_v20 = vor.u32 %v4615_v27, %v3767_v33 }
 0x164   : > { %v2905_v54 = vpop.f32.mrf.mxu2  ;;  %v2819_v26 = vpop.f32.mrf.mxu1 }
 0x165   : > { %v2906_v59 = vadd.f32 %v2905_v54, %v2817_v0  ;;  %v2820_v42 = vadd.f32 %v2819_v26, %v5510_v36  ;;  %v3772_v26 = vor.u32 %v4611_v43, %v3769_v23  ;;  %v3811_v23 = vld [vmem:[#allocation2 + $0x68] sm:$0xf] }
 0x166   : > { %v3083_v11 = vpop.f32.mrf.mxu0  ;;  %v2994_v15 = vpop.f32.mrf.mxu3 }
 0x167   : > { %v2995_v21 = vadd.f32 %v2994_v15, %v2906_v59  ;;  %2858 = vmatmul.bf16.gmra.mxu1 %v4288_v47  ;;  %v4616_v59 = vld [vmem:[#allocation2 + $0x40] sm:$0xf0] }
 0x168   : > { %v3776_v15 = vor.u32 %v4616_v59, %v3775_v40 }
 0x169   : > { %2947 = vmatmul.bf16.gmra.mxu2 %v4292_v10  ;;  %v5751_v22 = vadd.f32 %v3083_v11, %v2995_v21 }
 0x16b   : > { %3036 = vmatmul.bf16.gmra.mxu3 %v4296_v61 }
 0x16c   : > { %v2908_v18 = vpop.f32.mrf.mxu2  ;;  %v2821_v12 = vpop.f32.mrf.mxu1 }
 0x16d   : > { %v2909_v53 = vadd.f32 %v2908_v18, %v2820_v42  ;;  %v2822_v60 = vadd.f32 %v2821_v12, %v5540_v6  ;;  %v4619_v42 = vld [vmem:[#allocation2 + $0x5c] sm:$0xf]  ;;  %v3797_v18 = vld [vmem:[#allocation2 + $0x7c] sm:$0xf0] }
 0x16e   : > { %v3086_v2 = vpop.f32.mrf.mxu0  ;;  %v2997_v19 = vpop.f32.mrf.mxu3 }
 0x16f   : > { %v2998_v1 = vadd.f32 %v2997_v19, %v2909_v53  ;;  %v4624_v53 = vld [vmem:[#allocation2 + $0x80] sm:$0xf0]  ;;  %v3800_v19 = vor.u32 %v4619_v42, %v3797_v18  ;;  %v4629_v42 = vld [vmem:[#allocation2 + $0xac] sm:$0xf]  ;;  %v3841_v18 = vld [vmem:[#allocation2 + $0xcc] sm:$0xf0] }
 0x171   : > { %3125 = vmatmul.bf16.gmra.mxu0 %v4300_v8  ;;  %v5754_v17 = vadd.f32 %v3086_v2, %v2998_v1  ;;  %v3803_v8 = vld [vmem:[#allocation2 + $0x60] sm:$0xf] }
 0x172   : > { %v3804_v27 = vor.u32 %v4624_v53, %v3803_v8 }
 0x174   : > { %v2910_v58 = vpop.f32.mrf.mxu2  ;;  %v2824_v36 = vpop.f32.mrf.mxu1 }
 0x175   : > { %v2911_v49 = vadd.f32 %v2910_v58, %v2822_v60  ;;  %v2825_v10 = vadd.f32 %v2824_v36, %v5392_v37  ;;  %v3808_v36 = vor.u32 %v4620_v52, %v3805_v41  ;;  %v3847_v41 = vld [vmem:[#allocation2 + $0xb0] sm:$0xf] }
 0x176   : > { %v3088_v0 = vpop.f32.mrf.mxu0  ;;  %v2999_v47 = vpop.f32.mrf.mxu3 }
 0x177   : > { %v3000_v54 = vadd.f32 %v2999_v47, %v2911_v49  ;;  %3139 = vmatmul.bf16.vlgmr.msra.gmra.mxu1 %v3764_v14  ;;  %v4625_v49 = vld [vmem:[#allocation2 + $0x88] sm:$0xf0] }
 0x178   : > { %v3812_v47 = vor.u32 %v4625_v49, %v3811_v23 }
 0x179   : > { %3228 = vmatmul.bf16.vlgmr.msra.gmra.mxu2 %v3768_v20  ;;  %v5757_v3 = vadd.f32 %v3088_v0, %v3000_v54 }
 0x17b   : > { %3317 = vmatmul.bf16.vlgmr.msra.gmra.mxu3 %v3772_v26 }
 0x17c   : > { %v2913_v6 = vpop.f32.mrf.mxu2  ;;  %v2826_v11 = vpop.f32.mrf.mxu1 }
 0x17d   : > { %v2914_v21 = vadd.f32 %v2913_v6, %v2825_v10  ;;  %v2827_v2 = vadd.f32 %v2826_v11, %v5415_v63  ;;  %v4628_v10 = vld [vmem:[#allocation2 + $0xa4] sm:$0xf]  ;;  %v3833_v6 = vld [vmem:[#allocation2 + $0xc4] sm:$0xf0] }
 0x17e   : > { %v3091_v61 = vpop.f32.mrf.mxu0  ;;  %v3002_v4 = vpop.f32.mrf.mxu3 }
 0x17f   : > { %v3003_v46 = vadd.f32 %v3002_v4, %v2914_v21  ;;  %v4633_v21 = vld [vmem:[#allocation2 + $0xc8] sm:$0xf0]  ;;  %v3836_v4 = vor.u32 %v4628_v10, %v3833_v6  ;;  %v4638_v10 = vld [vmem:[#allocation2 + $0xf4] sm:$0xf]  ;;  %v3877_v6 = vld [vmem:[#allocation2 + $0x114] sm:$0xf0] }
 0x181   : > { %3406 = vmatmul.bf16.vlgmr.msra.gmra.mxu0 %v3776_v15  ;;  %v5760_v12 = vadd.f32 %v3091_v61, %v3003_v46  ;;  %v3839_v15 = vld [vmem:[#allocation2 + $0xa8] sm:$0xf] }
 0x182   : > { %v3840_v53 = vor.u32 %v4633_v21, %v3839_v15 }
 0x184   : > { %v2915_v1 = vpop.f32.mrf.mxu2  ;;  %v2829_v37 = vpop.f32.mrf.mxu1 }
 0x185   : > { %v2916_v33 = vadd.f32 %v2915_v1, %v2827_v2  ;;  %v2830_v20 = vadd.f32 %v2829_v37, %v5434_v13  ;;  %v3844_v37 = vor.u32 %v4629_v42, %v3841_v18  ;;  %v3883_v18 = vld [vmem:[#allocation2 + $0xf8] sm:$0xf] }
 0x186   : > { %v3093_v60 = vpop.f32.mrf.mxu0  ;;  %v3004_v14 = vpop.f32.mrf.mxu3 }
 0x187   : > { %v3005_v58 = vadd.f32 %v3004_v14, %v2916_v33  ;;  %3144 = vmatmul.bf16.gmra.mxu1 %v3800_v19  ;;  %v4634_v33 = vld [vmem:[#allocation2 + $0xd0] sm:$0xf0] }
 0x188   : > { %v3848_v14 = vor.u32 %v4634_v33, %v3847_v41 }
 0x189   : > { %3233 = vmatmul.bf16.gmra.mxu2 %v3804_v27  ;;  %v5763_v43 = vadd.f32 %v3093_v60, %v3005_v58 }
 0x18b   : > { %3322 = vmatmul.bf16.gmra.mxu3 %v3808_v36 }
 0x18c   : > { %v2918_v63 = vpop.f32.mrf.mxu2  ;;  %v2831_v0 = vpop.f32.mrf.mxu1 }
 0x18d   : > { %v2919_v54 = vadd.f32 %v2918_v63, %v2830_v20  ;;  %v2832_v61 = vadd.f32 %v2831_v0, %v5464_v51  ;;  %v4637_v20 = vld [vmem:[#allocation2 + $0xec] sm:$0xf]  ;;  %v3869_v63 = vld [vmem:[#allocation2 + $0x10c] sm:$0xf0] }
 0x18e   : > { %v3096_v26 = vpop.f32.mrf.mxu0  ;;  %v3007_v40 = vpop.f32.mrf.mxu3 }
 0x18f   : > { %v3008_v59 = vadd.f32 %v3007_v40, %v2919_v54  ;;  %v4642_v54 = vld [vmem:[#allocation2 + $0x110] sm:$0xf0]  ;;  %v3872_v40 = vor.u32 %v4637_v20, %v3869_v63  ;;  %v4647_v20 = vld [vmem:[#allocation2 + $0x13c] sm:$0xf]  ;;  %v3913_v63 = vld [vmem:[#allocation2 + $0x15c] sm:$0xf0] }
 0x191   : > { %3411 = vmatmul.bf16.gmra.mxu0 %v3812_v47  ;;  %v5766_v11 = vadd.f32 %v3096_v26, %v3008_v59  ;;  %v3875_v47 = vld [vmem:[#allocation2 + $0xf0] sm:$0xf] }
 0x192   : > { %v3876_v21 = vor.u32 %v4642_v54, %v3875_v47 }
 0x194   : > { %v2920_v46 = vpop.f32.mrf.mxu2  ;;  %v2834_v13 = vpop.f32.mrf.mxu1 }
 0x195   : > { %v2921_v8 = vadd.f32 %v2920_v46, %v2832_v61  ;;  %v2835_v27 = vadd.f32 %v2834_v13, %v5485_v48  ;;  %v3880_v13 = vor.u32 %v4638_v10, %v3877_v6  ;;  %v3919_v6 = vld [vmem:[#allocation2 + $0x140] sm:$0xf] }
 0x196   : > { %v3098_v2 = vpop.f32.mrf.mxu0  ;;  %v3009_v19 = vpop.f32.mrf.mxu3 }
 0x197   : > { %v3010_v1 = vadd.f32 %v3009_v19, %v2921_v8  ;;  %3149 = vmatmul.bf16.gmra.mxu1 %v3836_v4  ;;  %v4643_v8 = vld [vmem:[#allocation2 + $0x118] sm:$0xf0] }
 0x198   : > { %v3884_v19 = vor.u32 %v4643_v8, %v3883_v18 }
 0x199   : > { %3238 = vmatmul.bf16.gmra.mxu2 %v3840_v53  ;;  %v5769_v52 = vadd.f32 %v3098_v2, %v3010_v1 }
 0x19b   : > { %3327 = vmatmul.bf16.gmra.mxu3 %v3844_v37 }
 0x19c   : > { %v2923_v51 = vpop.f32.mrf.mxu2  ;;  %v2836_v60 = vpop.f32.mrf.mxu1 }
 0x19d   : > { %v2924_v58 = vadd.f32 %v2923_v51, %v2835_v27  ;;  %v2837_v26 = vadd.f32 %v2836_v60, %v5501_v56  ;;  %v4646_v27 = vld [vmem:[#allocation2 + $0x134] sm:$0xf]  ;;  %v3905_v51 = vld [vmem:[#allocation2 + $0x154] sm:$0xf0] }
 0x19e   : > { %v3101_v36 = vpop.f32.mrf.mxu0  ;;  %v3012_v23 = vpop.f32.mrf.mxu3 }
 0x19f   : > { %v3013_v49 = vadd.f32 %v3012_v23, %v2924_v58  ;;  %v4651_v58 = vld [vmem:[#allocation2 + $0x158] sm:$0xf0]  ;;  %v3908_v23 = vor.u32 %v4646_v27, %v3905_v51  ;;  %v4656_v27 = vld [vmem:[#allocation2 + $0x184] sm:$0xf]  ;;  %v3949_v51 = vld [vmem:[#allocation2 + $0x1a4] sm:$0xf0] }
 0x1a1   : > { %3416 = vmatmul.bf16.gmra.mxu0 %v3848_v14  ;;  %v5772_v0 = vadd.f32 %v3101_v36, %v3013_v49  ;;  %v3911_v14 = vld [vmem:[#allocation2 + $0x138] sm:$0xf] }
 0x1a2   : > { %v3912_v54 = vor.u32 %v4651_v58, %v3911_v14 }
 0x1a4   : > { %v2925_v59 = vpop.f32.mrf.mxu2  ;;  %v2839_v48 = vpop.f32.mrf.mxu1 }
 0x1a5   : > { %v2926_v15 = vadd.f32 %v2925_v59, %v2837_v26  ;;  %v2840_v53 = vadd.f32 %v2839_v48, %v5536_v39  ;;  %v3916_v48 = vor.u32 %v4647_v20, %v3913_v63  ;;  %v3955_v63 = vld [vmem:[#allocation2 + $0x188] sm:$0xf] }
 0x1a6   : > { %v3103_v61 = vpop.f32.mrf.mxu0  ;;  %v3014_v4 = vpop.f32.mrf.mxu3 }
 0x1a7   : > { %v3015_v46 = vadd.f32 %v3014_v4, %v2926_v15  ;;  %3154 = vmatmul.bf16.gmra.mxu1 %v3872_v40  ;;  %v4652_v15 = vld [vmem:[#allocation2 + $0x160] sm:$0xf0] }
 0x1a8   : > { %v3920_v4 = vor.u32 %v4652_v15, %v3919_v6 }
 0x1a9   : > { %3243 = vmatmul.bf16.gmra.mxu2 %v3876_v21  ;;  %v5775_v42 = vadd.f32 %v3103_v61, %v3015_v46 }
 0x1ab   : > { %3332 = vmatmul.bf16.gmra.mxu3 %v3880_v13 }
 0x1ac   : > { %v2928_v56 = vpop.f32.mrf.mxu2  ;;  %v2841_v2 = vpop.f32.mrf.mxu1 }
 0x1ad   : > { %v2929_v1 = vadd.f32 %v2928_v56, %v2840_v53  ;;  %v2842_v36 = vadd.f32 %v2841_v2, %v5556_v7  ;;  %v4655_v53 = vld [vmem:[#allocation2 + $0x17c] sm:$0xf]  ;;  %v3941_v56 = vld [vmem:[#allocation2 + $0x19c] sm:$0xf0] }
 0x1ae   : > { %v3106_v37 = vpop.f32.mrf.mxu0  ;;  %v3017_v41 = vpop.f32.mrf.mxu3 }
 0x1af   : > { %v3018_v33 = vadd.f32 %v3017_v41, %v2929_v1  ;;  %v4660_v1 = vld [vmem:[#allocation2 + $0x1a0] sm:$0xf0]  ;;  %v3944_v41 = vor.u32 %v4655_v53, %v3941_v56 }
 0x1b1   : > { %3421 = vmatmul.bf16.gmra.mxu0 %v3884_v19  ;;  %v5778_v60 = vadd.f32 %v3106_v37, %v3018_v33  ;;  %v3947_v19 = vld [vmem:[#allocation2 + $0x180] sm:$0xf] }
 0x1b2   : > { %v3948_v58 = vor.u32 %v4660_v1, %v3947_v19  ;;  %v4665_v1 = vld [vmem:[#allocation2 + $0x1cc] sm:$0xf] }
 0x1b4   : > { %v2930_v49 = vpop.f32.mrf.mxu2  ;;  %v2844_v39 = vpop.f32.mrf.mxu1 }
 0x1b5   : > { %v2931_v47 = vadd.f32 %v2930_v49, %v2842_v36  ;;  %v2845_v21 = vadd.f32 %v2844_v39, %v5406_v44  ;;  %v3952_v39 = vor.u32 %v4656_v27, %v3949_v51 }
 0x1b6   : > { %v3108_v26 = vpop.f32.mrf.mxu0  ;;  %v3019_v40 = vpop.f32.mrf.mxu3 }
 0x1b7   : > { %v3020_v59 = vadd.f32 %v3019_v40, %v2931_v47  ;;  %3159 = vmatmul.bf16.gmra.mxu1 %v3908_v23  ;;  %v4661_v47 = vld [vmem:[#allocation2 + $0x1a8] sm:$0xf0] }
 0x1b9   : > { %3248 = vmatmul.bf16.gmra.mxu2 %v3912_v54  ;;  %v5781_v10 = vadd.f32 %v3108_v26, %v3020_v59  ;;  %v5916_v54 = vld [vmem:[#allocation3_spill] sm:$0xff]  ;;  %v3956_v59 = vor.u32 %v4661_v47, %v3955_v63 }
 0x1bb   : > { %3337 = vmatmul.bf16.gmra.mxu3 %v3916_v48 }
 0x1bc   : > { %v2933_v7 = vpop.f32.mrf.mxu2  ;;  %v2846_v61 = vpop.f32.mrf.mxu1 }
 0x1bd   : > { %v2934_v46 = vadd.f32 %v2933_v7, %v2845_v21  ;;  %v2847_v37 = vadd.f32 %v2846_v61, %v5428_v55  ;;  %v4664_v7 = vld [vmem:[#allocation2 + $0x1c4] sm:$0xf]  ;;  %v3977_v61 = vld [vmem:[#allocation2 + $0x1e4] sm:$0xf0] }
 0x1be   : > { %v3111_v13 = vpop.f32.mrf.mxu0  ;;  %v3022_v18 = vpop.f32.mrf.mxu3  ;;  %v3980_v53 = vor.u32 %v4664_v7, %v3977_v61  ;;  %v4678_v7 = vld [vmem:[#allocation2 + $0x230] sm:$0xf0]  ;;  %v5919_v61 = vld [vmem:[#allocation6_spill] sm:$0xff] }
 0x1bf   : > { %v3023_v8 = vadd.f32 %v3022_v18, %v2934_v46  ;;  %v3983_v46 = vld [vmem:[#allocation2 + $0x1c8] sm:$0xf] }
 0x1c0   : > { %v5917_v18 = vld [vmem:[#allocation4_spill] sm:$0xff] }
 0x1c1   : > { %3426 = vmatmul.bf16.gmra.mxu0 %v3920_v4  ;;  %v5784_v2 = vadd.f32 %v3111_v13, %v3023_v8  ;;  %v4669_v13 = vld [vmem:[#allocation2 + $0x1e8] sm:$0xf0] }
 0x1c4   : > { %v2935_v33 = vpop.f32.mrf.mxu2  ;;  %v2849_v44 = vpop.f32.mrf.mxu1 }
 0x1c5   : > { %v2936_v14 = vadd.f32 %v2935_v33, %v2847_v37  ;;  %v2850_v26 = vadd.f32 %v2849_v44, %v5916_v54  ;;  %v3985_v37 = vld [vmem:[#allocation2 + $0x1ec] sm:$0xf0]  ;;  %v3984_v33 = vor.u32 %v4669_v13, %v3983_v46 }
 0x1c6   : > { %v3113_v36 = vpop.f32.mrf.mxu0  ;;  %v3024_v23 = vpop.f32.mrf.mxu3 }
 0x1c7   : > { %v3025_v49 = vadd.f32 %v3024_v23, %v2936_v14  ;;  %3164 = vmatmul.bf16.gmra.mxu1 %v3944_v41  ;;  %v3988_v14 = vor.u32 %v4665_v1, %v3985_v37  ;;  %v4670_v23 = vld [vmem:[#allocation2 + $0x1f0] sm:$0xf0] }
 0x1c9   : > { %3253 = vmatmul.bf16.gmra.mxu2 %v3948_v58  ;;  %v5787_v20 = vadd.f32 %v3113_v36, %v3025_v49  ;;  %v3991_v36 = vld [vmem:[#allocation2 + $0x1d0] sm:$0xf] }
 0x1ca   : > { %v5918_v49 = vld [vmem:[#allocation5_spill] sm:$0xff]  ;;  %v3992_v54 = vor.u32 %v4670_v23, %v3991_v36  ;;  %v5920_v36 = vld [vmem:[#allocation7_spill] sm:$0xff] }
 0x1cb   : > { %3342 = vmatmul.bf16.gmra.mxu3 %v3952_v39 }
 0x1cc   : > { %v2938_v55 = vpop.f32.mrf.mxu2  ;;  %v2851_v40 = vpop.f32.mrf.mxu1 }
 0x1cd   : > { %v2939_v48 = vadd.f32 %v2938_v55, %v2850_v26  ;;  %v2852_v8 = vadd.f32 %v2851_v40, %v5917_v18 }
 0x1ce   : > { %v3116_v6 = vpop.f32.mrf.mxu0  ;;  %v3027_v15 = vpop.f32.mrf.mxu3 }
 0x1cf   : > { %v3028_v21 = vadd.f32 %v3027_v15, %v2939_v48  ;;  %v4673_v48 = vld [vmem:[#allocation2 + $0x20c] sm:$0xf] }
 0x1d1   : > { %3431 = vmatmul.bf16.gmra.mxu0 %v3956_v59  ;;  %v5790_v4 = vadd.f32 %v3116_v6, %v3028_v21  ;;  %v4013_v6 = vld [vmem:[#allocation2 + $0x22c] sm:$0xf0] }
 0x1d2   : > { %v4019_v21 = vld [vmem:[#allocation2 + $0x210] sm:$0xf]  ;;  %v4016_v13 = vor.u32 %v4673_v48, %v4013_v6  ;;  %v4055_v6 = vld [vmem:[#allocation2 + $0x258] sm:$0xf] }
 0x1d3   : > { %v4020_v1 = vor.u32 %v4678_v7, %v4019_v21  ;;  %v4687_v21 = vld [vmem:[#allocation2 + $0x278] sm:$0xf0]  ;;  %v5921_v7 = vld [vmem:[#allocation8_spill] sm:$0xff] }
 0x1d4   : > { %v2940_v56 = vpop.f32.mrf.mxu2  ;;  %v2854_v19 = vpop.f32.mrf.mxu1 }
 0x1d5   : > { %v2941_v41 = vadd.f32 %v2940_v56, %v2852_v8  ;;  %v2855_v39 = vadd.f32 %v2854_v19, %v5918_v49  ;;  %v4021_v56 = vld [vmem:[#allocation2 + $0x234] sm:$0xf0] }
 0x1d6   : > { %v3118_v44 = vpop.f32.mrf.mxu0  ;;  %v3029_v27 = vpop.f32.mrf.mxu3 }
 0x1d7   : > { %v3030_v51 = vadd.f32 %v3029_v27, %v2941_v41  ;;  %3169 = vmatmul.bf16.gmra.mxu1 %v3980_v53  ;;  %v4674_v53 = vld [vmem:[#allocation2 + $0x214] sm:$0xf] }
 0x1d9   : > { %3258 = vmatmul.bf16.gmra.mxu2 %v3984_v33  ;;  %v5793_v58 = vadd.f32 %v3118_v44, %v3030_v51  ;;  %v4024_v44 = vor.u32 %v4674_v53, %v4021_v56  ;;  %v4027_v51 = vld [vmem:[#allocation2 + $0x218] sm:$0xf]  ;;  %v4057_v53 = vld [vmem:[#allocation2 + $0x27c] sm:$0xf0] }
 0x1db   : > { %3347 = vmatmul.bf16.gmra.mxu3 %v3988_v14  ;;  %v4679_v14 = vld [vmem:[#allocation2 + $0x238] sm:$0xf0] }
 0x1dc   : > { %v2943_v63 = vpop.f32.mrf.mxu2  ;;  %v2856_v47 = vpop.f32.mrf.mxu1 }
 0x1dd   : > { %v2944_v26 = vadd.f32 %v2943_v63, %v2855_v39  ;;  %v2857_v46 = vadd.f32 %v2856_v47, %v5919_v61  ;;  %v4028_v63 = vor.u32 %v4679_v14, %v4027_v51  ;;  %v4063_v51 = vld [vmem:[#allocation2 + $0x260] sm:$0xf]  ;;  %v4688_v14 = vld [vmem:[#allocation2 + $0x280] sm:$0xf0] }
 0x1de   : > { %v3121_v55 = vpop.f32.mrf.mxu0  ;;  %v3032_v40 = vpop.f32.mrf.mxu3 }
 0x1df   : > { %v3033_v59 = vadd.f32 %v3032_v40, %v2944_v26  ;;  %v4682_v40 = vld [vmem:[#allocation2 + $0x254] sm:$0xf] }
 0x1e1   : > { %3436 = vmatmul.bf16.gmra.mxu0 %v3992_v54  ;;  %v5796_v15 = vadd.f32 %v3121_v55, %v3033_v59  ;;  %v4049_v59 = vld [vmem:[#allocation2 + $0x274] sm:$0xf0] }
 0x1e4   : > { %v2945_v18 = vpop.f32.mrf.mxu2  ;;  %v2859_v8 = vpop.f32.mrf.mxu1 }
 0x1e5   : > { %v2946_v19 = vadd.f32 %v2945_v18, %v2857_v46  ;;  %v2860_v23 = vadd.f32 %v2859_v8, %v5920_v36  ;;  %v4052_v46 = vor.u32 %v4682_v40, %v4049_v59  ;;  %v4683_v8 = vld [vmem:[#allocation2 + $0x25c] sm:$0xf]  ;;  %v4085_v40 = vld [vmem:[#allocation2 + $0x2bc] sm:$0xf0] }
 0x1e6   : > { %v3123_v37 = vpop.f32.mrf.mxu0  ;;  %v3034_v41 = vpop.f32.mrf.mxu3 }
 0x1e7   : > { %v3035_v33 = vadd.f32 %v3034_v41, %v2946_v19  ;;  %3174 = vmatmul.bf16.gmra.mxu1 %v4016_v13  ;;  %v4056_v19 = vor.u32 %v4687_v21, %v4055_v6  ;;  %v4696_v6 = vld [vmem:[#allocation2 + $0x2c0] sm:$0xf0] }
 0x1e9   : > { %3263 = vmatmul.bf16.gmra.mxu2 %v4020_v1  ;;  %v5799_v27 = vadd.f32 %v3123_v37, %v3035_v33  ;;  %v4060_v33 = vor.u32 %v4683_v8, %v4057_v53 }
 0x1eb   : > { %3352 = vmatmul.bf16.gmra.mxu3 %v4024_v44 }
 0x1ec   : > { %v2948_v49 = vpop.f32.mrf.mxu2  ;;  %v2861_v39 = vpop.f32.mrf.mxu1 }
 0x1ed   : > { %v2949_v47 = vadd.f32 %v2948_v49, %v2860_v23  ;;  %v2862_v61 = vadd.f32 %v2861_v39, %v5921_v7  ;;  %v4064_v39 = vor.u32 %v4688_v14, %v4063_v51  ;;  %v4099_v51 = vld [vmem:[#allocation2 + $0x2a8] sm:$0xf]  ;;  %v4697_v14 = vld [vmem:[#allocation2 + $0x2c8] sm:$0xf0] }
 0x1ee   : > { %v3126_v54 = vpop.f32.mrf.mxu0  ;;  %v3037_v26 = vpop.f32.mrf.mxu3 }
 0x1ef   : > { %v3038_v55 = vadd.f32 %v3037_v26, %v2949_v47 }
 0x1f1   : > { %3441 = vmatmul.bf16.gmra.mxu0 %v4028_v63  ;;  %v5802_v48 = vadd.f32 %v3126_v54, %v3038_v55  ;;  %v4691_v55 = vld [vmem:[#allocation2 + $0x29c] sm:$0xf] }
 0x1f2   : > { %v4088_v7 = vor.u32 %v4691_v55, %v4085_v40 }
 0x1f4   : > { %v2950_v13 = vpop.f32.mrf.mxu2  ;;  %v3140_v18 = vpop.f32.mrf.mxu1 }
 0x1f5   : > { %v2951_v56 = vadd.f32 %v2950_v13, %v2862_v61  ;;  %v3141_v36 = vadd.f32 %v3140_v18, %v5591_v38  ;;  %v4091_v38 = vld [vmem:[#allocation2 + $0x2a0] sm:$0xf]  ;;  %v4692_v13 = vld [vmem:[#allocation2 + $0x2a4] sm:$0xf]  ;;  %v4093_v18 = vld [vmem:[#allocation2 + $0x2c4] sm:$0xf0] }
 0x1f6   : > { %v3128_v1 = vpop.f32.mrf.mxu0  ;;  %v3039_v37 = vpop.f32.mrf.mxu3  ;;  %v4092_v53 = vor.u32 %v4696_v6, %v4091_v38  ;;  %v4700_v38 = vld [vmem:[#allocation2 + $0x2e4] sm:$0xf]  ;;  %v4121_v6 = vld [vmem:[#allocation2 + $0x304] sm:$0xf0] }
 0x1f7   : > { %v3040_v41 = vadd.f32 %v3039_v37, %v2951_v56  ;;  %3179 = vmatmul.bf16.gmra.mxu1 %v4052_v46  ;;  %v4096_v37 = vor.u32 %v4692_v13, %v4093_v18 }
 0x1f9   : > { %3268 = vmatmul.bf16.gmra.mxu2 %v4056_v19  ;;  %v5805_v44 = vadd.f32 %v3128_v1, %v3040_v41 }
 0x1fb   : > { %3357 = vmatmul.bf16.gmra.mxu3 %v4060_v33 }
 0x1fc   : > { %v3229_v23 = vpop.f32.mrf.mxu2  ;;  %v3142_v49 = vpop.f32.mrf.mxu1 }
 0x1fd   : > { %v3230_v63 = vadd.f32 %v3229_v23, %v3141_v36  ;;  %v3143_v21 = vadd.f32 %v3142_v49, %v5607_v30 }
 0x1fe   : > { %v3407_v47 = vpop.f32.mrf.mxu0  ;;  %v3318_v54 = vpop.f32.mrf.mxu3 }
 0x1ff   : > { %v3319_v26 = vadd.f32 %v3318_v54, %v3230_v63 }
 0x201   : > { %3446 = vmatmul.bf16.gmra.mxu0 %v4064_v39  ;;  %v3408_v59 = vadd.f32 %v3407_v47, %v3319_v26  ;;  %v4100_v47 = vor.u32 %v4697_v14, %v4099_v51 }
 0x203   : > { %3487 = vst [vmem:[%s5812_s20] sm:$0xff] %v3408_v59  ;;  %v3556_v33 = vmul.f32 %v3408_v59, %v3408_v59 }
 0x204   : > { %v3231_v61 = vpop.f32.mrf.mxu2  ;;  %v3145_v46 = vpop.f32.mrf.mxu1 }
 0x205   : > { %v3232_v8 = vadd.f32 %v3231_v61, %v3143_v21  ;;  %v3146_v23 = vadd.f32 %v3145_v46, %v5620_v16  ;;  %v4705_v61 = vld [vmem:[#allocation2 + $0x308] sm:$0xf0]  ;;  %v4124_v46 = vor.u32 %v4700_v38, %v4121_v6 }
 0x206   : > { %v3409_v56 = vpop.f32.mrf.mxu0  ;;  %v3320_v19 = vpop.f32.mrf.mxu3 }
 0x207   : > { %v3321_v1 = vadd.f32 %v3320_v19, %v3232_v8  ;;  %3184 = vmatmul.bf16.gmra.mxu1 %v4088_v7  ;;  %v4127_v7 = vld [vmem:[#allocation2 + $0x2e8] sm:$0xf] }
 0x209   : > { %v3410_v41 = vadd.f32 %v3409_v56, %v3321_v1  ;;  %3273 = vmatmul.bf16.gmra.mxu2 %v4092_v53  ;;  %v4701_v53 = vld [vmem:[#allocation2 + $0x2ec] sm:$0xf]  ;;  %v4129_v56 = vld [vmem:[#allocation2 + $0x30c] sm:$0xf0] }
 0x20a   : > { %v4132_v14 = vor.u32 %v4701_v53, %v4129_v56  ;;  %v4710_v56 = vld [vmem:[#allocation2 + $0x334] sm:$0xf] }
 0x20b   : > { %3488 = vst [vmem:[%s5812_s20 + $0x8] sm:$0xff] %v3410_v41  ;;  %v3519_v30 = vadd.f32 %v3410_v41, %v3408_v59  ;;  %v3557_v36 = vmul.f32 %v3410_v41, %v3410_v41  ;;  %3362 = vmatmul.bf16.gmra.mxu3 %v4096_v37  ;;  %v4128_v37 = vor.u32 %v4705_v61, %v4127_v7  ;;  %v4157_v7 = vld [vmem:[#allocation2 + $0x34c] sm:$0xf0] }
 0x20c   : > { %v3234_v49 = vpop.f32.mrf.mxu2  ;;  %v3147_v39 = vpop.f32.mrf.mxu1 }
 0x20d   : > { %v3588_v63 = vadd.f32 %v3557_v36, %v3556_v33  ;;  %v3235_v54 = vadd.f32 %v3234_v49, %v3146_v23  ;;  %v3148_v16 = vadd.f32 %v3147_v39, %v5632_v35  ;;  %v4706_v23 = vld [vmem:[#allocation2 + $0x310] sm:$0xf0] }
 0x20e   : > { %v3412_v26 = vpop.f32.mrf.mxu0  ;;  %v3323_v55 = vpop.f32.mrf.mxu3 }
 0x20f   : > { %v3324_v40 = vadd.f32 %v3323_v55, %v3235_v54 }
 0x211   : > { %3451 = vmatmul.bf16.gmra.mxu0 %v4100_v47  ;;  %v3413_v21 = vadd.f32 %v3412_v26, %v3324_v40 }
 0x213   : > { %3489 = vst [vmem:[%s5812_s20 + $0x10] sm:$0xff] %v3413_v21  ;;  %v3520_v59 = vadd.f32 %v3519_v30, %v3413_v21  ;;  %v3558_v13 = vmul.f32 %v3413_v21, %v3413_v21  ;;  %v4135_v30 = vld [vmem:[#allocation2 + $0x2f0] sm:$0xf]  ;;  %v4709_v21 = vld [vmem:[#allocation2 + $0x32c] sm:$0xf] }
 0x214   : > { %v3236_v18 = vpop.f32.mrf.mxu2  ;;  %v3150_v8 = vpop.f32.mrf.mxu1  ;;  %v4136_v26 = vor.u32 %v4706_v23, %v4135_v30  ;;  %v4171_v23 = vld [vmem:[#allocation2 + $0x338] sm:$0xf] }
 0x215   : > { %v3589_v19 = vadd.f32 %v3588_v63, %v3558_v13  ;;  %v3237_v1 = vadd.f32 %v3236_v18, %v3148_v16  ;;  %v3151_v39 = vadd.f32 %v3150_v8, %v5654_v29  ;;  %v4163_v13 = vld [vmem:[#allocation2 + $0x330] sm:$0xf]  ;;  %v4714_v16 = vld [vmem:[#allocation2 + $0x350] sm:$0xf0]  ;;  %v4160_v18 = vor.u32 %v4709_v21, %v4157_v7  ;;  %v4193_v7 = vld [vmem:[#allocation2 + $0x394] sm:$0xf0] }
 0x216   : > { %v3414_v41 = vpop.f32.mrf.mxu0  ;;  %v3325_v33 = vpop.f32.mrf.mxu3  ;;  %v4718_v21 = vld [vmem:[#allocation2 + $0x374] sm:$0xf] }
 0x217   : > { %v3326_v51 = vadd.f32 %v3325_v33, %v3237_v1  ;;  %3189 = vmatmul.bf16.gmra.mxu1 %v4124_v46 }
 0x219   : > { %v3415_v36 = vadd.f32 %v3414_v41, %v3326_v51  ;;  %3278 = vmatmul.bf16.gmra.mxu2 %v4128_v37  ;;  %v4164_v41 = vor.u32 %v4714_v16, %v4163_v13  ;;  %v4199_v13 = vld [vmem:[#allocation2 + $0x378] sm:$0xf]  ;;  %v4723_v16 = vld [vmem:[#allocation2 + $0x398] sm:$0xf0] }
 0x21b   : > { %3490 = vst [vmem:[%s5812_s20 + $0x18] sm:$0xff] %v3415_v36  ;;  %v3521_v35 = vadd.f32 %v3520_v59, %v3415_v36  ;;  %v3559_v49 = vmul.f32 %v3415_v36, %v3415_v36  ;;  %3367 = vmatmul.bf16.gmra.mxu3 %v4132_v14 }
 0x21c   : > { %v3239_v47 = vpop.f32.mrf.mxu2  ;;  %v3152_v63 = vpop.f32.mrf.mxu1 }
 0x21d   : > { %v3590_v54 = vadd.f32 %v3589_v19, %v3559_v49  ;;  %v3240_v55 = vadd.f32 %v3239_v47, %v3151_v39  ;;  %v3153_v29 = vadd.f32 %v3152_v63, %v5669_v50  ;;  %v4165_v19 = vld [vmem:[#allocation2 + $0x354] sm:$0xf0] }
 0x21e   : > { %v3417_v40 = vpop.f32.mrf.mxu0  ;;  %v3328_v38 = vpop.f32.mrf.mxu3  ;;  %v4168_v36 = vor.u32 %v4710_v56, %v4165_v19  ;;  %v4201_v19 = vld [vmem:[#allocation2 + $0x39c] sm:$0xf0] }
 0x21f   : > { %v3329_v6 = vadd.f32 %v3328_v38, %v3240_v55 }
 0x221   : > { %3456 = vmatmul.bf16.gmra.mxu0 %v4136_v26  ;;  %v3418_v61 = vadd.f32 %v3417_v40, %v3329_v6 }
 0x223   : > { %3491 = vst [vmem:[%s5812_s20 + $0x20] sm:$0xff] %v3418_v61  ;;  %v3522_v59 = vadd.f32 %v3521_v35, %v3418_v61  ;;  %v3560_v46 = vmul.f32 %v3418_v61, %v3418_v61  ;;  %v4715_v35 = vld [vmem:[#allocation2 + $0x358] sm:$0xf0] }
 0x224   : > { %v3241_v8 = vpop.f32.mrf.mxu2  ;;  %v3155_v53 = vpop.f32.mrf.mxu1  ;;  %v4172_v26 = vor.u32 %v4715_v35, %v4171_v23 }
 0x225   : > { %v3591_v1 = vadd.f32 %v3590_v54, %v3560_v46  ;;  %v3242_v37 = vadd.f32 %v3241_v8, %v3153_v29  ;;  %v3156_v39 = vadd.f32 %v3155_v53, %v5682_v32  ;;  %v4719_v8 = vld [vmem:[#allocation2 + $0x37c] sm:$0xf] }
 0x226   : > { %v3419_v33 = vpop.f32.mrf.mxu0  ;;  %v3330_v51 = vpop.f32.mrf.mxu3 }
 0x227   : > { %v3331_v14 = vadd.f32 %v3330_v51, %v3242_v37  ;;  %3194 = vmatmul.bf16.gmra.mxu1 %v4160_v18  ;;  %v4196_v18 = vor.u32 %v4718_v21, %v4193_v7  ;;  %v4727_v7 = vld [vmem:[#allocation2 + $0x3bc] sm:$0xf] }
 0x229   : > { %v3420_v30 = vadd.f32 %v3419_v33, %v3331_v14  ;;  %3283 = vmatmul.bf16.gmra.mxu2 %v4164_v41  ;;  %v4857_v41 = vld [vmem:[%s4909_s23 + $0xc8] sm:$0x1] }
 0x22a   : > { %v1044_v33 = vrot.slane %v4857_v41, 5 }
 0x22b   : > { %3492 = vst [vmem:[%s5812_s20 + $0x28] sm:$0xff] %v3420_v30  ;;  %v3523_v50 = vadd.f32 %v3522_v59, %v3420_v30  ;;  %v3561_v49 = vmul.f32 %v3420_v30, %v3420_v30  ;;  %3372 = vmatmul.bf16.gmra.mxu3 %v4168_v36  ;;  %v1041_v59 = vrot.slane %v5705_v24, 5  ;;  %v4200_v36 = vor.u32 %v4723_v16, %v4199_v13  ;;  %v234_v13 = vld [vmem:[%s4909_s23 + $0xd0] sm:$0xf] }
 0x22c   : > { %v3244_v47 = vpop.f32.mrf.mxu2  ;;  %v3157_v63 = vpop.f32.mrf.mxu1  ;;  %1111 = vst [vmem:[#allocation2 + $0x474] sm:$0xf] %v234_v13  ;;  %v1126_v41 = vshrl.u32 %v234_v13, 16 }
 0x22d   : > { %v3592_v54 = vadd.f32 %v3591_v1, %v3561_v49  ;;  %v3245_v55 = vadd.f32 %v3244_v47, %v3156_v39  ;;  %v3158_v29 = vadd.f32 %v3157_v63, %v5693_v57  ;;  %v3739_v1 = vrot.slane %v5702_v5, 9  ;;  %v4207_v49 = vld [vmem:[#allocation2 + $0x380] sm:$0xf]  ;;  %v4724_v39 = vld [vmem:[#allocation2 + $0x3a0] sm:$0xf0] }
 0x22e   : > { %v3422_v40 = vpop.f32.mrf.mxu0  ;;  %v3333_v38 = vpop.f32.mrf.mxu3  ;;  %v1043_v37 = vrot.slane %v1041_v59, 4 }
 0x22f   : > { %v3334_v6 = vadd.f32 %v3333_v38, %v3245_v55  ;;  %v1042_v23 = vsel %vm5258_vm5, %v3739_v1, %v1041_v59 }
 0x230   : > { %v1045_v57 = vsel %vm5258_vm5, %v1043_v37, %v1044_v33  ;;  %1210 = vst [vmem:[#allocation2 + $0x410] sm:$0xf] %v1042_v23 }
 0x231   : > { %3461 = vmatmul.bf16.gmra.mxu0 %v4172_v26  ;;  %v3423_v61 = vadd.f32 %v3422_v40, %v3334_v6  ;;  %1211 = vst [vmem:[#allocation2 + $0x434] sm:$0xf] %v1045_v57  ;;  %v233_v26 = vld [vmem:[%s4909_s23 + $0xcc] sm:$0xf]  ;;  %v4208_v6 = vor.u32 %v4724_v39, %v4207_v49  ;;  %v4237_v39 = vld [vmem:[#allocation2 + $0x3e4] sm:$0xf0] }
 0x232   : > { %1078 = vst [vmem:[#allocation2 + $0x44c] sm:$0xf] %v1042_v23 }
 0x233   : > { %3493 = vst [vmem:[%s5812_s20 + $0x30] sm:$0xff] %v3423_v61  ;;  %v3524_v32 = vadd.f32 %v3523_v50, %v3423_v61  ;;  %v3562_v46 = vmul.f32 %v3423_v61, %v3423_v61  ;;  %v4204_v50 = vor.u32 %v4719_v8, %v4201_v19  ;;  %v4229_v61 = vld [vmem:[#allocation2 + $0x3dc] sm:$0xf0]  ;;  %v235_v8 = vld [vmem:[%s4909_s23 + $0xd4] sm:$0x1]  ;;  %v1122_v19 = vshll.u32 %v234_v13, 16 }
 0x234   : > { %v3246_v53 = vpop.f32.mrf.mxu2  ;;  %v3160_v56 = vpop.f32.mrf.mxu1  ;;  %1079 = vst [vmem:[#allocation2 + $0x470] sm:$0xf] %v1045_v57  ;;  %v4232_v37 = vor.u32 %v4727_v7, %v4229_v61  ;;  %v1132_v33 = vshll.u32 %v235_v8, 16  ;;  %s3722_s23 = sshll.u32 %s5923_s13, 1 }
 0x235   : > { %v3593_v51 = vadd.f32 %v3592_v54, %v3562_v46  ;;  %v3247_v14 = vadd.f32 %v3246_v53, %v3158_v29  ;;  %v3161_v54 = vadd.f32 %v3160_v56, %v5718_v9  ;;  %v4235_v46 = vld [vmem:[#allocation2 + $0x3c0] sm:$0xf]  ;;  %1110 = vst [vmem:[#allocation2 + $0x450] sm:$0xf] %v233_v26  ;;  %v1113_v29 = vshrl.u32 %v233_v26, 16  ;;  %s181_s24 = scalar_lea.vmem %s5905_s3, %s3722_s23 }
 0x236   : > { %v3424_v24 = vpop.f32.mrf.mxu0  ;;  %v3335_v30 = vpop.f32.mrf.mxu3  ;;  %v4732_v9 = vld [vmem:[#allocation2 + $0x3e0] sm:$0xf0] }
 0x237   : > { %v3336_v35 = vadd.f32 %v3335_v30, %v3247_v14  ;;  %3199 = vmatmul.bf16.gmra.mxu1 %v4196_v18  ;;  %v1115_v53 = vrot.slane %v1113_v29, 4 }
 0x239   : > { %v3425_v5 = vadd.f32 %v3424_v24, %v3336_v35  ;;  %3288 = vmatmul.bf16.gmra.mxu2 %v4200_v36  ;;  %v1124_v36 = vrot.slane %v1122_v19, 5  ;;  %v1175_v24 = vrot.slane %v234_v13, 5  ;;  %v4728_v35 = vld [vmem:[#allocation2 + $0x3c4] sm:$0xf] }
 0x23b   : > { %3494 = vst [vmem:[%s5812_s20 + $0x38] sm:$0xff] %v3425_v5  ;;  %v3525_v47 = vadd.f32 %v3524_v32, %v3425_v5  ;;  %v3563_v63 = vmul.f32 %v3425_v5, %v3425_v5  ;;  %3377 = vmatmul.bf16.gmra.mxu3 %v4204_v50  ;;  %v1116_v32 = vshll.u32 %v233_v26, 16  ;;  %v1128_v50 = vrot.slane %v1126_v41, 4 }
 0x23c   : > { %v3249_v55 = vpop.f32.mrf.mxu2  ;;  %v3162_v40 = vpop.f32.mrf.mxu1 }
 0x23d   : > { %v3594_v38 = vadd.f32 %v3593_v51, %v3563_v63  ;;  %v3250_v21 = vadd.f32 %v3249_v55, %v3161_v54  ;;  %v1118_v56 = vrot.slane %v1116_v32, 5  ;;  %v4236_v51 = vor.u32 %v4732_v9, %v4235_v46  ;;  %v4733_v9 = vld [vmem:[#allocation2 + $0x3e8] sm:$0xf0] }
 0x23e   : > { %v3427_v16 = vpop.f32.mrf.mxu0  ;;  %v3338_v59 = vpop.f32.mrf.mxu3  ;;  %v3163_v57 = vadd.f32 %v3162_v40, %v5733_v34  ;;  %v3740_v54 = vrot.slane %v233_v26, 9  ;;  %v1177_v55 = vrot.slane %v1175_v24, 4  ;;  %v1129_v61 = vor.u32 %v1128_v50, %v1124_v36 }
 0x23f   : > { %v3339_v18 = vadd.f32 %v3338_v59, %v3250_v21  ;;  %v1119_v14 = vor.u32 %v1118_v56, %v1115_v53  ;;  %v4240_v26 = vor.u32 %v4728_v35, %v4237_v39  ;;  %v4737_v39 = vld [vmem:[#allocation2 + $0x40c] sm:$0xf] }
 0x240   : > { %v1176_v34 = vsel %vm5258_vm5, %v3740_v54, %v1175_v24  ;;  %v1130_v29 = vrot.slane %v1129_v61, 4 }
 0x241   : > { %3466 = vmatmul.bf16.gmra.mxu0 %v4208_v6  ;;  %v3428_v1 = vadd.f32 %v3427_v16, %v3339_v18  ;;  %v1120_v63 = vrot.slane %v1119_v14, 4  ;;  %v1178_v6 = vrot.slane %v235_v8, 5  ;;  %v1134_v16 = vrot.slane %v1132_v33, 5  ;;  %1212 = vst [vmem:[#allocation2 + $0x458] sm:$0xf] %v1176_v34 }
 0x242   : > { %v4243_v18 = vld [vmem:[#allocation2 + $0x3c8] sm:$0xf]  ;;  %v4736_v14 = vld [vmem:[#allocation2 + $0x404] sm:$0xf] }
 0x243   : > { %3495 = vst [vmem:[%s5812_s20 + $0x40] sm:$0xff] %v3428_v1  ;;  %v3526_v30 = vadd.f32 %v3525_v47, %v3428_v1  ;;  %v3564_v23 = vmul.f32 %v3428_v1, %v3428_v1  ;;  %v1125_v47 = vsel %vm5237_vm2, %v1120_v63, %v1124_v36  ;;  %v1179_v40 = vsel %vm5258_vm5, %v1177_v55, %v1178_v6  ;;  %v4265_v36 = vld [vmem:[#allocation2 + $0x424] sm:$0xf0]  ;;  %v4273_v63 = vld [vmem:[#allocation2 + $0x42c] sm:$0xf0] }
 0x244   : > { %v3251_v5 = vpop.f32.mrf.mxu2  ;;  %v3165_v49 = vpop.f32.mrf.mxu1  ;;  %1168 = vst [vmem:[#allocation2 + $0x454] sm:$0xf] %v1125_v47  ;;  %v1135_v32 = vsel %vm5237_vm2, %v1130_v29, %v1134_v16  ;;  %v4268_v50 = vor.u32 %v4736_v14, %v4265_v36  ;;  %v4276_v16 = vor.u32 %v4737_v39, %v4273_v63  ;;  %v4742_v47 = vld [vmem:[#allocation2 + $0x430] sm:$0xf0] }
 0x245   : > { %v3595_v21 = vadd.f32 %v3594_v38, %v3564_v23  ;;  %v3252_v7 = vadd.f32 %v3251_v5, %v3163_v57  ;;  %1213 = vst [vmem:[#allocation2 + $0x47c] sm:$0xf] %v1179_v40  ;;  %v3166_v28 = vadd.f32 %v3165_v49, %v5742_v45  ;;  %v4271_v23 = vld [vmem:[#allocation2 + $0x408] sm:$0xf]  ;;  %v4741_v57 = vld [vmem:[#allocation2 + $0x428] sm:$0xf0] }
 0x246   : > { %v3429_v59 = vpop.f32.mrf.mxu0  ;;  %v3340_v13 = vpop.f32.mrf.mxu3  ;;  %1169 = vst [vmem:[#allocation2 + $0x478] sm:$0xf] %v1135_v32  ;;  %v4272_v6 = vor.u32 %v4741_v57, %v4271_v23 }
 0x247   : > { %v3341_v46 = vadd.f32 %v3340_v13, %v3252_v7  ;;  %3204 = vmatmul.bf16.gmra.mxu1 %v4232_v37  ;;  %v4244_v37 = vor.u32 %v4733_v9, %v4243_v18  ;;  %v4279_v13 = vld [vmem:[#allocation2 + $0x410] sm:$0xf] }
 0x249   : > { %v3430_v38 = vadd.f32 %v3429_v59, %v3341_v46  ;;  %3293 = vmatmul.bf16.gmra.mxu2 %v4236_v51 }
 0x24b   : > { %3496 = vst [vmem:[%s5812_s20 + $0x48] sm:$0xff] %v3430_v38  ;;  %v3527_v8 = vadd.f32 %v3526_v30, %v3430_v38  ;;  %v3565_v53 = vmul.f32 %v3430_v38, %v3430_v38  ;;  %3382 = vmatmul.bf16.gmra.mxu3 %v4240_v26  ;;  %v4280_v38 = vor.u32 %v4742_v47, %v4279_v13  ;;  %v4746_v14 = vld [vmem:[#allocation2 + $0x454] sm:$0xf] }
 0x24c   : > { %v3254_v56 = vpop.f32.mrf.mxu2  ;;  %v3167_v19 = vpop.f32.mrf.mxu1  ;;  %v4751_v39 = vld [vmem:[#allocation2 + $0x478] sm:$0xf0] }
 0x24d   : > { %v3596_v1 = vadd.f32 %v3595_v21, %v3565_v53  ;;  %v3255_v41 = vadd.f32 %v3254_v56, %v3166_v28  ;;  %v3168_v45 = vadd.f32 %v3167_v19, %v5745_v31  ;;  %v4745_v53 = vld [vmem:[#allocation2 + $0x44c] sm:$0xf]  ;;  %v4301_v28 = vld [vmem:[#allocation2 + $0x46c] sm:$0xf0]  ;;  %v4309_v36 = vld [vmem:[#allocation2 + $0x474] sm:$0xf0] }
 0x24e   : > { %v3432_v33 = vpop.f32.mrf.mxu0  ;;  %v3343_v51 = vpop.f32.mrf.mxu3  ;;  %v4307_v19 = vld [vmem:[#allocation2 + $0x450] sm:$0xf] }
 0x24f   : > { %v3344_v62 = vadd.f32 %v3343_v51, %v3255_v41 }
 0x251   : > { %3471 = vmatmul.bf16.gmra.mxu0 %v4244_v37  ;;  %v3433_v24 = vadd.f32 %v3432_v33, %v3344_v62  ;;  %v4304_v33 = vor.u32 %v4745_v53, %v4301_v28 }
 0x253   : > { %3497 = vst [vmem:[%s5812_s20 + $0x50] sm:$0xff] %v3433_v24  ;;  %v3528_v30 = vadd.f32 %v3527_v8, %v3433_v24  ;;  %v3566_v35 = vmul.f32 %v3433_v24, %v3433_v24 }
 0x254   : > { %v3256_v5 = vpop.f32.mrf.mxu2  ;;  %v3170_v49 = vpop.f32.mrf.mxu1 }
 0x255   : > { %v3597_v54 = vadd.f32 %v3596_v1, %v3566_v35  ;;  %v3257_v55 = vadd.f32 %v3256_v5, %v3168_v45  ;;  %v3171_v40 = vadd.f32 %v3170_v49, %v5748_v25  ;;  %v4750_v1 = vld [vmem:[#allocation2 + $0x470] sm:$0xf0]  ;;  %v4315_v49 = vld [vmem:[#allocation2 + $0x458] sm:$0xf] }
 0x256   : > { %v3434_v21 = vpop.f32.mrf.mxu0  ;;  %v3345_v7 = vpop.f32.mrf.mxu3  ;;  %v4308_v57 = vor.u32 %v4750_v1, %v4307_v19 }
 0x257   : > { %v3346_v61 = vadd.f32 %v3345_v7, %v3257_v55  ;;  %3209 = vmatmul.bf16.gmra.mxu1 %v4268_v50  ;;  %v4312_v50 = vor.u32 %v4746_v14, %v4309_v36  ;;  %v4316_v7 = vor.u32 %v4751_v39, %v4315_v49 }
 0x259   : > { %v3435_v59 = vadd.f32 %v3434_v21, %v3346_v61  ;;  %3298 = vmatmul.bf16.gmra.mxu2 %v4272_v6 }
 0x25b   : > { %3498 = vst [vmem:[%s5812_s20 + $0x58] sm:$0xff] %v3435_v59  ;;  %v3529_v31 = vadd.f32 %v3528_v30, %v3435_v59  ;;  %v3567_v34 = vmul.f32 %v3435_v59, %v3435_v59  ;;  %3387 = vmatmul.bf16.gmra.mxu3 %v4276_v16 }
 0x25c   : > { %v3259_v46 = vpop.f32.mrf.mxu2  ;;  %v3172_v26 = vpop.f32.mrf.mxu1 }
 0x25d   : > { %v3598_v29 = vadd.f32 %v3597_v54, %v3567_v34  ;;  %v3260_v32 = vadd.f32 %v3259_v46, %v3171_v40  ;;  %v3173_v25 = vadd.f32 %v3172_v26, %v5751_v22 }
 0x25e   : > { %v3437_v18 = vpop.f32.mrf.mxu0  ;;  %v3348_v9 = vpop.f32.mrf.mxu3 }
 0x25f   : > { %v3349_v8 = vadd.f32 %v3348_v9, %v3260_v32 }
 0x261   : > { %3476 = vmatmul.bf16.gmra.mxu0 %v4280_v38  ;;  %v3438_v56 = vadd.f32 %v3437_v18, %v3349_v8 }
 0x263   : > { %3499 = vst [vmem:[%s5812_s20 + $0x60] sm:$0xff] %v3438_v56  ;;  %v3530_v37 = vadd.f32 %v3529_v31, %v3438_v56  ;;  %v3568_v41 = vmul.f32 %v3438_v56, %v3438_v56 }
 0x264   : > { %v3261_v51 = vpop.f32.mrf.mxu2  ;;  %v3175_v62 = vpop.f32.mrf.mxu1 }
 0x265   : > { %v3599_v24 = vadd.f32 %v3598_v29, %v3568_v41  ;;  %v3262_v23 = vadd.f32 %v3261_v51, %v3173_v25  ;;  %v3176_v54 = vadd.f32 %v3175_v62, %v5754_v17 }
 0x266   : > { %v3439_v30 = vpop.f32.mrf.mxu0  ;;  %v3350_v35 = vpop.f32.mrf.mxu3 }
 0x267   : > { %v3351_v45 = vadd.f32 %v3350_v35, %v3262_v23  ;;  %3214 = vmatmul.bf16.gmra.mxu1 %v4304_v33 }
 0x269   : > { %v3440_v5 = vadd.f32 %v3439_v30, %v3351_v45  ;;  %3303 = vmatmul.bf16.gmra.mxu2 %v4308_v57 }
 0x26b   : > { %3500 = vst [vmem:[%s5812_s20 + $0x68] sm:$0xff] %v3440_v5  ;;  %v3531_v22 = vadd.f32 %v3530_v37, %v3440_v5  ;;  %v3569_v63 = vmul.f32 %v3440_v5, %v3440_v5  ;;  %3392 = vmatmul.bf16.gmra.mxu3 %v4312_v50 }
 0x26c   : > { %v3264_v55 = vpop.f32.mrf.mxu2  ;;  %v3177_v6 = vpop.f32.mrf.mxu1 }
 0x26d   : > { %v3600_v21 = vadd.f32 %v3599_v24, %v3569_v63  ;;  %v3265_v61 = vadd.f32 %v3264_v55, %v3176_v54  ;;  %v3178_v40 = vadd.f32 %v3177_v6, %v5757_v3 }
 0x26e   : > { %v3442_v16 = vpop.f32.mrf.mxu0  ;;  %v3353_v59 = vpop.f32.mrf.mxu3 }
 0x26f   : > { %v3354_v13 = vadd.f32 %v3353_v59, %v3265_v61 }
 0x271   : > { %3481 = vmatmul.bf16.gmra.mxu0 %v4316_v7  ;;  %v3443_v47 = vadd.f32 %v3442_v16, %v3354_v13 }
 0x273   : > { %3501 = vst [vmem:[%s5812_s20 + $0x70] sm:$0xff] %v3443_v47  ;;  %v3532_v31 = vadd.f32 %v3531_v22, %v3443_v47  ;;  %v3570_v34 = vmul.f32 %v3443_v47, %v3443_v47 }
 0x274   : > { %v3266_v46 = vpop.f32.mrf.mxu2  ;;  %v3180_v26 = vpop.f32.mrf.mxu1 }
 0x275   : > { %v3601_v17 = vadd.f32 %v3600_v21, %v3570_v34  ;;  %v3267_v29 = vadd.f32 %v3266_v46, %v3178_v40  ;;  %v3181_v28 = vadd.f32 %v3180_v26, %v5760_v12 }
 0x276   : > { %v3444_v38 = vpop.f32.mrf.mxu0  ;;  %v3355_v32 = vpop.f32.mrf.mxu3 }
 0x277   : > { %v3356_v18 = vadd.f32 %v3355_v32, %v3267_v29 }
 0x279   : > { %v3445_v9 = vadd.f32 %v3444_v38, %v3356_v18 }
 0x27b   : > { %3502 = vst [vmem:[%s5812_s20 + $0x78] sm:$0xff] %v3445_v9  ;;  %v3533_v8 = vadd.f32 %v3532_v31, %v3445_v9  ;;  %v3571_v53 = vmul.f32 %v3445_v9, %v3445_v9 }
 0x27c   : > { %v3269_v56 = vpop.f32.mrf.mxu2  ;;  %v3182_v19 = vpop.f32.mrf.mxu1 }
 0x27d   : > { %v3602_v1 = vadd.f32 %v3601_v17, %v3571_v53  ;;  %v3270_v37 = vadd.f32 %v3269_v56, %v3181_v28  ;;  %v3183_v14 = vadd.f32 %v3182_v19, %v5763_v43 }
 0x27e   : > { %v3447_v41 = vpop.f32.mrf.mxu0  ;;  %v3358_v3 = vpop.f32.mrf.mxu3 }
 0x27f   : > { %v3359_v25 = vadd.f32 %v3358_v3, %v3270_v37 }
 0x281   : > { %v3448_v33 = vadd.f32 %v3447_v41, %v3359_v25 }
 0x283   : > { %3503 = vst [vmem:[%s5812_s20 + $0x80] sm:$0xff] %v3448_v33  ;;  %v3534_v51 = vadd.f32 %v3533_v8, %v3448_v33  ;;  %v3572_v62 = vmul.f32 %v3448_v33, %v3448_v33 }
 0x284   : > { %v3271_v36 = vpop.f32.mrf.mxu2  ;;  %v3185_v24 = vpop.f32.mrf.mxu1 }
 0x285   : > { %v3603_v23 = vadd.f32 %v3602_v1, %v3572_v62  ;;  %v3272_v57 = vadd.f32 %v3271_v36, %v3183_v14  ;;  %v3186_v49 = vadd.f32 %v3185_v24, %v5766_v11 }
 0x286   : > { %v3449_v30 = vpop.f32.mrf.mxu0  ;;  %v3360_v12 = vpop.f32.mrf.mxu3 }
 0x287   : > { %v3361_v35 = vadd.f32 %v3360_v12, %v3272_v57 }
 0x289   : > { %v3450_v45 = vadd.f32 %v3449_v30, %v3361_v35 }
 0x28b   : > { %3504 = vst [vmem:[%s5812_s20 + $0x88] sm:$0xff] %v3450_v45  ;;  %v3535_v50 = vadd.f32 %v3534_v51, %v3450_v45  ;;  %v3573_v5 = vmul.f32 %v3450_v45, %v3450_v45 }
 0x28c   : > { %v3274_v39 = vpop.f32.mrf.mxu2  ;;  %v3187_v22 = vpop.f32.mrf.mxu1 }
 0x28d   : > { %v3604_v63 = vadd.f32 %v3603_v23, %v3573_v5  ;;  %v3275_v54 = vadd.f32 %v3274_v39, %v3186_v49  ;;  %v3188_v16 = vadd.f32 %v3187_v22, %v5769_v52 }
 0x28e   : > { %v3452_v55 = vpop.f32.mrf.mxu0  ;;  %v3363_v43 = vpop.f32.mrf.mxu3 }
 0x28f   : > { %v3364_v6 = vadd.f32 %v3363_v43, %v3275_v54 }
 0x291   : > { %v3453_v21 = vadd.f32 %v3452_v55, %v3364_v6 }
 0x293   : > { %3505 = vst [vmem:[%s5812_s20 + $0x90] sm:$0xff] %v3453_v21  ;;  %v3536_v7 = vadd.f32 %v3535_v50, %v3453_v21  ;;  %v3574_v61 = vmul.f32 %v3453_v21, %v3453_v21 }
 0x294   : > { %v3276_v59 = vpop.f32.mrf.mxu2  ;;  %v3190_v13 = vpop.f32.mrf.mxu1 }
 0x295   : > { %v3605_v47 = vadd.f32 %v3604_v63, %v3574_v61  ;;  %v3277_v31 = vadd.f32 %v3276_v59, %v3188_v16  ;;  %v3191_v29 = vadd.f32 %v3190_v13, %v5772_v0 }
 0x296   : > { %v3454_v34 = vpop.f32.mrf.mxu0  ;;  %v3365_v11 = vpop.f32.mrf.mxu3 }
 0x297   : > { %v3366_v40 = vadd.f32 %v3365_v11, %v3277_v31 }
 0x299   : > { %v3455_v46 = vadd.f32 %v3454_v34, %v3366_v40 }
 0x29b   : > { %3506 = vst [vmem:[%s5812_s20 + $0x98] sm:$0xff] %v3455_v46  ;;  %v3537_v26 = vadd.f32 %v3536_v7, %v3455_v46  ;;  %v3575_v17 = vmul.f32 %v3455_v46, %v3455_v46 }
 0x29c   : > { %v3279_v38 = vpop.f32.mrf.mxu2  ;;  %v3192_v32 = vpop.f32.mrf.mxu1 }
 0x29d   : > { %v3606_v18 = vadd.f32 %v3605_v47, %v3575_v17  ;;  %v3280_v9 = vadd.f32 %v3279_v38, %v3191_v29  ;;  %v3193_v1 = vadd.f32 %v3192_v32, %v5775_v42 }
 0x29e   : > { %v3457_v8 = vpop.f32.mrf.mxu0  ;;  %v3368_v52 = vpop.f32.mrf.mxu3 }
 0x29f   : > { %v3369_v53 = vadd.f32 %v3368_v52, %v3280_v9 }
 0x2a1   : > { %v3458_v28 = vadd.f32 %v3457_v8, %v3369_v53 }
 0x2a3   : > { %3507 = vst [vmem:[%s5812_s20 + $0xa0] sm:$0xff] %v3458_v28  ;;  %v3538_v56 = vadd.f32 %v3537_v26, %v3458_v28  ;;  %v3576_v19 = vmul.f32 %v3458_v28, %v3458_v28 }
 0x2a4   : > { %v3281_v37 = vpop.f32.mrf.mxu2  ;;  %v3195_v41 = vpop.f32.mrf.mxu1 }
 0x2a5   : > { %v3607_v3 = vadd.f32 %v3606_v18, %v3576_v19  ;;  %v3282_v25 = vadd.f32 %v3281_v37, %v3193_v1  ;;  %v3196_v24 = vadd.f32 %v3195_v41, %v5778_v60 }
 0x2a6   : > { %v3459_v33 = vpop.f32.mrf.mxu0  ;;  %v3370_v0 = vpop.f32.mrf.mxu3 }
 0x2a7   : > { %v3371_v51 = vadd.f32 %v3370_v0, %v3282_v25 }
 0x2a9   : > { %v3460_v62 = vadd.f32 %v3459_v33, %v3371_v51 }
 0x2ab   : > { %3508 = vst [vmem:[%s5812_s20 + $0xa8] sm:$0xff] %v3460_v62  ;;  %v3539_v14 = vadd.f32 %v3538_v56, %v3460_v62  ;;  %v3577_v36 = vmul.f32 %v3460_v62, %v3460_v62 }
 0x2ac   : > { %v3284_v23 = vpop.f32.mrf.mxu2  ;;  %v3197_v57 = vpop.f32.mrf.mxu1 }
 0x2ad   : > { %v3608_v30 = vadd.f32 %v3607_v3, %v3577_v36  ;;  %v3285_v12 = vadd.f32 %v3284_v23, %v3196_v24  ;;  %v3198_v39 = vadd.f32 %v3197_v57, %v5781_v10 }
 0x2ae   : > { %v3462_v35 = vpop.f32.mrf.mxu0  ;;  %v3373_v42 = vpop.f32.mrf.mxu3 }
 0x2af   : > { %v3374_v45 = vadd.f32 %v3373_v42, %v3285_v12 }
 0x2b1   : > { %v3463_v50 = vadd.f32 %v3462_v35, %v3374_v45 }
 0x2b3   : > { %3509 = vst [vmem:[%s5812_s20 + $0xb0] sm:$0xff] %v3463_v50  ;;  %v3540_v5 = vadd.f32 %v3539_v14, %v3463_v50  ;;  %v3578_v49 = vmul.f32 %v3463_v50, %v3463_v50 }
 0x2b4   : > { %v3286_v22 = vpop.f32.mrf.mxu2  ;;  %v3200_v63 = vpop.f32.mrf.mxu1 }
 0x2b5   : > { %v3609_v54 = vadd.f32 %v3608_v30, %v3578_v49  ;;  %v3287_v55 = vadd.f32 %v3286_v22, %v3198_v39  ;;  %v3201_v16 = vadd.f32 %v3200_v63, %v5784_v2 }
 0x2b6   : > { %v3464_v43 = vpop.f32.mrf.mxu0  ;;  %v3375_v60 = vpop.f32.mrf.mxu3 }
 0x2b7   : > { %v3376_v6 = vadd.f32 %v3375_v60, %v3287_v55 }
 0x2b9   : > { %v3465_v21 = vadd.f32 %v3464_v43, %v3376_v6 }
 0x2bb   : > { %3510 = vst [vmem:[%s5812_s20 + $0xb8] sm:$0xff] %v3465_v21  ;;  %v3541_v7 = vadd.f32 %v3540_v5, %v3465_v21  ;;  %v3579_v61 = vmul.f32 %v3465_v21, %v3465_v21 }
 0x2bc   : > { %v3289_v59 = vpop.f32.mrf.mxu2  ;;  %v3202_v13 = vpop.f32.mrf.mxu1 }
 0x2bd   : > { %v3610_v47 = vadd.f32 %v3609_v54, %v3579_v61  ;;  %v3290_v31 = vadd.f32 %v3289_v59, %v3201_v16  ;;  %v3203_v17 = vadd.f32 %v3202_v13, %v5787_v20 }
 0x2be   : > { %v3467_v34 = vpop.f32.mrf.mxu0  ;;  %v3378_v10 = vpop.f32.mrf.mxu3 }
 0x2bf   : > { %v3379_v11 = vadd.f32 %v3378_v10, %v3290_v31 }
 0x2c1   : > { %v3468_v40 = vadd.f32 %v3467_v34, %v3379_v11 }
 0x2c3   : > { %3511 = vst [vmem:[%s5812_s20 + $0xc0] sm:$0xff] %v3468_v40  ;;  %v3542_v46 = vadd.f32 %v3541_v7, %v3468_v40  ;;  %v3580_v26 = vmul.f32 %v3468_v40, %v3468_v40 }
 0x2c4   : > { %v3291_v29 = vpop.f32.mrf.mxu2  ;;  %v3205_v38 = vpop.f32.mrf.mxu1 }
 0x2c5   : > { %v3611_v32 = vadd.f32 %v3610_v47, %v3580_v26  ;;  %v3292_v18 = vadd.f32 %v3291_v29, %v3203_v17  ;;  %v3206_v56 = vadd.f32 %v3205_v38, %v5790_v4 }
 0x2c6   : > { %v3469_v9 = vpop.f32.mrf.mxu0  ;;  %v3380_v2 = vpop.f32.mrf.mxu3 }
 0x2c7   : > { %v3381_v8 = vadd.f32 %v3380_v2, %v3292_v18 }
 0x2c9   : > { %v3470_v52 = vadd.f32 %v3469_v9, %v3381_v8 }
 0x2cb   : > { %3512 = vst [vmem:[%s5812_s20 + $0xc8] sm:$0xff] %v3470_v52  ;;  %v3543_v53 = vadd.f32 %v3542_v46, %v3470_v52  ;;  %v3581_v28 = vmul.f32 %v3470_v52, %v3470_v52 }
 0x2cc   : > { %v3294_v19 = vpop.f32.mrf.mxu2  ;;  %v3207_v1 = vpop.f32.mrf.mxu1 }
 0x2cd   : > { %v3612_v37 = vadd.f32 %v3611_v32, %v3581_v28  ;;  %v3295_v41 = vadd.f32 %v3294_v19, %v3206_v56  ;;  %v3208_v62 = vadd.f32 %v3207_v1, %v5793_v58 }
 0x2ce   : > { %v3472_v3 = vpop.f32.mrf.mxu0  ;;  %v3383_v20 = vpop.f32.mrf.mxu3 }
 0x2cf   : > { %v3384_v25 = vadd.f32 %v3383_v20, %v3295_v41 }
 0x2d1   : > { %v3473_v33 = vadd.f32 %v3472_v3, %v3384_v25 }
 0x2d3   : > { %3513 = vst [vmem:[%s5812_s20 + $0xd0] sm:$0xff] %v3473_v33  ;;  %v3544_v0 = vadd.f32 %v3543_v53, %v3473_v33  ;;  %v3582_v51 = vmul.f32 %v3473_v33, %v3473_v33 }
 0x2d4   : > { %v3296_v14 = vpop.f32.mrf.mxu2  ;;  %v3210_v36 = vpop.f32.mrf.mxu1 }
 0x2d5   : > { %v3613_v24 = vadd.f32 %v3612_v37, %v3582_v51  ;;  %v3297_v23 = vadd.f32 %v3296_v14, %v3208_v62  ;;  %v3211_v45 = vadd.f32 %v3210_v36, %v5796_v15 }
 0x2d6   : > { %v3474_v57 = vpop.f32.mrf.mxu0  ;;  %v3385_v4 = vpop.f32.mrf.mxu3 }
 0x2d7   : > { %v3386_v30 = vadd.f32 %v3385_v4, %v3297_v23 }
 0x2d9   : > { %v3475_v12 = vadd.f32 %v3474_v57, %v3386_v30 }
 0x2db   : > { %3514 = vst [vmem:[%s5812_s20 + $0xd8] sm:$0xff] %v3475_v12  ;;  %v3545_v35 = vadd.f32 %v3544_v0, %v3475_v12  ;;  %v3583_v42 = vmul.f32 %v3475_v12, %v3475_v12 }
 0x2dc   : > { %v3299_v50 = vpop.f32.mrf.mxu2  ;;  %v3212_v5 = vpop.f32.mrf.mxu1 }
 0x2dd   : > { %v3614_v49 = vadd.f32 %v3613_v24, %v3583_v42  ;;  %v3300_v39 = vadd.f32 %v3299_v50, %v3211_v45  ;;  %v3213_v60 = vadd.f32 %v3212_v5, %v5799_v27 }
 0x2de   : > { %v3477_v22 = vpop.f32.mrf.mxu0  ;;  %v3388_v58 = vpop.f32.mrf.mxu3 }
 0x2df   : > { %v3389_v63 = vadd.f32 %v3388_v58, %v3300_v39 }
 0x2e1   : > { %v3478_v54 = vadd.f32 %v3477_v22, %v3389_v63 }
 0x2e3   : > { %3515 = vst [vmem:[%s5812_s20 + $0xe0] sm:$0xff] %v3478_v54  ;;  %v3546_v55 = vadd.f32 %v3545_v35, %v3478_v54  ;;  %v3584_v43 = vmul.f32 %v3478_v54, %v3478_v54 }
 0x2e4   : > { %v3301_v6 = vpop.f32.mrf.mxu2  ;;  %v3215_v61 = vpop.f32.mrf.mxu1 }
 0x2e5   : > { %v3615_v21 = vadd.f32 %v3614_v49, %v3584_v43  ;;  %v3302_v7 = vadd.f32 %v3301_v6, %v3213_v60  ;;  %v3216_v34 = vadd.f32 %v3215_v61, %v5802_v48 }
 0x2e6   : > { %v3479_v16 = vpop.f32.mrf.mxu0  ;;  %v3390_v15 = vpop.f32.mrf.mxu3 }
 0x2e7   : > { %v3391_v59 = vadd.f32 %v3390_v15, %v3302_v7 }
 0x2e9   : > { %v3480_v13 = vadd.f32 %v3479_v16, %v3391_v59 }
 0x2eb   : > { %3516 = vst [vmem:[%s5812_s20 + $0xe8] sm:$0xff] %v3480_v13  ;;  %v3547_v47 = vadd.f32 %v3546_v55, %v3480_v13  ;;  %v3585_v31 = vmul.f32 %v3480_v13, %v3480_v13 }
 0x2ec   : > { %v3304_v10 = vpop.f32.mrf.mxu2  ;;  %v3217_v17 = vpop.f32.mrf.mxu1 }
 0x2ed   : > { %v3616_v11 = vadd.f32 %v3615_v21, %v3585_v31  ;;  %v3305_v40 = vadd.f32 %v3304_v10, %v3216_v34  ;;  %v3218_v18 = vadd.f32 %v3217_v17, %v5805_v44 }
 0x2ee   : > { %v3482_v46 = vpop.f32.mrf.mxu0  ;;  %v3393_v27 = vpop.f32.mrf.mxu3 }
 0x2ef   : > { %v3394_v26 = vadd.f32 %v3393_v27, %v3305_v40 }
 0x2f1   : > { %v3483_v29 = vadd.f32 %v3482_v46, %v3394_v26 }
 0x2f3   : > { %3517 = vst [vmem:[%s5812_s20 + $0xf0] sm:$0xff] %v3483_v29  ;;  %v3548_v38 = vadd.f32 %v3547_v47, %v3483_v29  ;;  %v3586_v32 = vmul.f32 %v3483_v29, %v3483_v29 }
 0x2f4   : > { %v3306_v9 = vpop.f32.mrf.mxu2 }
 0x2f5   : > { %v3617_v2 = vadd.f32 %v3616_v11, %v3586_v32  ;;  %v3307_v8 = vadd.f32 %v3306_v9, %v3218_v18 }
 0x2f6   : > { %v3395_v52 = vpop.f32.mrf.mxu3  ;;  %v3484_v48 = vpop.f32.mrf.mxu0 }
 0x2f7   : > { %v3396_v53 = vadd.f32 %v3395_v52, %v3307_v8 }
 0x2f9   : > { %v3485_v28 = vadd.f32 %v3484_v48, %v3396_v53 }
 0x2fb   : > { %3518 = vst [vmem:[%s5812_s20 + $0xf8] sm:$0xff] %v3485_v28  ;;  %v3549_v56 = vadd.f32 %v3548_v38, %v3485_v28  ;;  %v3587_v19 = vmul.f32 %v3485_v28, %v3485_v28 }
 0x2fd   : > { %v3550_v1 = vrot.slane %v3549_v56, 4  ;;  %v3618_v37 = vadd.f32 %v3617_v2, %v3587_v19 }
 0x2ff   : > { %v3551_v41 = vadd.f32 %v3550_v1, %v3549_v56  ;;  %v3619_v3 = vrot.slane %v3618_v37, 4 }
 0x301   : > { %v3552_v20 = vrot.slane %v3551_v41, 2  ;;  %v3620_v25 = vadd.f32 %v3619_v3, %v3618_v37 }
 0x303   : > { %v3553_v33 = vadd.f32 %v3552_v20, %v3551_v41  ;;  %v3621_v0 = vrot.slane %v3620_v25, 2 }
 0x305   : > { %v3554_v44 = vrot.slane %v3553_v33, 1  ;;  %v3622_v51 = vadd.f32 %v3621_v0, %v3620_v25 }
 0x307   : > { %v3623_v62 = vrot.slane %v3622_v51, 1  ;;  %v3555_v14 = vadd.f32 %v3554_v44, %v3553_v33 }
 0x309   : > { %v3624_v36 = vadd.f32 %v3623_v62, %v3622_v51 }
 0x30b   : > { %v3626_v24 = vsel %vm3625_vm6, %v3555_v14, %v3624_v36 }
 0x30c   : > { %3627 = vst [vmem:[%s181_s24] sm:$0x3] %v3626_v24 }
 0x30d PF: > { %s14_s12 = sadd.s32 1, %s4864_s12  }
 0x30e   : > { %p11_p4 = scmp.ge.s32.totalorder %s14_s12, 4  }
 0x310   :  { %13 = sbr.rel (!%p11_p4) target bundleno = 1 (0x1), region = 70 }

// kernel: basic_block.4
= control target key start
LH: loop header
LB: loop body
LE: loop exit
PB: predicated region body
PF: predicated region fallthrough
CT: control target
= control target key end

     0   :  { %s5625_s18 = smov 0   ;;  %s6885_s0 = inlined_call_operand.vmem [shape: f32[2,16,16,128], index: 0, kind: input, shape index: {}]   ;;  %s6886_s1 = inlined_call_operand.vmem [shape: bf16[1152,128], index: 1, kind: input, shape index: {}]   ;;  %s6887_s2 = inlined_call_operand.vmem [shape: f32[1,128], index: 2, kind: input, shape index: {}]   ;;  %s6888_s3 = inlined_call_operand.vmem [shape: f32[1,128], index: 3, kind: input, shape index: {}]   ;;  %s6889_s4 = inlined_call_operand.vmem [shape: f32[2,16,16,128], index: 4, kind: output, shape index: {0}]   ;;  %s6890_s5 = inlined_call_operand.vmem [shape: f32[2,2,128], index: 5, kind: output, shape index: {1}]  }
   0x1 LB: > { %s4436_s19 = sadd.s32 4294967295, %s5592_s18   ;;  %p4440_p0 = scmp.ge.s32.totalorder %s5592_s18, 1  ;;  %s5592_s18 = sphi %s5625_s18, %s16_s18  }
   0x2   : > { %p190_p1 = scmp.lt.s32.totalorder %s5592_s18, 3 }
   0x4   : > { %p191_p2 = pnand %p4440_p0, %p190_p1 }
   0x6   : > { %194 = sbr.rel (%p191_p2) target bundleno = 894 (0x37e), region = 36 }
   0xb   : > { %p222_p3 = scmp.lt.s32.totalorder %s4436_s19, 1  ;;  %p4446_p4 = scmp.ne.s32.totalorder %s4436_s19, 0 }
   0xd   : > { %s223_s20 = scalar_select %p222_p3, %s4436_s19, 1 }
   0xe   : > { %240 = sbr.rel (%p4446_p4) target bundleno = 74 (0x4a), region = 40 }
   0xf   : > { %s5331_s21 = sshll.u32 %s223_s20, 8  ;;  %s4445_s22 = sshll.u32 %s223_s20, 1 }
  0x10   : > { %s5636_s25 = scalar_lea.vmem %s6885_s0, %s5331_s21  ;;  %s5641_s28 = scalar_lea.vmem %s6889_s4, %s5331_s21 }
  0x11   : > { %s5646_s6 = scalar_lea.vmem %s6890_s5, %s4445_s22 }
  0x13   : > { %v5594_v0 = vmov 0  }
  0x14   : > { %241 = vst [vmem:[#allocation2] sm:$0xf] %v5594_v0 }
  0x15   : > { %242 = vst [vmem:[#allocation2 + $0x4] sm:$0xf] %v5594_v0 }
  0x16   : > { %243 = vst [vmem:[#allocation2 + $0x8] sm:$0x1] %v5594_v0 }
  0x17   : > { %244 = vst [vmem:[#allocation2 + $0xc] sm:$0xf] %v5594_v0 }
  0x18   : > { %245 = vst [vmem:[#allocation2 + $0x10] sm:$0xf] %v5594_v0 }
  0x19   : > { %246 = vst [vmem:[#allocation2 + $0x14] sm:$0x1] %v5594_v0 }
  0x1a   : > { %247 = vst [vmem:[#allocation2 + $0x18] sm:$0xf] %v5594_v0 }
  0x1b   : > { %248 = vst [vmem:[#allocation2 + $0x1c] sm:$0xf] %v5594_v0 }
  0x1c   : > { %249 = vst [vmem:[#allocation2 + $0x20] sm:$0x1] %v5594_v0 }
  0x1d   : > { %250 = vst [vmem:[#allocation2 + $0x24] sm:$0xf] %v5594_v0 }
  0x1e   : > { %251 = vst [vmem:[#allocation2 + $0x28] sm:$0xf] %v5594_v0 }
  0x1f   : > { %252 = vst [vmem:[#allocation2 + $0x2c] sm:$0x1] %v5594_v0 }
  0x20   : > { %253 = vst [vmem:[#allocation2 + $0x30] sm:$0xf] %v5594_v0 }
  0x21   : > { %254 = vst [vmem:[#allocation2 + $0x34] sm:$0xf] %v5594_v0 }
  0x22   : > { %255 = vst [vmem:[#allocation2 + $0x38] sm:$0x1] %v5594_v0 }
  0x23   : > { %256 = vst [vmem:[#allocation2 + $0x3c] sm:$0xf] %v5594_v0 }
  0x24   : > { %257 = vst [vmem:[#allocation2 + $0x40] sm:$0xf] %v5594_v0 }
  0x25   : > { %258 = vst [vmem:[#allocation2 + $0x44] sm:$0x1] %v5594_v0 }
  0x26   : > { %259 = vst [vmem:[#allocation2 + $0x48] sm:$0xf] %v5594_v0 }
  0x27   : > { %260 = vst [vmem:[#allocation2 + $0x4c] sm:$0xf] %v5594_v0 }
  0x28   : > { %261 = vst [vmem:[#allocation2 + $0x50] sm:$0x1] %v5594_v0 }
  0x29   : > { %262 = vst [vmem:[#allocation2 + $0x54] sm:$0xf] %v5594_v0 }
  0x2a   : > { %263 = vst [vmem:[#allocation2 + $0x58] sm:$0xf] %v5594_v0 }
  0x2b   : > { %264 = vst [vmem:[#allocation2 + $0x5c] sm:$0x1] %v5594_v0 }
  0x2c   : > { %265 = vst [vmem:[#allocation2 + $0x60] sm:$0xf] %v5594_v0 }
  0x2d   : > { %266 = vst [vmem:[#allocation2 + $0x64] sm:$0xf] %v5594_v0 }
  0x2e   : > { %267 = vst [vmem:[#allocation2 + $0x68] sm:$0x1] %v5594_v0 }
  0x2f   : > { %268 = vst [vmem:[#allocation2 + $0x6c] sm:$0xf] %v5594_v0 }
  0x30   : > { %269 = vst [vmem:[#allocation2 + $0x70] sm:$0xf] %v5594_v0 }
  0x31   : > { %270 = vst [vmem:[#allocation2 + $0x74] sm:$0x1] %v5594_v0 }
  0x32   : > { %271 = vst [vmem:[#allocation2 + $0x78] sm:$0xf] %v5594_v0 }
  0x33   : > { %272 = vst [vmem:[#allocation2 + $0x7c] sm:$0xf] %v5594_v0 }
  0x34   : > { %273 = vst [vmem:[#allocation2 + $0x80] sm:$0x1] %v5594_v0 }
  0x35   : > { %274 = vst [vmem:[#allocation2 + $0x84] sm:$0xf] %v5594_v0 }
  0x36   : > { %275 = vst [vmem:[#allocation2 + $0x88] sm:$0xf] %v5594_v0 }
  0x37   : > { %276 = vst [vmem:[#allocation2 + $0x8c] sm:$0x1] %v5594_v0 }
  0x38   : > { %277 = vst [vmem:[#allocation2 + $0x90] sm:$0xf] %v5594_v0 }
  0x39   : > { %278 = vst [vmem:[#allocation2 + $0x94] sm:$0xf] %v5594_v0 }
  0x3a   : > { %279 = vst [vmem:[#allocation2 + $0x98] sm:$0x1] %v5594_v0 }
  0x3b   : > { %280 = vst [vmem:[#allocation2 + $0x9c] sm:$0xf] %v5594_v0 }
  0x3c   : > { %281 = vst [vmem:[#allocation2 + $0xa0] sm:$0xf] %v5594_v0 }
  0x3d   : > { %282 = vst [vmem:[#allocation2 + $0xa4] sm:$0x1] %v5594_v0 }
  0x3e   : > { %283 = vst [vmem:[#allocation2 + $0xa8] sm:$0xf] %v5594_v0 }
  0x3f   : > { %284 = vst [vmem:[#allocation2 + $0xac] sm:$0xf] %v5594_v0 }
  0x40   : > { %285 = vst [vmem:[#allocation2 + $0xb0] sm:$0x1] %v5594_v0 }
  0x41   : > { %286 = vst [vmem:[#allocation2 + $0xb4] sm:$0xf] %v5594_v0 }
  0x42   : > { %287 = vst [vmem:[#allocation2 + $0xb8] sm:$0xf] %v5594_v0 }
  0x43   : > { %288 = vst [vmem:[#allocation2 + $0xbc] sm:$0x1] %v5594_v0 }
  0x44   : > { %289 = vst [vmem:[#allocation2 + $0xc0] sm:$0xf] %v5594_v0 }
  0x45   : > { %290 = vst [vmem:[#allocation2 + $0xc4] sm:$0xf] %v5594_v0 }
  0x46   : > { %291 = vst [vmem:[#allocation2 + $0xc8] sm:$0x1] %v5594_v0 }
  0x47   : > { %292 = vst [vmem:[#allocation2 + $0xcc] sm:$0xf] %v5594_v0 }
  0x48   : > { %293 = vst [vmem:[#allocation2 + $0xd0] sm:$0xf] %v5594_v0 }
  0x49   : > { %294 = vst [vmem:[#allocation2 + $0xd4] sm:$0x1] %v5594_v0 }
  0x4a PF: > { %v5484_v1 = vld [vmem:[%s6886_s1 + $0x38] sm:$0xff]  ;;  %v5483_v2 = vld [vmem:[%s6886_s1 + $0x30] sm:$0xff]  ;;  %v5659_v5 = vld [vmem:[%s6887_s2] ss:$0 sm:$0xff]  ;;  %vm463_vm0 = vsmask.f32 256 }
  0x4b   : > { %5549 = vmatpush.bf16.msra.mxu1 %v5484_v1  ;;  %5550 = vmatpush.bf16.msra.mxu2 %v5484_v1  ;;  %v303_v3 = vld [vmem:[%s5636_s25 + $0x30] sm:$0xff]  ;;  %v304_v4 = vld [vmem:[%s5636_s25 + $0x38] sm:$0xff]  ;;  %v5664_v6 = vld [vmem:[%s6888_s3] ss:$0 sm:$0xff]  ;;  %vm464_vm1 = vsmask.f32 4368 }
  0x4c   : > { %5551 = vmatpush.bf16.msra.mxu3 %v5484_v1  ;;  %3408 = vmatpush.bf16.msra.mxu0 %v5484_v1  ;;  %v311_v7 = vld [vmem:[%s5636_s25 + $0x70] sm:$0xff]  ;;  %v5482_v8 = vld [vmem:[%s6886_s1 + $0x28] sm:$0xff]  ;;  %v338_v9 = vmul.f32 %v5659_v5, %v303_v3  ;;  %v339_v10 = vmul.f32 %v5659_v5, %v304_v4  ;;  %v312_v11 = vld [vmem:[%s5636_s25 + $0x78] sm:$0xff]  ;;  %vm787_vm2 = vcmask 1043456   ;;  %vm788_vm3 = vsmask.f32 7938 }
  0x4d   : > { %v346_v12 = vmul.f32 %v5659_v5, %v311_v7  ;;  %v319_v13 = vld [vmem:[%s5636_s25 + $0xb0] sm:$0xff]  ;;  %v347_v14 = vmul.f32 %v5659_v5, %v312_v11  ;;  %v320_v15 = vld [vmem:[%s5636_s25 + $0xb8] sm:$0xff]  ;;  %v305_v17 = vld [vmem:[%s5636_s25 + $0x40] sm:$0xff]  ;;  %v6904_v52 = vmov 0  ;;  %v6907_v57 = vmov 0 }
  0x4e   : > { %v354_v16 = vmul.f32 %v5659_v5, %v319_v13  ;;  %v373_v18 = vadd.f32 %v5664_v6, %v338_v9  ;;  %v374_v19 = vadd.f32 %v5664_v6, %v339_v10  ;;  %v355_v21 = vmul.f32 %v5659_v5, %v320_v15  ;;  %v5481_v25 = vld [vmem:[%s6886_s1 + $0x20] sm:$0xff]  ;;  %v306_v30 = vld [vmem:[%s5636_s25 + $0x48] sm:$0xff]  ;;  %v5480_v43 = vld [vmem:[%s6886_s1 + $0x18] sm:$0xff] }
  0x4f   : > { %5552 = vmatpush.bf16.msra.mxu1 %v5483_v2  ;;  %5553 = vmatpush.bf16.msra.mxu2 %v5483_v2  ;;  %v381_v20 = vadd.f32 %v5664_v6, %v346_v12  ;;  %v382_v22 = vadd.f32 %v5664_v6, %v347_v14  ;;  %v340_v24 = vmul.f32 %v5659_v5, %v305_v17  ;;  %v5691_v33 = vld [vmem:[#allocation2] sm:$0xf]  ;;  %v5693_v34 = vld [vmem:[#allocation2 + $0x4] sm:$0xf]  ;;  %vm5706_vm4 = vmor %vm463_vm0, %vm464_vm1  ;;  %vm794_vm6 = vcmask 1040384  }
  0x50   : > { %5554 = vmatpush.bf16.msra.mxu3 %v5483_v2  ;;  %3409 = vmatpush.bf16.msra.mxu0 %v5483_v2  ;;  %v389_v23 = vadd.f32 %v5664_v6, %v354_v16  ;;  %v405_v26 = vmax.f32 %v373_v18, 0.0  ;;  %v406_v27 = vmax.f32 %v374_v19, 0.0  ;;  %v390_v29 = vadd.f32 %v5664_v6, %v355_v21  ;;  %958 = vst [vmem:[#allocation3] sm:$0xf] %v5691_v33  ;;  %vm5714_vm5 = vmand %vm787_vm2, %vm788_vm3  ;;  %v813_v58 = vld [vmem:[#allocation2 + $0x30] sm:$0xf] }
  0x51   : > { %v413_v28 = vmax.f32 %v381_v20, 0.0  ;;  %v414_v31 = vmax.f32 %v382_v22, 0.0  ;;  %959 = vst [vmem:[#allocation3 + $0x24] sm:$0xf] %v5693_v34  ;;  %v341_v41 = vmul.f32 %v5659_v5, %v306_v30  ;;  %v5699_v42 = vadd.f32 %v5664_v6, %v340_v24  ;;  %v5479_v63 = vld [vmem:[%s6886_s1 + $0x10] sm:$0xff]  ;;  %v5478_v20 = vld [vmem:[%s6886_s1 + $0x8] sm:$0xff]  ;;  %vm6241_vm13 = vmand %vm794_vm6, %vm463_vm0 }
  0x52   : > { %v421_v32 = vmax.f32 %v389_v23, 0.0  ;;  %v437_v35 = vpack.c.bf16 %v405_v26, %v405_v26  ;;  %v438_v36 = vpack.c.bf16 %v406_v27, %v406_v27  ;;  %v422_v38 = vmax.f32 %v390_v29, 0.0  ;;  %v841_v3 = vld [vmem:[#allocation2 + $0x60] sm:$0xf]  ;;  %v869_v11 = vld [vmem:[#allocation2 + $0x90] sm:$0xf] }
  0x53   : > { %5555 = vmatpush.bf16.msra.mxu1 %v5482_v8  ;;  %5556 = vmatpush.bf16.msra.mxu2 %v5482_v8  ;;  %v445_v37 = vpack.c.bf16 %v413_v28, %v413_v28  ;;  %v446_v39 = vpack.c.bf16 %v414_v31, %v414_v31  ;;  %v6905_v52 = vsel %vm5706_vm4, 4294967295, %v6904_v52  ;;  %v6908_v57 = vsel %vm5714_vm5, 4294967295, %v6907_v57  ;;  %v313_v24 = vld [vmem:[%s5636_s25 + $0x80] sm:$0xff]  ;;  %v322_v28 = vld [vmem:[%s5636_s25 + $0xc8] sm:$0xff] }
  0x54   : > { %5557 = vmatpush.bf16.msra.mxu3 %v5482_v8  ;;  %3410 = vmatpush.bf16.msra.mxu0 %v5482_v8  ;;  %v453_v40 = vpack.c.bf16 %v421_v32, %v421_v32  ;;  %v518_v44 = vshrl.u32 %v437_v35, 16  ;;  %v521_v45 = vshll.u32 %v437_v35, 16  ;;  %v526_v46 = vshrl.u32 %v438_v36, 16  ;;  %6906 = vst [vmem:[#allocation4_spill] sm:$0xff] %v6905_v52  ;;  %v321_v27 = vld [vmem:[%s5636_s25 + $0xc0] sm:$0xff] }
  0x55   : > { %v529_v47 = vshll.u32 %v438_v36, 16  ;;  %v586_v48 = vshrl.u32 %v445_v37, 16  ;;  %v589_v49 = vshll.u32 %v445_v37, 16  ;;  %v594_v50 = vshrl.u32 %v446_v39, 16  ;;  %6909 = vst [vmem:[#allocation5_spill] sm:$0xff] %v6908_v57  ;;  %v297_v29 = vld [vmem:[%s5636_s25] sm:$0xff] }
  0x56   : > { %v597_v51 = vshll.u32 %v446_v39, 16  ;;  %v520_v53 = vrot.slane %v518_v44, 7  ;;  %v5710_v54 = vrot.slane %v526_v46, 7  ;;  %v454_v55 = vpack.c.bf16 %v422_v38, %v422_v38  ;;  %v5477_v31 = vld [vmem:[%s6886_s1] sm:$0xff]  ;;  %v298_v37 = vld [vmem:[%s5636_s25 + $0x8] sm:$0xff]  ;;  %v5500_v44 = vld [vmem:[%s6886_s1 + $0xb8] sm:$0xff] }
  0x57   : > { %5558 = vmatpush.bf16.msra.mxu1 %v5481_v25  ;;  %5559 = vmatpush.bf16.msra.mxu2 %v5481_v25  ;;  %v654_v56 = vshrl.u32 %v453_v40, 16  ;;  %v588_v59 = vrot.slane %v586_v48, 7  ;;  %v5718_v60 = vrot.slane %v594_v50, 7  ;;  %v657_v61 = vshll.u32 %v453_v40, 16  ;;  %v4467_v38 = vld [vmem:[#allocation3] sm:$0xf] }
  0x58   : > { %5560 = vmatpush.bf16.msra.mxu3 %v5481_v25  ;;  %3411 = vmatpush.bf16.msra.mxu0 %v5481_v25  ;;  %v5721_v62 = vadd.f32 %v5664_v6, %v341_v41  ;;  %v523_v0 = vor.u32 %v521_v45, %v520_v53  ;;  %v524_v1 = vrot.slane %v520_v53, 4  ;;  %v531_v2 = vor.u32 %v529_v47, %v5710_v54  ;;  %v314_v25 = vld [vmem:[%s5636_s25 + $0x88] sm:$0xff]  ;;  %v5337_v39 = vld [vmem:[#allocation3 + $0x20] sm:$0xf0] }
  0x59   : > { %v656_v4 = vrot.slane %v654_v56, 7  ;;  %v591_v7 = vor.u32 %v589_v49, %v588_v59  ;;  %v592_v8 = vrot.slane %v588_v59, 4  ;;  %v599_v9 = vor.u32 %v597_v51, %v5718_v60  ;;  %v5508_v45 = vld [vmem:[%s6886_s1 + $0xf8] sm:$0xff]  ;;  %v5499_v59 = vld [vmem:[%s6886_s1 + $0xb0] sm:$0xff] }
  0x5a   : > { %v662_v10 = vshrl.u32 %v454_v55, 16  ;;  %v532_v12 = vsel %vm5706_vm4, %v524_v1, %v531_v2  ;;  %v814_v13 = vsel %vm5714_vm5, %v523_v0, %v813_v58  ;;  %v665_v19 = vshll.u32 %v454_v55, 16  ;;  %v5492_v50 = vld [vmem:[%s6886_s1 + $0x78] sm:$0xff]  ;;  %v5507_v0 = vld [vmem:[%s6886_s1 + $0xf0] sm:$0xff] }
  0x5b   : > { %5561 = vmatpush.bf16.msra.mxu1 %v5480_v43  ;;  %5562 = vmatpush.bf16.msra.mxu2 %v5480_v43  ;;  %v659_v14 = vor.u32 %v657_v61, %v656_v4  ;;  %v660_v15 = vrot.slane %v656_v4, 4  ;;  %815 = vst [vmem:[#allocation2 + $0x30] sm:$0xf] %v814_v13  ;;  %v600_v16 = vsel %vm5706_vm4, %v592_v8, %v599_v9  ;;  %v407_v22 = vmax.f32 %v5699_v42, 0.0  ;;  %v5516_v51 = vld [vmem:[%s6886_s1 + $0x138] sm:$0xff]  ;;  %v5491_v13 = vld [vmem:[%s6886_s1 + $0x70] sm:$0xff] }
  0x5c   : > { %5563 = vmatpush.bf16.msra.mxu3 %v5480_v43  ;;  %3412 = vmatpush.bf16.msra.mxu0 %v5480_v43  ;;  %v842_v17 = vsel %vm5714_vm5, %v591_v7, %v841_v3  ;;  %v5736_v18 = vrot.slane %v662_v10, 7  ;;  %816 = vst [vmem:[#allocation2 + $0x34] sm:$0xf] %v532_v12  ;;  %v408_v26 = vmax.f32 %v5721_v62, 0.0  ;;  %v348_v35 = vmul.f32 %v5659_v5, %v313_v24 }
  0x5d   : > { %v870_v21 = vsel %vm5714_vm5, %v659_v14, %v869_v11  ;;  %843 = vst [vmem:[#allocation2 + $0x60] sm:$0xf] %v842_v17  ;;  %v5756_v32 = vpack.c.bf16 %v407_v22, %v407_v22  ;;  %v349_v36 = vmul.f32 %v5659_v5, %v314_v25  ;;  %v356_v40 = vmul.f32 %v5659_v5, %v321_v27 }
  0x5e   : > { %v667_v23 = vor.u32 %v665_v19, %v5736_v18  ;;  %844 = vst [vmem:[#allocation2 + $0x64] sm:$0xf] %v600_v16  ;;  %v357_v41 = vmul.f32 %v5659_v5, %v322_v28  ;;  %v332_v42 = vmul.f32 %v5659_v5, %v297_v29  ;;  %v5772_v46 = vpack.c.bf16 %v408_v26, %v408_v26 }
  0x5f   : > { %5564 = vmatpush.bf16.msra.mxu1 %v5479_v63  ;;  %5565 = vmatpush.bf16.msra.mxu2 %v5479_v63  ;;  %871 = vst [vmem:[#allocation2 + $0x90] sm:$0xf] %v870_v21  ;;  %v383_v47 = vadd.f32 %v5664_v6, %v348_v35  ;;  %v384_v48 = vadd.f32 %v5664_v6, %v349_v36  ;;  %v535_v1 = vshrl.u32 %v5756_v32, 16  ;;  %v538_v21 = vshll.u32 %v5756_v32, 16 }
  0x60   : > { %5566 = vmatpush.bf16.msra.mxu3 %v5479_v63  ;;  %3413 = vmatpush.bf16.msra.mxu0 %v5479_v63  ;;  %v668_v30 = vsel %vm5706_vm4, %v660_v15, %v667_v23  ;;  %v391_v53 = vadd.f32 %v5664_v6, %v356_v40  ;;  %v392_v55 = vadd.f32 %v5664_v6, %v357_v41  ;;  %v543_v8 = vshrl.u32 %v5772_v46, 16  ;;  %v820_v40 = vld [vmem:[#allocation2 + $0x3c] sm:$0xf] }
  0x61   : > { %872 = vst [vmem:[#allocation2 + $0x94] sm:$0xf] %v668_v30  ;;  %v333_v56 = vmul.f32 %v5659_v5, %v298_v37  ;;  %v4468_v58 = vor.u32 %v5337_v39, %v4467_v38  ;;  %v415_v61 = vmax.f32 %v383_v47, 0.0  ;;  %v416_v62 = vmax.f32 %v384_v48, 0.0  ;;  %v307_v47 = vld [vmem:[%s5636_s25 + $0x50] sm:$0xff] }
  0x62   : > { %v5764_v43 = vld [vmem:[#allocation2 + $0x30] sm:$0xf]  ;;  %v367_v63 = vadd.f32 %v5664_v6, %v332_v42  ;;  %v423_v2 = vmax.f32 %v391_v53, 0.0  ;;  %v424_v3 = vmax.f32 %v392_v55, 0.0  ;;  %v546_v22 = vshll.u32 %v5772_v46, 16 }
  0x63   : > { %5567 = vmatpush.bf16.msra.mxu1 %v5478_v20  ;;  %5568 = vmatpush.bf16.msra.mxu2 %v5478_v20  ;;  %v5776_v49 = vld [vmem:[#allocation2 + $0x34] sm:$0xf]  ;;  %966 = vst [vmem:[#allocation3 + $0x120] sm:$0xf] %v5764_v43  ;;  %v368_v4 = vadd.f32 %v5664_v6, %v333_v56  ;;  %v447_v9 = vpack.c.bf16 %v415_v61, %v415_v61  ;;  %v5820_v25 = vrot.slane %v543_v8, 7  ;;  %v308_v56 = vld [vmem:[%s5636_s25 + $0x58] sm:$0xff] }
  0x64   : > { %5569 = vmatpush.bf16.msra.mxu3 %v5478_v20  ;;  %3414 = vmatpush.bf16.msra.mxu0 %v5478_v20  ;;  %967 = vst [vmem:[#allocation3 + $0x144] sm:$0xf] %v5776_v49  ;;  %v5800_v7 = vld [vmem:[#allocation2 + $0x60] sm:$0xf]  ;;  %v448_v10 = vpack.c.bf16 %v416_v62, %v416_v62  ;;  %v399_v11 = vmax.f32 %v367_v63, 0.0  ;;  %v5809_v14 = vpack.c.bf16 %v423_v2, %v423_v2  ;;  %v537_v20 = vrot.slane %v535_v1, 7 }
  0x65   : > { %1674 = vst [vmem:[#allocation3 + $0xe4] sm:$0xf] %v5764_v43  ;;  %v5804_v12 = vld [vmem:[#allocation2 + $0x64] sm:$0xf]  ;;  %v5811_v15 = vpack.c.bf16 %v424_v3, %v424_v3  ;;  %v400_v16 = vmax.f32 %v368_v4, 0.0  ;;  %v603_v17 = vshrl.u32 %v447_v9, 16  ;;  %v548_v48 = vor.u32 %v546_v22, %v5820_v25 }
  0x66   : > { %1675 = vst [vmem:[#allocation3 + $0x108] sm:$0xf] %v5776_v49  ;;  %v611_v19 = vshrl.u32 %v448_v10, 16  ;;  %v5818_v24 = vld [vmem:[#allocation2 + $0x90] sm:$0xf]  ;;  %v671_v26 = vshrl.u32 %v5809_v14, 16  ;;  %v431_v27 = vpack.c.bf16 %v399_v11, %v399_v11  ;;  %v540_v42 = vor.u32 %v538_v21, %v537_v20 }
  0x67   : > { %5570 = vmatpush.bf16.msra.mxu1 %v5477_v31  ;;  %5571 = vmatpush.bf16.msra.mxu2 %v5477_v31  ;;  %1806 = vst [vmem:[#allocation3 + $0xa8] sm:$0xf] %v5764_v43  ;;  %v432_v28 = vpack.c.bf16 %v400_v16, %v400_v16  ;;  %v605_v30 = vrot.slane %v603_v17, 7  ;;  %v606_v35 = vshll.u32 %v447_v9, 16  ;;  %v614_v37 = vshll.u32 %v448_v10, 16  ;;  %v315_v10 = vld [vmem:[%s5636_s25 + $0x90] sm:$0xff] }
  0x68   : > { %5572 = vmatpush.bf16.msra.mxu3 %v5477_v31  ;;  %3415 = vmatpush.bf16.msra.mxu0 %v5477_v31  ;;  %1807 = vst [vmem:[#allocation3 + $0xcc] sm:$0xf] %v5776_v49  ;;  %v679_v31 = vshrl.u32 %v5811_v15, 16  ;;  %v5826_v36 = vrot.slane %v611_v19, 7  ;;  %v5829_v38 = vld [vmem:[#allocation2 + $0x94] sm:$0xf]  ;;  %v342_v3 = vmul.f32 %v5659_v5, %v307_v47  ;;  %v821_v8 = vsel %vm5714_vm5, %v540_v42, %v820_v40 }
  0x69   : > { %974 = vst [vmem:[#allocation3 + $0x240] sm:$0xf] %v5800_v7  ;;  %v541_v39 = vrot.slane %v537_v20, 4  ;;  %v467_v41 = vshrl.u32 %v431_v27, 16  ;;  %v475_v46 = vshrl.u32 %v432_v28, 16  ;;  %v682_v55 = vshll.u32 %v5811_v15, 16 }
  0x6a   : > { %v4611_v23 = vld [vmem:[#allocation3 + $0x120] sm:$0xf]  ;;  %975 = vst [vmem:[#allocation3 + $0x264] sm:$0xf] %v5804_v12  ;;  %v5836_v53 = vrot.slane %v679_v31, 7  ;;  %v616_v61 = vor.u32 %v614_v37, %v5826_v36  ;;  %v470_v63 = vshll.u32 %v431_v27, 16  ;;  %v343_v16 = vmul.f32 %v5659_v5, %v308_v56 }
  0x6b   : > { %3586 = vmatpush.bf16.msrb.mxu2 %v5500_v44  ;;  %3497 = vmatpush.bf16.msrb.mxu1 %v5492_v50  ;;  %v5373_v29 = vld [vmem:[#allocation3 + $0x140] sm:$0xf0]  ;;  %1682 = vst [vmem:[#allocation3 + $0x204] sm:$0xf] %v5800_v7  ;;  %v673_v44 = vrot.slane %v671_v26, 7  ;;  %v609_v50 = vrot.slane %v605_v30, 4  ;;  %v549_v11 = vsel %vm5706_vm4, %v541_v39, %v548_v48 }
  0x6c   : > { %3675 = vmatpush.bf16.msrb.mxu3 %v5508_v45  ;;  %3764 = vmatpush.bf16.msrb.mxu0 %v5516_v51  ;;  %v4612_v32 = vor.u32 %v5373_v29, %v4611_v23  ;;  %1683 = vst [vmem:[#allocation3 + $0x228] sm:$0xf] %v5804_v12  ;;  %v674_v45 = vshll.u32 %v5809_v14, 16  ;;  %v848_v51 = vld [vmem:[#allocation2 + $0x6c] sm:$0xf]  ;;  %v469_v62 = vrot.slane %v467_v41, 7  ;;  %v684_v14 = vor.u32 %v682_v55, %v5836_v53 }
  0x6d   : > { %3416 = vmatmul.bf16.vlgmr.msra.gmra.mxu0 %v4468_v58  ;;  %1814 = vst [vmem:[#allocation3 + $0x1c8] sm:$0xf] %v5800_v7  ;;  %v5843_v1 = vrot.slane %v475_v46, 7  ;;  %v478_v2 = vshll.u32 %v432_v28, 16  ;;  %v876_v15 = vld [vmem:[#allocation2 + $0x9c] sm:$0xf]  ;;  %v617_v19 = vsel %vm5706_vm4, %v609_v50, %v616_v61  ;;  %v377_v28 = vadd.f32 %v5664_v6, %v342_v3 }
  0x6e   : > { %3436 = vmatmul.bf16.vlgmr.msra.gmra.mxu1 %v4612_v32  ;;  %1815 = vst [vmem:[#allocation3 + $0x1ec] sm:$0xf] %v5804_v12  ;;  %v676_v9 = vor.u32 %v674_v45, %v673_v44  ;;  %v316_v17 = vld [vmem:[%s5636_s25 + $0x98] sm:$0xff]  ;;  %v5498_v21 = vld [vmem:[%s6886_s1 + $0xa8] sm:$0xff]  ;;  %v472_v22 = vor.u32 %v470_v63, %v469_v62  ;;  %v473_v23 = vrot.slane %v469_v62, 4  ;;  %v350_v29 = vmul.f32 %v5659_v5, %v315_v10  ;;  %v299_v42 = vld [vmem:[%s5636_s25 + $0x10] sm:$0xff] }
  0x6f   : > { %3587 = vmatpush.bf16.msrb.mxu2 %v5499_v59  ;;  %3498 = vmatpush.bf16.msrb.mxu1 %v5491_v13  ;;  %982 = vst [vmem:[#allocation3 + $0x360] sm:$0xf] %v5818_v24  ;;  %v608_v59 = vor.u32 %v606_v35, %v605_v30  ;;  %v677_v13 = vrot.slane %v673_v44, 4  ;;  %v480_v26 = vor.u32 %v478_v2, %v5843_v1  ;;  %v790_v27 = vld [vmem:[#allocation2 + $0xc] sm:$0xf]  ;;  %v323_v30 = vld [vmem:[%s5636_s25 + $0xd0] sm:$0xff] }
  0x70   : > { %3676 = vmatpush.bf16.msrb.mxu3 %v5507_v0  ;;  %v4755_v58 = vld [vmem:[#allocation3 + $0x240] sm:$0xf]  ;;  %983 = vst [vmem:[#allocation3 + $0x384] sm:$0xf] %v5829_v38  ;;  %v877_v32 = vsel %vm5714_vm5, %v676_v9, %v876_v15  ;;  %v351_v35 = vmul.f32 %v5659_v5, %v316_v17  ;;  %v378_v41 = vadd.f32 %v5664_v6, %v343_v16  ;;  %v409_v50 = vmax.f32 %v377_v28, 0.0  ;;  %v5506_v56 = vld [vmem:[%s6886_s1 + $0xe8] sm:$0xff] }
  0x71   : > { %v5409_v0 = vld [vmem:[#allocation3 + $0x260] sm:$0xf0]  ;;  %1690 = vst [vmem:[#allocation3 + $0x324] sm:$0xf] %v5818_v24  ;;  %v849_v20 = vsel %vm5714_vm5, %v608_v59, %v848_v51  ;;  %v685_v40 = vsel %vm5706_vm4, %v677_v13, %v684_v14  ;;  %v791_v45 = vsel %vm5714_vm5, %v472_v22, %v790_v27  ;;  %v358_v46 = vmul.f32 %v5659_v5, %v323_v30  ;;  %v5490_v59 = vld [vmem:[%s6886_s1 + $0x68] sm:$0xff]  ;;  %v5497_v63 = vld [vmem:[%s6886_s1 + $0xa0] sm:$0xff] }
  0x72   : > { %v4756_v4 = vor.u32 %v5409_v0, %v4755_v58  ;;  %1691 = vst [vmem:[#allocation3 + $0x348] sm:$0xf] %v5829_v38  ;;  %v324_v37 = vld [vmem:[%s5636_s25 + $0xd8] sm:$0xff]  ;;  %v481_v48 = vsel %vm5706_vm4, %v473_v23, %v480_v26  ;;  %v385_v51 = vadd.f32 %v5664_v6, %v350_v29  ;;  %v5515_v58 = vld [vmem:[%s6886_s1 + $0x130] sm:$0xff]  ;;  %v386_v61 = vadd.f32 %v5664_v6, %v351_v35 }
  0x73   : > { %1822 = vst [vmem:[#allocation3 + $0x2e8] sm:$0xf] %v5818_v24  ;;  %3588 = vmatpush.bf16.msrb.mxu2 %v5498_v21  ;;  %v300_v47 = vld [vmem:[%s5636_s25 + $0x18] sm:$0xff]  ;;  %v359_v55 = vmul.f32 %v5659_v5, %v324_v37  ;;  %v334_v62 = vmul.f32 %v5659_v5, %v299_v42  ;;  %v410_v0 = vmax.f32 %v378_v41, 0.0  ;;  %3765 = vmatpush.bf16.msrb.mxu0 %v5515_v58  ;;  %vm990_vm7 = vsmask.f32 3328 }
  0x74   : > { %3456 = vmatmul.bf16.vlgmr.msra.gmra.mxu2 %v4756_v4  ;;  %1823 = vst [vmem:[#allocation3 + $0x30c] sm:$0xf] %v5829_v38  ;;  %v335_v2 = vmul.f32 %v5659_v5, %v300_v47  ;;  %3677 = vmatpush.bf16.msrb.mxu3 %v5506_v56  ;;  %v5505_v4 = vld [vmem:[%s6886_s1 + $0xe0] sm:$0xff]  ;;  %v393_v9 = vadd.f32 %v5664_v6, %v358_v46  ;;  %v417_v14 = vmax.f32 %v385_v51, 0.0  ;;  %v418_v16 = vmax.f32 %v386_v61, 0.0 }
  0x75   : > { %822 = vst [vmem:[#allocation2 + $0x3c] sm:$0xf] %v821_v8  ;;  %v5514_v8 = vld [vmem:[%s6886_s1 + $0x128] sm:$0xff]  ;;  %3499 = vmatpush.bf16.msrb.mxu1 %v5490_v59  ;;  %v5914_v13 = vpack.c.bf16 %v409_v50, %v409_v50  ;;  %v394_v15 = vadd.f32 %v5664_v6, %v359_v55  ;;  %v369_v17 = vadd.f32 %v5664_v6, %v334_v62  ;;  %vm991_vm8 = vsmask.f32 7440 }
  0x76   : > { %v4899_v31 = vld [vmem:[#allocation3 + $0x360] sm:$0xf]  ;;  %823 = vst [vmem:[#allocation2 + $0x40] sm:$0xf] %v549_v11  ;;  %v5489_v11 = vld [vmem:[%s6886_s1 + $0x60] sm:$0xff]  ;;  %v442_v21 = vpack.c.bf16 %v410_v0, %v410_v0  ;;  %v425_v22 = vmax.f32 %v393_v9, 0.0  ;;  %v449_v27 = vpack.c.bf16 %v417_v14, %v417_v14  ;;  %v450_v29 = vpack.c.bf16 %v418_v16, %v418_v16  ;;  %vm6199_vm10 = vmor %vm990_vm7, %vm991_vm8 }
  0x77   : > { %v5445_v39 = vld [vmem:[#allocation3 + $0x380] sm:$0xf0]  ;;  %850 = vst [vmem:[#allocation2 + $0x6c] sm:$0xf] %v849_v20  ;;  %3589 = vmatpush.bf16.msrb.mxu2 %v5497_v63  ;;  %3766 = vmatpush.bf16.msrb.mxu0 %v5514_v8  ;;  %v552_v26 = vshrl.u32 %v5914_v13, 16  ;;  %v426_v28 = vmax.f32 %v394_v15, 0.0 }
  0x78   : > { %v4900_v44 = vor.u32 %v5445_v39, %v4899_v31  ;;  %851 = vst [vmem:[#allocation2 + $0x70] sm:$0xf] %v617_v19  ;;  %v370_v19 = vadd.f32 %v5664_v6, %v335_v2  ;;  %3678 = vmatpush.bf16.msrb.mxu3 %v5505_v4  ;;  %v401_v30 = vmax.f32 %v369_v17, 0.0  ;;  %v560_v35 = vshrl.u32 %v442_v21, 16  ;;  %v827_v9 = vld [vmem:[#allocation2 + $0x48] sm:$0xf] }
  0x79   : > { %878 = vst [vmem:[#allocation2 + $0x9c] sm:$0xf] %v877_v32  ;;  %3500 = vmatpush.bf16.msrb.mxu1 %v5489_v11  ;;  %v457_v37 = vpack.c.bf16 %v425_v22, %v425_v22  ;;  %v620_v41 = vshrl.u32 %v449_v27, 16  ;;  %v5934_v42 = vpack.c.bf16 %v426_v28, %v426_v28  ;;  %v628_v46 = vshrl.u32 %v450_v29, 16 }
  0x7a   : > { %3476 = vmatmul.bf16.vlgmr.msra.gmra.mxu3 %v4900_v44  ;;  %879 = vst [vmem:[#allocation2 + $0xa0] sm:$0xf] %v685_v40  ;;  %v402_v31 = vmax.f32 %v370_v19, 0.0  ;;  %v5932_v40 = vrot.slane %v552_v26, 7  ;;  %v5939_v47 = vpack.c.bf16 %v401_v30, %v401_v30  ;;  %v555_v51 = vshll.u32 %v5914_v13, 16 }
  0x7b   : > { %792 = vst [vmem:[#allocation2 + $0xc] sm:$0xf] %v791_v45  ;;  %v5948_v55 = vrot.slane %v560_v35, 7  ;;  %v563_v56 = vshll.u32 %v442_v21, 16  ;;  %v688_v58 = vshrl.u32 %v457_v37, 16  ;;  %v622_v61 = vrot.slane %v620_v41, 7 }
  0x7c   : > { %v5899_v3 = vld [vmem:[#allocation2 + $0x3c] sm:$0xf]  ;;  %793 = vst [vmem:[#allocation2 + $0x10] sm:$0xf] %v481_v48  ;;  %v5944_v50 = vpack.c.bf16 %v402_v31, %v402_v31  ;;  %v558_v59 = vrot.slane %v5932_v40, 4  ;;  %v623_v62 = vshll.u32 %v449_v27, 16  ;;  %v557_v16 = vor.u32 %v555_v51, %v5932_v40 }
  0x7d   : > { %v5908_v10 = vld [vmem:[#allocation2 + $0x40] sm:$0xf]  ;;  %968 = vst [vmem:[#allocation3 + $0x168] sm:$0xf] %v5899_v3  ;;  %v696_v63 = vshrl.u32 %v5934_v42, 16  ;;  %v5954_v2 = vrot.slane %v628_v46, 7  ;;  %v565_v22 = vor.u32 %v563_v56, %v5948_v55 }
  0x7e   : > { %969 = vst [vmem:[#allocation3 + $0x18c] sm:$0xf] %v5908_v10  ;;  %v5922_v20 = vld [vmem:[#allocation2 + $0x6c] sm:$0xf]  ;;  %v484_v4 = vshrl.u32 %v5939_v47, 16  ;;  %v631_v11 = vshll.u32 %v450_v29, 16  ;;  %v625_v29 = vor.u32 %v623_v62, %v622_v61 }
  0x7f   : > { %1676 = vst [vmem:[#allocation3 + $0x12c] sm:$0xf] %v5899_v3  ;;  %v5925_v23 = vld [vmem:[#allocation2 + $0x70] sm:$0xf]  ;;  %v492_v13 = vshrl.u32 %v5944_v50, 16  ;;  %v690_v17 = vrot.slane %v688_v58, 7  ;;  %v566_v56 = vsel %vm5706_vm4, %v558_v59, %v565_v22 }
  0x80   : > { %1677 = vst [vmem:[#allocation3 + $0x150] sm:$0xf] %v5908_v10  ;;  %v5937_v45 = vld [vmem:[#allocation2 + $0x9c] sm:$0xf]  ;;  %v691_v19 = vshll.u32 %v457_v37, 16  ;;  %v5967_v27 = vrot.slane %v696_v63, 7  ;;  %v633_v37 = vor.u32 %v631_v11, %v5954_v2 }
  0x81   : > { %1808 = vst [vmem:[#allocation3 + $0xf0] sm:$0xf] %v5899_v3  ;;  %v5942_v48 = vld [vmem:[#allocation2 + $0xa0] sm:$0xf]  ;;  %v855_v26 = vld [vmem:[#allocation2 + $0x78] sm:$0xf] }
  0x82   : > { %1809 = vst [vmem:[#allocation3 + $0x114] sm:$0xf] %v5908_v10  ;;  %v5960_v15 = vld [vmem:[#allocation2 + $0xc] sm:$0xf]  ;;  %v699_v28 = vshll.u32 %v5934_v42, 16  ;;  %v486_v30 = vrot.slane %v484_v4, 7  ;;  %v693_v46 = vor.u32 %v691_v19, %v690_v17 }
  0x83   : > { %976 = vst [vmem:[#allocation3 + $0x288] sm:$0xf] %v5922_v20  ;;  %v5964_v21 = vld [vmem:[#allocation2 + $0x10] sm:$0xf]  ;;  %v487_v31 = vshll.u32 %v5939_v47, 16  ;;  %v626_v35 = vrot.slane %v622_v61, 4 }
  0x84   : > { %v4647_v32 = vld [vmem:[#allocation3 + $0x168] sm:$0xf]  ;;  %977 = vst [vmem:[#allocation3 + $0x2ac] sm:$0xf] %v5925_v23  ;;  %v495_v40 = vshll.u32 %v5944_v50, 16  ;;  %v310_v41 = vld [vmem:[%s5636_s25 + $0x68] sm:$0xff]  ;;  %v701_v61 = vor.u32 %v699_v28, %v5967_v27 }
  0x85   : > { %v5382_v39 = vld [vmem:[#allocation3 + $0x188] sm:$0xf0]  ;;  %1684 = vst [vmem:[#allocation3 + $0x24c] sm:$0xf] %v5922_v20  ;;  %v883_v47 = vld [vmem:[#allocation2 + $0xa8] sm:$0xf]  ;;  %v345_v59 = vmul.f32 %v5659_v5, %v310_v41 }
  0x86   : > { %v4648_v44 = vor.u32 %v5382_v39, %v4647_v32  ;;  %1685 = vst [vmem:[#allocation3 + $0x270] sm:$0xf] %v5925_v23  ;;  %v309_v32 = vld [vmem:[%s5636_s25 + $0x60] sm:$0xff]  ;;  %v5975_v39 = vrot.slane %v492_v13, 7  ;;  %v694_v58 = vrot.slane %v690_v17, 4  ;;  %v5496_v4 = vld [vmem:[%s6886_s1 + $0x98] sm:$0xff] }
  0x87   : > { %1816 = vst [vmem:[#allocation3 + $0x210] sm:$0xf] %v5922_v20  ;;  %v344_v50 = vmul.f32 %v5659_v5, %v309_v32  ;;  %v317_v62 = vld [vmem:[%s5636_s25 + $0xa0] sm:$0xff]  ;;  %v490_v11 = vrot.slane %v486_v30, 4  ;;  %3590 = vmatpush.bf16.msrb.mxu2 %v5496_v4  ;;  %v318_v17 = vld [vmem:[%s5636_s25 + $0xa8] sm:$0xff]  ;;  %vm1489_vm9 = vcmask 1042432  }
  0x88   : > { %6910 = vst [vmem:[#allocation6_spill] sm:$0xff] %v5942_v48  ;;  %3441 = vmatmul.bf16.gmra.mxu1 %v4648_v44  ;;  %v828_v44 = vsel %vm5714_vm5, %v557_v16, %v827_v9  ;;  %v634_v9 = vsel %vm5706_vm4, %v626_v35, %v633_v37  ;;  %v497_v13 = vor.u32 %v495_v40, %v5975_v39  ;;  %v325_v28 = vld [vmem:[%s5636_s25 + $0xe0] sm:$0xff]  ;;  %v326_v32 = vld [vmem:[%s5636_s25 + $0xe8] sm:$0xff]  ;;  %vm1490_vm11 = vcmask 1046532  }
  0x89   : > { %1817 = vst [vmem:[#allocation3 + $0x234] sm:$0xf] %v5925_v23  ;;  %v884_v16 = vsel %vm5714_vm5, %v693_v46, %v883_v47  ;;  %v352_v19 = vmul.f32 %v5659_v5, %v317_v62  ;;  %v702_v22 = vsel %vm5706_vm4, %v694_v58, %v701_v61  ;;  %v353_v40 = vmul.f32 %v5659_v5, %v318_v17  ;;  %v301_v41 = vld [vmem:[%s5636_s25 + $0x20] sm:$0xff]  ;;  %v5504_v46 = vld [vmem:[%s6886_s1 + $0xd8] sm:$0xff]  ;;  %v5495_v61 = vld [vmem:[%s6886_s1 + $0x90] sm:$0xff] }
  0x8a   : > { %984 = vst [vmem:[#allocation3 + $0x3a8] sm:$0xf] %v5937_v45  ;;  %v4791_v0 = vld [vmem:[#allocation3 + $0x288] sm:$0xf]  ;;  %v498_v37 = vsel %vm5706_vm4, %v490_v11, %v497_v13  ;;  %v360_v58 = vmul.f32 %v5659_v5, %v325_v28  ;;  %v361_v62 = vmul.f32 %v5659_v5, %v326_v32  ;;  %3679 = vmatpush.bf16.msrb.mxu3 %v5504_v46  ;;  %v5487_v11 = vld [vmem:[%s6886_s1 + $0x50] sm:$0xff]  ;;  %vm6223_vm12 = vmor %vm1489_vm9, %vm1490_vm11 }
  0x8b   : > { %985 = vst [vmem:[#allocation3 + $0x3cc] sm:$0xf] %v5942_v48  ;;  %v5418_v8 = vld [vmem:[#allocation3 + $0x2a8] sm:$0xf0]  ;;  %v388_v13 = vadd.f32 %v5664_v6, %v353_v40  ;;  %3591 = vmatpush.bf16.msrb.mxu2 %v5495_v61 }
  0x8c   : > { %1692 = vst [vmem:[#allocation3 + $0x36c] sm:$0xf] %v5937_v45  ;;  %v4792_v14 = vor.u32 %v5418_v8, %v4791_v0  ;;  %v856_v0 = vsel %vm5714_vm5, %v625_v29, %v855_v26  ;;  %v489_v8 = vor.u32 %v487_v31, %v486_v30  ;;  %v379_v26 = vadd.f32 %v5664_v6, %v344_v50  ;;  %v5513_v47 = vld [vmem:[%s6886_s1 + $0x120] sm:$0xff] }
  0x8d   : > { %1693 = vst [vmem:[#allocation3 + $0x390] sm:$0xf] %v5942_v48  ;;  %v380_v31 = vadd.f32 %v5664_v6, %v345_v59  ;;  %3767 = vmatpush.bf16.msrb.mxu0 %v5513_v47  ;;  %v395_v17 = vadd.f32 %v5664_v6, %v360_v58 }
  0x8e   : > { %1824 = vst [vmem:[#allocation3 + $0x330] sm:$0xf] %v5937_v45  ;;  %3461 = vmatmul.bf16.gmra.mxu2 %v4792_v14  ;;  %v799_v14 = vld [vmem:[#allocation2 + $0x18] sm:$0xf]  ;;  %v411_v50 = vmax.f32 %v379_v26, 0.0 }
  0x8f   : > { %6911 = vst [vmem:[#allocation7_spill] sm:$0xff] %v5967_v27  ;;  %v800_v30 = vsel %vm5714_vm5, %v489_v8, %v799_v14  ;;  %v412_v4 = vmax.f32 %v380_v31, 0.0  ;;  %v336_v8 = vmul.f32 %v5659_v5, %v301_v41 }
  0x90   : > { %1825 = vst [vmem:[#allocation3 + $0x354] sm:$0xf] %v5942_v48  ;;  %v443_v26 = vpack.c.bf16 %v411_v50, %v411_v50 }
  0x91   : > { %960 = vst [vmem:[#allocation3 + $0x48] sm:$0xf] %v5960_v15  ;;  %v4935_v42 = vld [vmem:[#allocation3 + $0x3a8] sm:$0xf]  ;;  %v371_v28 = vadd.f32 %v5664_v6, %v336_v8 }
  0x92   : > { %961 = vst [vmem:[#allocation3 + $0x6c] sm:$0xf] %v5964_v21  ;;  %v5454_v51 = vld [vmem:[#allocation3 + $0x3c8] sm:$0xf0]  ;;  %v569_v41 = vshrl.u32 %v443_v26, 16 }
  0x93   : > { %1668 = vst [vmem:[#allocation3 + $0xc] sm:$0xf] %v5960_v15  ;;  %v4936_v63 = vor.u32 %v5454_v51, %v4935_v42  ;;  %v302_v42 = vld [vmem:[%s5636_s25 + $0x28] sm:$0xff]  ;;  %v5488_v51 = vld [vmem:[%s6886_s1 + $0x58] sm:$0xff] }
  0x94   : > { %1669 = vst [vmem:[#allocation3 + $0x30] sm:$0xf] %v5964_v21  ;;  %3501 = vmatpush.bf16.msrb.mxu1 %v5488_v51  ;;  %v337_v14 = vmul.f32 %v5659_v5, %v302_v42  ;;  %v403_v42 = vmax.f32 %v371_v28, 0.0 }
  0x95   : > { %829 = vst [vmem:[#allocation2 + $0x48] sm:$0xf] %v828_v44  ;;  %3481 = vmatmul.bf16.gmra.mxu3 %v4936_v63 }
  0x96   : > { %830 = vst [vmem:[#allocation2 + $0x4c] sm:$0xf] %v566_v56  ;;  %v387_v56 = vadd.f32 %v5664_v6, %v352_v19  ;;  %v396_v19 = vadd.f32 %v5664_v6, %v361_v62  ;;  %v372_v31 = vadd.f32 %v5664_v6, %v337_v14  ;;  %v435_v8 = vpack.c.bf16 %v403_v42, %v403_v42 }
  0x97   : > { %857 = vst [vmem:[#allocation2 + $0x78] sm:$0xf] %v856_v0  ;;  %v5503_v0 = vld [vmem:[%s6886_s1 + $0xd0] sm:$0xff] }
  0x98   : > { %v4503_v29 = vld [vmem:[#allocation3 + $0x48] sm:$0xf]  ;;  %858 = vst [vmem:[#allocation2 + $0x7c] sm:$0xf] %v634_v9  ;;  %v5512_v9 = vld [vmem:[%s6886_s1 + $0x118] sm:$0xff]  ;;  %3680 = vmatpush.bf16.msrb.mxu3 %v5503_v0  ;;  %3502 = vmatpush.bf16.msrb.mxu1 %v5487_v11  ;;  %v404_v51 = vmax.f32 %v372_v31, 0.0 }
  0x99   : > { %v5346_v35 = vld [vmem:[#allocation3 + $0x68] sm:$0xf0]  ;;  %885 = vst [vmem:[#allocation2 + $0xa8] sm:$0xf] %v884_v16  ;;  %v419_v16 = vmax.f32 %v387_v56, 0.0  ;;  %3768 = vmatpush.bf16.msrb.mxu0 %v5512_v9  ;;  %v572_v0 = vshll.u32 %v443_v26, 16 }
  0x9a   : > { %v4504_v44 = vor.u32 %v5346_v35, %v4503_v29  ;;  %886 = vst [vmem:[#allocation2 + $0xac] sm:$0xf] %v702_v22  ;;  %v444_v29 = vpack.c.bf16 %v412_v4, %v412_v4  ;;  %v427_v35 = vmax.f32 %v395_v17, 0.0  ;;  %v571_v9 = vrot.slane %v569_v41, 7  ;;  %v834_v41 = vld [vmem:[#allocation2 + $0x54] sm:$0xf] }
  0x9b   : > { %801 = vst [vmem:[#allocation2 + $0x18] sm:$0xf] %v800_v30  ;;  %v420_v30 = vmax.f32 %v388_v13, 0.0  ;;  %v6060_v32 = vpack.c.bf16 %v419_v16, %v419_v16  ;;  %v436_v14 = vpack.c.bf16 %v404_v51, %v404_v51  ;;  %v504_v48 = vshll.u32 %v435_v8, 16 }
  0x9c   : > { %3421 = vmatmul.bf16.gmra.mxu0 %v4504_v44  ;;  %v6030_v63 = vld [vmem:[#allocation2 + $0x48] sm:$0xf]  ;;  %802 = vst [vmem:[#allocation2 + $0x1c] sm:$0xf] %v498_v37  ;;  %v428_v37 = vmax.f32 %v396_v19, 0.0  ;;  %v577_v46 = vshrl.u32 %v444_v29, 16  ;;  %v459_v61 = vpack.c.bf16 %v427_v35, %v427_v35 }
  0x9d   : > { %v6036_v59 = vld [vmem:[#allocation2 + $0x4c] sm:$0xf]  ;;  %970 = vst [vmem:[#allocation3 + $0x1b0] sm:$0xf] %v6030_v63  ;;  %v452_v47 = vpack.c.bf16 %v420_v30, %v420_v30  ;;  %v637_v58 = vshrl.u32 %v6060_v32, 16  ;;  %v580_v4 = vshll.u32 %v444_v29, 16 }
  0x9e   : > { %971 = vst [vmem:[#allocation3 + $0x1d4] sm:$0xf] %v6036_v59  ;;  %v6052_v22 = vld [vmem:[#allocation2 + $0x78] sm:$0xf]  ;;  %v460_v62 = vpack.c.bf16 %v428_v37, %v428_v37  ;;  %v6074_v11 = vrot.slane %v577_v46, 7  ;;  %v705_v19 = vshrl.u32 %v459_v61, 16 }
  0x9f   : > { %1678 = vst [vmem:[#allocation3 + $0x174] sm:$0xf] %v6030_v63  ;;  %v6056_v5 = vld [vmem:[#allocation2 + $0x7c] sm:$0xf]  ;;  %v645_v13 = vshrl.u32 %v452_v47, 16  ;;  %v639_v17 = vrot.slane %v637_v58, 7 }
  0xa0   : > { %1679 = vst [vmem:[#allocation3 + $0x198] sm:$0xf] %v6036_v59  ;;  %v6066_v56 = vld [vmem:[#allocation2 + $0xa8] sm:$0xf]  ;;  %v640_v30 = vshll.u32 %v6060_v32, 16  ;;  %v713_v26 = vshrl.u32 %v460_v62, 16  ;;  %v574_v32 = vor.u32 %v572_v0, %v571_v9 }
  0xa1   : > { %1810 = vst [vmem:[#allocation3 + $0x138] sm:$0xf] %v6030_v63  ;;  %v6070_v50 = vld [vmem:[#allocation2 + $0xac] sm:$0xf]  ;;  %v648_v35 = vshll.u32 %v452_v47, 16  ;;  %v501_v37 = vshrl.u32 %v435_v8, 16  ;;  %v582_v47 = vor.u32 %v580_v4, %v6074_v11 }
  0xa2   : > { %1811 = vst [vmem:[#allocation3 + $0x15c] sm:$0xf] %v6036_v59  ;;  %v6080_v31 = vld [vmem:[#allocation2 + $0x18] sm:$0xf]  ;;  %v6085_v42 = vrot.slane %v645_v13, 7  ;;  %v575_v46 = vrot.slane %v571_v9, 4  ;;  %v642_v13 = vor.u32 %v640_v30, %v639_v17 }
  0xa3   : > { %978 = vst [vmem:[#allocation3 + $0x2d0] sm:$0xf] %v6052_v22  ;;  %v707_v51 = vrot.slane %v705_v19, 7  ;;  %v643_v58 = vrot.slane %v639_v17, 4  ;;  %v512_v9 = vshll.u32 %v436_v14, 16 }
  0xa4   : > { %v4683_v40 = vld [vmem:[#allocation3 + $0x1b0] sm:$0xf]  ;;  %979 = vst [vmem:[#allocation3 + $0x2f4] sm:$0xf] %v6056_v5  ;;  %v583_v8 = vsel %vm5706_vm4, %v575_v46, %v582_v47 }
  0xa5   : > { %v5391_v44 = vld [vmem:[#allocation3 + $0x1d0] sm:$0xf0]  ;;  %1686 = vst [vmem:[#allocation3 + $0x294] sm:$0xf] %v6052_v22  ;;  %v711_v17 = vrot.slane %v707_v51, 4 }
  0xa6   : > { %v4684_v6 = vor.u32 %v5391_v44, %v4683_v40  ;;  %1687 = vst [vmem:[#allocation3 + $0x2b8] sm:$0xf] %v6056_v5  ;;  %v6083_v40 = vld [vmem:[#allocation2 + $0x1c] sm:$0xf]  ;;  %v509_v44 = vshrl.u32 %v436_v14, 16 }
  0xa7   : > { %6912 = vst [vmem:[#allocation8_spill] sm:$0xff] %v6066_v56 }
  0xa8   : > { %1818 = vst [vmem:[#allocation3 + $0x258] sm:$0xf] %v6052_v22  ;;  %3446 = vmatmul.bf16.gmra.mxu1 %v4684_v6  ;;  %v708_v6 = vshll.u32 %v459_v61, 16  ;;  %v650_v61 = vor.u32 %v648_v35, %v6085_v42  ;;  %v6095_v0 = vrot.slane %v509_v44, 7 }
  0xa9   : > { %6913 = vst [vmem:[#allocation9_spill] sm:$0xff] %v6070_v50 }
  0xaa   : > { %1819 = vst [vmem:[#allocation3 + $0x27c] sm:$0xf] %v6056_v5  ;;  %v4827_v16 = vld [vmem:[#allocation3 + $0x2d0] sm:$0xf]  ;;  %v710_v19 = vor.u32 %v708_v6, %v707_v51  ;;  %v651_v35 = vsel %vm5706_vm4, %v643_v58, %v650_v61  ;;  %v5493_v61 = vld [vmem:[%s6886_s1 + $0x80] sm:$0xff] }
  0xab   : > { %986 = vst [vmem:[#allocation3 + $0x3f0] sm:$0xf] %v6066_v56  ;;  %v5427_v28 = vld [vmem:[#allocation3 + $0x2f0] sm:$0xf0] }
  0xac   : > { %987 = vst [vmem:[#allocation3 + $0x414] sm:$0xf] %v6070_v50  ;;  %v4828_v29 = vor.u32 %v5427_v28, %v4827_v16  ;;  %v862_v16 = vld [vmem:[#allocation2 + $0x84] sm:$0xf]  ;;  %v6090_v28 = vrot.slane %v713_v26, 7  ;;  %v5502_v58 = vld [vmem:[%s6886_s1 + $0xc8] sm:$0xff] }
  0xad   : > { %1694 = vst [vmem:[#allocation3 + $0x3b4] sm:$0xf] %v6066_v56  ;;  %v890_v26 = vld [vmem:[#allocation2 + $0xb4] sm:$0xf]  ;;  %3681 = vmatpush.bf16.msrb.mxu3 %v5502_v58 }
  0xae   : > { %1695 = vst [vmem:[#allocation3 + $0x3d8] sm:$0xf] %v6070_v50  ;;  %3466 = vmatmul.bf16.gmra.mxu2 %v4828_v29  ;;  %v503_v29 = vrot.slane %v501_v37, 7 }
  0xaf   : > { %1826 = vst [vmem:[#allocation3 + $0x378] sm:$0xf] %v6066_v56  ;;  %v716_v56 = vshll.u32 %v460_v62, 16  ;;  %v835_v62 = vsel %vm5714_vm5, %v574_v32, %v834_v41  ;;  %v514_v41 = vor.u32 %v512_v9, %v6095_v0  ;;  %v891_v32 = vsel %vm5714_vm5, %v710_v19, %v890_v26 }
  0xb0   : > { %1827 = vst [vmem:[#allocation3 + $0x39c] sm:$0xf] %v6070_v50  ;;  %v506_v14 = vor.u32 %v504_v48, %v503_v29  ;;  %v507_v37 = vrot.slane %v503_v29, 4  ;;  %v994_v29 = vshrl.u32 %v5691_v33, 16  ;;  %v997_v19 = vshll.u32 %v5691_v33, 16 }
  0xb1   : > { %962 = vst [vmem:[#allocation3 + $0x90] sm:$0xf] %v6080_v31  ;;  %v718_v30 = vor.u32 %v716_v56, %v6090_v28  ;;  %v806_v56 = vld [vmem:[#allocation2 + $0x24] sm:$0xf]  ;;  %v1003_v26 = vshll.u32 %v5693_v34, 16 }
  0xb2   : > { %v4971_v27 = vld [vmem:[#allocation3 + $0x3f0] sm:$0xf]  ;;  %963 = vst [vmem:[#allocation3 + $0xb4] sm:$0xf] %v6083_v40  ;;  %v807_v6 = vsel %vm5714_vm5, %v506_v14, %v806_v56  ;;  %v515_v47 = vsel %vm5706_vm4, %v507_v37, %v514_v41  ;;  %v996_v14 = vrot.slane %v994_v29, 4  ;;  %v1021_v29 = vshll.u32 %v5960_v15, 16 }
  0xb3   : > { %v5463_v50 = vld [vmem:[#allocation3 + $0x410] sm:$0xf0]  ;;  %1670 = vst [vmem:[#allocation3 + $0x54] sm:$0xf] %v6080_v31  ;;  %v719_v51 = vsel %vm5706_vm4, %v711_v17, %v718_v30  ;;  %v5485_v17 = vld [vmem:[%s6886_s1 + $0x40] sm:$0xff]  ;;  %v1007_v30 = vshrl.u32 %v5693_v34, 16 }
  0xb4   : > { %v4972_v4 = vor.u32 %v5463_v50, %v4971_v27  ;;  %1671 = vst [vmem:[#allocation3 + $0x78] sm:$0xf] %v6083_v40  ;;  %v863_v27 = vsel %vm5714_vm5, %v642_v13, %v862_v16  ;;  %v5494_v50 = vld [vmem:[%s6886_s1 + $0x88] sm:$0xff]  ;;  %v5511_v16 = vld [vmem:[%s6886_s1 + $0x110] sm:$0xff]  ;;  %v6163_v56 = vrot.slane %v1003_v26, 5 }
  0xb5   : > { %1802 = vst [vmem:[#allocation3 + $0x18] sm:$0xf] %v6080_v31  ;;  %3592 = vmatpush.bf16.msrb.mxu2 %v5494_v50  ;;  %v5486_v13 = vld [vmem:[%s6886_s1 + $0x48] sm:$0xff]  ;;  %3769 = vmatpush.bf16.msrb.mxu0 %v5511_v16  ;;  %v5509_v50 = vld [vmem:[%s6886_s1 + $0x100] sm:$0xff]  ;;  %v1009_v41 = vrot.slane %v1007_v30, 4 }
  0xb6   : > { %3486 = vmatmul.bf16.gmra.mxu3 %v4972_v4  ;;  %1803 = vst [vmem:[#allocation3 + $0x3c] sm:$0xf] %v6083_v40  ;;  %v5501_v4 = vld [vmem:[%s6886_s1 + $0xc0] sm:$0xff]  ;;  %3503 = vmatpush.bf16.msrb.mxu1 %v5486_v13 }
  0xb7   : > { %836 = vst [vmem:[#allocation2 + $0x54] sm:$0xf] %v835_v62  ;;  %v5510_v62 = vld [vmem:[%s6886_s1 + $0x108] sm:$0xff]  ;;  %3682 = vmatpush.bf16.msrb.mxu3 %v5501_v4  ;;  %v1010_v16 = vor.u32 %v1009_v41, %v6163_v56 }
  0xb8   : > { %v4539_v44 = vld [vmem:[#allocation3 + $0x90] sm:$0xf]  ;;  %837 = vst [vmem:[#allocation2 + $0x58] sm:$0xf] %v583_v8 }
  0xb9   : > { %v5355_v46 = vld [vmem:[#allocation3 + $0xb0] sm:$0xf0]  ;;  %864 = vst [vmem:[#allocation2 + $0x84] sm:$0xf] %v863_v27  ;;  %3593 = vmatpush.bf16.msrb.mxu2 %v5493_v61  ;;  %3770 = vmatpush.bf16.msrb.mxu0 %v5510_v62  ;;  %v1494_v62 = vrot.slane %v5693_v34, 5 }
  0xba   : > { %v4540_v48 = vor.u32 %v5355_v46, %v4539_v44  ;;  %865 = vst [vmem:[#allocation2 + $0x88] sm:$0xf] %v651_v35  ;;  %v999_v35 = vrot.slane %v997_v19, 5  ;;  %3504 = vmatpush.bf16.msrb.mxu1 %v5485_v17  ;;  %v1018_v44 = vshrl.u32 %v5960_v15, 16  ;;  %v6168_v46 = vld [vmem:[#allocation2 + $0x8] sm:$0x1] }
  0xbb   : > { %892 = vst [vmem:[#allocation2 + $0xb4] sm:$0xf] %v891_v32  ;;  %v1013_v4 = vshll.u32 %v6168_v46, 16  ;;  %v1023_v19 = vrot.slane %v1021_v29, 5  ;;  %v1027_v17 = vshll.u32 %v5964_v21, 16  ;;  %v1496_v29 = vrot.slane %v1494_v62, 4 }
  0xbc   : > { %3426 = vmatmul.bf16.gmra.mxu0 %v4540_v48  ;;  %893 = vst [vmem:[#allocation2 + $0xb8] sm:$0xf] %v719_v51  ;;  %v1000_v48 = vor.u32 %v999_v35, %v996_v14  ;;  %v1020_v13 = vrot.slane %v1018_v44, 4 }
  0xbd   : > { %808 = vst [vmem:[#allocation2 + $0x24] sm:$0xf] %v807_v6  ;;  %3771 = vmatpush.bf16.msrb.mxu0 %v5509_v50  ;;  %v5532_v6 = vld [vmem:[%s6886_s1 + $0x1b8] sm:$0xff]  ;;  %v1011_v50 = vrot.slane %v1010_v16, 4  ;;  %v1015_v41 = vrot.slane %v1013_v4, 5  ;;  %v1045_v16 = vshll.u32 %v6080_v31, 16 }
  0xbe   : > { %v6134_v9 = vld [vmem:[#allocation2 + $0x54] sm:$0xf]  ;;  %809 = vst [vmem:[#allocation2 + $0x28] sm:$0xf] %v515_v47  ;;  %3942 = vmatpush.bf16.msra.mxu2 %v5532_v6  ;;  %v1001_v26 = vrot.slane %v1000_v48, 4  ;;  %v1024_v14 = vor.u32 %v1023_v19, %v1020_v13  ;;  %v4447_v13 = vrot.slane %v5691_v33, 9 }
  0xbf   : > { %v6143_v8 = vld [vmem:[#allocation2 + $0x58] sm:$0xf]  ;;  %972 = vst [vmem:[#allocation3 + $0x1f8] sm:$0xf] %v6134_v9  ;;  %v1497_v19 = vrot.slane %v6168_v46, 5 }
  0xc0   : > { %973 = vst [vmem:[#allocation3 + $0x21c] sm:$0xf] %v6143_v8  ;;  %v6154_v27 = vld [vmem:[#allocation2 + $0x84] sm:$0xf]  ;;  %v5540_v33 = vld [vmem:[%s6886_s1 + $0x1f8] sm:$0xff]  ;;  %v1006_v57 = vsel %vm6199_vm10, %v1001_v26, %v6163_v56 }
  0xc1   : > { %1680 = vst [vmem:[#allocation3 + $0x1bc] sm:$0xf] %v6134_v9  ;;  %v6160_v37 = vld [vmem:[#allocation2 + $0x88] sm:$0xf]  ;;  %4031 = vmatpush.bf16.msra.mxu3 %v5540_v33 }
  0xc2   : > { %1681 = vst [vmem:[#allocation3 + $0x1e0] sm:$0xf] %v6143_v8  ;;  %v6175_v58 = vld [vmem:[#allocation2 + $0xb4] sm:$0xf] }
  0xc3   : > { %1812 = vst [vmem:[#allocation3 + $0x180] sm:$0xf] %v6134_v9  ;;  %v6180_v61 = vld [vmem:[#allocation2 + $0xb8] sm:$0xf] }
  0xc4   : > { %1813 = vst [vmem:[#allocation3 + $0x1a4] sm:$0xf] %v6143_v8  ;;  %v6190_v44 = vld [vmem:[#allocation2 + $0x24] sm:$0xf] }
  0xc5   : > { %980 = vst [vmem:[#allocation3 + $0x318] sm:$0xf] %v6154_v27  ;;  %v6195_v6 = vld [vmem:[#allocation2 + $0x28] sm:$0xf] }
  0xc6   : > { %v4719_v32 = vld [vmem:[#allocation3 + $0x1f8] sm:$0xf]  ;;  %981 = vst [vmem:[#allocation3 + $0x33c] sm:$0xf] %v6160_v37 }
  0xc7   : > { %v5400_v51 = vld [vmem:[#allocation3 + $0x218] sm:$0xf0]  ;;  %1688 = vst [vmem:[#allocation3 + $0x2dc] sm:$0xf] %v6154_v27 }
  0xc8   : > { %v4720_v47 = vor.u32 %v5400_v51, %v4719_v32  ;;  %1689 = vst [vmem:[#allocation3 + $0x300] sm:$0xf] %v6160_v37  ;;  %v1025_v32 = vrot.slane %v1024_v14, 4  ;;  %v6192_v51 = vrot.slane %v1027_v17, 5  ;;  %v1501_v17 = vrot.slane %v5964_v21, 5 }
  0xc9   : > { %6914 = vst [vmem:[#allocation10_spill] sm:$0xff] %v6175_v58  ;;  %v1047_v14 = vrot.slane %v1045_v16, 5  ;;  %v4448_v16 = vrot.slane %v5960_v15, 9 }
  0xca   : > { %1820 = vst [vmem:[#allocation3 + $0x2a0] sm:$0xf] %v6154_v27  ;;  %3451 = vmatmul.bf16.gmra.mxu1 %v4720_v47  ;;  %v1042_v47 = vshrl.u32 %v6080_v31, 16  ;;  %v1030_v4 = vsel %vm6199_vm10, %v1025_v32, %v6192_v51 }
  0xcb   : > { %6915 = vst [vmem:[#allocation11_spill] sm:$0xff] %v6180_v61  ;;  %v1502_v56 = vsel %vm6223_vm12, %v4448_v16, %v1501_v17 }
  0xcc   : > { %1821 = vst [vmem:[#allocation3 + $0x2c4] sm:$0xf] %v6160_v37  ;;  %v4863_v30 = vld [vmem:[#allocation3 + $0x318] sm:$0xf] }
  0xcd   : > { %988 = vst [vmem:[#allocation3 + $0x438] sm:$0xf] %v6175_v58  ;;  %v5436_v35 = vld [vmem:[#allocation3 + $0x338] sm:$0xf0] }
  0xce   : > { %989 = vst [vmem:[#allocation3 + $0x45c] sm:$0xf] %v6180_v61  ;;  %v4864_v34 = vor.u32 %v5436_v35, %v4863_v30  ;;  %v1044_v30 = vrot.slane %v1042_v47, 4  ;;  %v5548_v47 = vld [vmem:[%s6886_s1 + $0x238] sm:$0xff] }
  0xcf   : > { %1696 = vst [vmem:[#allocation3 + $0x3fc] sm:$0xf] %v6175_v58  ;;  %4120 = vmatpush.bf16.msra.mxu0 %v5548_v47  ;;  %v499_v47 = vrot.slane %v5975_v39, 4 }
  0xd0   : > { %1697 = vst [vmem:[#allocation3 + $0x420] sm:$0xf] %v6180_v61  ;;  %3471 = vmatmul.bf16.gmra.mxu2 %v4864_v34  ;;  %v5524_v34 = vld [vmem:[%s6886_s1 + $0x178] sm:$0xff]  ;;  %v1048_v26 = vor.u32 %v1047_v14, %v1044_v30  ;;  %v4477_v14 = vld [vmem:[#allocation3 + $0x2c] sm:$0xf0] }
  0xd1   : > { %1828 = vst [vmem:[#allocation3 + $0x3c0] sm:$0xf] %v6175_v58  ;;  %3853 = vmatpush.bf16.msra.mxu1 %v5524_v34  ;;  %v1016_v58 = vsel %vm6199_vm10, %v1011_v50, %v1015_v41  ;;  %v1498_v50 = vsel %vm6223_vm12, %v1496_v29, %v1497_v19  ;;  %v1031_v41 = vshrl.u32 %v5964_v21, 16  ;;  %v5334_v19 = vld [vmem:[#allocation3 + $0xc] sm:$0xf] }
  0xd2   : > { %1829 = vst [vmem:[#allocation3 + $0x3e4] sm:$0xf] %v6180_v61  ;;  %v482_v61 = vrot.slane %v5843_v1, 4  ;;  %v1495_v1 = vsel %vm6223_vm12, %v4447_v13, %v1494_v62  ;;  %v803_v62 = vld [vmem:[#allocation2 + $0x20] sm:$0x1] }
  0xd3   : > { %964 = vst [vmem:[#allocation3 + $0xd8] sm:$0xf] %v6190_v44  ;;  %v1033_v13 = vrot.slane %v1031_v41, 4 }
  0xd4   : > { %v5007_v35 = vld [vmem:[#allocation3 + $0x438] sm:$0xf]  ;;  %965 = vst [vmem:[#allocation3 + $0xfc] sm:$0xf] %v6195_v6 }
  0xd5   : > { %v5472_v32 = vld [vmem:[#allocation3 + $0x458] sm:$0xf0]  ;;  %1672 = vst [vmem:[#allocation3 + $0x9c] sm:$0xf] %v6190_v44 }
  0xd6   : > { %v5008_v52 = vor.u32 %v5472_v32, %v5007_v35  ;;  %1673 = vst [vmem:[#allocation3 + $0xc0] sm:$0xf] %v6195_v6  ;;  %v796_v35 = vld [vmem:[#allocation2 + $0x14] sm:$0x1]  ;;  %v1051_v32 = vshll.u32 %v6083_v40, 16 }
  0xd7   : > { %1804 = vst [vmem:[#allocation3 + $0x60] sm:$0xf] %v6190_v44  ;;  %v797_v34 = vsel %vm6241_vm13, %v482_v61, %v796_v35  ;;  %v804_v61 = vsel %vm6241_vm13, %v499_v47, %v803_v62  ;;  %v1034_v35 = vor.u32 %v1033_v13, %v6192_v51 }
  0xd8   : > { %3491 = vmatmul.bf16.gmra.mxu3 %v5008_v52  ;;  %1805 = vst [vmem:[#allocation3 + $0x84] sm:$0xf] %v6195_v6  ;;  %v1053_v21 = vrot.slane %v1051_v32, 5 }
  0xd9   : > { %1409 = vst [vmem:[#allocation3 + $0x4] sm:$0xf] %v1006_v57  ;;  %v1049_v57 = vrot.slane %v1048_v26, 4  ;;  %v1035_v51 = vrot.slane %v1034_v35, 4 }
  0xda   : > { %v4575_v33 = vld [vmem:[#allocation3 + $0xd8] sm:$0xf]  ;;  %1410 = vst [vmem:[#allocation3 + $0x28] sm:$0xf] %v1016_v58  ;;  %v1055_v58 = vshrl.u32 %v6083_v40, 16 }
  0xdb   : > { %v5364_v52 = vld [vmem:[#allocation3 + $0xf8] sm:$0xf0]  ;;  %1636 = vst [vmem:[#allocation3 + $0x8] sm:$0xf] %v1495_v1  ;;  %v1054_v39 = vsel %vm6199_vm10, %v1049_v57, %v1053_v21  ;;  %v4449_v57 = vrot.slane %v6080_v31, 9 }
  0xdc   : > { %v4576_v16 = vor.u32 %v5364_v52, %v4575_v33  ;;  %1637 = vst [vmem:[#allocation3 + $0x2c] sm:$0xf] %v1498_v50  ;;  %v1503_v50 = vrot.slane %v1501_v17, 4  ;;  %v1057_v41 = vrot.slane %v1055_v58, 4  ;;  %v1066_v33 = vshrl.u32 %v6190_v44, 16 }
  0xdd   : > { %798 = vst [vmem:[#allocation2 + $0x14] sm:$0x1] %v797_v34  ;;  %v1069_v34 = vshll.u32 %v6190_v44, 16  ;;  %v4480_v52 = vor.u32 %v5334_v19, %v4477_v14 }
  0xde   : > { %3431 = vmatmul.bf16.gmra.mxu0 %v4576_v16  ;;  %1726 = vst [vmem:[#allocation3 + $0x10] sm:$0xf] %v1030_v4  ;;  %v1508_v16 = vrot.slane %v6083_v40, 5  ;;  %v1058_v17 = vor.u32 %v1057_v41, %v1053_v21  ;;  %v5531_v40 = vld [vmem:[%s6886_s1 + $0x1b0] sm:$0xff]  ;;  %v1075_v41 = vshll.u32 %v6195_v6, 16 }
  0xdf   : > { %1411 = vst [vmem:[#allocation3 + $0x4c] sm:$0xf] %v1030_v4  ;;  %3943 = vmatpush.bf16.msra.mxu2 %v5531_v40 }
  0xe0   : > { %v5333_v29 = vld [vmem:[#allocation3 + $0x4] sm:$0xf]  ;;  %1638 = vst [vmem:[#allocation3 + $0x50] sm:$0xf] %v1502_v56  ;;  %v1510_v19 = vrot.slane %v1508_v16, 4  ;;  %v1509_v31 = vsel %vm6223_vm12, %v4449_v57, %v1508_v16  ;;  %v1077_v57 = vrot.slane %v1075_v41, 5 }
  0xe1   : > { %v4469_v30 = vld [vmem:[#allocation3 + $0x24] sm:$0xf0]  ;;  %1770 = vst [vmem:[#allocation3 + $0x14] sm:$0xf] %v1502_v56  ;;  %v5343_v16 = vld [vmem:[#allocation3 + $0x54] sm:$0xf] }
  0xe2   : > { %v4472_v1 = vor.u32 %v5333_v29, %v4469_v30  ;;  %v4475_v26 = vld [vmem:[#allocation3 + $0x8] sm:$0xf]  ;;  %805 = vst [vmem:[#allocation2 + $0x20] sm:$0x1] %v804_v61  ;;  %v1068_v61 = vrot.slane %v1066_v33, 4  ;;  %v1071_v29 = vrot.slane %v1069_v34, 5 }
  0xe3   : > { %v5338_v4 = vld [vmem:[#allocation3 + $0x28] sm:$0xf0]  ;;  %1728 = vst [vmem:[#allocation3 + $0x58] sm:$0xf] %v1054_v39  ;;  %v1059_v30 = vrot.slane %v1058_v17, 4  ;;  %v533_v41 = vrot.slane %v5710_v54, 4 }
  0xe4   : > { %3505 = vmatmul.bf16.vlgmr.msrb.gmra.mxu1 %v4472_v1  ;;  %v4476_v32 = vor.u32 %v5338_v4, %v4475_v26  ;;  %v909_v47 = vld [vmem:[#allocation2 + $0x14] sm:$0x1]  ;;  %1860 = vst [vmem:[#allocation3 + $0x1c] sm:$0xf] %v1054_v39  ;;  %v1072_v1 = vor.u32 %v1071_v29, %v1068_v61  ;;  %v516_v4 = vrot.slane %v6095_v0, 4  ;;  %v1090_v0 = vshrl.u32 %v5764_v43, 16 }
  0xe5   : > { %v1037_v56 = vshll.u32 %v909_v47, 16  ;;  %v1504_v62 = vrot.slane %v909_v47, 5  ;;  %1413 = vst [vmem:[#allocation3 + $0x94] sm:$0xf] %v1054_v39  ;;  %v810_v33 = vld [vmem:[#allocation2 + $0x2c] sm:$0x1] }
  0xe6   : > { %3594 = vmatmul.bf16.vlgmr.msrb.gmra.mxu2 %v4476_v32  ;;  %1640 = vst [vmem:[#allocation3 + $0x98] sm:$0xf] %v1509_v31  ;;  %v4483_v34 = vld [vmem:[#allocation3 + $0x10] sm:$0xf]  ;;  %v5342_v17 = vld [vmem:[#allocation3 + $0x4c] sm:$0xf]  ;;  %v811_v40 = vsel %vm6241_vm13, %v516_v4, %v810_v33 }
  0xe7   : > { %v1039_v13 = vrot.slane %v1037_v56, 5  ;;  %v1505_v58 = vsel %vm6223_vm12, %v1503_v50, %v1504_v62  ;;  %v4511_v32 = vld [vmem:[#allocation3 + $0x50] sm:$0xf]  ;;  %1904 = vst [vmem:[#allocation3 + $0x20] sm:$0xf] %v1509_v31  ;;  %v1073_v56 = vrot.slane %v1072_v1, 4 }
  0xe8   : > { %3683 = vmatmul.bf16.vlgmr.msrb.gmra.mxu3 %v4480_v52  ;;  %1639 = vst [vmem:[#allocation3 + $0x74] sm:$0xf] %v1505_v58  ;;  %v1079_v62 = vshrl.u32 %v6195_v6, 16  ;;  %v5539_v1 = vld [vmem:[%s6886_s1 + $0x1f0] sm:$0xff]  ;;  %v1515_v33 = vrot.slane %v6195_v6, 5 }
  0xe9   : > { %v1040_v39 = vsel %vm6199_vm10, %v1035_v51, %v1039_v13  ;;  %1771 = vst [vmem:[#allocation3 + $0x38] sm:$0xf] %v1505_v58  ;;  %v912_v21 = vld [vmem:[#allocation2 + $0x20] sm:$0x1]  ;;  %v4513_v51 = vld [vmem:[#allocation3 + $0x74] sm:$0xf0]  ;;  %4032 = vmatpush.bf16.msra.mxu3 %v5539_v1 }
  0xea   : > { %1727 = vst [vmem:[#allocation3 + $0x34] sm:$0xf] %v1040_v39  ;;  %v1061_v14 = vshll.u32 %v912_v21, 16  ;;  %v1511_v35 = vrot.slane %v912_v21, 5  ;;  %v1093_v58 = vshll.u32 %v5764_v43, 16  ;;  %v1078_v21 = vsel %vm6199_vm10, %v1073_v56, %v1077_v57  ;;  %v5547_v4 = vld [vmem:[%s6886_s1 + $0x230] sm:$0xff] }
  0xeb   : > { %1412 = vst [vmem:[#allocation3 + $0x70] sm:$0xf] %v1040_v39  ;;  %4121 = vmatpush.bf16.msra.mxu0 %v5547_v4  ;;  %v4519_v56 = vld [vmem:[#allocation3 + $0x58] sm:$0xf] }
  0xec   : > { %v1063_v26 = vrot.slane %v1061_v14, 5  ;;  %v1512_v50 = vsel %vm6223_vm12, %v1510_v19, %v1511_v35  ;;  %1772 = vst [vmem:[#allocation3 + $0x5c] sm:$0xf] %v1509_v31  ;;  %v1092_v14 = vrot.slane %v1090_v0, 4  ;;  %v4516_v35 = vor.u32 %v5343_v16, %v4513_v51 }
  0xed   : > { %1641 = vst [vmem:[#allocation3 + $0xbc] sm:$0xf] %v1512_v50  ;;  %v1099_v31 = vshll.u32 %v5776_v49, 16  ;;  %v1103_v16 = vshrl.u32 %v5776_v49, 16 }
  0xee   : > { %v1064_v52 = vsel %vm6199_vm10, %v1059_v30, %v1063_v26  ;;  %1905 = vst [vmem:[#allocation3 + $0x44] sm:$0xf] %v1512_v50  ;;  %v1081_v30 = vrot.slane %v1079_v62, 4  ;;  %v5523_v26 = vld [vmem:[%s6886_s1 + $0x170] sm:$0xff]  ;;  %v1517_v62 = vrot.slane %v1515_v33, 4 }
  0xef   : > { %v5347_v47 = vld [vmem:[#allocation3 + $0x70] sm:$0xf0]  ;;  %1729 = vst [vmem:[#allocation3 + $0x7c] sm:$0xf] %v1064_v52  ;;  %3854 = vmatpush.bf16.msra.mxu1 %v5523_v26  ;;  %v1101_v51 = vrot.slane %v1099_v31, 5  ;;  %v550_v31 = vrot.slane %v5820_v25, 4 }
  0xf0   : > { %1861 = vst [vmem:[#allocation3 + $0x40] sm:$0xf] %v1064_v52  ;;  %v4512_v19 = vor.u32 %v5347_v47, %v4511_v32  ;;  %v817_v32 = vld [vmem:[#allocation2 + $0x38] sm:$0x1]  ;;  %v1082_v47 = vor.u32 %v1081_v30, %v1077_v57  ;;  %v1105_v57 = vrot.slane %v1103_v16, 4  ;;  %v1522_v25 = vrot.slane %v5776_v49, 5 }
  0xf1   : > { %v5339_v13 = vld [vmem:[#allocation3 + $0x30] sm:$0xf0]  ;;  %1414 = vst [vmem:[#allocation3 + $0xb8] sm:$0xf] %v1064_v52  ;;  %v4549_v26 = vld [vmem:[#allocation3 + $0xbc] sm:$0xf0] }
  0xf2   : > { %v4484_v61 = vor.u32 %v5339_v13, %v4483_v34  ;;  %v4505_v29 = vld [vmem:[#allocation3 + $0x6c] sm:$0xf0]  ;;  %1773 = vst [vmem:[#allocation3 + $0x80] sm:$0xf] %v1512_v50  ;;  %v4450_v50 = vrot.slane %v6190_v44, 9  ;;  %v1095_v34 = vrot.slane %v1093_v58, 5  ;;  %v818_v44 = vsel %vm6241_vm13, %v533_v41, %v817_v32 }
  0xf3   : > { %v4508_v39 = vor.u32 %v5342_v17, %v4505_v29  ;;  %812 = vst [vmem:[#allocation2 + $0x2c] sm:$0x1] %v811_v40  ;;  %v5351_v13 = vld [vmem:[#allocation3 + $0x94] sm:$0xf]  ;;  %v1083_v58 = vrot.slane %v1082_v47, 4  ;;  %v1106_v41 = vor.u32 %v1105_v57, %v1101_v51  ;;  %v1117_v32 = vshll.u32 %v5899_v3, 16 }
  0xf4   : > { %3772 = vmatmul.bf16.vlgmr.msrb.gmra.mxu0 %v4484_v61  ;;  %1730 = vst [vmem:[#allocation3 + $0xa0] sm:$0xf] %v1078_v21  ;;  %v1516_v54 = vsel %vm6223_vm12, %v4450_v50, %v1515_v33  ;;  %v1096_v52 = vor.u32 %v1095_v34, %v1092_v14  ;;  %v5356_v30 = vld [vmem:[#allocation3 + $0xb8] sm:$0xf0]  ;;  %v824_v33 = vld [vmem:[#allocation2 + $0x44] sm:$0x1] }
  0xf5   : > { %3510 = vmatmul.bf16.gmra.mxu1 %v4508_v39  ;;  %1415 = vst [vmem:[#allocation3 + $0xdc] sm:$0xf] %v1078_v21  ;;  %v4547_v39 = vld [vmem:[#allocation3 + $0x98] sm:$0xf]  ;;  %v1114_v34 = vshrl.u32 %v5899_v3, 16  ;;  %v1127_v47 = vshrl.u32 %v5908_v10, 16 }
  0xf6   : > { %3599 = vmatmul.bf16.gmra.mxu2 %v4512_v19  ;;  %1862 = vst [vmem:[#allocation3 + $0x64] sm:$0xf] %v1078_v21  ;;  %v1097_v6 = vrot.slane %v1096_v52, 4  ;;  %v5348_v61 = vld [vmem:[#allocation3 + $0x78] sm:$0xf0]  ;;  %v1123_v52 = vshll.u32 %v5908_v10, 16 }
  0xf7   : > { %1642 = vst [vmem:[#allocation3 + $0xe0] sm:$0xf] %v1516_v54  ;;  %v5352_v21 = vld [vmem:[#allocation3 + $0x9c] sm:$0xf]  ;;  %v4520_v1 = vor.u32 %v5348_v61, %v4519_v56 }
  0xf8   : > { %3688 = vmatmul.bf16.gmra.mxu3 %v4516_v35  ;;  %1774 = vst [vmem:[#allocation3 + $0xa4] sm:$0xf] %v1516_v54  ;;  %v1102_v17 = vsel %vm6199_vm10, %v1097_v6, %v1101_v51  ;;  %v4541_v40 = vld [vmem:[#allocation3 + $0xb4] sm:$0xf0]  ;;  %v4552_v16 = vor.u32 %v5352_v21, %v4549_v26  ;;  %v1116_v6 = vrot.slane %v1114_v34, 4  ;;  %v1107_v51 = vrot.slane %v1106_v41, 4 }
  0xf9   : > { %1906 = vst [vmem:[#allocation3 + $0x68] sm:$0xf] %v1516_v54  ;;  %v4544_v4 = vor.u32 %v5351_v13, %v4541_v40  ;;  %v4548_v54 = vor.u32 %v5356_v30, %v4547_v39  ;;  %v4451_v13 = vrot.slane %v5764_v43, 9  ;;  %v5530_v43 = vld [vmem:[%s6886_s1 + $0x1a8] sm:$0xff] }
  0xfa   : > { %v915_v0 = vld [vmem:[#allocation2 + $0x2c] sm:$0x1]  ;;  %819 = vst [vmem:[#allocation2 + $0x38] sm:$0x1] %v818_v44  ;;  %3944 = vmatpush.bf16.msra.mxu2 %v5530_v43 }
  0xfb   : > { %v1085_v29 = vshll.u32 %v915_v0, 16  ;;  %v1518_v19 = vrot.slane %v915_v0, 5  ;;  %1732 = vst [vmem:[#allocation3 + $0xe8] sm:$0xf] %v1102_v17  ;;  %v1524_v0 = vrot.slane %v1522_v25, 4  ;;  %v1523_v49 = vsel %vm6223_vm12, %v4451_v13, %v1522_v25 }
  0xfc   : > { %1417 = vst [vmem:[#allocation3 + $0x124] sm:$0xf] %v1102_v17 }
  0xfd   : > { %v1087_v14 = vrot.slane %v1085_v29, 5  ;;  %v1519_v35 = vsel %vm6223_vm12, %v1517_v62, %v1518_v19  ;;  %1864 = vst [vmem:[#allocation3 + $0xac] sm:$0xf] %v1102_v17  ;;  %v825_v62 = vsel %vm6241_vm13, %v550_v31, %v824_v33  ;;  %v1119_v17 = vrot.slane %v1117_v32, 5  ;;  %v5361_v33 = vld [vmem:[#allocation3 + $0xe4] sm:$0xf] }
  0xfe   : > { %1643 = vst [vmem:[#allocation3 + $0x104] sm:$0xf] %v1519_v35  ;;  %v1125_v29 = vrot.slane %v1123_v52, 5  ;;  %v1129_v19 = vrot.slane %v1127_v47, 4  ;;  %v4583_v26 = vld [vmem:[#allocation3 + $0xe0] sm:$0xf] }
  0xff   : > { %v1088_v50 = vsel %vm6199_vm10, %v1083_v58, %v1087_v14  ;;  %1775 = vst [vmem:[#allocation3 + $0xc8] sm:$0xf] %v1519_v35  ;;  %v1120_v61 = vor.u32 %v1119_v17, %v1116_v6  ;;  %v4555_v14 = vld [vmem:[#allocation3 + $0xa0] sm:$0xf]  ;;  %v4585_v52 = vld [vmem:[#allocation3 + $0x104] sm:$0xf0] }
 0x100   : > { %1731 = vst [vmem:[#allocation3 + $0xc4] sm:$0xf] %v1088_v50  ;;  %v1130_v30 = vor.u32 %v1129_v19, %v1125_v29  ;;  %v567_v47 = vrot.slane %v5948_v55, 4  ;;  %v831_v6 = vld [vmem:[#allocation2 + $0x50] sm:$0x1]  ;;  %v1147_v17 = vshll.u32 %v6036_v59, 16 }
 0x101   : > { %1416 = vst [vmem:[#allocation3 + $0x100] sm:$0xf] %v1088_v50  ;;  %v918_v44 = vld [vmem:[#allocation2 + $0x38] sm:$0x1]  ;;  %v1121_v21 = vrot.slane %v1120_v61, 4  ;;  %v1529_v55 = vrot.slane %v5908_v10, 5 }
 0x102   : > { %1863 = vst [vmem:[#allocation3 + $0x88] sm:$0xf] %v1088_v50  ;;  %v1109_v56 = vshll.u32 %v918_v44, 16  ;;  %v1525_v57 = vrot.slane %v918_v44, 5  ;;  %v1131_v34 = vrot.slane %v1130_v30, 4  ;;  %v6334_v44 = vpop.f32.mrf.mxu1  ;;  %v5538_v61 = vld [vmem:[%s6886_s1 + $0x1e8] sm:$0xff]  ;;  %v832_v10 = vsel %vm6241_vm13, %v567_v47, %v831_v6  ;;  %v6368_v6 = vpop.f32.mrf.mxu3 }
 0x103   : > { %1907 = vst [vmem:[#allocation3 + $0x8c] sm:$0xf] %v1519_v35  ;;  %v5360_v35 = vld [vmem:[#allocation3 + $0xdc] sm:$0xf]  ;;  %v1531_v43 = vrot.slane %v1529_v55, 4  ;;  %4033 = vmatpush.bf16.msra.mxu3 %v5538_v61  ;;  %v1165_v61 = vshll.u32 %v6134_v9, 16 }
 0x104   : > { %3777 = vmatmul.bf16.gmra.mxu0 %v4520_v1  ;;  %v1111_v58 = vrot.slane %v1109_v56, 5  ;;  %826 = vst [vmem:[#allocation2 + $0x44] sm:$0x1] %v825_v62  ;;  %v1526_v39 = vsel %vm6223_vm12, %v1524_v0, %v1525_v57  ;;  %v1141_v62 = vshll.u32 %v6030_v63, 16  ;;  %v4588_v57 = vor.u32 %v5361_v33, %v4585_v52  ;;  %v838_v33 = vld [vmem:[#allocation2 + $0x5c] sm:$0x1] }
 0x105   : > { %3515 = vmatmul.bf16.gmra.mxu1 %v4544_v4  ;;  %1644 = vst [vmem:[#allocation3 + $0x128] sm:$0xf] %v1523_v49  ;;  %v1126_v4 = vsel %vm6199_vm10, %v1121_v21, %v1125_v29  ;;  %v5365_v50 = vld [vmem:[#allocation3 + $0x100] sm:$0xf0]  ;;  %v5546_v29 = vld [vmem:[%s6886_s1 + $0x228] sm:$0xff] }
 0x106   : > { %3604 = vmatmul.bf16.gmra.mxu2 %v4548_v54  ;;  %v1112_v40 = vsel %vm6199_vm10, %v1107_v51, %v1111_v58  ;;  %1645 = vst [vmem:[#allocation3 + $0x14c] sm:$0xf] %v1526_v39  ;;  %v1138_v51 = vshrl.u32 %v6030_v63, 16  ;;  %v4584_v56 = vor.u32 %v5365_v50, %v4583_v26  ;;  %v1151_v58 = vshrl.u32 %v6036_v59, 16  ;;  %4122 = vmatpush.bf16.msra.mxu0 %v5546_v29  ;;  %v6359_v26 = vpop.f32.mrf.mxu2 }
 0x107   : > { %1733 = vst [vmem:[#allocation3 + $0x10c] sm:$0xf] %v1112_v40  ;;  %v5357_v1 = vld [vmem:[#allocation3 + $0xc0] sm:$0xf0]  ;;  %v1143_v19 = vrot.slane %v1141_v62, 5  ;;  %v1171_v29 = vshll.u32 %v6143_v8, 16 }
 0x108   : > { %3693 = vmatmul.bf16.gmra.mxu3 %v4552_v16  ;;  %1418 = vst [vmem:[#allocation3 + $0x148] sm:$0xf] %v1112_v40  ;;  %v4577_v41 = vld [vmem:[#allocation3 + $0xfc] sm:$0xf0]  ;;  %v4556_v54 = vor.u32 %v5357_v1, %v4555_v14  ;;  %v1140_v0 = vrot.slane %v1138_v51, 4 }
 0x109   : > { %1865 = vst [vmem:[#allocation3 + $0xd0] sm:$0xf] %v1112_v40  ;;  %v4580_v16 = vor.u32 %v5360_v35, %v4577_v41  ;;  %v4452_v40 = vrot.slane %v5899_v3, 9  ;;  %v1149_v35 = vrot.slane %v1147_v17, 5  ;;  %v1153_v3 = vrot.slane %v1151_v58, 4 }
 0x10a   : > { %1776 = vst [vmem:[#allocation3 + $0xec] sm:$0xf] %v1523_v49  ;;  %v1144_v21 = vor.u32 %v1143_v19, %v1140_v0  ;;  %v584_v41 = vrot.slane %v6074_v11, 4  ;;  %v5370_v17 = vld [vmem:[#allocation3 + $0x12c] sm:$0xf] }
 0x10b   : > { %1777 = vst [vmem:[#allocation3 + $0x110] sm:$0xf] %v1526_v39  ;;  %v921_v31 = vld [vmem:[#allocation2 + $0x44] sm:$0x1]  ;;  %v1530_v30 = vsel %vm6223_vm12, %v4452_v40, %v1529_v55  ;;  %v1154_v50 = vor.u32 %v1153_v3, %v1149_v35  ;;  %v6370_v55 = vpop.f32.mrf.mxu0  ;;  %v4453_v3 = vrot.slane %v6030_v63, 9 }
 0x10c   : > { %1908 = vst [vmem:[#allocation3 + $0xb0] sm:$0xf] %v1523_v49  ;;  %v1133_v32 = vshll.u32 %v921_v31, 16  ;;  %v5522_v49 = vld [vmem:[%s6886_s1 + $0x168] sm:$0xff]  ;;  %v1145_v1 = vrot.slane %v1144_v21, 4  ;;  %v839_v11 = vsel %vm6241_vm13, %v584_v41, %v838_v33  ;;  %v1167_v21 = vrot.slane %v1165_v61, 5 }
 0x10d   : > { %1909 = vst [vmem:[#allocation3 + $0xd4] sm:$0xf] %v1526_v39  ;;  %v1532_v39 = vrot.slane %v921_v31, 5  ;;  %3855 = vmatpush.bf16.msra.mxu1 %v5522_v49  ;;  %v6362_v31 = vpop.f32.mrf.mxu1  ;;  %v4619_v52 = vld [vmem:[#allocation3 + $0x128] sm:$0xf]  ;;  %v1155_v51 = vrot.slane %v1154_v50, 4 }
 0x10e   : > { %v1135_v25 = vrot.slane %v1133_v32, 5  ;;  %1734 = vst [vmem:[#allocation3 + $0x130] sm:$0xf] %v1126_v4  ;;  %v5369_v32 = vld [vmem:[#allocation3 + $0x124] sm:$0xf]  ;;  %v6376_v19 = vpop.f32.mrf.mxu2 }
 0x10f   : > { %1419 = vst [vmem:[#allocation3 + $0x16c] sm:$0xf] %v1126_v4  ;;  %v1533_v14 = vsel %vm6223_vm12, %v1531_v43, %v1532_v39  ;;  %v4613_v47 = vld [vmem:[#allocation3 + $0x144] sm:$0xf0]  ;;  %v1536_v43 = vrot.slane %v6036_v59, 5 }
 0x110   : > { %v1136_v13 = vsel %vm6199_vm10, %v1131_v34, %v1135_v25  ;;  %1866 = vst [vmem:[#allocation3 + $0xf4] sm:$0xf] %v1126_v4  ;;  %v1150_v4 = vsel %vm6199_vm10, %v1145_v1, %v1149_v35  ;;  %v4591_v34 = vld [vmem:[#allocation3 + $0xe8] sm:$0xf]  ;;  %v5374_v25 = vld [vmem:[#allocation3 + $0x148] sm:$0xf0]  ;;  %v4616_v0 = vor.u32 %v5369_v32, %v4613_v47 }
 0x111   : > { %1735 = vst [vmem:[#allocation3 + $0x154] sm:$0xf] %v1136_v13  ;;  %v4620_v49 = vor.u32 %v5374_v25, %v4619_v52  ;;  %v1538_v41 = vrot.slane %v1536_v43, 4  ;;  %v1537_v59 = vsel %vm6223_vm12, %v4453_v3, %v1536_v43  ;;  %v6393_v52 = vpop.f32.mrf.mxu3  ;;  %v845_v61 = vld [vmem:[#allocation2 + $0x68] sm:$0x1]  ;;  %v1195_v3 = vshll.u32 %v5804_v12, 16 }
 0x112   : > { %1420 = vst [vmem:[#allocation3 + $0x190] sm:$0xf] %v1136_v13  ;;  %v5379_v43 = vld [vmem:[#allocation3 + $0x174] sm:$0xf] }
 0x113   : > { %1867 = vst [vmem:[#allocation3 + $0x118] sm:$0xf] %v1136_v13  ;;  %v4621_v13 = vld [vmem:[#allocation3 + $0x14c] sm:$0xf0] }
 0x114   : > { %3782 = vmatmul.bf16.gmra.mxu0 %v4556_v54  ;;  %833 = vst [vmem:[#allocation2 + $0x50] sm:$0x1] %v832_v10  ;;  %v5366_v54 = vld [vmem:[#allocation3 + $0x108] sm:$0xf0]  ;;  %v1175_v10 = vshrl.u32 %v6143_v8, 16 }
 0x115   : > { %3520 = vmatmul.bf16.gmra.mxu1 %v4580_v16  ;;  %1646 = vst [vmem:[#allocation3 + $0x170] sm:$0xf] %v1530_v30  ;;  %v4592_v62 = vor.u32 %v5366_v54, %v4591_v34  ;;  %v6381_v1 = vpop.f32.mrf.mxu1  ;;  %v5529_v54 = vld [vmem:[%s6886_s1 + $0x1a0] sm:$0xff] }
 0x116   : > { %3609 = vmatmul.bf16.gmra.mxu2 %v4584_v56  ;;  %1647 = vst [vmem:[#allocation3 + $0x194] sm:$0xf] %v1533_v14  ;;  %v1177_v35 = vrot.slane %v1175_v10, 4 }
 0x117   : > { %1778 = vst [vmem:[#allocation3 + $0x134] sm:$0xf] %v1530_v30  ;;  %3945 = vmatpush.bf16.msra.mxu2 %v5529_v54  ;;  %v5521_v54 = vld [vmem:[%s6886_s1 + $0x160] sm:$0xff] }
 0x118   : > { %3698 = vmatmul.bf16.gmra.mxu3 %v4588_v57  ;;  %1779 = vst [vmem:[#allocation3 + $0x158] sm:$0xf] %v1533_v14  ;;  %v1162_v57 = vshrl.u32 %v6134_v9, 16  ;;  %3856 = vmatpush.bf16.msra.mxu1 %v5521_v54 }
 0x119   : > { %1910 = vst [vmem:[#allocation3 + $0xf8] sm:$0xf] %v1530_v30  ;;  %v4624_v30 = vor.u32 %v5370_v17, %v4621_v13  ;;  %v5375_v17 = vld [vmem:[#allocation3 + $0x150] sm:$0xf0]  ;;  %v6400_v13 = vpop.f32.mrf.mxu2 }
 0x11a   : > { %1911 = vst [vmem:[#allocation3 + $0x11c] sm:$0xf] %v1533_v14  ;;  %v1164_v39 = vrot.slane %v1162_v57, 4  ;;  %v1173_v14 = vrot.slane %v1171_v29, 5  ;;  %v4649_v57 = vld [vmem:[#allocation3 + $0x18c] sm:$0xf0] }
 0x11b   : > { %v924_v16 = vld [vmem:[#allocation2 + $0x50] sm:$0x1]  ;;  %1736 = vst [vmem:[#allocation3 + $0x178] sm:$0xf] %v1150_v4 }
 0x11c   : > { %v1157_v56 = vshll.u32 %v924_v16, 16  ;;  %1421 = vst [vmem:[#allocation3 + $0x1b4] sm:$0xf] %v1150_v4  ;;  %v1539_v50 = vrot.slane %v924_v16, 5  ;;  %v1178_v33 = vor.u32 %v1177_v35, %v1173_v14 }
 0x11d   : > { %1868 = vst [vmem:[#allocation3 + $0x13c] sm:$0xf] %v1150_v4  ;;  %v1168_v4 = vor.u32 %v1167_v21, %v1164_v39  ;;  %v5383_v29 = vld [vmem:[#allocation3 + $0x190] sm:$0xf0]  ;;  %v6405_v10 = vpop.f32.mrf.mxu1  ;;  %v4657_v21 = vld [vmem:[#allocation3 + $0x194] sm:$0xf0] }
 0x11e   : > { %v1159_v58 = vrot.slane %v1157_v56, 5  ;;  %840 = vst [vmem:[#allocation2 + $0x5c] sm:$0x1] %v839_v11  ;;  %v1540_v32 = vsel %vm6223_vm12, %v1538_v41, %v1539_v50  ;;  %v1179_v47 = vrot.slane %v1178_v33, 4  ;;  %v6396_v11 = vpop.f32.mrf.mxu0  ;;  %v4627_v56 = vld [vmem:[#allocation3 + $0x130] sm:$0xf] }
 0x11f   : > { %v1169_v34 = vrot.slane %v1168_v4, 4  ;;  %1648 = vst [vmem:[#allocation3 + $0x1b8] sm:$0xf] %v1537_v59  ;;  %v1199_v41 = vshrl.u32 %v5804_v12, 16  ;;  %v6413_v4 = vpop.f32.mrf.mxu3  ;;  %v1543_v50 = vrot.slane %v6143_v8, 5  ;;  %v4454_v8 = vrot.slane %v6134_v9, 9 }
 0x120   : > { %v1160_v40 = vsel %vm6199_vm10, %v1155_v51, %v1159_v58  ;;  %1649 = vst [vmem:[#allocation3 + $0x1dc] sm:$0xf] %v1540_v32  ;;  %v601_v58 = vrot.slane %v5718_v60, 4  ;;  %v1189_v60 = vshll.u32 %v5800_v7, 16 }
 0x121   : > { %1737 = vst [vmem:[#allocation3 + $0x19c] sm:$0xf] %v1160_v40  ;;  %v1174_v25 = vsel %vm6199_vm10, %v1169_v34, %v1173_v14  ;;  %v1186_v14 = vshrl.u32 %v5800_v7, 16  ;;  %v4660_v34 = vor.u32 %v5379_v43, %v4657_v21 }
 0x122   : > { %1422 = vst [vmem:[#allocation3 + $0x1d8] sm:$0xf] %v1160_v40 }
 0x123   : > { %1869 = vst [vmem:[#allocation3 + $0x160] sm:$0xf] %v1160_v40  ;;  %v4628_v40 = vor.u32 %v5375_v17, %v4627_v56  ;;  %v1188_v33 = vrot.slane %v1186_v14, 4  ;;  %v1201_v17 = vrot.slane %v1199_v41, 4  ;;  %v852_v14 = vld [vmem:[#allocation2 + $0x74] sm:$0x1] }
 0x124   : > { %3787 = vmatmul.bf16.gmra.mxu0 %v4592_v62  ;;  %1780 = vst [vmem:[#allocation3 + $0x17c] sm:$0xf] %v1537_v59  ;;  %v5378_v62 = vld [vmem:[#allocation3 + $0x16c] sm:$0xf] }
 0x125   : > { %3525 = vmatmul.bf16.gmra.mxu1 %v4616_v0  ;;  %v6391_v63 = vld [vmem:[#allocation2 + $0x5c] sm:$0x1]  ;;  %1781 = vst [vmem:[#allocation3 + $0x1a0] sm:$0xf] %v1540_v32  ;;  %v4652_v39 = vor.u32 %v5378_v62, %v4649_v57  ;;  %v1197_v62 = vrot.slane %v1195_v3, 5  ;;  %v6435_v9 = vpop.f32.mrf.mxu1 }
 0x126   : > { %3614 = vmatmul.bf16.gmra.mxu2 %v4620_v49  ;;  %v1181_v16 = vshll.u32 %v6391_v63, 16  ;;  %1912 = vst [vmem:[#allocation3 + $0x140] sm:$0xf] %v1537_v59  ;;  %v4655_v49 = vld [vmem:[#allocation3 + $0x170] sm:$0xf]  ;;  %v1191_v59 = vrot.slane %v1189_v60, 5 }
 0x127   : > { %1913 = vst [vmem:[#allocation3 + $0x164] sm:$0xf] %v1540_v32  ;;  %v4656_v35 = vor.u32 %v5383_v29, %v4655_v49  ;;  %v5537_v32 = vld [vmem:[%s6886_s1 + $0x1e0] sm:$0xff]  ;;  %v618_v49 = vrot.slane %v5826_v36, 4  ;;  %v4663_v29 = vld [vmem:[#allocation3 + $0x178] sm:$0xf]  ;;  %v6440_v21 = vpop.f32.mrf.mxu3 }
 0x128   : > { %3703 = vmatmul.bf16.gmra.mxu3 %v4624_v30  ;;  %v1183_v51 = vrot.slane %v1181_v16, 5  ;;  %1738 = vst [vmem:[#allocation3 + $0x1c0] sm:$0xf] %v1174_v25  ;;  %v846_v30 = vsel %vm6241_vm13, %v601_v58, %v845_v61  ;;  %v6425_v16 = vpop.f32.mrf.mxu0  ;;  %v1192_v56 = vor.u32 %v1191_v59, %v1188_v33  ;;  %v1544_v58 = vsel %vm6223_vm12, %v4454_v8, %v1543_v50  ;;  %v5384_v43 = vld [vmem:[#allocation3 + $0x198] sm:$0xf0] }
 0x129   : > { %1423 = vst [vmem:[#allocation3 + $0x1fc] sm:$0xf] %v1174_v25  ;;  %4034 = vmatpush.bf16.msra.mxu3 %v5537_v32  ;;  %v4685_v60 = vld [vmem:[#allocation3 + $0x1d4] sm:$0xf0]  ;;  %v853_v36 = vsel %vm6241_vm13, %v618_v49, %v852_v14  ;;  %v5392_v33 = vld [vmem:[#allocation3 + $0x1d8] sm:$0xf0] }
 0x12a   : > { %v1184_v0 = vsel %vm6199_vm10, %v1179_v47, %v1183_v51  ;;  %1870 = vst [vmem:[#allocation3 + $0x184] sm:$0xf] %v1174_v25  ;;  %v5545_v47 = vld [vmem:[%s6886_s1 + $0x220] sm:$0xff]  ;;  %v1545_v25 = vrot.slane %v1543_v50, 4  ;;  %v1546_v51 = vrot.slane %v6391_v63, 5  ;;  %v1193_v61 = vrot.slane %v1192_v56, 4 }
 0x12b   : > { %1739 = vst [vmem:[#allocation3 + $0x1e4] sm:$0xf] %v1184_v0  ;;  %4123 = vmatpush.bf16.msra.mxu0 %v5545_v47  ;;  %v1202_v63 = vor.u32 %v1201_v17, %v1197_v62  ;;  %v4691_v50 = vld [vmem:[#allocation3 + $0x1b8] sm:$0xf]  ;;  %v5388_v59 = vld [vmem:[#allocation3 + $0x1bc] sm:$0xf] }
 0x12c   : > { %1424 = vst [vmem:[#allocation3 + $0x220] sm:$0xf] %v1184_v0  ;;  %v1547_v57 = vsel %vm6223_vm12, %v1545_v25, %v1546_v51  ;;  %v4693_v32 = vld [vmem:[#allocation3 + $0x1dc] sm:$0xf0]  ;;  %v1210_v25 = vshrl.u32 %v5922_v20, 16  ;;  %v1213_v51 = vshll.u32 %v5922_v20, 16 }
 0x12d   : > { %1871 = vst [vmem:[#allocation3 + $0x1a8] sm:$0xf] %v1184_v0  ;;  %v6429_v0 = vpop.f32.mrf.mxu2  ;;  %v1219_v56 = vshll.u32 %v5925_v23, 16 }
 0x12e   : > { %847 = vst [vmem:[#allocation2 + $0x68] sm:$0x1] %v846_v30  ;;  %v1215_v49 = vrot.slane %v1213_v51, 5 }
 0x12f   : > { %1650 = vst [vmem:[#allocation3 + $0x200] sm:$0xf] %v1544_v58 }
 0x130   : > { %1651 = vst [vmem:[#allocation3 + $0x224] sm:$0xf] %v1547_v57  ;;  %v6444_v41 = vpop.f32.mrf.mxu0 }
 0x131   : > { %1782 = vst [vmem:[#allocation3 + $0x1c4] sm:$0xf] %v1544_v58 }
 0x132   : > { %1783 = vst [vmem:[#allocation3 + $0x1e8] sm:$0xf] %v1547_v57  ;;  %v5393_v51 = vld [vmem:[#allocation3 + $0x1e0] sm:$0xf0] }
 0x133   : > { %1914 = vst [vmem:[#allocation3 + $0x188] sm:$0xf] %v1544_v58  ;;  %v1223_v58 = vshrl.u32 %v5925_v23, 16 }
 0x134   : > { %3792 = vmatmul.bf16.gmra.mxu0 %v4628_v40  ;;  %v1198_v40 = vsel %vm6199_vm10, %v1193_v61, %v1197_v62  ;;  %6922 = vst [vmem:[#allocation12_spill] sm:$0xff] %v6440_v21  ;;  %v4692_v62 = vor.u32 %v5392_v33, %v4691_v50  ;;  %v1550_v61 = vrot.slane %v5804_v12, 5 }
 0x135   : > { %3530 = vmatmul.bf16.gmra.mxu1 %v4652_v39  ;;  %v5387_v39 = vld [vmem:[#allocation3 + $0x1b4] sm:$0xf]  ;;  %1915 = vst [vmem:[#allocation3 + $0x1ac] sm:$0xf] %v1547_v57  ;;  %v930_v30 = vld [vmem:[#allocation2 + $0x68] sm:$0x1]  ;;  %v6446_v8 = vpop.f32.mrf.mxu2  ;;  %v6454_v57 = vpop.f32.mrf.mxu1 }
 0x136   : > { %3619 = vmatmul.bf16.gmra.mxu2 %v4656_v35  ;;  %v1203_v35 = vrot.slane %v1202_v63, 4  ;;  %v1205_v3 = vshll.u32 %v930_v30, 16  ;;  %1740 = vst [vmem:[#allocation3 + $0x208] sm:$0xf] %v1198_v40  ;;  %v4688_v47 = vor.u32 %v5387_v39, %v4685_v60  ;;  %v1212_v63 = vrot.slane %v1210_v25, 4 }
 0x137   : > { %1425 = vst [vmem:[#allocation3 + $0x244] sm:$0xf] %v1198_v40  ;;  %v4455_v39 = vrot.slane %v5800_v7, 9  ;;  %v1552_v14 = vrot.slane %v1550_v61, 4  ;;  %v4699_v25 = vld [vmem:[#allocation3 + $0x1c0] sm:$0xf] }
 0x138   : > { %3708 = vmatmul.bf16.gmra.mxu3 %v4660_v34  ;;  %v4664_v34 = vor.u32 %v5384_v43, %v4663_v29  ;;  %v1207_v54 = vrot.slane %v1205_v3, 5  ;;  %1872 = vst [vmem:[#allocation3 + $0x1cc] sm:$0xf] %v1198_v40  ;;  %v1221_v29 = vrot.slane %v1219_v56, 5  ;;  %v4696_v40 = vor.u32 %v5388_v59, %v4693_v32 }
 0x139   : > { %854 = vst [vmem:[#allocation2 + $0x74] sm:$0x1] %v853_v36  ;;  %v1225_v43 = vrot.slane %v1223_v58, 4  ;;  %v1216_v60 = vor.u32 %v1215_v49, %v1212_v63  ;;  %v6458_v36 = vpop.f32.mrf.mxu3  ;;  %v1551_v12 = vsel %vm6223_vm12, %v4455_v39, %v1550_v61  ;;  %v635_v61 = vrot.slane %v5954_v2, 4  ;;  %v4727_v63 = vld [vmem:[#allocation3 + $0x200] sm:$0xf] }
 0x13a   : > { %v1208_v17 = vsel %vm6199_vm10, %v1203_v35, %v1207_v54  ;;  %v1553_v35 = vrot.slane %v930_v30, 5  ;;  %6923 = vst [vmem:[#allocation13_spill] sm:$0xff] %v6458_v36  ;;  %v5401_v49 = vld [vmem:[#allocation3 + $0x220] sm:$0xf0]  ;;  %v4729_v39 = vld [vmem:[#allocation3 + $0x224] sm:$0xf0] }
 0x13b   : > { %1741 = vst [vmem:[#allocation3 + $0x22c] sm:$0xf] %v1208_v17  ;;  %v1226_v3 = vor.u32 %v1225_v43, %v1221_v29  ;;  %v1217_v50 = vrot.slane %v1216_v60, 4  ;;  %v4700_v43 = vor.u32 %v5393_v51, %v4699_v25  ;;  %v1247_v51 = vshrl.u32 %v6056_v5, 16 }
 0x13c   : > { %1426 = vst [vmem:[#allocation3 + $0x268] sm:$0xf] %v1208_v17  ;;  %v1554_v33 = vsel %vm6223_vm12, %v1552_v14, %v1553_v35  ;;  %v5528_v35 = vld [vmem:[%s6886_s1 + $0x198] sm:$0xff]  ;;  %v1267_v36 = vshll.u32 %v6160_v37, 16 }
 0x13d   : > { %1873 = vst [vmem:[#allocation3 + $0x1f0] sm:$0xf] %v1208_v17  ;;  %v1227_v30 = vrot.slane %v1226_v3, 4  ;;  %v6469_v32 = vpop.f32.mrf.mxu2  ;;  %v1222_v54 = vsel %vm6199_vm10, %v1217_v50, %v1221_v29  ;;  %v4721_v17 = vld [vmem:[#allocation3 + $0x21c] sm:$0xf0]  ;;  %v1234_v3 = vshrl.u32 %v6052_v22, 16  ;;  %v4728_v50 = vor.u32 %v5401_v49, %v4727_v63  ;;  %3946 = vmatpush.bf16.msra.mxu2 %v5528_v35 }
 0x13e   : > { %1652 = vst [vmem:[#allocation3 + $0x248] sm:$0xf] %v1551_v12  ;;  %v5397_v29 = vld [vmem:[#allocation3 + $0x204] sm:$0xf]  ;;  %v1249_v35 = vrot.slane %v1247_v51, 4 }
 0x13f   : > { %1653 = vst [vmem:[#allocation3 + $0x26c] sm:$0xf] %v1554_v33  ;;  %v866_v51 = vld [vmem:[#allocation2 + $0x8c] sm:$0x1] }
 0x140   : > { %v6464_v59 = vld [vmem:[#allocation2 + $0x74] sm:$0x1]  ;;  %1784 = vst [vmem:[#allocation3 + $0x20c] sm:$0xf] %v1551_v12 }
 0x141   : > { %v1229_v7 = vshll.u32 %v6464_v59, 16  ;;  %1785 = vst [vmem:[#allocation3 + $0x230] sm:$0xf] %v1554_v33  ;;  %v6478_v14 = vpop.f32.mrf.mxu3 }
 0x142   : > { %1916 = vst [vmem:[#allocation3 + $0x1d0] sm:$0xf] %v1551_v12  ;;  %v1237_v12 = vshll.u32 %v6052_v22, 16 }
 0x143   : > { %1917 = vst [vmem:[#allocation3 + $0x1f4] sm:$0xf] %v1554_v33  ;;  %v1243_v33 = vshll.u32 %v6056_v5, 16 }
 0x144   : > { %3797 = vmatmul.bf16.gmra.mxu0 %v4664_v34  ;;  %v6466_v34 = vpop.f32.mrf.mxu0  ;;  %1742 = vst [vmem:[#allocation3 + $0x250] sm:$0xf] %v1222_v54  ;;  %v1239_v25 = vrot.slane %v1237_v12, 5 }
 0x145   : > { %3535 = vmatmul.bf16.gmra.mxu1 %v4688_v47  ;;  %v1231_v47 = vrot.slane %v1229_v7, 5  ;;  %6924 = vst [vmem:[#allocation14_spill] sm:$0xff] %v6478_v14  ;;  %v1261_v14 = vshll.u32 %v6154_v27, 16 }
 0x146   : > { %3624 = vmatmul.bf16.gmra.mxu2 %v4692_v62  ;;  %v5396_v62 = vld [vmem:[#allocation3 + $0x1fc] sm:$0xf]  ;;  %1427 = vst [vmem:[#allocation3 + $0x28c] sm:$0xf] %v1222_v54 }
 0x147   : > { %v6473_v56 = vpop.f32.mrf.mxu1  ;;  %v1232_v58 = vsel %vm6199_vm10, %v1227_v30, %v1231_v47  ;;  %v4724_v60 = vor.u32 %v5396_v62, %v4721_v17  ;;  %v1557_v30 = vrot.slane %v5925_v23, 5  ;;  %v1236_v47 = vrot.slane %v1234_v3, 4  ;;  %1874 = vst [vmem:[#allocation3 + $0x214] sm:$0xf] %v1222_v54  ;;  %v5536_v17 = vld [vmem:[%s6886_s1 + $0x1d8] sm:$0xff] }
 0x148   : > { %3713 = vmatmul.bf16.gmra.mxu3 %v4696_v40  ;;  %v859_v40 = vld [vmem:[#allocation2 + $0x80] sm:$0x1]  ;;  %1743 = vst [vmem:[#allocation3 + $0x274] sm:$0xf] %v1232_v58  ;;  %v4732_v62 = vor.u32 %v5397_v29, %v4729_v39  ;;  %v4456_v23 = vrot.slane %v5922_v20, 9  ;;  %v1560_v54 = vrot.slane %v6464_v59, 5 }
 0x149   : > { %v860_v2 = vsel %vm6241_vm13, %v635_v61, %v859_v40  ;;  %1428 = vst [vmem:[#allocation3 + $0x2b0] sm:$0xf] %v1232_v58  ;;  %v5520_v61 = vld [vmem:[%s6886_s1 + $0x158] sm:$0xff]  ;;  %v1559_v49 = vrot.slane %v1557_v30, 4  ;;  %v1240_v40 = vor.u32 %v1239_v25, %v1236_v47  ;;  %4035 = vmatpush.bf16.msra.mxu3 %v5536_v17  ;;  %v4735_v59 = vld [vmem:[#allocation3 + $0x208] sm:$0xf] }
 0x14a   : > { %1875 = vst [vmem:[#allocation3 + $0x238] sm:$0xf] %v1232_v58  ;;  %3857 = vmatpush.bf16.msra.mxu1 %v5520_v61  ;;  %v1558_v29 = vsel %vm6223_vm12, %v4456_v23, %v1557_v30  ;;  %v5544_v58 = vld [vmem:[%s6886_s1 + $0x218] sm:$0xff]  ;;  %v5402_v3 = vld [vmem:[#allocation3 + $0x228] sm:$0xf0]  ;;  %v652_v30 = vrot.slane %v6085_v42, 4 }
 0x14b   : > { %861 = vst [vmem:[#allocation2 + $0x80] sm:$0x1] %v860_v2  ;;  %v1241_v39 = vrot.slane %v1240_v40, 4  ;;  %v1561_v20 = vsel %vm6223_vm12, %v1559_v49, %v1560_v54  ;;  %4124 = vmatpush.bf16.msra.mxu0 %v5544_v58  ;;  %v4763_v23 = vld [vmem:[#allocation3 + $0x248] sm:$0xf]  ;;  %v4736_v54 = vor.u32 %v5402_v3, %v4735_v59 }
 0x14c   : > { %v6488_v7 = vpop.f32.mrf.mxu0  ;;  %1654 = vst [vmem:[#allocation3 + $0x290] sm:$0xf] %v1558_v29  ;;  %v5410_v49 = vld [vmem:[#allocation3 + $0x268] sm:$0xf0] }
 0x14d   : > { %1655 = vst [vmem:[#allocation3 + $0x2b4] sm:$0xf] %v1561_v20 }
 0x14e   : > { %1786 = vst [vmem:[#allocation3 + $0x254] sm:$0xf] %v1558_v29 }
 0x14f   : > { %1787 = vst [vmem:[#allocation3 + $0x278] sm:$0xf] %v1561_v20 }
 0x150   : > { %1918 = vst [vmem:[#allocation3 + $0x218] sm:$0xf] %v1558_v29  ;;  %v867_v29 = vsel %vm6241_vm13, %v652_v30, %v866_v51 }
 0x151   : > { %1919 = vst [vmem:[#allocation3 + $0x23c] sm:$0xf] %v1561_v20  ;;  %v1258_v20 = vshrl.u32 %v6154_v27, 16 }
 0x152   : > { %v936_v25 = vld [vmem:[#allocation2 + $0x80] sm:$0x1]  ;;  %868 = vst [vmem:[#allocation2 + $0x8c] sm:$0x1] %v867_v29 }
 0x153   : > { %v6498_v63 = vpop.f32.mrf.mxu2  ;;  %v1253_v17 = vshll.u32 %v936_v25, 16  ;;  %v1260_v30 = vrot.slane %v1258_v20, 4 }
 0x154   : > { %3802 = vmatmul.bf16.gmra.mxu0 %v4700_v43  ;;  %v6502_v43 = vpop.f32.mrf.mxu1 }
 0x155   : > { %3540 = vmatmul.bf16.gmra.mxu1 %v4724_v60  ;;  %v1245_v60 = vrot.slane %v1243_v33, 5  ;;  %v5405_v33 = vld [vmem:[#allocation3 + $0x244] sm:$0xf]  ;;  %v1255_v58 = vrot.slane %v1253_v17, 5 }
 0x156   : > { %3629 = vmatmul.bf16.gmra.mxu2 %v4728_v50 }
 0x157   : > { %v1246_v50 = vsel %vm6199_vm10, %v1241_v39, %v1245_v60  ;;  %v1250_v2 = vor.u32 %v1249_v35, %v1245_v60  ;;  %v5406_v39 = vld [vmem:[#allocation3 + $0x24c] sm:$0xf]  ;;  %v4765_v35 = vld [vmem:[#allocation3 + $0x26c] sm:$0xf0] }
 0x158   : > { %3718 = vmatmul.bf16.gmra.mxu3 %v4732_v62  ;;  %v4757_v62 = vld [vmem:[#allocation3 + $0x264] sm:$0xf0]  ;;  %1744 = vst [vmem:[#allocation3 + $0x298] sm:$0xf] %v1246_v50  ;;  %v4768_v51 = vor.u32 %v5406_v39, %v4765_v35  ;;  %v5411_v35 = vld [vmem:[#allocation3 + $0x270] sm:$0xf0] }
 0x159   : > { %v1251_v40 = vrot.slane %v1250_v2, 4  ;;  %v4760_v42 = vor.u32 %v5405_v33, %v4757_v62  ;;  %1429 = vst [vmem:[#allocation3 + $0x2d4] sm:$0xf] %v1246_v50  ;;  %v1271_v2 = vshrl.u32 %v6160_v37, 16  ;;  %v1564_v33 = vrot.slane %v6056_v5, 5 }
 0x15a   : > { %1876 = vst [vmem:[#allocation3 + $0x25c] sm:$0xf] %v1246_v50  ;;  %v1263_v62 = vrot.slane %v1261_v14, 5  ;;  %v1269_v50 = vrot.slane %v1267_v36, 5 }
 0x15b   : > { %v6511_v12 = vpop.f32.mrf.mxu3  ;;  %v6516_v47 = vpop.f32.mrf.mxu0  ;;  %v1256_v3 = vsel %vm6199_vm10, %v1251_v40, %v1255_v58  ;;  %v1273_v17 = vrot.slane %v1271_v2, 4 }
 0x15c   : > { %6925 = vst [vmem:[#allocation15_spill] sm:$0xff] %v6511_v12  ;;  %v6518_v61 = vpop.f32.mrf.mxu2  ;;  %v4764_v12 = vor.u32 %v5410_v49, %v4763_v23  ;;  %v4457_v23 = vrot.slane %v6052_v22, 9  ;;  %v1566_v49 = vrot.slane %v1564_v33, 4  ;;  %v1264_v21 = vor.u32 %v1263_v62, %v1260_v30  ;;  %v5419_v30 = vld [vmem:[#allocation3 + $0x2b0] sm:$0xf0] }
 0x15d   : > { %1745 = vst [vmem:[#allocation3 + $0x2bc] sm:$0xf] %v1256_v3 }
 0x15e   : > { %1430 = vst [vmem:[#allocation3 + $0x2f8] sm:$0xf] %v1256_v3  ;;  %v1565_v5 = vsel %vm6223_vm12, %v4457_v23, %v1564_v33  ;;  %v1265_v14 = vrot.slane %v1264_v21, 4  ;;  %v4793_v21 = vld [vmem:[#allocation3 + $0x2ac] sm:$0xf0] }
 0x15f   : > { %1877 = vst [vmem:[#allocation3 + $0x280] sm:$0xf] %v1256_v3  ;;  %v4799_v3 = vld [vmem:[#allocation3 + $0x290] sm:$0xf] }
 0x160   : > { %1656 = vst [vmem:[#allocation3 + $0x2d8] sm:$0xf] %v1565_v5 }
 0x161   : > { %v3506_v60 = vpop.f32.mrf.mxu1  ;;  %1788 = vst [vmem:[#allocation3 + $0x29c] sm:$0xf] %v1565_v5 }
 0x162   : > { %v3507_v39 = vadd.f32 %v3506_v60, %v6370_v55  ;;  %v1270_v55 = vsel %vm6199_vm10, %v1265_v14, %v1269_v50  ;;  %1920 = vst [vmem:[#allocation3 + $0x260] sm:$0xf] %v1565_v5  ;;  %v4800_v5 = vor.u32 %v5419_v30, %v4799_v3  ;;  %v1295_v3 = vshrl.u32 %v5829_v38, 16 }
 0x163   : > { %v6526_v59 = vpop.f32.mrf.mxu3  ;;  %v6532_v40 = vpop.f32.mrf.mxu0  ;;  %1746 = vst [vmem:[#allocation3 + $0x2e0] sm:$0xf] %v1270_v55 }
 0x164   : > { %6926 = vst [vmem:[#allocation16_spill] sm:$0xff] %v6526_v59  ;;  %3807 = vmatmul.bf16.gmra.mxu0 %v4736_v54  ;;  %v1567_v59 = vrot.slane %v936_v25, 5  ;;  %v1274_v54 = vor.u32 %v1273_v17, %v1269_v50  ;;  %v6539_v25 = vld [vmem:[#allocation2 + $0x8c] sm:$0x1]  ;;  %v873_v17 = vld [vmem:[#allocation2 + $0x98] sm:$0x1] }
 0x165   : > { %3545 = vmatmul.bf16.gmra.mxu1 %v4760_v42  ;;  %v4771_v42 = vld [vmem:[#allocation3 + $0x250] sm:$0xf]  ;;  %v1277_v20 = vshll.u32 %v6539_v25, 16  ;;  %1431 = vst [vmem:[#allocation3 + $0x31c] sm:$0xf] %v1270_v55 }
 0x166   : > { %3634 = vmatmul.bf16.gmra.mxu2 %v4764_v12  ;;  %v1568_v36 = vsel %vm6223_vm12, %v1566_v49, %v1567_v59  ;;  %v1275_v60 = vrot.slane %v1274_v54, 4  ;;  %v5414_v59 = vld [vmem:[#allocation3 + $0x28c] sm:$0xf]  ;;  %v4772_v23 = vor.u32 %v5411_v35, %v4771_v42  ;;  %v5415_v49 = vld [vmem:[#allocation3 + $0x294] sm:$0xf] }
 0x167   : > { %1657 = vst [vmem:[#allocation3 + $0x2fc] sm:$0xf] %v1568_v36  ;;  %v1279_v33 = vrot.slane %v1277_v20, 5  ;;  %v4801_v54 = vld [vmem:[#allocation3 + $0x2b4] sm:$0xf0]  ;;  %v1571_v20 = vrot.slane %v6160_v37, 5 }
 0x168   : > { %3723 = vmatmul.bf16.gmra.mxu3 %v4768_v51  ;;  %1789 = vst [vmem:[#allocation3 + $0x2c0] sm:$0xf] %v1568_v36  ;;  %v669_v51 = vrot.slane %v5736_v18, 4  ;;  %v1282_v18 = vshrl.u32 %v5818_v24, 16  ;;  %v4804_v30 = vor.u32 %v5415_v49, %v4801_v54  ;;  %v4458_v37 = vrot.slane %v6154_v27, 9 }
 0x169   : > { %v3595_v22 = vpop.f32.mrf.mxu2  ;;  %v3508_v29 = vpop.f32.mrf.mxu1  ;;  %1921 = vst [vmem:[#allocation3 + $0x284] sm:$0xf] %v1568_v36  ;;  %v1280_v62 = vsel %vm6199_vm10, %v1275_v60, %v1279_v33  ;;  %v5527_v36 = vld [vmem:[%s6886_s1 + $0x190] sm:$0xff] }
 0x16a   : > { %v3596_v12 = vadd.f32 %v3595_v22, %v3507_v39  ;;  %v3509_v50 = vadd.f32 %v3508_v29, %v6396_v11  ;;  %v4796_v22 = vor.u32 %v5414_v59, %v4793_v21  ;;  %1747 = vst [vmem:[#allocation3 + $0x304] sm:$0xf] %v1280_v62  ;;  %v874_v11 = vsel %vm6241_vm13, %v669_v51, %v873_v17  ;;  %v5535_v51 = vld [vmem:[%s6886_s1 + $0x1d0] sm:$0xff] }
 0x16b   : > { %v3684_v58 = vpop.f32.mrf.mxu3  ;;  %v1291_v29 = vshll.u32 %v5829_v38, 16  ;;  %3947 = vmatpush.bf16.msra.mxu2 %v5527_v36  ;;  %1432 = vst [vmem:[#allocation3 + $0x340] sm:$0xf] %v1280_v62  ;;  %v1284_v59 = vrot.slane %v1282_v18, 4  ;;  %v1573_v17 = vrot.slane %v1571_v20, 4  ;;  %4036 = vmatpush.bf16.msra.mxu3 %v5535_v51 }
 0x16c   : > { %v3685_v2 = vadd.f32 %v3684_v58, %v3596_v12  ;;  %v1285_v12 = vshll.u32 %v5818_v24, 16  ;;  %1878 = vst [vmem:[#allocation3 + $0x2a4] sm:$0xf] %v1270_v55  ;;  %v1572_v55 = vsel %vm6223_vm12, %v4458_v37, %v1571_v20  ;;  %v880_v51 = vld [vmem:[#allocation2 + $0xa4] sm:$0x1] }
 0x16d   : > { %1879 = vst [vmem:[#allocation3 + $0x2c8] sm:$0xf] %v1280_v62  ;;  %v1293_v54 = vrot.slane %v1291_v29, 5 }
 0x16e   : > { %v1287_v21 = vrot.slane %v1285_v12, 5  ;;  %875 = vst [vmem:[#allocation2 + $0x98] sm:$0x1] %v874_v11  ;;  %v4807_v12 = vld [vmem:[#allocation3 + $0x298] sm:$0xf] }
 0x16f   : > { %1658 = vst [vmem:[#allocation3 + $0x320] sm:$0xf] %v1572_v55  ;;  %v4829_v11 = vld [vmem:[#allocation3 + $0x2f4] sm:$0xf0] }
 0x170   : > { %1790 = vst [vmem:[#allocation3 + $0x2e4] sm:$0xf] %v1572_v55 }
 0x171   : > { %v3773_v39 = vpop.f32.mrf.mxu0  ;;  %v3597_v14 = vpop.f32.mrf.mxu2  ;;  %1922 = vst [vmem:[#allocation3 + $0x2a8] sm:$0xf] %v1572_v55 }
 0x172   : > { %v3598_v58 = vadd.f32 %v3597_v14, %v3509_v50  ;;  %v3511_v60 = vpop.f32.mrf.mxu1  ;;  %v6556_v42 = vadd.f32 %v3773_v39, %v3685_v2  ;;  %v5519_v2 = vld [vmem:[%s6886_s1 + $0x150] sm:$0xff]  ;;  %v1288_v50 = vor.u32 %v1287_v21, %v1284_v59  ;;  %v1297_v39 = vrot.slane %v1295_v3, 4 }
 0x173   : > { %v3686_v35 = vpop.f32.mrf.mxu3  ;;  %3858 = vmatpush.bf16.msra.mxu1 %v5519_v2  ;;  %v3512_v14 = vadd.f32 %v3511_v60, %v6425_v16  ;;  %v5423_v60 = vld [vmem:[#allocation3 + $0x2d4] sm:$0xf]  ;;  %v4835_v59 = vld [vmem:[#allocation3 + $0x2d8] sm:$0xf]  ;;  %v5428_v21 = vld [vmem:[#allocation3 + $0x2f8] sm:$0xf0] }
 0x174   : > { %3812 = vmatmul.bf16.gmra.mxu0 %v4772_v23  ;;  %v3687_v33 = vadd.f32 %v3686_v35, %v3598_v58  ;;  %v1574_v23 = vrot.slane %v6539_v25, 5  ;;  %v1289_v49 = vrot.slane %v1288_v50, 4  ;;  %v5543_v25 = vld [vmem:[%s6886_s1 + $0x210] sm:$0xff]  ;;  %v1298_v35 = vor.u32 %v1297_v39, %v1293_v54  ;;  %v4837_v2 = vld [vmem:[#allocation3 + $0x2fc] sm:$0xf0] }
 0x175   : > { %3550 = vmatmul.bf16.gmra.mxu1 %v4796_v22  ;;  %v5420_v58 = vld [vmem:[#allocation3 + $0x2b8] sm:$0xf0]  ;;  %4125 = vmatpush.bf16.msra.mxu0 %v5543_v25 }
 0x176   : > { %3639 = vmatmul.bf16.gmra.mxu2 %v4800_v5  ;;  %v1575_v27 = vsel %vm6223_vm12, %v1573_v17, %v1574_v23  ;;  %v1294_v29 = vsel %vm6199_vm10, %v1289_v49, %v1293_v54  ;;  %v5424_v3 = vld [vmem:[#allocation3 + $0x2dc] sm:$0xf]  ;;  %v1299_v17 = vrot.slane %v1298_v35, 4  ;;  %v4808_v50 = vor.u32 %v5420_v58, %v4807_v12  ;;  %v6927_v12 = vld [vmem:[#allocation6_spill] sm:$0xff] }
 0x177   : > { %1659 = vst [vmem:[#allocation3 + $0x344] sm:$0xf] %v1575_v27  ;;  %v4840_v55 = vor.u32 %v5424_v3, %v4837_v2  ;;  %v1315_v58 = vshll.u32 %v6927_v12, 16 }
 0x178   : > { %3728 = vmatmul.bf16.gmra.mxu3 %v4804_v30  ;;  %1791 = vst [vmem:[#allocation3 + $0x308] sm:$0xf] %v1575_v27  ;;  %v686_v30 = vrot.slane %v5836_v53, 4  ;;  %v1306_v53 = vshrl.u32 %v5937_v45, 16 }
 0x179   : > { %v3775_v62 = vpop.f32.mrf.mxu0  ;;  %v3600_v22 = vpop.f32.mrf.mxu2  ;;  %1923 = vst [vmem:[#allocation3 + $0x2cc] sm:$0xf] %v1575_v27 }
 0x17a   : > { %v3601_v5 = vadd.f32 %v3600_v22, %v3512_v14  ;;  %v3513_v36 = vpop.f32.mrf.mxu1  ;;  %v6576_v18 = vadd.f32 %v3775_v62, %v3687_v33  ;;  %v942_v33 = vld [vmem:[#allocation2 + $0x98] sm:$0x1]  ;;  %1748 = vst [vmem:[#allocation3 + $0x328] sm:$0xf] %v1294_v29  ;;  %v4832_v14 = vor.u32 %v5423_v60, %v4829_v11  ;;  %v881_v49 = vsel %vm6241_vm13, %v686_v30, %v880_v51 }
 0x17b   : > { %v3689_v16 = vpop.f32.mrf.mxu3  ;;  %v1301_v37 = vshll.u32 %v942_v33, 16  ;;  %v3514_v23 = vadd.f32 %v3513_v36, %v6444_v41  ;;  %v4836_v62 = vor.u32 %v5428_v21, %v4835_v59  ;;  %1433 = vst [vmem:[#allocation3 + $0x364] sm:$0xf] %v1294_v29  ;;  %v1319_v41 = vshrl.u32 %v6927_v12, 16 }
 0x17c   : > { %v3690_v20 = vadd.f32 %v3689_v16, %v3601_v5  ;;  %1880 = vst [vmem:[#allocation3 + $0x2ec] sm:$0xf] %v1294_v29  ;;  %v1309_v5 = vshll.u32 %v5937_v45, 16  ;;  %v1578_v11 = vrot.slane %v5829_v38, 5  ;;  %v1308_v35 = vrot.slane %v1306_v53, 4 }
 0x17d   : > { %v1303_v22 = vrot.slane %v1301_v37, 5  ;;  %882 = vst [vmem:[#allocation2 + $0xa4] sm:$0x1] %v881_v49  ;;  %v1317_v21 = vrot.slane %v1315_v58, 5  ;;  %v1321_v3 = vrot.slane %v1319_v41, 4  ;;  %v4459_v30 = vrot.slane %v5818_v24, 9 }
 0x17e   : > { %v1311_v29 = vrot.slane %v1309_v5, 5  ;;  %v1580_v51 = vrot.slane %v1578_v11, 4  ;;  %v5432_v58 = vld [vmem:[#allocation3 + $0x31c] sm:$0xf]  ;;  %v4865_v41 = vld [vmem:[#allocation3 + $0x33c] sm:$0xf0] }
 0x17f   : > { %v1304_v60 = vsel %vm6199_vm10, %v1299_v17, %v1303_v22  ;;  %v1579_v38 = vsel %vm6223_vm12, %v4459_v30, %v1578_v11  ;;  %v1322_v17 = vor.u32 %v1321_v3, %v1317_v21  ;;  %v5433_v3 = vld [vmem:[#allocation3 + $0x324] sm:$0xf]  ;;  %v4873_v30 = vld [vmem:[#allocation3 + $0x344] sm:$0xf0] }
 0x180   : > { %1749 = vst [vmem:[#allocation3 + $0x34c] sm:$0xf] %v1304_v60  ;;  %v1312_v37 = vor.u32 %v1311_v29, %v1308_v35  ;;  %v5437_v35 = vld [vmem:[#allocation3 + $0x340] sm:$0xf0] }
 0x181   : > { %v3778_v54 = vpop.f32.mrf.mxu0  ;;  %v3602_v39 = vpop.f32.mrf.mxu2  ;;  %1434 = vst [vmem:[#allocation3 + $0x388] sm:$0xf] %v1304_v60 }
 0x182   : > { %v3603_v27 = vadd.f32 %v3602_v39, %v3514_v23  ;;  %v3516_v25 = vpop.f32.mrf.mxu1  ;;  %v6593_v2 = vadd.f32 %v3778_v54, %v3690_v20  ;;  %1881 = vst [vmem:[#allocation3 + $0x310] sm:$0xf] %v1304_v60  ;;  %v1313_v23 = vrot.slane %v1312_v37, 4  ;;  %v4843_v39 = vld [vmem:[#allocation3 + $0x2e0] sm:$0xf]  ;;  %v6928_v60 = vld [vmem:[#allocation7_spill] sm:$0xff] }
 0x183   : > { %v3691_v36 = vpop.f32.mrf.mxu3  ;;  %v3517_v16 = vadd.f32 %v3516_v25, %v6466_v34  ;;  %v1581_v34 = vrot.slane %v942_v33, 5  ;;  %1660 = vst [vmem:[#allocation3 + $0x368] sm:$0xf] %v1579_v38  ;;  %v703_v11 = vrot.slane %v6928_v60, 4  ;;  %v5534_v60 = vld [vmem:[%s6886_s1 + $0x1c8] sm:$0xff] }
 0x184   : > { %3817 = vmatmul.bf16.gmra.mxu0 %v4808_v50  ;;  %v3692_v59 = vadd.f32 %v3691_v36, %v3603_v27  ;;  %1792 = vst [vmem:[#allocation3 + $0x32c] sm:$0xf] %v1579_v38  ;;  %v6599_v54 = vld [vmem:[#allocation2 + $0xa4] sm:$0x1]  ;;  %v1318_v53 = vsel %vm6199_vm10, %v1313_v23, %v1317_v21  ;;  %v1323_v27 = vrot.slane %v1322_v17, 4  ;;  %v4868_v21 = vor.u32 %v5432_v58, %v4865_v41 }
 0x185   : > { %3555 = vmatmul.bf16.gmra.mxu1 %v4832_v14  ;;  %v1582_v50 = vsel %vm6223_vm12, %v1580_v51, %v1581_v34  ;;  %v1325_v25 = vshll.u32 %v6599_v54, 16  ;;  %1924 = vst [vmem:[#allocation3 + $0x2f0] sm:$0xf] %v1579_v38  ;;  %v4871_v36 = vld [vmem:[#allocation3 + $0x320] sm:$0xf]  ;;  %v5526_v38 = vld [vmem:[%s6886_s1 + $0x188] sm:$0xff]  ;;  %4037 = vmatpush.bf16.msra.mxu3 %v5534_v60 }
 0x186   : > { %3644 = vmatmul.bf16.gmra.mxu2 %v4836_v62  ;;  %1661 = vst [vmem:[#allocation3 + $0x38c] sm:$0xf] %v1582_v50  ;;  %v5429_v62 = vld [vmem:[#allocation3 + $0x300] sm:$0xf0]  ;;  %v4872_v37 = vor.u32 %v5437_v35, %v4871_v36  ;;  %v1585_v58 = vrot.slane %v6927_v12, 5 }
 0x187   : > { %1793 = vst [vmem:[#allocation3 + $0x350] sm:$0xf] %v1582_v50  ;;  %v4844_v29 = vor.u32 %v5429_v62, %v4843_v39  ;;  %3948 = vmatpush.bf16.msra.mxu2 %v5526_v38 }
 0x188   : > { %3733 = vmatmul.bf16.gmra.mxu3 %v4840_v55  ;;  %1925 = vst [vmem:[#allocation3 + $0x314] sm:$0xf] %v1582_v50  ;;  %v6929_v50 = vld [vmem:[#allocation8_spill] sm:$0xff] }
 0x189   : > { %v3780_v14 = vpop.f32.mrf.mxu0  ;;  %v3605_v49 = vpop.f32.mrf.mxu2  ;;  %1750 = vst [vmem:[#allocation3 + $0x370] sm:$0xf] %v1318_v53  ;;  %v1330_v23 = vshrl.u32 %v6929_v50, 16 }
 0x18a   : > { %v3606_v24 = vadd.f32 %v3605_v49, %v3517_v16  ;;  %v3518_v20 = vpop.f32.mrf.mxu1  ;;  %v6601_v33 = vadd.f32 %v3780_v14, %v3692_v59  ;;  %v1327_v16 = vrot.slane %v1325_v25, 5  ;;  %v887_v59 = vld [vmem:[#allocation2 + $0xb0] sm:$0x1]  ;;  %v1333_v14 = vshll.u32 %v6929_v50, 16  ;;  %1435 = vst [vmem:[#allocation3 + $0x3ac] sm:$0xf] %v1318_v53 }
 0x18b   : > { %v3694_v22 = vpop.f32.mrf.mxu3  ;;  %v3519_v55 = vadd.f32 %v3518_v20, %v6488_v7  ;;  %v888_v17 = vsel %vm6241_vm13, %v703_v11, %v887_v59  ;;  %v6930_v20 = vld [vmem:[#allocation9_spill] sm:$0xff]  ;;  %v1332_v41 = vrot.slane %v1330_v23, 4  ;;  %1882 = vst [vmem:[#allocation3 + $0x334] sm:$0xf] %v1318_v53  ;;  %v1587_v11 = vrot.slane %v1585_v58, 4 }
 0x18c   : > { %v3695_v5 = vadd.f32 %v3694_v22, %v3606_v24  ;;  %v1328_v7 = vsel %vm6199_vm10, %v1323_v27, %v1327_v16  ;;  %v1339_v39 = vshll.u32 %v6930_v20, 16  ;;  %v1343_v62 = vshrl.u32 %v6930_v20, 16  ;;  %889 = vst [vmem:[#allocation2 + $0xb0] sm:$0x1] %v888_v17  ;;  %v5584_v17 = vld [vmem:[%s6887_s2] ss:$0 sm:$0xff] }
 0x18d   : > { %1751 = vst [vmem:[#allocation3 + $0x394] sm:$0xf] %v1328_v7  ;;  %v1335_v36 = vrot.slane %v1333_v14, 5  ;;  %v1588_v53 = vrot.slane %v6599_v54, 5  ;;  %v327_v54 = vld [vmem:[%s5636_s25 + $0xf0] sm:$0xff] }
 0x18e   : > { %1436 = vst [vmem:[#allocation3 + $0x3d0] sm:$0xf] %v1328_v7  ;;  %v1341_v35 = vrot.slane %v1339_v39, 5  ;;  %v1345_v59 = vrot.slane %v1343_v62, 4  ;;  %v362_v23 = vmul.f32 %v5584_v17, %v327_v54 }
 0x18f   : > { %1883 = vst [vmem:[#allocation3 + $0x358] sm:$0xf] %v1328_v7  ;;  %v1336_v12 = vor.u32 %v1335_v36, %v1332_v41  ;;  %v4907_v41 = vld [vmem:[#allocation3 + $0x368] sm:$0xf]  ;;  %v5446_v36 = vld [vmem:[#allocation3 + $0x388] sm:$0xf0] }
 0x190   : > { %v1346_v38 = vor.u32 %v1345_v59, %v1341_v35  ;;  %v894_v59 = vld [vmem:[#allocation2 + $0xbc] sm:$0x1] }
 0x191   : > { %v3783_v51 = vpop.f32.mrf.mxu0  ;;  %v3607_v34 = vpop.f32.mrf.mxu2 }
 0x192   : > { %v3608_v49 = vadd.f32 %v3607_v34, %v3519_v55  ;;  %v3521_v24 = vpop.f32.mrf.mxu1  ;;  %v6619_v22 = vadd.f32 %v3783_v51, %v3695_v5  ;;  %v4876_v55 = vor.u32 %v5433_v3, %v4873_v30  ;;  %v5518_v5 = vld [vmem:[%s6886_s1 + $0x148] sm:$0xff]  ;;  %v1337_v3 = vrot.slane %v1336_v12, 4  ;;  %v328_v51 = vld [vmem:[%s5636_s25 + $0xf8] sm:$0xff] }
 0x193   : > { %v3696_v27 = vpop.f32.mrf.mxu3  ;;  %v3522_v25 = vadd.f32 %v3521_v24, %v6516_v47  ;;  %v4460_v47 = vrot.slane %v5937_v45, 9  ;;  %3859 = vmatpush.bf16.msra.mxu1 %v5518_v5  ;;  %v1589_v45 = vsel %vm6223_vm12, %v1587_v11, %v1588_v53  ;;  %v5542_v30 = vld [vmem:[%s6886_s1 + $0x208] sm:$0xff]  ;;  %v363_v14 = vmul.f32 %v5584_v17, %v328_v51  ;;  %v5438_v24 = vld [vmem:[#allocation3 + $0x348] sm:$0xf0]  ;;  %v948_v53 = vld [vmem:[#allocation2 + $0xb0] sm:$0x1] }
 0x194   : > { %3822 = vmatmul.bf16.gmra.mxu0 %v4844_v29  ;;  %v3697_v16 = vadd.f32 %v3696_v27, %v3608_v49  ;;  %1663 = vst [vmem:[#allocation3 + $0x3d4] sm:$0xf] %v1589_v45  ;;  %v4879_v49 = vld [vmem:[#allocation3 + $0x328] sm:$0xf]  ;;  %v5441_v27 = vld [vmem:[#allocation3 + $0x364] sm:$0xf] }
 0x195   : > { %3560 = vmatmul.bf16.gmra.mxu1 %v4868_v21  ;;  %v1586_v29 = vsel %vm6223_vm12, %v4460_v47, %v1585_v58  ;;  %v4901_v58 = vld [vmem:[#allocation3 + $0x384] sm:$0xf0]  ;;  %4126 = vmatpush.bf16.msra.mxu0 %v5542_v30  ;;  %1795 = vst [vmem:[#allocation3 + $0x398] sm:$0xf] %v1589_v45  ;;  %v5442_v5 = vld [vmem:[#allocation3 + $0x36c] sm:$0xf] }
 0x196   : > { %3649 = vmatmul.bf16.gmra.mxu2 %v4872_v37  ;;  %1662 = vst [vmem:[#allocation3 + $0x3b0] sm:$0xf] %v1586_v29  ;;  %v720_v47 = vrot.slane %v6090_v28, 4  ;;  %v1349_v30 = vshll.u32 %v948_v53, 16  ;;  %v4904_v54 = vor.u32 %v5441_v27, %v4901_v58 }
 0x197   : > { %1794 = vst [vmem:[#allocation3 + $0x374] sm:$0xf] %v1586_v29 }
 0x198   : > { %3738 = vmatmul.bf16.gmra.mxu3 %v4876_v55  ;;  %1926 = vst [vmem:[#allocation3 + $0x338] sm:$0xf] %v1586_v29  ;;  %v4908_v29 = vor.u32 %v5446_v36, %v4907_v41  ;;  %v895_v28 = vsel %vm6241_vm13, %v720_v47, %v894_v59  ;;  %v1351_v17 = vrot.slane %v1349_v30, 5  ;;  %v1592_v36 = vrot.slane %v6930_v20, 5 }
 0x199   : > { %v3785_v7 = vpop.f32.mrf.mxu0  ;;  %v3610_v21 = vpop.f32.mrf.mxu2  ;;  %1927 = vst [vmem:[#allocation3 + $0x35c] sm:$0xf] %v1589_v45  ;;  %v6931_v45 = vld [vmem:[#allocation10_spill] sm:$0xff]  ;;  %v4461_v59 = vrot.slane %v6929_v50, 9 }
 0x19a   : > { %v3611_v34 = vadd.f32 %v3610_v21, %v3522_v25  ;;  %v3523_v37 = vpop.f32.mrf.mxu1  ;;  %v1342_v25 = vsel %vm6199_vm10, %v1337_v3, %v1341_v35  ;;  %v6646_v55 = vadd.f32 %v3785_v7, %v3697_v16  ;;  %v4909_v21 = vld [vmem:[#allocation3 + $0x38c] sm:$0xf0]  ;;  %v1347_v16 = vrot.slane %v1346_v38, 4  ;;  %896 = vst [vmem:[#allocation2 + $0xbc] sm:$0x1] %v895_v28 }
 0x19b   : > { %v3699_v39 = vpop.f32.mrf.mxu3  ;;  %v3524_v62 = vadd.f32 %v3523_v37, %v6532_v40  ;;  %v5585_v40 = vld [vmem:[%s6888_s3] ss:$0 sm:$0xff]  ;;  %1752 = vst [vmem:[#allocation3 + $0x3b8] sm:$0xf] %v1342_v25  ;;  %v4880_v7 = vor.u32 %v5438_v24, %v4879_v49  ;;  %v4912_v37 = vor.u32 %v5442_v5, %v4909_v21  ;;  %v1357_v38 = vshll.u32 %v6931_v45, 16  ;;  %v6932_v49 = vld [vmem:[#allocation11_spill] sm:$0xff] }
 0x19c   : > { %v3700_v60 = vadd.f32 %v3699_v39, %v3611_v34  ;;  %v397_v11 = vadd.f32 %v5585_v40, %v362_v23  ;;  %v398_v12 = vadd.f32 %v5585_v40, %v363_v14  ;;  %1437 = vst [vmem:[#allocation3 + $0x3f4] sm:$0xf] %v1342_v25  ;;  %v1354_v23 = vshrl.u32 %v6931_v45, 16 }
 0x19d   : > { %1884 = vst [vmem:[#allocation3 + $0x37c] sm:$0xf] %v1342_v25  ;;  %v1363_v24 = vshll.u32 %v6932_v49, 16  ;;  %v1367_v27 = vshrl.u32 %v6932_v49, 16  ;;  %v1352_v41 = vsel %vm6199_vm10, %v1347_v16, %v1351_v17  ;;  %v1594_v21 = vrot.slane %v1592_v36, 4 }
 0x19e   : > { %v429_v35 = vmax.f32 %v397_v11, 0.0  ;;  %v430_v3 = vmax.f32 %v398_v12, 0.0  ;;  %v1356_v5 = vrot.slane %v1354_v23, 4  ;;  %1753 = vst [vmem:[#allocation3 + $0x3dc] sm:$0xf] %v1352_v41  ;;  %v1593_v16 = vsel %vm6223_vm12, %v4461_v59, %v1592_v36 }
 0x19f   : > { %v1365_v25 = vrot.slane %v1363_v24, 5  ;;  %v1369_v12 = vrot.slane %v1367_v27, 4  ;;  %1438 = vst [vmem:[#allocation3 + $0x418] sm:$0xf] %v1352_v41  ;;  %v4915_v24 = vld [vmem:[#allocation3 + $0x370] sm:$0xf] }
 0x1a0   : > { %v6655_v14 = vpack.c.bf16 %v429_v35, %v429_v35  ;;  %v462_v47 = vpack.c.bf16 %v430_v3, %v430_v3  ;;  %1885 = vst [vmem:[#allocation3 + $0x3a0] sm:$0xf] %v1352_v41  ;;  %v1595_v35 = vrot.slane %v948_v53, 5  ;;  %v4943_v59 = vld [vmem:[#allocation3 + $0x3b0] sm:$0xf] }
 0x1a1   : > { %v3788_v51 = vpop.f32.mrf.mxu0  ;;  %v3612_v34 = vpop.f32.mrf.mxu2  ;;  %v1370_v3 = vor.u32 %v1369_v12, %v1365_v25  ;;  %1664 = vst [vmem:[#allocation3 + $0x3f8] sm:$0xf] %v1593_v16  ;;  %v6672_v17 = vld [vmem:[#allocation2 + $0xbc] sm:$0x1]  ;;  %v4937_v12 = vld [vmem:[#allocation3 + $0x3cc] sm:$0xf0] }
 0x1a2   : > { %v3613_v39 = vadd.f32 %v3612_v34, %v3524_v62  ;;  %v3526_v40 = vpop.f32.mrf.mxu1  ;;  %v1359_v62 = vrot.slane %v1357_v38, 5  ;;  %v6664_v30 = vadd.f32 %v3788_v51, %v3700_v60  ;;  %v730_v60 = vshrl.u32 %v462_v47, 16  ;;  %1796 = vst [vmem:[#allocation3 + $0x3bc] sm:$0xf] %v1593_v16 }
 0x1a3   : > { %v3701_v58 = vpop.f32.mrf.mxu3  ;;  %v3527_v28 = vadd.f32 %v3526_v40, %v6334_v44  ;;  %v725_v23 = vshll.u32 %v6655_v14, 16  ;;  %v1373_v40 = vshll.u32 %v6672_v17, 16  ;;  %1928 = vst [vmem:[#allocation3 + $0x380] sm:$0xf] %v1593_v16  ;;  %v733_v41 = vshll.u32 %v462_v47, 16 }
 0x1a4   : > { %3827 = vmatmul.bf16.gmra.mxu0 %v4880_v7  ;;  %v3702_v11 = vadd.f32 %v3701_v58, %v3613_v39  ;;  %v1360_v20 = vor.u32 %v1359_v62, %v1356_v5  ;;  %v722_v7 = vshrl.u32 %v6655_v14, 16  ;;  %v6678_v58 = vrot.slane %v730_v60, 7  ;;  %v5447_v5 = vld [vmem:[#allocation3 + $0x390] sm:$0xf0]  ;;  %v5450_v62 = vld [vmem:[#allocation3 + $0x3ac] sm:$0xf] }
 0x1a5   : > { %3565 = vmatmul.bf16.gmra.mxu1 %v4904_v54  ;;  %v1596_v54 = vsel %vm6223_vm12, %v1594_v21, %v1595_v35  ;;  %v1375_v14 = vrot.slane %v1373_v40, 5  ;;  %v4945_v60 = vld [vmem:[#allocation3 + $0x3d4] sm:$0xf0] }
 0x1a6   : > { %3654 = vmatmul.bf16.gmra.mxu2 %v4908_v29  ;;  %v1361_v50 = vrot.slane %v1360_v20, 4  ;;  %1665 = vst [vmem:[#allocation3 + $0x41c] sm:$0xf] %v1596_v54  ;;  %v724_v38 = vrot.slane %v722_v7, 7  ;;  %v4916_v20 = vor.u32 %v5447_v5, %v4915_v24  ;;  %v735_v47 = vor.u32 %v733_v41, %v6678_v58  ;;  %v5533_v41 = vld [vmem:[%s6886_s1 + $0x1c0] sm:$0xff] }
 0x1a7   : > { %1797 = vst [vmem:[#allocation3 + $0x3e0] sm:$0xf] %v1596_v54  ;;  %4038 = vmatpush.bf16.msra.mxu3 %v5533_v41 }
 0x1a8   : > { %3743 = vmatmul.bf16.gmra.mxu3 %v4912_v37  ;;  %v1366_v44 = vsel %vm6199_vm10, %v1361_v50, %v1365_v25  ;;  %v1371_v37 = vrot.slane %v1370_v3, 4  ;;  %1929 = vst [vmem:[#allocation3 + $0x3a4] sm:$0xf] %v1596_v54  ;;  %v5455_v25 = vld [vmem:[#allocation3 + $0x3d0] sm:$0xf0]  ;;  %v727_v35 = vor.u32 %v725_v23, %v724_v38  ;;  %v728_v7 = vrot.slane %v724_v38, 4 }
 0x1a9   : > { %v3790_v51 = vpop.f32.mrf.mxu0  ;;  %v3615_v29 = vpop.f32.mrf.mxu2  ;;  %1754 = vst [vmem:[#allocation3 + $0x400] sm:$0xf] %v1366_v44  ;;  %v5451_v3 = vld [vmem:[#allocation3 + $0x3b4] sm:$0xf]  ;;  %v4940_v50 = vor.u32 %v5450_v62, %v4937_v12  ;;  %v4944_v23 = vor.u32 %v5455_v25, %v4943_v59 }
 0x1aa   : > { %v3616_v53 = vadd.f32 %v3615_v29, %v3527_v28  ;;  %v3528_v34 = vpop.f32.mrf.mxu1  ;;  %v6680_v36 = vadd.f32 %v3790_v51, %v3702_v11  ;;  %v1376_v21 = vsel %vm6199_vm10, %v1371_v37, %v1375_v14  ;;  %v897_v11 = vld [vmem:[#allocation2 + $0xc0] sm:$0xf]  ;;  %1439 = vst [vmem:[#allocation3 + $0x43c] sm:$0xf] %v1366_v44  ;;  %v4948_v24 = vor.u32 %v5451_v3, %v4945_v60  ;;  %v5460_v37 = vld [vmem:[#allocation3 + $0x3fc] sm:$0xf] }
 0x1ab   : > { %v3704_v39 = vpop.f32.mrf.mxu3  ;;  %v3529_v16 = vadd.f32 %v3528_v34, %v6362_v31  ;;  %v5525_v51 = vld [vmem:[%s6886_s1 + $0x180] sm:$0xff]  ;;  %1755 = vst [vmem:[#allocation3 + $0x424] sm:$0xf] %v1376_v21  ;;  %v1599_v34 = vrot.slane %v6932_v49, 5  ;;  %v898_v40 = vsel %vm5714_vm5, %v727_v35, %v897_v11  ;;  %v736_v14 = vsel %vm5706_vm4, %v728_v7, %v735_v47  ;;  %v5456_v7 = vld [vmem:[#allocation3 + $0x3d8] sm:$0xf0] }
 0x1ac   : > { %v3705_v27 = vadd.f32 %v3704_v39, %v3616_v53  ;;  %3949 = vmatpush.bf16.msra.mxu2 %v5525_v51  ;;  %1440 = vst [vmem:[#allocation3 + $0x460] sm:$0xf] %v1376_v21  ;;  %v4462_v49 = vrot.slane %v6931_v45, 9  ;;  %v5541_v35 = vld [vmem:[%s6886_s1 + $0x200] sm:$0xff]  ;;  %v737_v47 = vrot.slane %v6678_v58, 4 }
 0x1ad   : > { %1886 = vst [vmem:[#allocation3 + $0x3c4] sm:$0xf] %v1366_v44  ;;  %v1601_v62 = vrot.slane %v1599_v34, 4  ;;  %v1602_v44 = vrot.slane %v6672_v17, 5  ;;  %v4951_v17 = vld [vmem:[#allocation3 + $0x3b8] sm:$0xf]  ;;  %4127 = vmatpush.bf16.msra.mxu0 %v5541_v35 }
 0x1ae   : > { %1887 = vst [vmem:[#allocation3 + $0x3e8] sm:$0xf] %v1376_v21  ;;  %v1600_v12 = vsel %vm6223_vm12, %v4462_v49, %v1599_v34  ;;  %v5464_v34 = vld [vmem:[#allocation3 + $0x418] sm:$0xf0] }
 0x1af   : > { %899 = vst [vmem:[#allocation2 + $0xc0] sm:$0xf] %v898_v40  ;;  %v1603_v25 = vsel %vm6223_vm12, %v1601_v62, %v1602_v44 }
 0x1b0   : > { %900 = vst [vmem:[#allocation2 + $0xc4] sm:$0xf] %v736_v14  ;;  %v4981_v14 = vld [vmem:[#allocation3 + $0x41c] sm:$0xf0] }
 0x1b1   : > { %v3793_v28 = vpop.f32.mrf.mxu0  ;;  %v3617_v54 = vpop.f32.mrf.mxu2  ;;  %1666 = vst [vmem:[#allocation3 + $0x440] sm:$0xf] %v1600_v12 }
 0x1b2   : > { %v3618_v29 = vadd.f32 %v3617_v54, %v3529_v16  ;;  %v3531_v53 = vpop.f32.mrf.mxu1  ;;  %v6689_v39 = vadd.f32 %v3793_v28, %v3705_v27  ;;  %v5517_v27 = vld [vmem:[%s6886_s1 + $0x140] sm:$0xff]  ;;  %1667 = vst [vmem:[#allocation3 + $0x464] sm:$0xf] %v1603_v25  ;;  %v5459_v28 = vld [vmem:[#allocation3 + $0x3f4] sm:$0xf] }
 0x1b3   : > { %v3706_v31 = vpop.f32.mrf.mxu3  ;;  %3860 = vmatpush.bf16.msra.mxu1 %v5517_v27  ;;  %v3532_v59 = vadd.f32 %v3531_v53, %v6381_v1  ;;  %1798 = vst [vmem:[#allocation3 + $0x404] sm:$0xf] %v1600_v12  ;;  %v901_v54 = vld [vmem:[#allocation2 + $0xc8] sm:$0x1] }
 0x1b4   : > { %3832 = vmatmul.bf16.gmra.mxu0 %v4916_v20  ;;  %v3707_v38 = vadd.f32 %v3706_v31, %v3618_v29  ;;  %1799 = vst [vmem:[#allocation3 + $0x428] sm:$0xf] %v1603_v25  ;;  %v4979_v31 = vld [vmem:[#allocation3 + $0x3f8] sm:$0xf]  ;;  %v902_v40 = vsel %vm6241_vm13, %v737_v47, %v901_v54 }
 0x1b5   : > { %3570 = vmatmul.bf16.gmra.mxu1 %v4940_v50  ;;  %1930 = vst [vmem:[#allocation3 + $0x3c8] sm:$0xf] %v1600_v12  ;;  %v4973_v50 = vld [vmem:[#allocation3 + $0x414] sm:$0xf0]  ;;  %v4980_v12 = vor.u32 %v5464_v34, %v4979_v31 }
 0x1b6   : > { %3659 = vmatmul.bf16.gmra.mxu2 %v4944_v23  ;;  %1931 = vst [vmem:[#allocation3 + $0x3ec] sm:$0xf] %v1603_v25  ;;  %v6715_v60 = vld [vmem:[#allocation2 + $0xc0] sm:$0xf]  ;;  %v4952_v23 = vor.u32 %v5456_v7, %v4951_v17  ;;  %v4976_v5 = vor.u32 %v5459_v28, %v4973_v50  ;;  %v4984_v17 = vor.u32 %v5460_v37, %v4981_v14  ;;  %v5465_v37 = vld [vmem:[#allocation3 + $0x420] sm:$0xf0] }
 0x1b7   : > { %v6717_v51 = vld [vmem:[#allocation2 + $0xc4] sm:$0xf]  ;;  %1698 = vst [vmem:[#allocation3 + $0x444] sm:$0xf] %v6715_v60  ;;  %v1701_v29 = vshrl.u32 %v6715_v60, 16  ;;  %v1704_v53 = vshll.u32 %v6715_v60, 16 }
 0x1b8   : > { %3748 = vmatmul.bf16.gmra.mxu3 %v4948_v24  ;;  %1699 = vst [vmem:[#allocation3 + $0x468] sm:$0xf] %v6717_v51  ;;  %v1710_v49 = vshll.u32 %v6717_v51, 16  ;;  %v1714_v62 = vshrl.u32 %v6717_v51, 16 }
 0x1b9   : > { %v3795_v21 = vpop.f32.mrf.mxu0  ;;  %v3620_v45 = vpop.f32.mrf.mxu2  ;;  %v1706_v24 = vrot.slane %v1704_v53, 5  ;;  %1830 = vst [vmem:[#allocation3 + $0x408] sm:$0xf] %v6715_v60 }
 0x1ba   : > { %v3621_v20 = vadd.f32 %v3620_v45, %v3532_v59  ;;  %v3533_v16 = vpop.f32.mrf.mxu1  ;;  %v6712_v3 = vadd.f32 %v3795_v21, %v3707_v38  ;;  %v1703_v38 = vrot.slane %v1701_v29, 4  ;;  %1831 = vst [vmem:[#allocation3 + $0x42c] sm:$0xf] %v6717_v51  ;;  %v1712_v21 = vrot.slane %v1710_v49, 5 }
 0x1bb   : > { %v3709_v1 = vpop.f32.mrf.mxu3  ;;  %v3534_v58 = vadd.f32 %v3533_v16, %v6405_v10  ;;  %903 = vst [vmem:[#allocation2 + $0xc8] sm:$0x1] %v902_v40  ;;  %v1716_v45 = vrot.slane %v1714_v62, 4 }
 0x1bc   : > { %v3710_v11 = vadd.f32 %v3709_v1, %v3621_v20  ;;  %v1707_v59 = vor.u32 %v1706_v24, %v1703_v38  ;;  %v5468_v38 = vld [vmem:[#allocation3 + $0x43c] sm:$0xf]  ;;  %v5015_v24 = vld [vmem:[#allocation3 + $0x440] sm:$0xf] }
 0x1bd   : > { %v1717_v7 = vor.u32 %v1716_v45, %v1712_v21 }
 0x1be   : > { %v1708_v20 = vrot.slane %v1707_v59, 4 }
 0x1c0   : > { %v1713_v16 = vsel %vm6199_vm10, %v1708_v20, %v1712_v21  ;;  %v4995_v46 = vld [vmem:[#allocation3 + $0x408] sm:$0xf] }
 0x1c1   : > { %v3798_v41 = vpop.f32.mrf.mxu0  ;;  %v3622_v27 = vpop.f32.mrf.mxu2  ;;  %1756 = vst [vmem:[#allocation3 + $0x448] sm:$0xf] %v1713_v16 }
 0x1c2   : > { %v3623_v44 = vadd.f32 %v3622_v27, %v3534_v58  ;;  %v3536_v10 = vpop.f32.mrf.mxu1  ;;  %v6730_v15 = vadd.f32 %v3798_v41, %v3710_v11  ;;  %1888 = vst [vmem:[#allocation3 + $0x40c] sm:$0xf] %v1713_v16  ;;  %v6735_v50 = vld [vmem:[#allocation2 + $0xc8] sm:$0x1]  ;;  %v4987_v58 = vld [vmem:[#allocation3 + $0x400] sm:$0xf] }
 0x1c3   : > { %v3711_v25 = vpop.f32.mrf.mxu3  ;;  %v3537_v1 = vadd.f32 %v3536_v10, %v6435_v9  ;;  %v1720_v31 = vshll.u32 %v6735_v50, 16  ;;  %v5009_v9 = vld [vmem:[#allocation3 + $0x45c] sm:$0xf0]  ;;  %v5473_v41 = vld [vmem:[#allocation3 + $0x460] sm:$0xf0] }
 0x1c4   : > { %3837 = vmatmul.bf16.gmra.mxu0 %v4952_v23  ;;  %v3712_v35 = vadd.f32 %v3711_v25, %v3623_v44  ;;  %v1718_v23 = vrot.slane %v1717_v7, 4  ;;  %v5012_v44 = vor.u32 %v5468_v38, %v5009_v9  ;;  %v5469_v10 = vld [vmem:[#allocation3 + $0x444] sm:$0xf]  ;;  %v5016_v21 = vor.u32 %v5473_v41, %v5015_v24  ;;  %v5336_v41 = vld [vmem:[#allocation3 + $0x1c] sm:$0xf] }
 0x1c5   : > { %3575 = vmatmul.bf16.gmra.mxu1 %v4976_v5  ;;  %v1722_v40 = vrot.slane %v1720_v31, 5  ;;  %v4988_v5 = vor.u32 %v5465_v37, %v4987_v58  ;;  %v5335_v31 = vld [vmem:[#allocation3 + $0x14] sm:$0xf]  ;;  %v4491_v58 = vld [vmem:[#allocation3 + $0x18] sm:$0xf] }
 0x1c6   : > { %3664 = vmatmul.bf16.gmra.mxu2 %v4980_v12  ;;  %v5017_v12 = vld [vmem:[#allocation3 + $0x464] sm:$0xf0]  ;;  %v5340_v37 = vld [vmem:[#allocation3 + $0x38] sm:$0xf0] }
 0x1c7   : > { %v1723_v27 = vsel %vm6199_vm10, %v1718_v23, %v1722_v40  ;;  %v5020_v20 = vor.u32 %v5469_v10, %v5017_v12 }
 0x1c8   : > { %3753 = vmatmul.bf16.gmra.mxu3 %v4984_v17  ;;  %1757 = vst [vmem:[#allocation3 + $0x46c] sm:$0xf] %v1723_v27 }
 0x1c9   : > { %v3800_v47 = vpop.f32.mrf.mxu0  ;;  %v3625_v11 = vpop.f32.mrf.mxu2  ;;  %1889 = vst [vmem:[#allocation3 + $0x430] sm:$0xf] %v1723_v27  ;;  %v4493_v27 = vld [vmem:[#allocation3 + $0x3c] sm:$0xf0] }
 0x1ca   : > { %v3626_v28 = vadd.f32 %v3625_v11, %v3537_v1  ;;  %v3538_v54 = vpop.f32.mrf.mxu1  ;;  %v6737_v29 = vadd.f32 %v3800_v47, %v3712_v35  ;;  %v4496_v12 = vor.u32 %v5336_v41, %v4493_v27 }
 0x1cb   : > { %v3714_v53 = vpop.f32.mrf.mxu3  ;;  %v3539_v14 = vadd.f32 %v3538_v54, %v6454_v57 }
 0x1cc   : > { %v3715_v34 = vadd.f32 %v3714_v53, %v3626_v28  ;;  %v5023_v53 = vld [vmem:[#allocation3 + $0x448] sm:$0xf] }
 0x1cf   : > { %v5474_v23 = vld [vmem:[#allocation3 + $0x468] sm:$0xf0] }
 0x1d0   : > { %v5024_v40 = vor.u32 %v5474_v23, %v5023_v53 }
 0x1d1   : > { %v3803_v49 = vpop.f32.mrf.mxu0  ;;  %v3627_v62 = vpop.f32.mrf.mxu2 }
 0x1d2   : > { %v3628_v59 = vadd.f32 %v3627_v62, %v3539_v14  ;;  %v3541_v25 = vpop.f32.mrf.mxu1  ;;  %v6743_v45 = vadd.f32 %v3803_v49, %v3715_v34  ;;  %v4485_v34 = vld [vmem:[#allocation3 + $0x34] sm:$0xf0]  ;;  %v4492_v49 = vor.u32 %v5340_v37, %v4491_v58  ;;  %v5345_v58 = vld [vmem:[#allocation3 + $0x64] sm:$0xf]  ;;  %v4529_v37 = vld [vmem:[#allocation3 + $0x84] sm:$0xf0] }
 0x1d3   : > { %v3716_v35 = vpop.f32.mrf.mxu3  ;;  %v3542_v57 = vadd.f32 %v3541_v25, %v6473_v56  ;;  %v4488_v24 = vor.u32 %v5335_v31, %v4485_v34  ;;  %v4532_v27 = vor.u32 %v5345_v58, %v4529_v37 }
 0x1d4   : > { %3842 = vmatmul.bf16.gmra.mxu0 %v4988_v5  ;;  %v3717_v17 = vadd.f32 %v3716_v35, %v3628_v59 }
 0x1d5   : > { %3580 = vmatmul.bf16.gmra.mxu1 %v5012_v44 }
 0x1d6   : > { %3669 = vmatmul.bf16.gmra.mxu2 %v5016_v21 }
 0x1d8   : > { %3758 = vmatmul.bf16.gmra.mxu3 %v5020_v20 }
 0x1d9   : > { %v3805_v16 = vpop.f32.mrf.mxu0  ;;  %v3630_v7 = vpop.f32.mrf.mxu2 }
 0x1da   : > { %v3631_v1 = vadd.f32 %v3630_v7, %v3542_v57  ;;  %v3543_v47 = vpop.f32.mrf.mxu1  ;;  %v6746_v11 = vadd.f32 %v3805_v16, %v3717_v17  ;;  %v4499_v16 = vld [vmem:[#allocation3 + $0x20] sm:$0xf]  ;;  %v5341_v7 = vld [vmem:[#allocation3 + $0x40] sm:$0xf0] }
 0x1db   : > { %v3719_v28 = vpop.f32.mrf.mxu3  ;;  %v3544_v38 = vadd.f32 %v3543_v47, %v6502_v43  ;;  %v4521_v47 = vld [vmem:[#allocation3 + $0x7c] sm:$0xf0]  ;;  %v4500_v53 = vor.u32 %v5341_v7, %v4499_v16 }
 0x1dc   : > { %v3720_v54 = vadd.f32 %v3719_v28, %v3631_v1  ;;  %v5344_v1 = vld [vmem:[#allocation3 + $0x5c] sm:$0xf]  ;;  %v4527_v28 = vld [vmem:[#allocation3 + $0x60] sm:$0xf] }
 0x1dd   : > { %v4524_v34 = vor.u32 %v5344_v1, %v4521_v47 }
 0x1e1   : > { %v3808_v9 = vpop.f32.mrf.mxu0  ;;  %v3632_v56 = vpop.f32.mrf.mxu2 }
 0x1e2   : > { %v3633_v5 = vadd.f32 %v3632_v56, %v3544_v38  ;;  %v3546_v14 = vpop.f32.mrf.mxu1  ;;  %v6749_v62 = vadd.f32 %v3808_v9, %v3720_v54  ;;  %v5349_v54 = vld [vmem:[#allocation3 + $0x80] sm:$0xf0] }
 0x1e3   : > { %v3721_v44 = vpop.f32.mrf.mxu3  ;;  %v3547_v59 = vadd.f32 %v3546_v14, %v6359_v26  ;;  %v4528_v9 = vor.u32 %v5349_v54, %v4527_v28  ;;  %v5354_v28 = vld [vmem:[#allocation3 + $0xac] sm:$0xf]  ;;  %v4565_v54 = vld [vmem:[#allocation3 + $0xcc] sm:$0xf0] }
 0x1e4   : > { %3847 = vmatmul.bf16.gmra.mxu0 %v5024_v40  ;;  %v3722_v10 = vadd.f32 %v3721_v44, %v3633_v5  ;;  %v4568_v37 = vor.u32 %v5354_v28, %v4565_v54 }
 0x1e5   : > { %3861 = vmatmul.bf16.vlgmr.msra.gmra.mxu1 %v4488_v24 }
 0x1e6   : > { %3950 = vmatmul.bf16.vlgmr.msra.gmra.mxu2 %v4492_v49 }
 0x1e8   : > { %4039 = vmatmul.bf16.vlgmr.msra.gmra.mxu3 %v4496_v12 }
 0x1e9   : > { %v3810_v43 = vpop.f32.mrf.mxu0  ;;  %v3635_v25 = vpop.f32.mrf.mxu2 }
 0x1ea   : > { %v3636_v21 = vadd.f32 %v3635_v25, %v3547_v59  ;;  %v3548_v35 = vpop.f32.mrf.mxu1  ;;  %v6752_v17 = vadd.f32 %v3810_v43, %v3722_v10  ;;  %v4535_v43 = vld [vmem:[#allocation3 + $0x68] sm:$0xf]  ;;  %v5350_v25 = vld [vmem:[#allocation3 + $0x88] sm:$0xf0] }
 0x1eb   : > { %v3724_v20 = vpop.f32.mrf.mxu3  ;;  %v3549_v23 = vadd.f32 %v3548_v35, %v6376_v19  ;;  %v4557_v35 = vld [vmem:[#allocation3 + $0xc4] sm:$0xf0]  ;;  %v4536_v16 = vor.u32 %v5350_v25, %v4535_v43 }
 0x1ec   : > { %v3725_v57 = vadd.f32 %v3724_v20, %v3636_v21  ;;  %v5353_v21 = vld [vmem:[#allocation3 + $0xa4] sm:$0xf]  ;;  %v4563_v20 = vld [vmem:[#allocation3 + $0xa8] sm:$0xf] }
 0x1ed   : > { %v4560_v47 = vor.u32 %v5353_v21, %v4557_v35 }
 0x1f1   : > { %v3813_v31 = vpop.f32.mrf.mxu0  ;;  %v3637_v26 = vpop.f32.mrf.mxu2 }
 0x1f2   : > { %v3638_v40 = vadd.f32 %v3637_v26, %v3549_v23  ;;  %v3551_v38 = vpop.f32.mrf.mxu1  ;;  %v6755_v56 = vadd.f32 %v3813_v31, %v3725_v57  ;;  %v5358_v57 = vld [vmem:[#allocation3 + $0xc8] sm:$0xf0] }
 0x1f3   : > { %v3726_v24 = vpop.f32.mrf.mxu3  ;;  %v3552_v5 = vadd.f32 %v3551_v38, %v6400_v13  ;;  %v4564_v31 = vor.u32 %v5358_v57, %v4563_v20  ;;  %v5363_v20 = vld [vmem:[#allocation3 + $0xf4] sm:$0xf]  ;;  %v4601_v57 = vld [vmem:[#allocation3 + $0x114] sm:$0xf0] }
 0x1f4   : > { %4128 = vmatmul.bf16.vlgmr.msra.gmra.mxu0 %v4500_v53  ;;  %v3727_v41 = vadd.f32 %v3726_v24, %v3638_v40  ;;  %v4604_v54 = vor.u32 %v5363_v20, %v4601_v57 }
 0x1f5   : > { %3866 = vmatmul.bf16.gmra.mxu1 %v4524_v34 }
 0x1f6   : > { %3955 = vmatmul.bf16.gmra.mxu2 %v4528_v9 }
 0x1f8   : > { %4044 = vmatmul.bf16.gmra.mxu3 %v4532_v27 }
 0x1f9   : > { %v3815_v19 = vpop.f32.mrf.mxu0  ;;  %v3640_v14 = vpop.f32.mrf.mxu2 }
 0x1fa   : > { %v3641_v49 = vadd.f32 %v3640_v14, %v3552_v5  ;;  %v3553_v44 = vpop.f32.mrf.mxu1  ;;  %v6758_v10 = vadd.f32 %v3815_v19, %v3727_v41  ;;  %v4571_v19 = vld [vmem:[#allocation3 + $0xb0] sm:$0xf]  ;;  %v5359_v14 = vld [vmem:[#allocation3 + $0xd0] sm:$0xf0] }
 0x1fb   : > { %v3729_v12 = vpop.f32.mrf.mxu3  ;;  %v3554_v7 = vadd.f32 %v3553_v44, %v6429_v0  ;;  %v4593_v44 = vld [vmem:[#allocation3 + $0x10c] sm:$0xf0]  ;;  %v4572_v43 = vor.u32 %v5359_v14, %v4571_v19 }
 0x1fc   : > { %v3730_v59 = vadd.f32 %v3729_v12, %v3641_v49  ;;  %v5362_v49 = vld [vmem:[#allocation3 + $0xec] sm:$0xf]  ;;  %v4599_v12 = vld [vmem:[#allocation3 + $0xf0] sm:$0xf] }
 0x1fd   : > { %v4596_v35 = vor.u32 %v5362_v49, %v4593_v44 }
 0x201   : > { %v3818_v1 = vpop.f32.mrf.mxu0  ;;  %v3642_v13 = vpop.f32.mrf.mxu2 }
 0x202   : > { %v3643_v53 = vadd.f32 %v3642_v13, %v3554_v7  ;;  %v3556_v23 = vpop.f32.mrf.mxu1  ;;  %v6761_v26 = vadd.f32 %v3818_v1, %v3730_v59  ;;  %v5367_v59 = vld [vmem:[#allocation3 + $0x110] sm:$0xf0] }
 0x203   : > { %v3731_v34 = vpop.f32.mrf.mxu3  ;;  %v3557_v40 = vadd.f32 %v3556_v23, %v6446_v8  ;;  %v4600_v1 = vor.u32 %v5367_v59, %v4599_v12  ;;  %v5372_v12 = vld [vmem:[#allocation3 + $0x13c] sm:$0xf]  ;;  %v4637_v59 = vld [vmem:[#allocation3 + $0x15c] sm:$0xf0] }
 0x204   : > { %4133 = vmatmul.bf16.gmra.mxu0 %v4536_v16  ;;  %v3732_v58 = vadd.f32 %v3731_v34, %v3643_v53  ;;  %v4640_v57 = vor.u32 %v5372_v12, %v4637_v59 }
 0x205   : > { %3871 = vmatmul.bf16.gmra.mxu1 %v4560_v47 }
 0x206   : > { %3960 = vmatmul.bf16.gmra.mxu2 %v4564_v31 }
 0x208   : > { %4049 = vmatmul.bf16.gmra.mxu3 %v4568_v37 }
 0x209   : > { %v3820_v0 = vpop.f32.mrf.mxu0  ;;  %v3645_v38 = vpop.f32.mrf.mxu2 }
 0x20a   : > { %v3646_v9 = vadd.f32 %v3645_v38, %v3557_v40  ;;  %v3558_v24 = vpop.f32.mrf.mxu1  ;;  %v6764_v41 = vadd.f32 %v3820_v0, %v3732_v58  ;;  %v4607_v0 = vld [vmem:[#allocation3 + $0xf8] sm:$0xf]  ;;  %v5368_v38 = vld [vmem:[#allocation3 + $0x118] sm:$0xf0] }
 0x20b   : > { %v3734_v27 = vpop.f32.mrf.mxu3  ;;  %v3559_v25 = vadd.f32 %v3558_v24, %v6469_v32  ;;  %v4629_v24 = vld [vmem:[#allocation3 + $0x154] sm:$0xf0]  ;;  %v4608_v19 = vor.u32 %v5368_v38, %v4607_v0 }
 0x20c   : > { %v3735_v5 = vadd.f32 %v3734_v27, %v3646_v9  ;;  %v5371_v9 = vld [vmem:[#allocation3 + $0x134] sm:$0xf]  ;;  %v4635_v27 = vld [vmem:[#allocation3 + $0x138] sm:$0xf] }
 0x20d   : > { %v4632_v44 = vor.u32 %v5371_v9, %v4629_v24 }
 0x211   : > { %v3823_v21 = vpop.f32.mrf.mxu0  ;;  %v3647_v8 = vpop.f32.mrf.mxu2 }
 0x212   : > { %v3648_v16 = vadd.f32 %v3647_v8, %v3559_v25  ;;  %v3561_v7 = vpop.f32.mrf.mxu1  ;;  %v6767_v13 = vadd.f32 %v3823_v21, %v3735_v5  ;;  %v5376_v5 = vld [vmem:[#allocation3 + $0x158] sm:$0xf0] }
 0x213   : > { %v3736_v47 = vpop.f32.mrf.mxu3  ;;  %v3562_v53 = vadd.f32 %v3561_v7, %v6498_v63  ;;  %v4636_v21 = vor.u32 %v5376_v5, %v4635_v27  ;;  %v5381_v27 = vld [vmem:[#allocation3 + $0x184] sm:$0xf]  ;;  %v4673_v5 = vld [vmem:[#allocation3 + $0x1a4] sm:$0xf0] }
 0x214   : > { %4138 = vmatmul.bf16.gmra.mxu0 %v4572_v43  ;;  %v3737_v28 = vadd.f32 %v3736_v47, %v3648_v16  ;;  %v4676_v59 = vor.u32 %v5381_v27, %v4673_v5 }
 0x215   : > { %3876 = vmatmul.bf16.gmra.mxu1 %v4596_v35 }
 0x216   : > { %3965 = vmatmul.bf16.gmra.mxu2 %v4600_v1 }
 0x218   : > { %4054 = vmatmul.bf16.gmra.mxu3 %v4604_v54 }
 0x219   : > { %v3825_v32 = vpop.f32.mrf.mxu0  ;;  %v3650_v23 = vpop.f32.mrf.mxu2 }
 0x21a   : > { %v3651_v31 = vadd.f32 %v3650_v23, %v3562_v53  ;;  %v3563_v34 = vpop.f32.mrf.mxu1  ;;  %v6770_v58 = vadd.f32 %v3825_v32, %v3737_v28  ;;  %v4643_v32 = vld [vmem:[#allocation3 + $0x140] sm:$0xf]  ;;  %v5377_v23 = vld [vmem:[#allocation3 + $0x160] sm:$0xf0] }
 0x21b   : > { %v3739_v37 = vpop.f32.mrf.mxu3  ;;  %v3564_v14 = vadd.f32 %v3563_v34, %v6518_v61  ;;  %v4665_v34 = vld [vmem:[#allocation3 + $0x19c] sm:$0xf0]  ;;  %v4644_v0 = vor.u32 %v5377_v23, %v4643_v32 }
 0x21c   : > { %v3740_v40 = vadd.f32 %v3739_v37, %v3651_v31  ;;  %v5380_v31 = vld [vmem:[#allocation3 + $0x17c] sm:$0xf]  ;;  %v4671_v37 = vld [vmem:[#allocation3 + $0x180] sm:$0xf] }
 0x21d   : > { %v4668_v24 = vor.u32 %v5380_v31, %v4665_v34  ;;  %v6935_v23 = vld [vmem:[#allocation12_spill] sm:$0xff] }
 0x221   : > { %v3828_v49 = vpop.f32.mrf.mxu0  ;;  %v3652_v63 = vpop.f32.mrf.mxu2 }
 0x222   : > { %v3653_v43 = vadd.f32 %v3652_v63, %v3564_v14  ;;  %v3566_v25 = vpop.f32.mrf.mxu1  ;;  %v6773_v8 = vadd.f32 %v3828_v49, %v3740_v40  ;;  %v5385_v40 = vld [vmem:[#allocation3 + $0x1a0] sm:$0xf0] }
 0x223   : > { %v3741_v35 = vpop.f32.mrf.mxu3  ;;  %v3567_v16 = vadd.f32 %v3566_v25, %v6368_v6  ;;  %v4672_v49 = vor.u32 %v5385_v40, %v4671_v37  ;;  %v5390_v40 = vld [vmem:[#allocation3 + $0x1cc] sm:$0xf] }
 0x224   : > { %4143 = vmatmul.bf16.gmra.mxu0 %v4608_v19  ;;  %v3742_v20 = vadd.f32 %v3741_v35, %v3653_v43 }
 0x225   : > { %3881 = vmatmul.bf16.gmra.mxu1 %v4632_v44 }
 0x226   : > { %3970 = vmatmul.bf16.gmra.mxu2 %v4636_v21 }
 0x228   : > { %4059 = vmatmul.bf16.gmra.mxu3 %v4640_v57 }
 0x229   : > { %v3830_v61 = vpop.f32.mrf.mxu0  ;;  %v3655_v7 = vpop.f32.mrf.mxu2 }
 0x22a   : > { %v3656_v1 = vadd.f32 %v3655_v7, %v3567_v16  ;;  %v3568_v47 = vpop.f32.mrf.mxu1  ;;  %v6776_v28 = vadd.f32 %v3830_v61, %v3742_v20  ;;  %v4679_v61 = vld [vmem:[#allocation3 + $0x188] sm:$0xf]  ;;  %v5386_v7 = vld [vmem:[#allocation3 + $0x1a8] sm:$0xf0] }
 0x22b   : > { %v3744_v54 = vpop.f32.mrf.mxu3  ;;  %v3569_v38 = vadd.f32 %v3568_v47, %v6393_v52  ;;  %v4701_v47 = vld [vmem:[#allocation3 + $0x1e4] sm:$0xf0]  ;;  %v4680_v32 = vor.u32 %v5386_v7, %v4679_v61  ;;  %v4737_v61 = vld [vmem:[#allocation3 + $0x22c] sm:$0xf0] }
 0x22c   : > { %v3745_v53 = vadd.f32 %v3744_v54, %v3656_v1  ;;  %v5389_v1 = vld [vmem:[#allocation3 + $0x1c4] sm:$0xf]  ;;  %v4707_v54 = vld [vmem:[#allocation3 + $0x1c8] sm:$0xf]  ;;  %v4743_v7 = vld [vmem:[#allocation3 + $0x210] sm:$0xf] }
 0x22d   : > { %v4704_v37 = vor.u32 %v5389_v1, %v4701_v47  ;;  %v5403_v1 = vld [vmem:[#allocation3 + $0x230] sm:$0xf0] }
 0x231   : > { %v3833_v9 = vpop.f32.mrf.mxu0  ;;  %v3657_v6 = vpop.f32.mrf.mxu2 }
 0x232   : > { %v3658_v19 = vadd.f32 %v3657_v6, %v3569_v38  ;;  %v3571_v14 = vpop.f32.mrf.mxu1  ;;  %v6779_v63 = vadd.f32 %v3833_v9, %v3745_v53  ;;  %v5394_v53 = vld [vmem:[#allocation3 + $0x1e8] sm:$0xf0] }
 0x233   : > { %v3746_v44 = vpop.f32.mrf.mxu3  ;;  %v3572_v43 = vadd.f32 %v3571_v14, %v6413_v4  ;;  %v4708_v6 = vor.u32 %v5394_v53, %v4707_v54  ;;  %v6936_v14 = vld [vmem:[#allocation13_spill] sm:$0xff]  ;;  %v6937_v54 = vld [vmem:[#allocation14_spill] sm:$0xff] }
 0x234   : > { %4148 = vmatmul.bf16.gmra.mxu0 %v4644_v0  ;;  %v3747_v12 = vadd.f32 %v3746_v44, %v3658_v19  ;;  %v4709_v0 = vld [vmem:[#allocation3 + $0x1ec] sm:$0xf0] }
 0x235   : > { %3886 = vmatmul.bf16.gmra.mxu1 %v4668_v24  ;;  %v4712_v19 = vor.u32 %v5390_v40, %v4709_v0  ;;  %v4744_v0 = vor.u32 %v5403_v1, %v4743_v7  ;;  %v5412_v7 = vld [vmem:[#allocation3 + $0x278] sm:$0xf0] }
 0x236   : > { %3975 = vmatmul.bf16.gmra.mxu2 %v4672_v49 }
 0x238   : > { %4064 = vmatmul.bf16.gmra.mxu3 %v4676_v59 }
 0x239   : > { %v3835_v52 = vpop.f32.mrf.mxu0  ;;  %v3660_v25 = vpop.f32.mrf.mxu2 }
 0x23a   : > { %v3661_v21 = vadd.f32 %v3660_v25, %v3572_v43  ;;  %v3573_v35 = vpop.f32.mrf.mxu1  ;;  %v6782_v20 = vadd.f32 %v3835_v52, %v3747_v12 }
 0x23b   : > { %v3749_v57 = vpop.f32.mrf.mxu3  ;;  %v3574_v31 = vadd.f32 %v3573_v35, %v6935_v23  ;;  %v4715_v35 = vld [vmem:[#allocation3 + $0x1d0] sm:$0xf] }
 0x23c   : > { %v3750_v16 = vadd.f32 %v3749_v57, %v3661_v21  ;;  %v5395_v57 = vld [vmem:[#allocation3 + $0x1f0] sm:$0xf0] }
 0x23d   : > { %v4716_v47 = vor.u32 %v5395_v57, %v4715_v35  ;;  %v4751_v35 = vld [vmem:[#allocation3 + $0x218] sm:$0xf]  ;;  %v5407_v57 = vld [vmem:[#allocation3 + $0x254] sm:$0xf] }
 0x241   : > { %v3838_v34 = vpop.f32.mrf.mxu0  ;;  %v3662_v4 = vpop.f32.mrf.mxu2 }
 0x242   : > { %v3663_v38 = vadd.f32 %v3662_v4, %v3574_v31  ;;  %v3576_v9 = vpop.f32.mrf.mxu1  ;;  %v6785_v24 = vadd.f32 %v3838_v34, %v3750_v16  ;;  %v5398_v16 = vld [vmem:[#allocation3 + $0x20c] sm:$0xf]  ;;  %v5399_v34 = vld [vmem:[#allocation3 + $0x214] sm:$0xf]  ;;  %v4745_v4 = vld [vmem:[#allocation3 + $0x234] sm:$0xf0] }
 0x243   : > { %v3751_v27 = vpop.f32.mrf.mxu3  ;;  %v3577_v49 = vadd.f32 %v3576_v9, %v6936_v14  ;;  %v4740_v31 = vor.u32 %v5398_v16, %v4737_v61  ;;  %v4773_v16 = vld [vmem:[#allocation3 + $0x274] sm:$0xf0] }
 0x244   : > { %4153 = vmatmul.bf16.gmra.mxu0 %v4680_v32  ;;  %v3752_v5 = vadd.f32 %v3751_v27, %v3663_v38  ;;  %v4748_v27 = vor.u32 %v5399_v34, %v4745_v4  ;;  %v4779_v61 = vld [vmem:[#allocation3 + $0x258] sm:$0xf]  ;;  %v4781_v34 = vld [vmem:[#allocation3 + $0x27c] sm:$0xf0] }
 0x245   : > { %3891 = vmatmul.bf16.gmra.mxu1 %v4704_v37 }
 0x246   : > { %3980 = vmatmul.bf16.gmra.mxu2 %v4708_v6 }
 0x248   : > { %4069 = vmatmul.bf16.gmra.mxu3 %v4712_v19 }
 0x249   : > { %v3840_v44 = vpop.f32.mrf.mxu0  ;;  %v3665_v12 = vpop.f32.mrf.mxu2 }
 0x24a   : > { %v3666_v59 = vadd.f32 %v3665_v12, %v3577_v49  ;;  %v3578_v43 = vpop.f32.mrf.mxu1  ;;  %v6788_v52 = vadd.f32 %v3840_v44, %v3752_v5  ;;  %v6938_v5 = vld [vmem:[#allocation15_spill] sm:$0xff] }
 0x24b   : > { %v3754_v25 = vpop.f32.mrf.mxu3  ;;  %v3579_v53 = vadd.f32 %v3578_v43, %v6937_v54 }
 0x24c   : > { %v3755_v21 = vadd.f32 %v3754_v25, %v3666_v59 }
 0x251   : > { %v3843_v32 = vpop.f32.mrf.mxu0  ;;  %v3667_v23 = vpop.f32.mrf.mxu2 }
 0x252   : > { %v3668_v37 = vadd.f32 %v3667_v23, %v3579_v53  ;;  %v3581_v40 = vpop.f32.mrf.mxu1  ;;  %v6791_v38 = vadd.f32 %v3843_v32, %v3755_v21  ;;  %v5404_v21 = vld [vmem:[#allocation3 + $0x238] sm:$0xf0]  ;;  %v4776_v23 = vor.u32 %v5407_v57, %v4773_v16  ;;  %v4809_v16 = vld [vmem:[#allocation3 + $0x2bc] sm:$0xf0] }
 0x253   : > { %v3756_v9 = vpop.f32.mrf.mxu3  ;;  %v3582_v19 = vadd.f32 %v3581_v40, %v6938_v5  ;;  %v4752_v1 = vor.u32 %v5404_v21, %v4751_v35  ;;  %v4780_v40 = vor.u32 %v5412_v7, %v4779_v61  ;;  %v4787_v35 = vld [vmem:[#allocation3 + $0x260] sm:$0xf]  ;;  %v5413_v21 = vld [vmem:[#allocation3 + $0x280] sm:$0xf0]  ;;  %v5416_v57 = vld [vmem:[#allocation3 + $0x29c] sm:$0xf] }
 0x254   : > { %4158 = vmatmul.bf16.gmra.mxu0 %v4716_v47  ;;  %v3757_v6 = vadd.f32 %v3756_v9, %v3668_v37  ;;  %v6939_v47 = vld [vmem:[#allocation16_spill] sm:$0xff] }
 0x255   : > { %3896 = vmatmul.bf16.gmra.mxu1 %v4740_v31  ;;  %v5408_v31 = vld [vmem:[#allocation3 + $0x25c] sm:$0xf]  ;;  %v4815_v61 = vld [vmem:[#allocation3 + $0x2a0] sm:$0xf]  ;;  %v5421_v7 = vld [vmem:[#allocation3 + $0x2c0] sm:$0xf0] }
 0x256   : > { %3985 = vmatmul.bf16.gmra.mxu2 %v4744_v0 }
 0x258   : > { %4074 = vmatmul.bf16.gmra.mxu3 %v4748_v27  ;;  %v4784_v27 = vor.u32 %v5408_v31, %v4781_v34 }
 0x259   : > { %v3845_v14 = vpop.f32.mrf.mxu0  ;;  %v3670_v49 = vpop.f32.mrf.mxu2 }
 0x25a   : > { %v3671_v44 = vadd.f32 %v3670_v49, %v3582_v19  ;;  %v3583_v12 = vpop.f32.mrf.mxu1  ;;  %v6794_v59 = vadd.f32 %v3845_v14, %v3757_v6 }
 0x25b   : > { %v3759_v43 = vpop.f32.mrf.mxu3  ;;  %v3584_v54 = vadd.f32 %v3583_v12, %v6939_v47 }
 0x25c   : > { %v3760_v25 = vadd.f32 %v3759_v43, %v3671_v44 }
 0x261   : > { %v3848_v53 = vpop.f32.mrf.mxu0  ;;  %v3672_v32 = vpop.f32.mrf.mxu2 }
 0x262   : > { %v3673_v4 = vadd.f32 %v3672_v32, %v3584_v54  ;;  %v3862_v37 = vpop.f32.mrf.mxu1  ;;  %v6797_v0 = vadd.f32 %v3848_v53, %v3760_v25  ;;  %v4812_v53 = vor.u32 %v5416_v57, %v4809_v16  ;;  %v5417_v32 = vld [vmem:[#allocation3 + $0x2a4] sm:$0xf]  ;;  %v5422_v57 = vld [vmem:[#allocation3 + $0x2c8] sm:$0xf0] }
 0x263   : > { %v3761_v9 = vpop.f32.mrf.mxu3  ;;  %v3863_v5 = vadd.f32 %v3862_v37, %v6556_v42  ;;  %v4816_v37 = vor.u32 %v5421_v7, %v4815_v61  ;;  %v5425_v7 = vld [vmem:[#allocation3 + $0x2e4] sm:$0xf] }
 0x264   : > { %4163 = vmatmul.bf16.gmra.mxu0 %v4752_v1  ;;  %v3762_v6 = vadd.f32 %v3761_v9, %v3673_v4  ;;  %v4788_v1 = vor.u32 %v5413_v21, %v4787_v35 }
 0x265   : > { %3901 = vmatmul.bf16.gmra.mxu1 %v4776_v23  ;;  %v4817_v23 = vld [vmem:[#allocation3 + $0x2c4] sm:$0xf0] }
 0x266   : > { %3990 = vmatmul.bf16.gmra.mxu2 %v4780_v40  ;;  %v4820_v9 = vor.u32 %v5417_v32, %v4817_v23 }
 0x268   : > { %4079 = vmatmul.bf16.gmra.mxu3 %v4784_v27 }
 0x269   : > { %v3850_v19 = vpop.f32.mrf.mxu0  ;;  %v3951_v14 = vpop.f32.mrf.mxu2 }
 0x26a   : > { %v3952_v49 = vadd.f32 %v3951_v14, %v3863_v5  ;;  %v3864_v44 = vpop.f32.mrf.mxu1  ;;  %v6800_v12 = vadd.f32 %v3850_v19, %v3762_v6 }
 0x26b   : > { %v4040_v43 = vpop.f32.mrf.mxu3  ;;  %v3865_v47 = vadd.f32 %v3864_v44, %v6576_v18 }
 0x26c   : > { %v4041_v25 = vadd.f32 %v4040_v43, %v3952_v49 }
 0x271   : > { %v4129_v42 = vpop.f32.mrf.mxu0  ;;  %v3953_v54 = vpop.f32.mrf.mxu2 }
 0x272   : > { %v4130_v31 = vadd.f32 %v4129_v42, %v4041_v25  ;;  %v3954_v34 = vadd.f32 %v3953_v54, %v3865_v47  ;;  %v3867_v4 = vpop.f32.mrf.mxu1  ;;  %v4823_v25 = vld [vmem:[#allocation3 + $0x2a8] sm:$0xf] }
 0x273   : > { %v4042_v40 = vpop.f32.mrf.mxu3  ;;  %v3868_v27 = vadd.f32 %v3867_v4, %v6593_v2  ;;  %v4851_v47 = vld [vmem:[#allocation3 + $0x2e8] sm:$0xf]  ;;  %v5430_v2 = vld [vmem:[#allocation3 + $0x308] sm:$0xf0]  ;;  %v4824_v42 = vor.u32 %v5422_v57, %v4823_v25  ;;  %v4853_v4 = vld [vmem:[#allocation3 + $0x30c] sm:$0xf0] }
 0x274   : > { %4168 = vmatmul.bf16.gmra.mxu0 %v4788_v1  ;;  %4209 = vst [vmem:[%s5641_s28] sm:$0xff] %v4130_v31  ;;  %v4043_v6 = vadd.f32 %v4042_v40, %v3954_v34  ;;  %v4278_v43 = vmul.f32 %v4130_v31, %v4130_v31  ;;  %v4845_v1 = vld [vmem:[#allocation3 + $0x304] sm:$0xf0]  ;;  %v5426_v34 = vld [vmem:[#allocation3 + $0x2ec] sm:$0xf] }
 0x275   : > { %3906 = vmatmul.bf16.gmra.mxu1 %v4812_v53  ;;  %v4848_v23 = vor.u32 %v5425_v7, %v4845_v1  ;;  %v4859_v1 = vld [vmem:[#allocation3 + $0x2f0] sm:$0xf] }
 0x276   : > { %3995 = vmatmul.bf16.gmra.mxu2 %v4816_v37 }
 0x278   : > { %4084 = vmatmul.bf16.gmra.mxu3 %v4820_v9  ;;  %v4852_v9 = vor.u32 %v5430_v2, %v4851_v47 }
 0x279   : > { %v4131_v18 = vpop.f32.mrf.mxu0  ;;  %v3956_v5 = vpop.f32.mrf.mxu2 }
 0x27a   : > { %v4132_v19 = vadd.f32 %v4131_v18, %v4043_v6  ;;  %v3957_v14 = vadd.f32 %v3956_v5, %v3868_v27  ;;  %v3869_v49 = vpop.f32.mrf.mxu1  ;;  %v4856_v5 = vor.u32 %v5426_v34, %v4853_v4 }
 0x27b   : > { %v4045_v44 = vpop.f32.mrf.mxu3  ;;  %v3870_v54 = vadd.f32 %v3869_v49, %v6601_v33 }
 0x27c   : > { %4210 = vst [vmem:[%s5641_s28 + $0x8] sm:$0xff] %v4132_v19  ;;  %v4241_v35 = vadd.f32 %v4132_v19, %v4130_v31  ;;  %v4279_v21 = vmul.f32 %v4132_v19, %v4132_v19  ;;  %v4046_v61 = vadd.f32 %v4045_v44, %v3957_v14 }
 0x27e   : > { %v4310_v16 = vadd.f32 %v4279_v21, %v4278_v43 }
 0x281   : > { %v4134_v53 = vpop.f32.mrf.mxu0  ;;  %v3958_v32 = vpop.f32.mrf.mxu2 }
 0x282   : > { %v4135_v37 = vadd.f32 %v4134_v53, %v4046_v61  ;;  %v3959_v31 = vadd.f32 %v3958_v32, %v3870_v54  ;;  %v3872_v40 = vpop.f32.mrf.mxu1  ;;  %v4887_v54 = vld [vmem:[#allocation3 + $0x330] sm:$0xf]  ;;  %v5439_v53 = vld [vmem:[#allocation3 + $0x350] sm:$0xf0] }
 0x283   : > { %v4047_v6 = vpop.f32.mrf.mxu3  ;;  %v3873_v33 = vadd.f32 %v3872_v40, %v6619_v22 }
 0x284   : > { %4173 = vmatmul.bf16.gmra.mxu0 %v4824_v42  ;;  %4211 = vst [vmem:[%s5641_s28 + $0x10] sm:$0xff] %v4135_v37  ;;  %v4242_v27 = vadd.f32 %v4241_v35, %v4135_v37  ;;  %v4280_v18 = vmul.f32 %v4135_v37, %v4135_v37  ;;  %v4048_v14 = vadd.f32 %v4047_v6, %v3959_v31  ;;  %v5431_v35 = vld [vmem:[#allocation3 + $0x310] sm:$0xf0]  ;;  %v5434_v42 = vld [vmem:[#allocation3 + $0x32c] sm:$0xf] }
 0x285   : > { %3911 = vmatmul.bf16.gmra.mxu1 %v4848_v23  ;;  %v4860_v22 = vor.u32 %v5431_v35, %v4859_v1  ;;  %v5435_v37 = vld [vmem:[#allocation3 + $0x334] sm:$0xf]  ;;  %v4889_v31 = vld [vmem:[#allocation3 + $0x354] sm:$0xf0] }
 0x286   : > { %v4311_v19 = vadd.f32 %v4310_v16, %v4280_v18  ;;  %4000 = vmatmul.bf16.gmra.mxu2 %v4852_v9  ;;  %v4881_v16 = vld [vmem:[#allocation3 + $0x34c] sm:$0xf0] }
 0x287   : > { %v4884_v4 = vor.u32 %v5434_v42, %v4881_v16 }
 0x288   : > { %4089 = vmatmul.bf16.gmra.mxu3 %v4856_v5 }
 0x289   : > { %v4136_v49 = vpop.f32.mrf.mxu0  ;;  %v3961_v44 = vpop.f32.mrf.mxu2 }
 0x28a   : > { %v4137_v43 = vadd.f32 %v4136_v49, %v4048_v14  ;;  %v3962_v21 = vadd.f32 %v3961_v44, %v3873_v33  ;;  %v3874_v25 = vpop.f32.mrf.mxu1  ;;  %v4892_v14 = vor.u32 %v5435_v37, %v4889_v31  ;;  %v5444_v37 = vld [vmem:[#allocation3 + $0x37c] sm:$0xf]  ;;  %v4925_v31 = vld [vmem:[#allocation3 + $0x39c] sm:$0xf0] }
 0x28b   : > { %v4050_v57 = vpop.f32.mrf.mxu3  ;;  %v3875_v32 = vadd.f32 %v3874_v25, %v6646_v55 }
 0x28c   : > { %4212 = vst [vmem:[%s5641_s28 + $0x18] sm:$0xff] %v4137_v43  ;;  %v4243_v61 = vadd.f32 %v4242_v27, %v4137_v43  ;;  %v4281_v7 = vmul.f32 %v4137_v43, %v4137_v43  ;;  %v4051_v2 = vadd.f32 %v4050_v57, %v3962_v21  ;;  %v4888_v27 = vor.u32 %v5439_v53, %v4887_v54  ;;  %v5443_v54 = vld [vmem:[#allocation3 + $0x374] sm:$0xf]  ;;  %v4923_v53 = vld [vmem:[#allocation3 + $0x378] sm:$0xf] }
 0x28e   : > { %v4312_v47 = vadd.f32 %v4311_v19, %v4281_v7 }
 0x291   : > { %v4139_v23 = vpop.f32.mrf.mxu0  ;;  %v3963_v34 = vpop.f32.mrf.mxu2 }
 0x292   : > { %v4140_v40 = vadd.f32 %v4139_v23, %v4051_v2  ;;  %v3964_v9 = vadd.f32 %v3963_v34, %v3875_v32  ;;  %v3877_v6 = vpop.f32.mrf.mxu1  ;;  %v4895_v2 = vld [vmem:[#allocation3 + $0x338] sm:$0xf] }
 0x293   : > { %v4052_v18 = vpop.f32.mrf.mxu3  ;;  %v3878_v55 = vadd.f32 %v3877_v6, %v6664_v30 }
 0x294   : > { %4178 = vmatmul.bf16.gmra.mxu0 %v4860_v22  ;;  %4213 = vst [vmem:[%s5641_s28 + $0x20] sm:$0xff] %v4140_v40  ;;  %v4244_v5 = vadd.f32 %v4243_v61, %v4140_v40  ;;  %v4282_v19 = vmul.f32 %v4140_v40, %v4140_v40  ;;  %v4053_v49 = vadd.f32 %v4052_v18, %v3964_v9  ;;  %v5440_v61 = vld [vmem:[#allocation3 + $0x358] sm:$0xf0] }
 0x295   : > { %3916 = vmatmul.bf16.gmra.mxu1 %v4884_v4  ;;  %v5448_v22 = vld [vmem:[#allocation3 + $0x398] sm:$0xf0]  ;;  %v4896_v30 = vor.u32 %v5440_v61, %v4895_v2 }
 0x296   : > { %v4313_v33 = vadd.f32 %v4312_v47, %v4282_v19  ;;  %4005 = vmatmul.bf16.gmra.mxu2 %v4888_v27  ;;  %v4917_v47 = vld [vmem:[#allocation3 + $0x394] sm:$0xf0]  ;;  %v4924_v27 = vor.u32 %v5448_v22, %v4923_v53  ;;  %v4953_v53 = vld [vmem:[#allocation3 + $0x3dc] sm:$0xf0]  ;;  %v955_v22 = vld [vmem:[#allocation2 + $0xcc] sm:$0xf] }
 0x297   : > { %v4920_v4 = vor.u32 %v5443_v54, %v4917_v47  ;;  %1832 = vst [vmem:[#allocation3 + $0x450] sm:$0xf] %v955_v22 }
 0x298   : > { %4094 = vmatmul.bf16.gmra.mxu3 %v4892_v14  ;;  %v4928_v14 = vor.u32 %v5444_v37, %v4925_v31  ;;  %v4961_v37 = vld [vmem:[#allocation3 + $0x3e4] sm:$0xf0] }
 0x299   : > { %v4141_v44 = vpop.f32.mrf.mxu0  ;;  %v3966_v43 = vpop.f32.mrf.mxu2 }
 0x29a   : > { %v4142_v21 = vadd.f32 %v4141_v44, %v4053_v49  ;;  %v3967_v25 = vadd.f32 %v3966_v43, %v3878_v55  ;;  %v3879_v57 = vpop.f32.mrf.mxu1  ;;  %v4463_v55 = vrot.slane %v6715_v60, 9  ;;  %v1766_v43 = vrot.slane %v6735_v50, 5 }
 0x29b   : > { %v4055_v7 = vpop.f32.mrf.mxu3  ;;  %v3880_v32 = vadd.f32 %v3879_v57, %v6680_v36 }
 0x29c   : > { %4214 = vst [vmem:[%s5641_s28 + $0x28] sm:$0xff] %v4142_v21  ;;  %v4245_v1 = vadd.f32 %v4244_v5, %v4142_v21  ;;  %v4283_v35 = vmul.f32 %v4142_v21, %v4142_v21  ;;  %v4056_v16 = vadd.f32 %v4055_v7, %v3967_v25 }
 0x29e   : > { %v4314_v42 = vadd.f32 %v4313_v33, %v4283_v35  ;;  %v1763_v33 = vrot.slane %v6717_v51, 5 }
 0x2a0   : > { %v1765_v44 = vrot.slane %v1763_v33, 4  ;;  %v1764_v7 = vsel %vm6223_vm12, %v4463_v55, %v1763_v33 }
 0x2a1   : > { %v4144_v23 = vpop.f32.mrf.mxu0  ;;  %v3968_v34 = vpop.f32.mrf.mxu2  ;;  %1932 = vst [vmem:[#allocation3 + $0x410] sm:$0xf] %v1764_v7 }
 0x2a2   : > { %v4145_v40 = vadd.f32 %v4144_v23, %v4056_v16  ;;  %v3969_v9 = vadd.f32 %v3968_v34, %v3880_v32  ;;  %v3882_v6 = vpop.f32.mrf.mxu1  ;;  %v1767_v51 = vsel %vm6223_vm12, %v1765_v44, %v1766_v43  ;;  %v5452_v16 = vld [vmem:[#allocation3 + $0x3bc] sm:$0xf]  ;;  %1800 = vst [vmem:[#allocation3 + $0x44c] sm:$0xf] %v1764_v7  ;;  %v5457_v32 = vld [vmem:[#allocation3 + $0x3e0] sm:$0xf0] }
 0x2a3   : > { %v4057_v18 = vpop.f32.mrf.mxu3  ;;  %v3883_v21 = vadd.f32 %v3882_v6, %v6689_v39  ;;  %1933 = vst [vmem:[#allocation3 + $0x434] sm:$0xf] %v1767_v51  ;;  %v5449_v39 = vld [vmem:[#allocation3 + $0x3a0] sm:$0xf0]  ;;  %v956_v6 = vld [vmem:[#allocation2 + $0xd0] sm:$0xf] }
 0x2a4   : > { %4183 = vmatmul.bf16.gmra.mxu0 %v4896_v30  ;;  %4215 = vst [vmem:[%s5641_s28 + $0x30] sm:$0xff] %v4145_v40  ;;  %v4246_v5 = vadd.f32 %v4245_v1, %v4145_v40  ;;  %v4284_v19 = vmul.f32 %v4145_v40, %v4145_v40  ;;  %v4058_v36 = vadd.f32 %v4057_v18, %v3969_v9  ;;  %v4959_v30 = vld [vmem:[#allocation3 + $0x3c0] sm:$0xf]  ;;  %v1838_v18 = vshll.u32 %v955_v22, 16 }
 0x2a5   : > { %3921 = vmatmul.bf16.gmra.mxu1 %v4920_v4  ;;  %1801 = vst [vmem:[#allocation3 + $0x470] sm:$0xf] %v1767_v51  ;;  %v5453_v4 = vld [vmem:[#allocation3 + $0x3c4] sm:$0xf]  ;;  %v4956_v9 = vor.u32 %v5452_v16, %v4953_v53  ;;  %v4960_v33 = vor.u32 %v5457_v32, %v4959_v30  ;;  %v1848_v7 = vshrl.u32 %v956_v6, 16 }
 0x2a6   : > { %v4315_v49 = vadd.f32 %v4314_v42, %v4284_v19  ;;  %4010 = vmatmul.bf16.gmra.mxu2 %v4924_v27  ;;  %v4931_v42 = vld [vmem:[#allocation3 + $0x380] sm:$0xf]  ;;  %v1835_v27 = vshrl.u32 %v955_v22, 16  ;;  %1833 = vst [vmem:[#allocation3 + $0x474] sm:$0xf] %v956_v6  ;;  %v1840_v44 = vrot.slane %v1838_v18, 5 }
 0x2a7   : > { %v4932_v23 = vor.u32 %v5449_v39, %v4931_v42  ;;  %v1850_v42 = vrot.slane %v1848_v7, 4  ;;  %v4464_v39 = vrot.slane %v955_v22, 9  ;;  %v5458_v18 = vld [vmem:[#allocation3 + $0x3e8] sm:$0xf0] }
 0x2a8   : > { %4099 = vmatmul.bf16.gmra.mxu3 %v4928_v14  ;;  %v1837_v55 = vrot.slane %v1835_v27, 4  ;;  %v4967_v27 = vld [vmem:[#allocation3 + $0x3c8] sm:$0xf] }
 0x2a9   : > { %v4146_v25 = vpop.f32.mrf.mxu0  ;;  %v3971_v57 = vpop.f32.mrf.mxu2 }
 0x2aa   : > { %v4147_v1 = vadd.f32 %v4146_v25, %v4058_v36  ;;  %v3972_v35 = vadd.f32 %v3971_v57, %v3883_v21  ;;  %v3884_v2 = vpop.f32.mrf.mxu1  ;;  %v4964_v21 = vor.u32 %v5453_v4, %v4961_v37  ;;  %v1844_v25 = vshll.u32 %v956_v6, 16 }
 0x2ab   : > { %v4060_v61 = vpop.f32.mrf.mxu3  ;;  %v3885_v34 = vadd.f32 %v3884_v2, %v6712_v3  ;;  %v1841_v57 = vor.u32 %v1840_v44, %v1837_v55  ;;  %v4968_v55 = vor.u32 %v5458_v18, %v4967_v27 }
 0x2ac   : > { %4216 = vst [vmem:[%s5641_s28 + $0x38] sm:$0xff] %v4147_v1  ;;  %v4247_v60 = vadd.f32 %v4246_v5, %v4147_v1  ;;  %v4285_v50 = vmul.f32 %v4147_v1, %v4147_v1  ;;  %v4061_v47 = vadd.f32 %v4060_v61, %v3972_v35  ;;  %v1897_v1 = vrot.slane %v956_v6, 5 }
 0x2ad   : > { %v1846_v61 = vrot.slane %v1844_v25, 5  ;;  %v5462_v25 = vld [vmem:[#allocation3 + $0x40c] sm:$0xf] }
 0x2ae   : > { %v4316_v54 = vadd.f32 %v4315_v49, %v4285_v50  ;;  %v957_v49 = vld [vmem:[#allocation2 + $0xd4] sm:$0x1]  ;;  %v1842_v50 = vrot.slane %v1841_v57, 4  ;;  %v4997_v57 = vld [vmem:[#allocation3 + $0x42c] sm:$0xf0] }
 0x2af   : > { %v1854_v51 = vshll.u32 %v957_v49, 16 }
 0x2b0   : > { %v1847_v32 = vsel %vm6199_vm10, %v1842_v50, %v1846_v61  ;;  %v5000_v50 = vor.u32 %v5462_v25, %v4997_v57 }
 0x2b1   : > { %v4149_v31 = vpop.f32.mrf.mxu0  ;;  %v3973_v40 = vpop.f32.mrf.mxu2  ;;  %1890 = vst [vmem:[#allocation3 + $0x454] sm:$0xf] %v1847_v32 }
 0x2b2   : > { %v4150_v5 = vadd.f32 %v4149_v31, %v4061_v47  ;;  %v3974_v19 = vadd.f32 %v3973_v40, %v3885_v34  ;;  %v3887_v14 = vpop.f32.mrf.mxu1  ;;  %v1899_v47 = vrot.slane %v1897_v1, 4  ;;  %v1856_v34 = vrot.slane %v1854_v51, 5 }
 0x2b3   : > { %v4062_v36 = vpop.f32.mrf.mxu3  ;;  %v3888_v16 = vadd.f32 %v3887_v14, %v6730_v15 }
 0x2b4   : > { %4188 = vmatmul.bf16.gmra.mxu0 %v4932_v23  ;;  %4217 = vst [vmem:[%s5641_s28 + $0x40] sm:$0xff] %v4150_v5  ;;  %v4248_v3 = vadd.f32 %v4247_v60, %v4150_v5  ;;  %v4286_v43 = vmul.f32 %v4150_v5, %v4150_v5  ;;  %v4063_v2 = vadd.f32 %v4062_v36, %v3974_v19  ;;  %v1900_v60 = vrot.slane %v957_v49, 5  ;;  %v4989_v49 = vld [vmem:[#allocation3 + $0x424] sm:$0xf0]  ;;  %v5466_v36 = vld [vmem:[#allocation3 + $0x428] sm:$0xf0] }
 0x2b5   : > { %3926 = vmatmul.bf16.gmra.mxu1 %v4956_v9  ;;  %v1851_v23 = vor.u32 %v1850_v42, %v1846_v61 }
 0x2b6   : > { %v4317_v35 = vadd.f32 %v4316_v54, %v4286_v43  ;;  %4015 = vmatmul.bf16.gmra.mxu2 %v4960_v33  ;;  %v1898_v54 = vsel %vm6223_vm12, %v4464_v39, %v1897_v1  ;;  %v1901_v15 = vsel %vm6223_vm12, %v1899_v47, %v1900_v60  ;;  %v5461_v33 = vld [vmem:[#allocation3 + $0x404] sm:$0xf]  ;;  %v4996_v1 = vor.u32 %v5466_v36, %v4995_v46 }
 0x2b7   : > { %v1852_v40 = vrot.slane %v1851_v23, 4  ;;  %1934 = vst [vmem:[#allocation3 + $0x458] sm:$0xf] %v1898_v54  ;;  %v5003_v54 = vld [vmem:[#allocation3 + $0x410] sm:$0xf] }
 0x2b8   : > { %4104 = vmatmul.bf16.gmra.mxu3 %v4964_v21  ;;  %1935 = vst [vmem:[#allocation3 + $0x47c] sm:$0xf] %v1901_v15  ;;  %v4992_v21 = vor.u32 %v5461_v33, %v4989_v49  ;;  %v5470_v15 = vld [vmem:[#allocation3 + $0x44c] sm:$0xf] }
 0x2b9   : > { %v4151_v53 = vpop.f32.mrf.mxu0  ;;  %v3976_v30 = vpop.f32.mrf.mxu2  ;;  %v1857_v5 = vsel %vm6199_vm10, %v1852_v40, %v1856_v34  ;;  %v5031_v40 = vld [vmem:[#allocation3 + $0x450] sm:$0xf] }
 0x2ba   : > { %v4152_v4 = vadd.f32 %v4151_v53, %v4063_v2  ;;  %v3977_v37 = vadd.f32 %v3976_v30, %v3888_v16  ;;  %v3889_v31 = vpop.f32.mrf.mxu1  ;;  %1891 = vst [vmem:[#allocation3 + $0x478] sm:$0xf] %v1857_v5 }
 0x2bb   : > { %v4065_v22 = vpop.f32.mrf.mxu3  ;;  %v3890_v44 = vadd.f32 %v3889_v31, %v6737_v29 }
 0x2bc   : > { %4218 = vst [vmem:[%s5641_s28 + $0x48] sm:$0xff] %v4152_v4  ;;  %v4249_v9 = vadd.f32 %v4248_v3, %v4152_v4  ;;  %v4287_v6 = vmul.f32 %v4152_v4, %v4152_v4  ;;  %v4066_v14 = vadd.f32 %v4065_v22, %v3977_v37  ;;  %v5467_v4 = vld [vmem:[#allocation3 + $0x430] sm:$0xf0]  ;;  %v5025_v22 = vld [vmem:[#allocation3 + $0x46c] sm:$0xf0] }
 0x2bd   : > { %v5028_v5 = vor.u32 %v5470_v15, %v5025_v22 }
 0x2be   : > { %v4318_v19 = vadd.f32 %v4317_v35, %v4287_v6 }
 0x2c1   : > { %v4154_v43 = vpop.f32.mrf.mxu0  ;;  %v3978_v3 = vpop.f32.mrf.mxu2 }
 0x2c2   : > { %v4155_v7 = vadd.f32 %v4154_v43, %v4066_v14  ;;  %v3979_v48 = vadd.f32 %v3978_v3, %v3890_v44  ;;  %v3892_v51 = vpop.f32.mrf.mxu1  ;;  %v5033_v14 = vld [vmem:[#allocation3 + $0x474] sm:$0xf0] }
 0x2c3   : > { %v4067_v35 = vpop.f32.mrf.mxu3  ;;  %v3893_v29 = vadd.f32 %v3892_v51, %v6743_v45  ;;  %v5004_v45 = vor.u32 %v5467_v4, %v5003_v54 }
 0x2c4   : > { %4193 = vmatmul.bf16.gmra.mxu0 %v4968_v55  ;;  %4219 = vst [vmem:[%s5641_s28 + $0x50] sm:$0xff] %v4155_v7  ;;  %v4250_v2 = vadd.f32 %v4249_v9, %v4155_v7  ;;  %v4288_v61 = vmul.f32 %v4155_v7, %v4155_v7  ;;  %v4068_v39 = vadd.f32 %v4067_v35, %v3979_v48  ;;  %v5475_v9 = vld [vmem:[#allocation3 + $0x470] sm:$0xf0] }
 0x2c5   : > { %3931 = vmatmul.bf16.gmra.mxu1 %v4992_v21  ;;  %v5032_v36 = vor.u32 %v5475_v9, %v5031_v40 }
 0x2c6   : > { %v4319_v42 = vadd.f32 %v4318_v19, %v4288_v61  ;;  %4020 = vmatmul.bf16.gmra.mxu2 %v4996_v1  ;;  %v5471_v19 = vld [vmem:[#allocation3 + $0x454] sm:$0xf] }
 0x2c7   : > { %v5036_v3 = vor.u32 %v5471_v19, %v5033_v14 }
 0x2c8   : > { %4109 = vmatmul.bf16.gmra.mxu3 %v5000_v50  ;;  %v5039_v50 = vld [vmem:[#allocation3 + $0x458] sm:$0xf] }
 0x2c9   : > { %v4156_v16 = vpop.f32.mrf.mxu0  ;;  %v3981_v47 = vpop.f32.mrf.mxu2 }
 0x2ca   : > { %v4157_v60 = vadd.f32 %v4156_v16, %v4068_v39  ;;  %v3982_v53 = vadd.f32 %v3981_v47, %v3893_v29  ;;  %v3894_v30 = vpop.f32.mrf.mxu1 }
 0x2cb   : > { %v4070_v32 = vpop.f32.mrf.mxu3  ;;  %v3895_v6 = vadd.f32 %v3894_v30, %v6746_v11 }
 0x2cc   : > { %4220 = vst [vmem:[%s5641_s28 + $0x58] sm:$0xff] %v4157_v60  ;;  %v4251_v23 = vadd.f32 %v4250_v2, %v4157_v60  ;;  %v4289_v34 = vmul.f32 %v4157_v60, %v4157_v60  ;;  %v4071_v31 = vadd.f32 %v4070_v32, %v3982_v53 }
 0x2ce   : > { %v4320_v37 = vadd.f32 %v4319_v42, %v4289_v34  ;;  %v5476_v42 = vld [vmem:[#allocation3 + $0x478] sm:$0xf0] }
 0x2cf   : > { %v5040_v16 = vor.u32 %v5476_v42, %v5039_v50 }
 0x2d1   : > { %v4159_v27 = vpop.f32.mrf.mxu0  ;;  %v3983_v18 = vpop.f32.mrf.mxu2 }
 0x2d2   : > { %v4160_v33 = vadd.f32 %v4159_v27, %v4071_v31  ;;  %v3984_v49 = vadd.f32 %v3983_v18, %v3895_v6  ;;  %v3897_v46 = vpop.f32.mrf.mxu1 }
 0x2d3   : > { %v4072_v55 = vpop.f32.mrf.mxu3  ;;  %v3898_v11 = vadd.f32 %v3897_v46, %v6749_v62 }
 0x2d4   : > { %4198 = vmatmul.bf16.gmra.mxu0 %v5004_v45  ;;  %4221 = vst [vmem:[%s5641_s28 + $0x60] sm:$0xff] %v4160_v33  ;;  %v4252_v44 = vadd.f32 %v4251_v23, %v4160_v33  ;;  %v4290_v43 = vmul.f32 %v4160_v33, %v4160_v33  ;;  %v4073_v25 = vadd.f32 %v4072_v55, %v3984_v49 }
 0x2d5   : > { %3936 = vmatmul.bf16.gmra.mxu1 %v5028_v5 }
 0x2d6   : > { %v4321_v21 = vadd.f32 %v4320_v37, %v4290_v43  ;;  %4025 = vmatmul.bf16.gmra.mxu2 %v5032_v36 }
 0x2d8   : > { %4114 = vmatmul.bf16.gmra.mxu3 %v5036_v3 }
 0x2d9   : > { %v4161_v57 = vpop.f32.mrf.mxu0  ;;  %v3986_v7 = vpop.f32.mrf.mxu2 }
 0x2da   : > { %v4162_v48 = vadd.f32 %v4161_v57, %v4073_v25  ;;  %v3987_v51 = vadd.f32 %v3986_v7, %v3898_v11  ;;  %v3899_v1 = vpop.f32.mrf.mxu1 }
 0x2db   : > { %v4075_v35 = vpop.f32.mrf.mxu3  ;;  %v3900_v47 = vadd.f32 %v3899_v1, %v6752_v17 }
 0x2dc   : > { %4222 = vst [vmem:[%s5641_s28 + $0x68] sm:$0xff] %v4162_v48  ;;  %v4253_v2 = vadd.f32 %v4252_v44, %v4162_v48  ;;  %v4291_v61 = vmul.f32 %v4162_v48, %v4162_v48  ;;  %v4076_v29 = vadd.f32 %v4075_v35, %v3987_v51 }
 0x2de   : > { %v4322_v39 = vadd.f32 %v4321_v21, %v4291_v61 }
 0x2e1   : > { %v4164_v60 = vpop.f32.mrf.mxu0  ;;  %v3988_v62 = vpop.f32.mrf.mxu2 }
 0x2e2   : > { %v4165_v53 = vadd.f32 %v4164_v60, %v4076_v29  ;;  %v3989_v30 = vadd.f32 %v3988_v62, %v3900_v47  ;;  %v3902_v32 = vpop.f32.mrf.mxu1 }
 0x2e3   : > { %v4077_v23 = vpop.f32.mrf.mxu3  ;;  %v3903_v31 = vadd.f32 %v3902_v32, %v6755_v56 }
 0x2e4   : > { %4203 = vmatmul.bf16.gmra.mxu0 %v5040_v16  ;;  %4223 = vst [vmem:[%s5641_s28 + $0x70] sm:$0xff] %v4165_v53  ;;  %v4254_v34 = vadd.f32 %v4253_v2, %v4165_v53  ;;  %v4292_v54 = vmul.f32 %v4165_v53, %v4165_v53  ;;  %v4078_v37 = vadd.f32 %v4077_v23, %v3989_v30 }
 0x2e6   : > { %v4323_v4 = vadd.f32 %v4322_v39, %v4292_v54 }
 0x2e9   : > { %v4166_v15 = vpop.f32.mrf.mxu0  ;;  %v3991_v22 = vpop.f32.mrf.mxu2 }
 0x2ea   : > { %v4167_v40 = vadd.f32 %v4166_v15, %v4078_v37  ;;  %v3992_v17 = vadd.f32 %v3991_v22, %v3903_v31  ;;  %v3904_v9 = vpop.f32.mrf.mxu1 }
 0x2eb   : > { %v4080_v45 = vpop.f32.mrf.mxu3  ;;  %v3905_v19 = vadd.f32 %v3904_v9, %v6758_v10 }
 0x2ec   : > { %4224 = vst [vmem:[%s5641_s28 + $0x78] sm:$0xff] %v4167_v40  ;;  %v4255_v6 = vadd.f32 %v4254_v34, %v4167_v40  ;;  %v4293_v27 = vmul.f32 %v4167_v40, %v4167_v40  ;;  %v4081_v5 = vadd.f32 %v4080_v45, %v3992_v17 }
 0x2ee   : > { %v4324_v18 = vadd.f32 %v4323_v4, %v4293_v27 }
 0x2f1   : > { %v4169_v14 = vpop.f32.mrf.mxu0  ;;  %v3993_v33 = vpop.f32.mrf.mxu2 }
 0x2f2   : > { %v4170_v49 = vadd.f32 %v4169_v14, %v4081_v5  ;;  %v3994_v46 = vadd.f32 %v3993_v33, %v3905_v19  ;;  %v3907_v56 = vpop.f32.mrf.mxu1 }
 0x2f3   : > { %v4082_v36 = vpop.f32.mrf.mxu3  ;;  %v3908_v21 = vadd.f32 %v3907_v56, %v6761_v26 }
 0x2f4   : > { %4225 = vst [vmem:[%s5641_s28 + $0x80] sm:$0xff] %v4170_v49  ;;  %v4256_v55 = vadd.f32 %v4255_v6, %v4170_v49  ;;  %v4294_v44 = vmul.f32 %v4170_v49, %v4170_v49  ;;  %v4083_v3 = vadd.f32 %v4082_v36, %v3994_v46 }
 0x2f6   : > { %v4325_v43 = vadd.f32 %v4324_v18, %v4294_v44 }
 0x2f9   : > { %v4171_v25 = vpop.f32.mrf.mxu0  ;;  %v3996_v11 = vpop.f32.mrf.mxu2 }
 0x2fa   : > { %v4172_v57 = vadd.f32 %v4171_v25, %v4083_v3  ;;  %v3997_v7 = vadd.f32 %v3996_v11, %v3908_v21  ;;  %v3909_v10 = vpop.f32.mrf.mxu1 }
 0x2fb   : > { %v4085_v48 = vpop.f32.mrf.mxu3  ;;  %v3910_v61 = vadd.f32 %v3909_v10, %v6764_v41 }
 0x2fc   : > { %4226 = vst [vmem:[%s5641_s28 + $0x88] sm:$0xff] %v4172_v57  ;;  %v4257_v51 = vadd.f32 %v4256_v55, %v4172_v57  ;;  %v4295_v1 = vmul.f32 %v4172_v57, %v4172_v57  ;;  %v4086_v2 = vadd.f32 %v4085_v48, %v3997_v7 }
 0x2fe   : > { %v4326_v35 = vadd.f32 %v4325_v43, %v4295_v1 }
 0x301   : > { %v4174_v50 = vpop.f32.mrf.mxu0  ;;  %v3998_v42 = vpop.f32.mrf.mxu2 }
 0x302   : > { %v4175_v39 = vadd.f32 %v4174_v50, %v4086_v2  ;;  %v3999_v29 = vadd.f32 %v3998_v42, %v3910_v61  ;;  %v3912_v26 = vpop.f32.mrf.mxu1 }
 0x303   : > { %v4087_v16 = vpop.f32.mrf.mxu3  ;;  %v3913_v30 = vadd.f32 %v3912_v26, %v6767_v13 }
 0x304   : > { %4227 = vst [vmem:[%s5641_s28 + $0x90] sm:$0xff] %v4175_v39  ;;  %v4258_v47 = vadd.f32 %v4257_v51, %v4175_v39  ;;  %v4296_v60 = vmul.f32 %v4175_v39, %v4175_v39  ;;  %v4088_v53 = vadd.f32 %v4087_v16, %v3999_v29 }
 0x306   : > { %v4327_v62 = vadd.f32 %v4326_v35, %v4296_v60 }
 0x309   : > { %v4176_v32 = vpop.f32.mrf.mxu0  ;;  %v4001_v23 = vpop.f32.mrf.mxu2 }
 0x30a   : > { %v4177_v34 = vadd.f32 %v4176_v32, %v4088_v53  ;;  %v4002_v54 = vadd.f32 %v4001_v23, %v3913_v30  ;;  %v3914_v41 = vpop.f32.mrf.mxu1 }
 0x30b   : > { %v4090_v4 = vpop.f32.mrf.mxu3  ;;  %v3915_v40 = vadd.f32 %v3914_v41, %v6770_v58 }
 0x30c   : > { %4228 = vst [vmem:[%s5641_s28 + $0x98] sm:$0xff] %v4177_v34  ;;  %v4259_v37 = vadd.f32 %v4258_v47, %v4177_v34  ;;  %v4297_v31 = vmul.f32 %v4177_v34, %v4177_v34  ;;  %v4091_v22 = vadd.f32 %v4090_v4, %v4002_v54 }
 0x30e   : > { %v4328_v15 = vadd.f32 %v4327_v62, %v4297_v31 }
 0x311   : > { %v4179_v17 = vpop.f32.mrf.mxu0  ;;  %v4003_v9 = vpop.f32.mrf.mxu2 }
 0x312   : > { %v4180_v45 = vadd.f32 %v4179_v17, %v4091_v22  ;;  %v4004_v6 = vadd.f32 %v4003_v9, %v3915_v40  ;;  %v3917_v13 = vpop.f32.mrf.mxu1 }
 0x313   : > { %v4092_v27 = vpop.f32.mrf.mxu3  ;;  %v3918_v33 = vadd.f32 %v3917_v13, %v6773_v8 }
 0x314   : > { %4229 = vst [vmem:[%s5641_s28 + $0xa0] sm:$0xff] %v4180_v45  ;;  %v4260_v18 = vadd.f32 %v4259_v37, %v4180_v45  ;;  %v4298_v5 = vmul.f32 %v4180_v45, %v4180_v45  ;;  %v4093_v14 = vadd.f32 %v4092_v27, %v4004_v6 }
 0x316   : > { %v4329_v19 = vadd.f32 %v4328_v15, %v4298_v5 }
 0x319   : > { %v4181_v49 = vpop.f32.mrf.mxu0  ;;  %v4006_v46 = vpop.f32.mrf.mxu2 }
 0x31a   : > { %v4182_v56 = vadd.f32 %v4181_v49, %v4093_v14  ;;  %v4007_v36 = vadd.f32 %v4006_v46, %v3918_v33  ;;  %v3919_v58 = vpop.f32.mrf.mxu1 }
 0x31b   : > { %v4095_v55 = vpop.f32.mrf.mxu3  ;;  %v3920_v25 = vadd.f32 %v3919_v58, %v6776_v28 }
 0x31c   : > { %4230 = vst [vmem:[%s5641_s28 + $0xa8] sm:$0xff] %v4182_v56  ;;  %v4261_v44 = vadd.f32 %v4260_v18, %v4182_v56  ;;  %v4299_v43 = vmul.f32 %v4182_v56, %v4182_v56  ;;  %v4096_v21 = vadd.f32 %v4095_v55, %v4007_v36 }
 0x31e   : > { %v4330_v3 = vadd.f32 %v4329_v19, %v4299_v43 }
 0x321   : > { %v4184_v11 = vpop.f32.mrf.mxu0  ;;  %v4008_v57 = vpop.f32.mrf.mxu2 }
 0x322   : > { %v4185_v7 = vadd.f32 %v4184_v11, %v4096_v21  ;;  %v4009_v10 = vadd.f32 %v4008_v57, %v3920_v25  ;;  %v3922_v8 = vpop.f32.mrf.mxu1 }
 0x323   : > { %v4097_v48 = vpop.f32.mrf.mxu3  ;;  %v3923_v61 = vadd.f32 %v3922_v8, %v6779_v63 }
 0x324   : > { %4231 = vst [vmem:[%s5641_s28 + $0xb0] sm:$0xff] %v4185_v7  ;;  %v4262_v51 = vadd.f32 %v4261_v44, %v4185_v7  ;;  %v4300_v1 = vmul.f32 %v4185_v7, %v4185_v7  ;;  %v4098_v2 = vadd.f32 %v4097_v48, %v4009_v10 }
 0x326   : > { %v4331_v35 = vadd.f32 %v4330_v3, %v4300_v1 }
 0x329   : > { %v4186_v50 = vpop.f32.mrf.mxu0  ;;  %v4011_v42 = vpop.f32.mrf.mxu2 }
 0x32a   : > { %v4187_v39 = vadd.f32 %v4186_v50, %v4098_v2  ;;  %v4012_v29 = vadd.f32 %v4011_v42, %v3923_v61  ;;  %v3924_v28 = vpop.f32.mrf.mxu1 }
 0x32b   : > { %v4100_v26 = vpop.f32.mrf.mxu3  ;;  %v3925_v53 = vadd.f32 %v3924_v28, %v6782_v20 }
 0x32c   : > { %4232 = vst [vmem:[%s5641_s28 + $0xb8] sm:$0xff] %v4187_v39  ;;  %v4263_v16 = vadd.f32 %v4262_v51, %v4187_v39  ;;  %v4301_v47 = vmul.f32 %v4187_v39, %v4187_v39  ;;  %v4101_v62 = vadd.f32 %v4100_v26, %v4012_v29 }
 0x32e   : > { %v4332_v60 = vadd.f32 %v4331_v35, %v4301_v47 }
 0x331   : > { %v4189_v30 = vpop.f32.mrf.mxu0  ;;  %v4013_v32 = vpop.f32.mrf.mxu2 }
 0x332   : > { %v4190_v23 = vadd.f32 %v4189_v30, %v4101_v62  ;;  %v4014_v34 = vadd.f32 %v4013_v32, %v3925_v53  ;;  %v3927_v63 = vpop.f32.mrf.mxu1 }
 0x333   : > { %v4102_v54 = vpop.f32.mrf.mxu3  ;;  %v3928_v15 = vadd.f32 %v3927_v63, %v6785_v24 }
 0x334   : > { %4233 = vst [vmem:[%s5641_s28 + $0xc0] sm:$0xff] %v4190_v23  ;;  %v4264_v41 = vadd.f32 %v4263_v16, %v4190_v23  ;;  %v4302_v4 = vmul.f32 %v4190_v23, %v4190_v23  ;;  %v4103_v31 = vadd.f32 %v4102_v54, %v4014_v34 }
 0x336   : > { %v4333_v37 = vadd.f32 %v4332_v60, %v4302_v4 }
 0x339   : > { %v4191_v22 = vpop.f32.mrf.mxu0  ;;  %v4016_v40 = vpop.f32.mrf.mxu2 }
 0x33a   : > { %v4192_v17 = vadd.f32 %v4191_v22, %v4103_v31  ;;  %v4017_v9 = vadd.f32 %v4016_v40, %v3928_v15  ;;  %v3929_v20 = vpop.f32.mrf.mxu1 }
 0x33b   : > { %v4105_v45 = vpop.f32.mrf.mxu3  ;;  %v3930_v5 = vadd.f32 %v3929_v20, %v6788_v52 }
 0x33c   : > { %4234 = vst [vmem:[%s5641_s28 + $0xc8] sm:$0xff] %v4192_v17  ;;  %v4265_v6 = vadd.f32 %v4264_v41, %v4192_v17  ;;  %v4303_v13 = vmul.f32 %v4192_v17, %v4192_v17  ;;  %v4106_v18 = vadd.f32 %v4105_v45, %v4017_v9 }
 0x33e   : > { %v4334_v27 = vadd.f32 %v4333_v37, %v4303_v13 }
 0x341   : > { %v4194_v19 = vpop.f32.mrf.mxu0  ;;  %v4018_v14 = vpop.f32.mrf.mxu2 }
 0x342   : > { %v4195_v33 = vadd.f32 %v4194_v19, %v4106_v18  ;;  %v4019_v49 = vadd.f32 %v4018_v14, %v3930_v5  ;;  %v3932_v24 = vpop.f32.mrf.mxu1 }
 0x343   : > { %v4107_v46 = vpop.f32.mrf.mxu3  ;;  %v3933_v44 = vadd.f32 %v3932_v24, %v6791_v38 }
 0x344   : > { %4235 = vst [vmem:[%s5641_s28 + $0xd0] sm:$0xff] %v4195_v33  ;;  %v4266_v56 = vadd.f32 %v4265_v6, %v4195_v33  ;;  %v4304_v36 = vmul.f32 %v4195_v33, %v4195_v33  ;;  %v4108_v55 = vadd.f32 %v4107_v46, %v4019_v49 }
 0x346   : > { %v4335_v58 = vadd.f32 %v4334_v27, %v4304_v36 }
 0x349   : > { %v4196_v43 = vpop.f32.mrf.mxu0  ;;  %v4021_v3 = vpop.f32.mrf.mxu2 }
 0x34a   : > { %v4197_v21 = vadd.f32 %v4196_v43, %v4108_v55  ;;  %v4022_v25 = vadd.f32 %v4021_v3, %v3933_v44  ;;  %v3934_v52 = vpop.f32.mrf.mxu1 }
 0x34b   : > { %v4110_v11 = vpop.f32.mrf.mxu3  ;;  %v3935_v48 = vadd.f32 %v3934_v52, %v6794_v59 }
 0x34c   : > { %4236 = vst [vmem:[%s5641_s28 + $0xd8] sm:$0xff] %v4197_v21  ;;  %v4267_v57 = vadd.f32 %v4266_v56, %v4197_v21  ;;  %v4305_v7 = vmul.f32 %v4197_v21, %v4197_v21  ;;  %v4111_v8 = vadd.f32 %v4110_v11, %v4022_v25 }
 0x34e   : > { %v4336_v10 = vadd.f32 %v4335_v58, %v4305_v7 }
 0x351   : > { %v4199_v51 = vpop.f32.mrf.mxu0  ;;  %v4023_v1 = vpop.f32.mrf.mxu2 }
 0x352   : > { %v4200_v35 = vadd.f32 %v4199_v51, %v4111_v8  ;;  %v4024_v2 = vadd.f32 %v4023_v1, %v3935_v48  ;;  %v3937_v61 = vpop.f32.mrf.mxu1 }
 0x353   : > { %v4112_v38 = vpop.f32.mrf.mxu3  ;;  %v3938_v28 = vadd.f32 %v3937_v61, %v6797_v0 }
 0x354   : > { %4237 = vst [vmem:[%s5641_s28 + $0xe0] sm:$0xff] %v4200_v35  ;;  %v4268_v50 = vadd.f32 %v4267_v57, %v4200_v35  ;;  %v4306_v42 = vmul.f32 %v4200_v35, %v4200_v35  ;;  %v4113_v29 = vadd.f32 %v4112_v38, %v4024_v2 }
 0x356   : > { %v4337_v39 = vadd.f32 %v4336_v10, %v4306_v42 }
 0x359   : > { %v4201_v26 = vpop.f32.mrf.mxu0  ;;  %v4026_v16 = vpop.f32.mrf.mxu2 }
 0x35a   : > { %v4202_v47 = vadd.f32 %v4201_v26, %v4113_v29  ;;  %v4027_v60 = vadd.f32 %v4026_v16, %v3938_v28  ;;  %v3939_v30 = vpop.f32.mrf.mxu1 }
 0x35b   : > { %v4115_v59 = vpop.f32.mrf.mxu3  ;;  %v3940_v34 = vadd.f32 %v3939_v30, %v6800_v12 }
 0x35c   : > { %4238 = vst [vmem:[%s5641_s28 + $0xe8] sm:$0xff] %v4202_v47  ;;  %v4269_v62 = vadd.f32 %v4268_v50, %v4202_v47  ;;  %v4307_v53 = vmul.f32 %v4202_v47, %v4202_v47  ;;  %v4116_v23 = vadd.f32 %v4115_v59, %v4027_v60 }
 0x35e   : > { %v4338_v32 = vadd.f32 %v4337_v39, %v4307_v53 }
 0x361   : > { %v4204_v63 = vpop.f32.mrf.mxu0  ;;  %v4028_v54 = vpop.f32.mrf.mxu2 }
 0x362   : > { %v4205_v41 = vadd.f32 %v4204_v63, %v4116_v23  ;;  %v4029_v4 = vadd.f32 %v4028_v54, %v3940_v34 }
 0x363   : > { %v4117_v31 = vpop.f32.mrf.mxu3 }
 0x364   : > { %4239 = vst [vmem:[%s5641_s28 + $0xf0] sm:$0xff] %v4205_v41  ;;  %v4270_v0 = vadd.f32 %v4269_v62, %v4205_v41  ;;  %v4308_v37 = vmul.f32 %v4205_v41, %v4205_v41  ;;  %v4118_v22 = vadd.f32 %v4117_v31, %v4029_v4 }
 0x366   : > { %v4339_v15 = vadd.f32 %v4338_v32, %v4308_v37 }
 0x369   : > { %v4206_v40 = vpop.f32.mrf.mxu0 }
 0x36a   : > { %v4207_v17 = vadd.f32 %v4206_v40, %v4118_v22 }
 0x36c   : > { %4240 = vst [vmem:[%s5641_s28 + $0xf8] sm:$0xff] %v4207_v17  ;;  %v4271_v9 = vadd.f32 %v4270_v0, %v4207_v17  ;;  %v4309_v20 = vmul.f32 %v4207_v17, %v4207_v17 }
 0x36e   : > { %v4272_v45 = vrot.slane %v4271_v9, 4  ;;  %v4340_v6 = vadd.f32 %v4339_v15, %v4309_v20 }
 0x370   : > { %v4273_v13 = vadd.f32 %v4272_v45, %v4271_v9  ;;  %v4341_v12 = vrot.slane %v4340_v6, 4 }
 0x372   : > { %v4274_v27 = vrot.slane %v4273_v13, 2  ;;  %v4342_v18 = vadd.f32 %v4341_v12, %v4340_v6 }
 0x374   : > { %v4275_v5 = vadd.f32 %v4274_v27, %v4273_v13  ;;  %v4343_v19 = vrot.slane %v4342_v18, 2 }
 0x376   : > { %v4276_v14 = vrot.slane %v4275_v5, 1  ;;  %v4344_v33 = vadd.f32 %v4343_v19, %v4342_v18 }
 0x378   : > { %v4345_v49 = vrot.slane %v4344_v33, 1  ;;  %v4277_v24 = vadd.f32 %v4276_v14, %v4275_v5 }
 0x37a   : > { %v4346_v46 = vadd.f32 %v4345_v49, %v4344_v33 }
 0x37c   : > { %v4348_v56 = vsel %vm794_vm6, %v4277_v24, %v4346_v46 }
 0x37d   : > { %4349 = vst [vmem:[%s5646_s6] sm:$0x3] %v4348_v56 }
 0x37e PF: > { %s16_s18 = sadd.s32 1, %s5592_s18  }
 0x37f   : > { %p13_p5 = scmp.ge.s32.totalorder %s16_s18, 4  }
 0x381   :  { %15 = sbr.rel (!%p13_p5) target bundleno = 1 (0x1), region = 83 }

</bundles_post_ra>
